<compile_context>
chip_gen: v7x
topology: tpu7x:2x2x1
jax: 0.10.0
libtpu: 0.0.40
codegen_flags: <defaults>
</compile_context>

<pallas_src>
import functools

import jax
import jax.numpy as jnp
from jax.experimental import pallas as pl
from jax.experimental.pallas import tpu as pltpu


# fc1 tiling: K = 32*28*28 = 25088 = 4*6272, N = 512 = 2*256 (both 128-aligned).
FC1_TK = 6272
FC1_TN = 256


# ----------------------------- Pallas kernel -------------------------------
def _linear_kernel(x_ref, w_ref, b_ref, o_ref, *, relu):
    """One (m, n, k) grid step of y = relu?(x @ w + b), accumulating into o_ref."""
    k = pl.program_id(2)
    part = jnp.dot(x_ref[...], w_ref[...], preferred_element_type=jnp.float32)

    @pl.when(k == 0)
    def _():
        o_ref[...] = part

    @pl.when(k > 0)
    def _():
        o_ref[...] += part

    @pl.when(k == pl.num_programs(2) - 1)
    def _():
        r = o_ref[...] + b_ref[...]
        if relu:
            r = jnp.maximum(r, 0.0)
        o_ref[...] = r


def _round_up(v, m):
    return ((v + m - 1) // m) * m


def _tile_bytes(r, c, dtype):
    """Conservative padded VMEM footprint of an (r, c) tile."""
    return jnp.dtype(dtype).itemsize * _round_up(r, 16) * _round_up(c, 128)


def _vmem_cap_bytes():
    """Generation-aware scoped-VMEM cap (~45% of physical VMEM)."""
    try:
        return max(int(pltpu.get_tpu_info().vmem_capacity_bytes * 0.45), 24 << 20)
    except Exception:
        return 28 << 20          # safe on every gen, incl. v7x (64 MiB physical)


def pallas_linear(x, w, b, *, relu=False, tm=None, tk=None, tn=None):
    """y = relu?(x @ w + b).

    x : (M, K) f32 or bf16
    w : (K, N) plain row-major weights, OR
        (N//tn, K//tk, tk, tn) offline tile-major repack (each (tk, tn) weight
        tile is one contiguous HBM chunk -> efficient DMA on the hot layer).
    b : (N,) f32
    """
    M, K = x.shape
    if w.ndim == 4:
        nb, kb, tk, tn = w.shape
        N = nb * tn
        assert kb * tk == K
    else:
        Kw, N = w.shape
        assert Kw == K
        if tk is None or tk >= K:
            tk = K
        if tn is None or tn >= N:
            tn = N
    # M-tiling is optional; fall back to a single tile if it does not divide.
    if tm is None or tm >= M or M % tm or (tm % 8 and tm != M):
        tm = M

    assert K % tk == 0 and N % tn == 0
    # (8,128) rule: blocked last-two dims must be multiples of (8,128) or full.
    assert tm == M or tm % 8 == 0
    assert tk == K or tk % 128 == 0
    assert tn == N or tn % 128 == 0

    grid = (M // tm, N // tn, K // tk)            # reduction axis (K) innermost
    b2 = b.reshape(1, N).astype(jnp.float32)

    if w.ndim == 4:
        # Tile-major weights: leading two dims squeezed, contiguous tile DMA.
        w_spec = pl.BlockSpec((None, None, tk, tn), lambda m, n, k: (n, k, 0, 0))
    else:
        w_spec = pl.BlockSpec((tk, tn), lambda m, n, k: (k, n))

    # Scoped VMEM: double-buffered input tiles + resident output + headroom.
    vmem_bytes = (2 * _tile_bytes(tm, tk, x.dtype)
                  + 2 * _tile_bytes(tk, tn, w.dtype)
                  + 2 * _tile_bytes(1, tn, jnp.float32)
                  + 2 * _tile_bytes(tm, tn, jnp.float32)
                  + (8 << 20))
    vmem_bytes = int(min(vmem_bytes, _vmem_cap_bytes()))

    kern = functools.partial(_linear_kernel, relu=relu)
    return pl.pallas_call(
        kern,
        out_shape=jax.ShapeDtypeStruct((M, N), jnp.float32),
        grid_spec=pltpu.PrefetchScalarGridSpec(
            num_scalar_prefetch=0,
            grid=grid,
            in_specs=[
                pl.BlockSpec((tm, tk), lambda m, n, k: (m, k)),
                w_spec,
                pl.BlockSpec((1, tn), lambda m, n, k: (0, n)),
            ],
            out_specs=pl.BlockSpec((tm, tn), lambda m, n, k: (m, n)),
        ),
        compiler_params=pltpu.CompilerParams(
            dimension_semantics=("parallel", "parallel", "arbitrary"),
            vmem_limit_bytes=vmem_bytes,
        ),
    )(x, w, b2)


# ------------------------------ conv glue -----------------------------------
def im2col_nhwc(x, kh, kw):
    """x:(N,H,W,C) -> (N*Ho*Wo, kh*kw*C); column order is (di, dj, c)."""
    n, h, w, c = x.shape
    ho, wo = h - kh + 1, w - kw + 1
    patches = [x[:, di:di + ho, dj:dj + wo, :]
               for di in range(kh) for dj in range(kw)]
    p = jnp.stack(patches, axis=3)                   # (N, Ho, Wo, kh*kw, C)
    return p.reshape(n * ho * wo, kh * kw * c), ho, wo


def _pick_tm(m, max_tiles=4):
    """Largest split of m into <= max_tiles tiles with a multiple-of-8 tile."""
    best = m
    for t in range(2, max_tiles + 1):
        if m % t == 0 and (m // t) % 8 == 0:
            best = m // t
    return best


def conv2d_relu_nhwc(x, wmat, b, kh=3, kw=3):
    """Valid conv + ReLU in NHWC; wmat:(kh*kw*Cin, Cout) pre-packed offline.

    NOTE: conv1->conv2->flatten could be fused into one Pallas kernel with the
    tiny intermediates resident in VMEM (removes the im2col HBM round trip and
    the narrow-lane conv writebacks); kept as im2col + matmul for lowering
    robustness since the convs are a small fraction of the forward.
    """
    n = x.shape[0]
    cout = wmat.shape[1]
    cols, ho, wo = im2col_nhwc(x, kh, kw)
    tm = _pick_tm(cols.shape[0])                     # parallel M tiles
    out = pallas_linear(cols, wmat, b, relu=True, tm=tm)   # (N*Ho*Wo, Cout)
    return out.reshape(n, ho, wo, cout)              # stays NHWC, no transpose


# ------------------------------ Encoder -------------------------------------
def init_params(key, latent_dim):
    """PyTorch-layout parameters (matches nn.Conv2d / nn.Linear init shapes)."""
    ks = jax.random.split(key, 10)

    def u(k, shape, fan_in):
        bound = 1.0 / jnp.sqrt(jnp.float32(fan_in))
        return jax.random.uniform(k, shape, jnp.float32, -bound, bound)

    return {
        "conv1_w": u(ks[0], (16, 3, 3, 3), 3 * 9),
        "conv1_b": u(ks[1], (16,), 3 * 9),
        "conv2_w": u(ks[2], (32, 16, 3, 3), 16 * 9),
        "conv2_b": u(ks[3], (32,), 16 * 9),
        "fc1_w": u(ks[4], (512, 32 * 28 * 28), 32 * 28 * 28),
        "fc1_b": u(ks[5], (512,), 32 * 28 * 28),
        "fc_mu_w": u(ks[6], (latent_dim, 512), 512),
        "fc_mu_b": u(ks[7], (latent_dim,), 512),
        "fc_logvar_w": u(ks[8], (latent_dim, 512), 512),
        "fc_logvar_b": u(ks[9], (latent_dim,), 512),
    }


def prepare_params(p):
    """One-time repack of PyTorch-layout params into kernel-friendly layouts.

    * conv weights -> (kh*kw*Cin, Cout), matching the NHWC im2col column order
    * fc1 weight   -> rows permuted so an NHWC flatten of the conv2 output
      reproduces PyTorch's NCHW `.view` contraction, then repacked tile-major
      (N/tn, K/tk, tk, tn) and cast to bf16 (contiguous per-tile DMA + half
      the HBM stream on the dominant layer)
    * fc_mu / fc_logvar fused along the output dim
    All transposes / casts happen here, never in the hot forward path.
    """
    conv1_wm = p["conv1_w"].transpose(2, 3, 1, 0).reshape(3 * 3 * 3, 16)
    conv2_wm = p["conv2_w"].transpose(2, 3, 1, 0).reshape(3 * 3 * 16, 32)
    K, N = 32 * 28 * 28, 512
    fc1_wm = (p["fc1_w"].reshape(512, 32, 28, 28)
              .transpose(2, 3, 1, 0).reshape(K, N))
    fc1_wt = (fc1_wm.reshape(K // FC1_TK, FC1_TK, N // FC1_TN, FC1_TN)
              .transpose(2, 0, 1, 3)                      # (N/tn, K/tk, tk, tn)
              .astype(jnp.bfloat16))
    head_w = jnp.concatenate([p["fc_mu_w"], p["fc_logvar_w"]], axis=0).T  # (512, 2L)
    head_b = jnp.concatenate([p["fc_mu_b"], p["fc_logvar_b"]], axis=0)
    return {
        "conv1_wm": conv1_wm, "conv1_b": p["conv1_b"],
        "conv2_wm": conv2_wm, "conv2_b": p["conv2_b"],
        "fc1_wt": fc1_wt, "fc1_b": p["fc1_b"],
        "head_w": head_w, "head_b": head_b,
    }


@jax.jit
def encoder_forward(prep, x_nchw):
    x = x_nchw.transpose(0, 2, 3, 1)                               # NCHW -> NHWC once
    h = conv2d_relu_nhwc(x, prep["conv1_wm"], prep["conv1_b"])     # (N,30,30,16)
    h = conv2d_relu_nhwc(h, prep["conv2_wm"], prep["conv2_b"])     # (N,28,28,32)
    n = h.shape[0]
    # NHWC flatten matches fc1's row permutation; bf16 feed -> native MXU bf16.
    flat = h.reshape(n, 28 * 28 * 32).astype(jnp.bfloat16)
    h1 = pallas_linear(flat, prep["fc1_wt"], prep["fc1_b"], relu=True)    # (N,512)
    head = pallas_linear(h1, prep["head_w"], prep["head_b"], relu=False)  # fused mu|logvar
    latent = prep["head_w"].shape[1] // 2
    return head[:, :latent], head[:, latent:]


# ------------------------------ reference -----------------------------------
def ref_forward(params, x):
    """Pure-JAX reference in original PyTorch layout (NCHW, OIHW, (out,in))."""
    hp = jax.lax.Precision.HIGHEST

    def conv(x, w, b):
        out = jax.lax.conv_general_dilated(
            x, w, window_strides=(1, 1), padding="VALID",
            dimension_numbers=("NCHW", "OIHW", "NCHW"), precision=hp)
        return jnp.maximum(out + b[None, :, None, None], 0.0)

    h = conv(x, params["conv1_w"], params["conv1_b"])
    h = conv(h, params["conv2_w"], params["conv2_b"])
    flat = h.reshape(h.shape[0], -1)
    h1 = jnp.maximum(jnp.dot(flat, params["fc1_w"].T, precision=hp) + params["fc1_b"], 0.0)
    mu = jnp.dot(h1, params["fc_mu_w"].T, precision=hp) + params["fc_mu_b"]
    lv = jnp.dot(h1, params["fc_logvar_w"].T, precision=hp) + params["fc_logvar_b"]
    return mu, lv


if __name__ == "__main__":
    key = jax.random.PRNGKey(0)
    kp, kx = jax.random.split(key)
    latent_dim = 16

    params = init_params(kp, latent_dim)
    prep = prepare_params(params)          # one-time repack; no runtime transposes
    # Input spatial size 32x32 is forced by fc1's 32*28*28 expectation (32->30->28).
    x = jax.random.normal(kx, (2, 3, 32, 32), jnp.float32)

    mu, logvar = encoder_forward(prep, x)
    jax.block_until_ready((mu, logvar))

    mu_r, lv_r = ref_forward(params, x)
    assert mu.shape == (2, latent_dim) and logvar.shape == (2, latent_dim)
    # bf16 weight/activation streaming on fc1 (K=25088) carries ~1e-3-level
    # error vs. the f32 reference, so tolerances are looser than the f32 path.
    assert jnp.allclose(mu, mu_r, atol=2e-2, rtol=2e-2), float(jnp.max(jnp.abs(mu - mu_r)))
    assert jnp.allclose(logvar, lv_r, atol=2e-2, rtol=2e-2), float(jnp.max(jnp.abs(logvar - lv_r)))
    print("KERNEL_OK")
</pallas_src>

<mosaic_0001>
module attributes {stable_mosaic.version = 11 : i64} {
  func.func @_linear_kernel(%arg0: i32, %arg1: i32, %arg2: i32, %arg3: memref<600x27xf32, #tpu.memory_space<vmem>>, %arg4: memref<27x16xf32, #tpu.memory_space<vmem>>, %arg5: memref<1x16xf32, #tpu.memory_space<vmem>>, %arg6: memref<600x16xf32, #tpu.memory_space<vmem>>) attributes {dimension_semantics = [#tpu.dimension_semantics<parallel>, #tpu.dimension_semantics<parallel>, #tpu.dimension_semantics<arbitrary>], iteration_bounds = array<i64: 3, 1, 1>, scalar_prefetch = 0 : i64, scratch_operands = 0 : i64, tpu.core_type = #tpu.core_type<tc>, window_params = [{transform_indices = @transform_0, window_bounds = array<i64: 600, 27>}, {transform_indices = @transform_1, window_bounds = array<i64: 27, 16>}, {transform_indices = @transform_2, window_bounds = array<i64: 1, 16>}, {transform_indices = @transform_3, window_bounds = array<i64: 600, 16>}]} {
    %c0 = arith.constant 0 : index
    %c0_0 = arith.constant 0 : index
    %0 = vector.load %arg3[%c0, %c0_0] : memref<600x27xf32, #tpu.memory_space<vmem>>, vector<600x27xf32>
    %c0_1 = arith.constant 0 : index
    %c0_2 = arith.constant 0 : index
    %1 = vector.load %arg4[%c0_1, %c0_2] : memref<27x16xf32, #tpu.memory_space<vmem>>, vector<27x16xf32>
    %cst = arith.constant dense<0.000000e+00> : vector<600x16xf32>
    %2 = tpu.matmul %0, %1, %cst {dimension_numbers = #tpu.dot_dimension_numbers<[1], [0], [0], [1], [0, 0, 1, 1], [], []>} : vector<600x27xf32>, vector<27x16xf32>, vector<600x16xf32> -> vector<600x16xf32>
    %c0_i32 = arith.constant 0 : i32
    %3 = arith.cmpi eq, %arg2, %c0_i32 : i32
    %4 = arith.extui %3 : i1 to i32
    %c0_i32_3 = arith.constant 0 : i32
    %5 = arith.cmpi ne, %4, %c0_i32_3 : i32
    scf.if %5 {
      %c0_8 = arith.constant 0 : index
      %c0_9 = arith.constant 0 : index
      %12 = vector.load %arg6[%c0_8, %c0_9] : memref<600x16xf32, #tpu.memory_space<vmem>>, vector<600x16xf32>
      tpu.vector_store %arg6[%c0_8, %c0_9], %2 {strides = array<i32>} : memref<600x16xf32, #tpu.memory_space<vmem>>, vector<600x16xf32>,
    } else {
    }
    %c0_i32_4 = arith.constant 0 : i32
    %6 = arith.cmpi sgt, %arg2, %c0_i32_4 : i32
    %7 = arith.extui %6 : i1 to i32
    %c0_i32_5 = arith.constant 0 : i32
    %8 = arith.cmpi ne, %7, %c0_i32_5 : i32
    scf.if %8 {
      %c0_8 = arith.constant 0 : index
      %c0_9 = arith.constant 0 : index
      %12 = vector.load %arg6[%c0_8, %c0_9] : memref<600x16xf32, #tpu.memory_space<vmem>>, vector<600x16xf32>
      %13 = arith.addf %12, %2 : vector<600x16xf32>
      %c0_10 = arith.constant 0 : index
      %c0_11 = arith.constant 0 : index
      %14 = vector.load %arg6[%c0_10, %c0_11] : memref<600x16xf32, #tpu.memory_space<vmem>>, vector<600x16xf32>
      tpu.vector_store %arg6[%c0_10, %c0_11], %13 {strides = array<i32>} : memref<600x16xf32, #tpu.memory_space<vmem>>, vector<600x16xf32>,
    } else {
    }
    %c0_i32_6 = arith.constant 0 : i32
    %9 = arith.cmpi eq, %arg2, %c0_i32_6 : i32
    %10 = arith.extui %9 : i1 to i32
    %c0_i32_7 = arith.constant 0 : i32
    %11 = arith.cmpi ne, %10, %c0_i32_7 : i32
    scf.if %11 {
      %c0_8 = arith.constant 0 : index
      %c0_9 = arith.constant 0 : index
      %12 = vector.load %arg6[%c0_8, %c0_9] : memref<600x16xf32, #tpu.memory_space<vmem>>, vector<600x16xf32>
      %c0_10 = arith.constant 0 : index
      %c0_11 = arith.constant 0 : index
      %13 = vector.load %arg5[%c0_10, %c0_11] : memref<1x16xf32, #tpu.memory_space<vmem>>, vector<1x16xf32>
      %14 = vector.broadcast %13 : vector<1x16xf32> to vector<600x16xf32>
      %15 = arith.addf %12, %14 : vector<600x16xf32>
      %cst_12 = arith.constant 0.000000e+00 : f32
      %16 = vector.broadcast %cst_12 : f32 to vector<600x16xf32>
      %17 = arith.maximumf %15, %16 : vector<600x16xf32>
      %c0_13 = arith.constant 0 : index
      %c0_14 = arith.constant 0 : index
      %18 = vector.load %arg6[%c0_13, %c0_14] : memref<600x16xf32, #tpu.memory_space<vmem>>, vector<600x16xf32>
      tpu.vector_store %arg6[%c0_13, %c0_14], %17 {strides = array<i32>} : memref<600x16xf32, #tpu.memory_space<vmem>>, vector<600x16xf32>,
    } else {
    }
    return
  }
  func.func @transform_0(%arg0: i32, %arg1: i32, %arg2: i32) -> (i32, i32) {
    %c0_i32 = arith.constant 0 : i32
    return %arg0, %arg2 : i32, i32
  }
  func.func @transform_1(%arg0: i32, %arg1: i32, %arg2: i32) -> (i32, i32) {
    %c0_i32 = arith.constant 0 : i32
    return %arg2, %arg1 : i32, i32
  }
  func.func @transform_2(%arg0: i32, %arg1: i32, %arg2: i32) -> (i32, i32) {
    %c0_i32 = arith.constant 0 : i32
    %c0_i32_0 = arith.constant 0 : i32
    return %c0_i32, %arg1 : i32, i32
  }
  func.func @transform_3(%arg0: i32, %arg1: i32, %arg2: i32) -> (i32, i32) {
    %c0_i32 = arith.constant 0 : i32
    return %arg0, %arg1 : i32, i32
  }
}

module attributes {stable_mosaic.version = 11 : i64} {
  func.func @_linear_kernel(%arg0: i32, %arg1: i32, %arg2: i32, %arg3: memref<392x144xf32, #tpu.memory_space<vmem>>, %arg4: memref<144x32xf32, #tpu.memory_space<vmem>>, %arg5: memref<1x32xf32, #tpu.memory_space<vmem>>, %arg6: memref<392x32xf32, #tpu.memory_space<vmem>>) attributes {dimension_semantics = [#tpu.dimension_semantics<parallel>, #tpu.dimension_semantics<parallel>, #tpu.dimension_semantics<arbitrary>], iteration_bounds = array<i64: 4, 1, 1>, scalar_prefetch = 0 : i64, scratch_operands = 0 : i64, tpu.core_type = #tpu.core_type<tc>, window_params = [{transform_indices = @transform_0, window_bounds = array<i64: 392, 144>}, {transform_indices = @transform_1, window_bounds = array<i64: 144, 32>}, {transform_indices = @transform_2, window_bounds = array<i64: 1, 32>}, {transform_indices = @transform_3, window_bounds = array<i64: 392, 32>}]} {
    %c0 = arith.constant 0 : index
    %c0_0 = arith.constant 0 : index
    %0 = vector.load %arg3[%c0, %c0_0] : memref<392x144xf32, #tpu.memory_space<vmem>>, vector<392x144xf32>
    %c0_1 = arith.constant 0 : index
    %c0_2 = arith.constant 0 : index
    %1 = vector.load %arg4[%c0_1, %c0_2] : memref<144x32xf32, #tpu.memory_space<vmem>>, vector<144x32xf32>
    %cst = arith.constant dense<0.000000e+00> : vector<392x32xf32>
    %2 = tpu.matmul %0, %1, %cst {dimension_numbers = #tpu.dot_dimension_numbers<[1], [0], [0], [1], [0, 0, 1, 1], [], []>} : vector<392x144xf32>, vector<144x32xf32>, vector<392x32xf32> -> vector<392x32xf32>
    %c0_i32 = arith.constant 0 : i32
    %3 = arith.cmpi eq, %arg2, %c0_i32 : i32
    %4 = arith.extui %3 : i1 to i32
    %c0_i32_3 = arith.constant 0 : i32
    %5 = arith.cmpi ne, %4, %c0_i32_3 : i32
    scf.if %5 {
      %c0_8 = arith.constant 0 : index
      %c0_9 = arith.constant 0 : index
      %12 = vector.load %arg6[%c0_8, %c0_9] : memref<392x32xf32, #tpu.memory_space<vmem>>, vector<392x32xf32>
      tpu.vector_store %arg6[%c0_8, %c0_9], %2 {strides = array<i32>} : memref<392x32xf32, #tpu.memory_space<vmem>>, vector<392x32xf32>,
    } else {
    }
    %c0_i32_4 = arith.constant 0 : i32
    %6 = arith.cmpi sgt, %arg2, %c0_i32_4 : i32
    %7 = arith.extui %6 : i1 to i32
    %c0_i32_5 = arith.constant 0 : i32
    %8 = arith.cmpi ne, %7, %c0_i32_5 : i32
    scf.if %8 {
      %c0_8 = arith.constant 0 : index
      %c0_9 = arith.constant 0 : index
      %12 = vector.load %arg6[%c0_8, %c0_9] : memref<392x32xf32, #tpu.memory_space<vmem>>, vector<392x32xf32>
      %13 = arith.addf %12, %2 : vector<392x32xf32>
      %c0_10 = arith.constant 0 : index
      %c0_11 = arith.constant 0 : index
      %14 = vector.load %arg6[%c0_10, %c0_11] : memref<392x32xf32, #tpu.memory_space<vmem>>, vector<392x32xf32>
      tpu.vector_store %arg6[%c0_10, %c0_11], %13 {strides = array<i32>} : memref<392x32xf32, #tpu.memory_space<vmem>>, vector<392x32xf32>,
    } else {
    }
    %c0_i32_6 = arith.constant 0 : i32
    %9 = arith.cmpi eq, %arg2, %c0_i32_6 : i32
    %10 = arith.extui %9 : i1 to i32
    %c0_i32_7 = arith.constant 0 : i32
    %11 = arith.cmpi ne, %10, %c0_i32_7 : i32
    scf.if %11 {
      %c0_8 = arith.constant 0 : index
      %c0_9 = arith.constant 0 : index
      %12 = vector.load %arg6[%c0_8, %c0_9] : memref<392x32xf32, #tpu.memory_space<vmem>>, vector<392x32xf32>
      %c0_10 = arith.constant 0 : index
      %c0_11 = arith.constant 0 : index
      %13 = vector.load %arg5[%c0_10, %c0_11] : memref<1x32xf32, #tpu.memory_space<vmem>>, vector<1x32xf32>
      %14 = vector.broadcast %13 : vector<1x32xf32> to vector<392x32xf32>
      %15 = arith.addf %12, %14 : vector<392x32xf32>
      %cst_12 = arith.constant 0.000000e+00 : f32
      %16 = vector.broadcast %cst_12 : f32 to vector<392x32xf32>
      %17 = arith.maximumf %15, %16 : vector<392x32xf32>
      %c0_13 = arith.constant 0 : index
      %c0_14 = arith.constant 0 : index
      %18 = vector.load %arg6[%c0_13, %c0_14] : memref<392x32xf32, #tpu.memory_space<vmem>>, vector<392x32xf32>
      tpu.vector_store %arg6[%c0_13, %c0_14], %17 {strides = array<i32>} : memref<392x32xf32, #tpu.memory_space<vmem>>, vector<392x32xf32>,
    } else {
    }
    return
  }
  func.func @transform_0(%arg0: i32, %arg1: i32, %arg2: i32) -> (i32, i32) {
    %c0_i32 = arith.constant 0 : i32
    return %arg0, %arg2 : i32, i32
  }
  func.func @transform_1(%arg0: i32, %arg1: i32, %arg2: i32) -> (i32, i32) {
    %c0_i32 = arith.constant 0 : i32
    return %arg2, %arg1 : i32, i32
  }
  func.func @transform_2(%arg0: i32, %arg1: i32, %arg2: i32) -> (i32, i32) {
    %c0_i32 = arith.constant 0 : i32
    %c0_i32_0 = arith.constant 0 : i32
    return %c0_i32, %arg1 : i32, i32
  }
  func.func @transform_3(%arg0: i32, %arg1: i32, %arg2: i32) -> (i32, i32) {
    %c0_i32 = arith.constant 0 : i32
    return %arg0, %arg1 : i32, i32
  }
}

module attributes {stable_mosaic.version = 11 : i64} {
  func.func @_linear_kernel(%arg0: i32, %arg1: i32, %arg2: i32, %arg3: memref<2x6272xbf16, #tpu.memory_space<vmem>>, %arg4: memref<1x1x6272x256xbf16, #tpu.memory_space<vmem>>, %arg5: memref<1x256xf32, #tpu.memory_space<vmem>>, %arg6: memref<2x256xf32, #tpu.memory_space<vmem>>) attributes {dimension_semantics = [#tpu.dimension_semantics<parallel>, #tpu.dimension_semantics<parallel>, #tpu.dimension_semantics<arbitrary>], iteration_bounds = array<i64: 1, 2, 4>, scalar_prefetch = 0 : i64, scratch_operands = 0 : i64, tpu.core_type = #tpu.core_type<tc>, window_params = [{transform_indices = @transform_0, window_bounds = array<i64: 2, 6272>}, {transform_indices = @transform_1, window_bounds = array<i64: 1, 1, 6272, 256>}, {transform_indices = @transform_2, window_bounds = array<i64: 1, 256>}, {transform_indices = @transform_3, window_bounds = array<i64: 2, 256>}]} {
    %c0 = arith.constant 0 : index
    %c0_0 = arith.constant 0 : index
    %0 = vector.load %arg3[%c0, %c0_0] : memref<2x6272xbf16, #tpu.memory_space<vmem>>, vector<2x6272xbf16>
    %c0_1 = arith.constant 0 : index
    %c0_2 = arith.constant 0 : index
    %c0_3 = arith.constant 0 : index
    %c0_4 = arith.constant 0 : index
    %1 = vector.load %arg4[%c0_1, %c0_2, %c0_3, %c0_4] : memref<1x1x6272x256xbf16, #tpu.memory_space<vmem>>, vector<1x1x6272x256xbf16>
    %2 = vector.shape_cast %1 : vector<1x1x6272x256xbf16> to vector<6272x256xbf16>
    %cst = arith.constant dense<0.000000e+00> : vector<2x256xf32>
    %3 = tpu.matmul %0, %2, %cst {dimension_numbers = #tpu.dot_dimension_numbers<[1], [0], [0], [1], [0, 0, 1, 1], [], []>} : vector<2x6272xbf16>, vector<6272x256xbf16>, vector<2x256xf32> -> vector<2x256xf32>
    %c0_i32 = arith.constant 0 : i32
    %4 = arith.cmpi eq, %arg2, %c0_i32 : i32
    %5 = arith.extui %4 : i1 to i32
    %c0_i32_5 = arith.constant 0 : i32
    %6 = arith.cmpi ne, %5, %c0_i32_5 : i32
    scf.if %6 {
      %c0_9 = arith.constant 0 : index
      %c0_10 = arith.constant 0 : index
      %13 = vector.load %arg6[%c0_9, %c0_10] : memref<2x256xf32, #tpu.memory_space<vmem>>, vector<2x256xf32>
      tpu.vector_store %arg6[%c0_9, %c0_10], %3 {strides = array<i32>} : memref<2x256xf32, #tpu.memory_space<vmem>>, vector<2x256xf32>,
    } else {
    }
    %c0_i32_6 = arith.constant 0 : i32
    %7 = arith.cmpi sgt, %arg2, %c0_i32_6 : i32
    %8 = arith.extui %7 : i1 to i32
    %c0_i32_7 = arith.constant 0 : i32
    %9 = arith.cmpi ne, %8, %c0_i32_7 : i32
    scf.if %9 {
      %c0_9 = arith.constant 0 : index
      %c0_10 = arith.constant 0 : index
      %13 = vector.load %arg6[%c0_9, %c0_10] : memref<2x256xf32, #tpu.memory_space<vmem>>, vector<2x256xf32>
      %14 = arith.addf %13, %3 : vector<2x256xf32>
      %c0_11 = arith.constant 0 : index
      %c0_12 = arith.constant 0 : index
      %15 = vector.load %arg6[%c0_11, %c0_12] : memref<2x256xf32, #tpu.memory_space<vmem>>, vector<2x256xf32>
      tpu.vector_store %arg6[%c0_11, %c0_12], %14 {strides = array<i32>} : memref<2x256xf32, #tpu.memory_space<vmem>>, vector<2x256xf32>,
    } else {
    }
    %c3_i32 = arith.constant 3 : i32
    %10 = arith.cmpi eq, %arg2, %c3_i32 : i32
    %11 = arith.extui %10 : i1 to i32
    %c0_i32_8 = arith.constant 0 : i32
    %12 = arith.cmpi ne, %11, %c0_i32_8 : i32
    scf.if %12 {
      %c0_9 = arith.constant 0 : index
      %c0_10 = arith.constant 0 : index
      %13 = vector.load %arg6[%c0_9, %c0_10] : memref<2x256xf32, #tpu.memory_space<vmem>>, vector<2x256xf32>
      %c0_11 = arith.constant 0 : index
      %c0_12 = arith.constant 0 : index
      %14 = vector.load %arg5[%c0_11, %c0_12] : memref<1x256xf32, #tpu.memory_space<vmem>>, vector<1x256xf32>
      %15 = vector.broadcast %14 : vector<1x256xf32> to vector<2x256xf32>
      %16 = arith.addf %13, %15 : vector<2x256xf32>
      %cst_13 = arith.constant 0.000000e+00 : f32
      %17 = vector.broadcast %cst_13 : f32 to vector<2x256xf32>
      %18 = arith.maximumf %16, %17 : vector<2x256xf32>
      %c0_14 = arith.constant 0 : index
      %c0_15 = arith.constant 0 : index
      %19 = vector.load %arg6[%c0_14, %c0_15] : memref<2x256xf32, #tpu.memory_space<vmem>>, vector<2x256xf32>
      tpu.vector_store %arg6[%c0_14, %c0_15], %18 {strides = array<i32>} : memref<2x256xf32, #tpu.memory_space<vmem>>, vector<2x256xf32>,
    } else {
    }
    return
  }
  func.func @transform_0(%arg0: i32, %arg1: i32, %arg2: i32) -> (i32, i32) {
    %c0_i32 = arith.constant 0 : i32
    return %arg0, %arg2 : i32, i32
  }
  func.func @transform_1(%arg0: i32, %arg1: i32, %arg2: i32) -> (i32, i32, i32, i32) {
    %c0_i32 = arith.constant 0 : i32
    %c0_i32_0 = arith.constant 0 : i32
    %c0_i32_1 = arith.constant 0 : i32
    return %arg1, %arg2, %c0_i32, %c0_i32_0 : i32, i32, i32, i32
  }
  func.func @transform_2(%arg0: i32, %arg1: i32, %arg2: i32) -> (i32, i32) {
    %c0_i32 = arith.constant 0 : i32
    %c0_i32_0 = arith.constant 0 : i32
    return %c0_i32, %arg1 : i32, i32
  }
  func.func @transform_3(%arg0: i32, %arg1: i32, %arg2: i32) -> (i32, i32) {
    %c0_i32 = arith.constant 0 : i32
    return %arg0, %arg1 : i32, i32
  }
}

module attributes {stable_mosaic.version = 11 : i64} {
  func.func @_linear_kernel(%arg0: i32, %arg1: i32, %arg2: i32, %arg3: memref<2x512xf32, #tpu.memory_space<vmem>>, %arg4: memref<512x32xf32, #tpu.memory_space<vmem>>, %arg5: memref<1x32xf32, #tpu.memory_space<vmem>>, %arg6: memref<2x32xf32, #tpu.memory_space<vmem>>) attributes {dimension_semantics = [#tpu.dimension_semantics<parallel>, #tpu.dimension_semantics<parallel>, #tpu.dimension_semantics<arbitrary>], iteration_bounds = array<i64: 1, 1, 1>, scalar_prefetch = 0 : i64, scratch_operands = 0 : i64, tpu.core_type = #tpu.core_type<tc>, window_params = [{transform_indices = @transform_0, window_bounds = array<i64: 2, 512>}, {transform_indices = @transform_1, window_bounds = array<i64: 512, 32>}, {transform_indices = @transform_2, window_bounds = array<i64: 1, 32>}, {transform_indices = @transform_3, window_bounds = array<i64: 2, 32>}]} {
    %c0 = arith.constant 0 : index
    %c0_0 = arith.constant 0 : index
    %0 = vector.load %arg3[%c0, %c0_0] : memref<2x512xf32, #tpu.memory_space<vmem>>, vector<2x512xf32>
    %c0_1 = arith.constant 0 : index
    %c0_2 = arith.constant 0 : index
    %1 = vector.load %arg4[%c0_1, %c0_2] : memref<512x32xf32, #tpu.memory_space<vmem>>, vector<512x32xf32>
    %cst = arith.constant dense<0.000000e+00> : vector<2x32xf32>
    %2 = tpu.matmul %0, %1, %cst {dimension_numbers = #tpu.dot_dimension_numbers<[1], [0], [0], [1], [0, 0, 1, 1], [], []>} : vector<2x512xf32>, vector<512x32xf32>, vector<2x32xf32> -> vector<2x32xf32>
    %c0_i32 = arith.constant 0 : i32
    %3 = arith.cmpi eq, %arg2, %c0_i32 : i32
    %4 = arith.extui %3 : i1 to i32
    %c0_i32_3 = arith.constant 0 : i32
    %5 = arith.cmpi ne, %4, %c0_i32_3 : i32
    scf.if %5 {
      %c0_8 = arith.constant 0 : index
      %c0_9 = arith.constant 0 : index
      %12 = vector.load %arg6[%c0_8, %c0_9] : memref<2x32xf32, #tpu.memory_space<vmem>>, vector<2x32xf32>
      tpu.vector_store %arg6[%c0_8, %c0_9], %2 {strides = array<i32>} : memref<2x32xf32, #tpu.memory_space<vmem>>, vector<2x32xf32>,
    } else {
    }
    %c0_i32_4 = arith.constant 0 : i32
    %6 = arith.cmpi sgt, %arg2, %c0_i32_4 : i32
    %7 = arith.extui %6 : i1 to i32
    %c0_i32_5 = arith.constant 0 : i32
    %8 = arith.cmpi ne, %7, %c0_i32_5 : i32
    scf.if %8 {
      %c0_8 = arith.constant 0 : index
      %c0_9 = arith.constant 0 : index
      %12 = vector.load %arg6[%c0_8, %c0_9] : memref<2x32xf32, #tpu.memory_space<vmem>>, vector<2x32xf32>
      %13 = arith.addf %12, %2 : vector<2x32xf32>
      %c0_10 = arith.constant 0 : index
      %c0_11 = arith.constant 0 : index
      %14 = vector.load %arg6[%c0_10, %c0_11] : memref<2x32xf32, #tpu.memory_space<vmem>>, vector<2x32xf32>
      tpu.vector_store %arg6[%c0_10, %c0_11], %13 {strides = array<i32>} : memref<2x32xf32, #tpu.memory_space<vmem>>, vector<2x32xf32>,
    } else {
    }
    %c0_i32_6 = arith.constant 0 : i32
    %9 = arith.cmpi eq, %arg2, %c0_i32_6 : i32
    %10 = arith.extui %9 : i1 to i32
    %c0_i32_7 = arith.constant 0 : i32
    %11 = arith.cmpi ne, %10, %c0_i32_7 : i32
    scf.if %11 {
      %c0_8 = arith.constant 0 : index
      %c0_9 = arith.constant 0 : index
      %12 = vector.load %arg6[%c0_8, %c0_9] : memref<2x32xf32, #tpu.memory_space<vmem>>, vector<2x32xf32>
      %c0_10 = arith.constant 0 : index
      %c0_11 = arith.constant 0 : index
      %13 = vector.load %arg5[%c0_10, %c0_11] : memref<1x32xf32, #tpu.memory_space<vmem>>, vector<1x32xf32>
      %14 = vector.broadcast %13 : vector<1x32xf32> to vector<2x32xf32>
      %15 = arith.addf %12, %14 : vector<2x32xf32>
      %c0_12 = arith.constant 0 : index
      %c0_13 = arith.constant 0 : index
      %16 = vector.load %arg6[%c0_12, %c0_13] : memref<2x32xf32, #tpu.memory_space<vmem>>, vector<2x32xf32>
      tpu.vector_store %arg6[%c0_12, %c0_13], %15 {strides = array<i32>} : memref<2x32xf32, #tpu.memory_space<vmem>>, vector<2x32xf32>,
    } else {
    }
    return
  }
  func.func @transform_0(%arg0: i32, %arg1: i32, %arg2: i32) -> (i32, i32) {
    %c0_i32 = arith.constant 0 : i32
    return %arg0, %arg2 : i32, i32
  }
  func.func @transform_1(%arg0: i32, %arg1: i32, %arg2: i32) -> (i32, i32) {
    %c0_i32 = arith.constant 0 : i32
    return %arg2, %arg1 : i32, i32
  }
  func.func @transform_2(%arg0: i32, %arg1: i32, %arg2: i32) -> (i32, i32) {
    %c0_i32 = arith.constant 0 : i32
    %c0_i32_0 = arith.constant 0 : i32
    return %c0_i32, %arg1 : i32, i32
  }
  func.func @transform_3(%arg0: i32, %arg1: i32, %arg2: i32) -> (i32, i32) {
    %c0_i32 = arith.constant 0 : i32
    return %arg0, %arg1 : i32, i32
  }
}

</mosaic_0001>

<bundles_post_ra>
// kernel: encoder_forward.4
= control target key start
LH: loop header
LB: loop body
LE: loop exit
PB: predicated region body
PF: predicated region fallthrough
CT: control target
= control target key end

     0   :  { %s2227_s12 = smov 0   ;;  %s2229_s13 = smov 0   ;;  %s3042_s0 = inlined_call_operand.vmem [shape: f32[1800,27], index: 0, kind: input, shape index: {}]   ;;  %s3043_s1 = inlined_call_operand.vmem [shape: f32[27,16], index: 1, kind: input, shape index: {}]   ;;  %s3044_s2 = inlined_call_operand.vmem [shape: f32[1,16], index: 2, kind: input, shape index: {}]   ;;  %s3045_s3 = inlined_call_operand.vmem [shape: f32[1800,16], index: 3, kind: output, shape index: {}]  }
   0x1   :  { %s2231_s14 = smov 0  }
   0x2 LB: > { %s32_s15 = sadd.s32 1, %s2197_s13  ;;  %p1746_p0 = scmp.ge.s32.totalorder %s2201_s14, 1  ;;  %s2201_s14 = sphi %s2231_s14, %s13_s14   ;;  %s2197_s13 = sphi %s2229_s13, %s3047_s13   ;;  %s2193_s12 = sphi %s2227_s12, %s3046_s12  }
   0x3   : > { %p34_p1 = scmp.ge.s32.totalorder %s32_s15, 3  ;;  %p188_p2 = scmp.lt.s32.totalorder %s2201_s14, 4 }
   0x5   : > { %s3049_s15 = smov (%p34_p1, %s32_s15), 0  ;;  %p189_p3 = pnand %p1746_p0, %p188_p2 }
   0x6   : > { %v334_v0 = vld [vmem:[%s3043_s1] sm:$0xff] (!%p189_p3)  ;;  %v335_v1 = vld [vmem:[%s3043_s1 + $0x8] sm:$0xff] (!%p189_p3)  ;;  %v336_v2 = vld [vmem:[%s3043_s1 + $0x10] sm:$0xff] (!%p189_p3)  ;;  %vm564_vm0 = vcmask (!%p189_p3), 1042432   ;;  %v2203_v3 = vmov (!%p189_p3), 0.0|0.0   ;;  %s229_s24 = smul.u32 (!%p189_p3), 75, %s2193_s12 }
   0x7   : > { %192 = sbr.rel (%p189_p3) target bundleno = 391 (0x187), region = 32  ;;  %2140 = vmatprep.subr.bf16.mxu0 (!%p189_p3), %v2203_v3  ;;  %v2141_v4 = vpack.c.bf16 (!%p189_p3), %v335_v1, %v334_v0  ;;  %2147 = vmatprep.subr.bf16.mxu1 (!%p189_p3), %v2203_v3  ;;  %v337_v5 = vld [vmem:[%s3043_s1 + $0x18] sm:$0x7] (!%p189_p3)  ;;  %vm2204_vm1 = vmmov (!%p189_p3), 0   ;;  %v2205_v6 = vmov (!%p189_p3), 0.0   ;;  %vm2206_vm2 = vmmov (!%p189_p3), 1  }
   0x8   : > { %1915 = vmatprep.mubr.msk.f32.mxu0 (!%p189_p3), %vm2204_vm1, %v2205_v6  ;;  %2029 = vmatprep.mubr.msk.f32.mxu1 (!%p189_p3), %vm2204_vm1, %v2205_v6  ;;  %v2144_v7 = vpack.c.bf16 (!%p189_p3), %v337_v5, %v336_v2  ;;  %p230_p4 = scmp.lt.s32.totalorder (!%p189_p3), %s229_s24, 224  ;;  %vm2145_vm3 = vmpackc.low (!%p189_p3), %vm564_vm0, %vm2206_vm2  ;;  %vm338_vm4 = vcmask (!%p189_p3), 220160   ;;  %vm1012_vm5 = vcmask (!%p189_p3), 130048  }
   0x9   : > { %2142 = vmatpush3.bf16.msra.mxu0 (!%p189_p3), %v2141_v4  ;;  %2149 = vmatpush3.bf16.msra.mxu1 (!%p189_p3), %v2141_v4 }
   0xa   : > { %2143 = vmatprep.subr.bf16.mxu0 (!%p189_p3), %v2203_v3  ;;  %2148 = vmatprep.subr.bf16.mxu1 (!%p189_p3), %v2203_v3 }
   0xd   : > { %2146 = vmatpush3.bf16.msk.msra.mxu0 (!%p189_p3), %vm2145_vm3, %v2144_v7  ;;  %2150 = vmatpush3.bf16.msk.msra.mxu1 (!%p189_p3), %vm2145_vm3, %v2144_v7 }
   0xe   : > { %s3051_s24 = smov (!%p230_p4, %s229_s24), 224 }
   0xf   : > { %s1747_s25 = sshll.u32 %s3051_s24, 3 }
  0x10   : > { %s2273_s28 = scalar_lea.vmem %s3042_s0, %s1747_s25  ;;  %s2576_s4 = scalar_lea.vmem %s3045_s3, %s1747_s25 }
  0x11   : > { %v259_v8 = vld [vmem:[%s2273_s28] sm:$0xff]  ;;  %v297_v9 = vld [vmem:[%s2273_s28 + $0x130] sm:$0xff]  ;;  %v260_v10 = vld [vmem:[%s2273_s28 + $0x8] sm:$0xff] }
  0x12   : > { %1916 = vmatmul.mubr.msk.f32.vlgmr.msra.gmra.mrb[0].mxu0 %vm338_vm4, %v259_v8  ;;  %2030 = vmatmul.mubr.msk.f32.vlgmr.msra.gmra.mrb[0].mxu1 %vm338_vm4, %v297_v9  ;;  %v298_v11 = vld [vmem:[%s2273_s28 + $0x138] sm:$0xff]  ;;  %v261_v12 = vld [vmem:[%s2273_s28 + $0x10] sm:$0xff]  ;;  %v299_v13 = vld [vmem:[%s2273_s28 + $0x140] sm:$0xff] }
  0x13   : > { %1918 = vmatprep.mubr.msk.f32.mxu0 %vm2204_vm1, %v2205_v6  ;;  %2032 = vmatprep.mubr.msk.f32.mxu1 %vm2204_vm1, %v2205_v6  ;;  %v262_v14 = vld [vmem:[%s2273_s28 + $0x18] sm:$0xff]  ;;  %v300_v15 = vld [vmem:[%s2273_s28 + $0x148] sm:$0xff]  ;;  %v263_v16 = vld [vmem:[%s2273_s28 + $0x20] sm:$0xff] }
  0x14   : > { %v301_v17 = vld [vmem:[%s2273_s28 + $0x150] sm:$0xff]  ;;  %v264_v18 = vld [vmem:[%s2273_s28 + $0x28] sm:$0xff]  ;;  %v302_v19 = vld [vmem:[%s2273_s28 + $0x158] sm:$0xff] }
  0x15   : > { %v265_v20 = vld [vmem:[%s2273_s28 + $0x30] sm:$0xff]  ;;  %v303_v21 = vld [vmem:[%s2273_s28 + $0x160] sm:$0xff]  ;;  %v266_v22 = vld [vmem:[%s2273_s28 + $0x38] sm:$0xff] }
  0x16   : > { %1919 = vmatmul.mubr.msk.f32.gmra.mrb[2].mxu0 %vm338_vm4, %v260_v10  ;;  %2033 = vmatmul.mubr.msk.f32.gmra.mrb[2].mxu1 %vm338_vm4, %v298_v11  ;;  %v304_v23 = vld [vmem:[%s2273_s28 + $0x168] sm:$0xff]  ;;  %v267_v24 = vld [vmem:[%s2273_s28 + $0x40] sm:$0xff]  ;;  %v305_v25 = vld [vmem:[%s2273_s28 + $0x170] sm:$0xff] }
  0x17   : > { %1921 = vmatprep.mubr.msk.f32.mxu0 %vm2204_vm1, %v2205_v6  ;;  %2035 = vmatprep.mubr.msk.f32.mxu1 %vm2204_vm1, %v2205_v6  ;;  %v268_v26 = vld [vmem:[%s2273_s28 + $0x48] sm:$0xff]  ;;  %v306_v27 = vld [vmem:[%s2273_s28 + $0x178] sm:$0xff]  ;;  %v269_v28 = vld [vmem:[%s2273_s28 + $0x50] sm:$0xff] }
  0x18   : > { %v307_v29 = vld [vmem:[%s2273_s28 + $0x180] sm:$0xff]  ;;  %v270_v30 = vld [vmem:[%s2273_s28 + $0x58] sm:$0xff]  ;;  %v308_v31 = vld [vmem:[%s2273_s28 + $0x188] sm:$0xff] }
  0x19   : > { %v271_v32 = vld [vmem:[%s2273_s28 + $0x60] sm:$0xff]  ;;  %v309_v33 = vld [vmem:[%s2273_s28 + $0x190] sm:$0xff]  ;;  %v272_v34 = vld [vmem:[%s2273_s28 + $0x68] sm:$0xff] }
  0x1a   : > { %1922 = vmatmul.mubr.msk.f32.gmra.mrb[4].mxu0 %vm338_vm4, %v261_v12  ;;  %2036 = vmatmul.mubr.msk.f32.gmra.mrb[4].mxu1 %vm338_vm4, %v299_v13  ;;  %v310_v35 = vld [vmem:[%s2273_s28 + $0x198] sm:$0xff]  ;;  %v273_v36 = vld [vmem:[%s2273_s28 + $0x70] sm:$0xff]  ;;  %v311_v37 = vld [vmem:[%s2273_s28 + $0x1a0] sm:$0xff] }
  0x1b   : > { %1924 = vmatprep.mubr.msk.f32.mxu0 %vm2204_vm1, %v2205_v6  ;;  %2038 = vmatprep.mubr.msk.f32.mxu1 %vm2204_vm1, %v2205_v6  ;;  %v274_v38 = vld [vmem:[%s2273_s28 + $0x78] sm:$0xff]  ;;  %v312_v39 = vld [vmem:[%s2273_s28 + $0x1a8] sm:$0xff]  ;;  %v275_v40 = vld [vmem:[%s2273_s28 + $0x80] sm:$0xff] }
  0x1c   : > { %v313_v41 = vld [vmem:[%s2273_s28 + $0x1b0] sm:$0xff]  ;;  %v276_v42 = vld [vmem:[%s2273_s28 + $0x88] sm:$0xff]  ;;  %v314_v43 = vld [vmem:[%s2273_s28 + $0x1b8] sm:$0xff] }
  0x1d   : > { %v277_v44 = vld [vmem:[%s2273_s28 + $0x90] sm:$0xff]  ;;  %v315_v45 = vld [vmem:[%s2273_s28 + $0x1c0] sm:$0xff]  ;;  %v278_v46 = vld [vmem:[%s2273_s28 + $0x98] sm:$0xff] }
  0x1e   : > { %1925 = vmatmul.mubr.msk.f32.gmra.mrb[6].mxu0 %vm338_vm4, %v262_v14  ;;  %2039 = vmatmul.mubr.msk.f32.gmra.mrb[6].mxu1 %vm338_vm4, %v300_v15  ;;  %v316_v47 = vld [vmem:[%s2273_s28 + $0x1c8] sm:$0xff]  ;;  %v279_v48 = vld [vmem:[%s2273_s28 + $0xa0] sm:$0xff]  ;;  %v317_v49 = vld [vmem:[%s2273_s28 + $0x1d0] sm:$0xff] }
  0x1f   : > { %1927 = vmatprep.mubr.msk.f32.mxu0 %vm2204_vm1, %v2205_v6  ;;  %2041 = vmatprep.mubr.msk.f32.mxu1 %vm2204_vm1, %v2205_v6  ;;  %v280_v50 = vld [vmem:[%s2273_s28 + $0xa8] sm:$0xff]  ;;  %v318_v51 = vld [vmem:[%s2273_s28 + $0x1d8] sm:$0xff]  ;;  %v281_v52 = vld [vmem:[%s2273_s28 + $0xb0] sm:$0xff] }
  0x20   : > { %v319_v53 = vld [vmem:[%s2273_s28 + $0x1e0] sm:$0xff]  ;;  %v282_v54 = vld [vmem:[%s2273_s28 + $0xb8] sm:$0xff]  ;;  %v320_v55 = vld [vmem:[%s2273_s28 + $0x1e8] sm:$0xff] }
  0x21   : > { %v283_v56 = vld [vmem:[%s2273_s28 + $0xc0] sm:$0xff]  ;;  %v321_v57 = vld [vmem:[%s2273_s28 + $0x1f0] sm:$0xff]  ;;  %v284_v58 = vld [vmem:[%s2273_s28 + $0xc8] sm:$0xff] }
  0x22   : > { %1928 = vmatmul.mubr.msk.f32.gmra.mrb[8].mxu0 %vm338_vm4, %v263_v16  ;;  %2042 = vmatmul.mubr.msk.f32.gmra.mrb[8].mxu1 %vm338_vm4, %v301_v17  ;;  %v322_v59 = vld [vmem:[%s2273_s28 + $0x1f8] sm:$0xff]  ;;  %v285_v60 = vld [vmem:[%s2273_s28 + $0xd0] sm:$0xff]  ;;  %v323_v61 = vld [vmem:[%s2273_s28 + $0x200] sm:$0xff] }
  0x23   : > { %1930 = vmatprep.mubr.msk.f32.mxu0 %vm2204_vm1, %v2205_v6  ;;  %2044 = vmatprep.mubr.msk.f32.mxu1 %vm2204_vm1, %v2205_v6  ;;  %v286_v62 = vld [vmem:[%s2273_s28 + $0xd8] sm:$0xff]  ;;  %v324_v63 = vld [vmem:[%s2273_s28 + $0x208] sm:$0xff]  ;;  %v287_v0 = vld [vmem:[%s2273_s28 + $0xe0] sm:$0xff] }
  0x24   : > { %v325_v1 = vld [vmem:[%s2273_s28 + $0x210] sm:$0xff]  ;;  %v288_v2 = vld [vmem:[%s2273_s28 + $0xe8] sm:$0xff]  ;;  %v326_v3 = vld [vmem:[%s2273_s28 + $0x218] sm:$0xff] }
  0x25   : > { %v289_v4 = vld [vmem:[%s2273_s28 + $0xf0] sm:$0xff]  ;;  %v327_v5 = vld [vmem:[%s2273_s28 + $0x220] sm:$0xff]  ;;  %v290_v7 = vld [vmem:[%s2273_s28 + $0xf8] sm:$0xff] }
  0x26   : > { %1931 = vmatmul.mubr.msk.f32.gmra.mrb[10].mxu0 %vm338_vm4, %v264_v18  ;;  %2045 = vmatmul.mubr.msk.f32.gmra.mrb[10].mxu1 %vm338_vm4, %v302_v19  ;;  %v328_v8 = vld [vmem:[%s2273_s28 + $0x228] sm:$0xff]  ;;  %v291_v9 = vld [vmem:[%s2273_s28 + $0x100] sm:$0xff]  ;;  %v329_v10 = vld [vmem:[%s2273_s28 + $0x230] sm:$0xff] }
  0x27   : > { %1933 = vmatprep.mubr.msk.f32.mxu0 %vm2204_vm1, %v2205_v6  ;;  %2047 = vmatprep.mubr.msk.f32.mxu1 %vm2204_vm1, %v2205_v6  ;;  %v292_v11 = vld [vmem:[%s2273_s28 + $0x108] sm:$0xff]  ;;  %v330_v12 = vld [vmem:[%s2273_s28 + $0x238] sm:$0xff]  ;;  %v293_v13 = vld [vmem:[%s2273_s28 + $0x110] sm:$0xff] }
  0x28   : > { %v331_v14 = vld [vmem:[%s2273_s28 + $0x240] sm:$0xff]  ;;  %v294_v15 = vld [vmem:[%s2273_s28 + $0x118] sm:$0xff]  ;;  %v332_v16 = vld [vmem:[%s2273_s28 + $0x248] sm:$0xff] }
  0x29   : > { %v295_v17 = vld [vmem:[%s2273_s28 + $0x120] sm:$0xff]  ;;  %v333_v18 = vld [vmem:[%s2273_s28 + $0x250] sm:$0xff]  ;;  %v296_v19 = vld [vmem:[%s2273_s28 + $0x128] sm:$0xff] }
  0x2a   : > { %1934 = vmatmul.mubr.msk.f32.gmra.mrb[12].mxu0 %vm338_vm4, %v265_v20  ;;  %2048 = vmatmul.mubr.msk.f32.gmra.mrb[12].mxu1 %vm338_vm4, %v303_v21 }
  0x2b   : > { %1936 = vmatprep.mubr.msk.f32.mxu0 %vm2204_vm1, %v2205_v6  ;;  %2050 = vmatprep.mubr.msk.f32.mxu1 %vm2204_vm1, %v2205_v6 }
  0x2e   : > { %1937 = vmatmul.mubr.msk.f32.gmra.mrb[14].mxu0 %vm338_vm4, %v266_v22  ;;  %2051 = vmatmul.mubr.msk.f32.gmra.mrb[14].mxu1 %vm338_vm4, %v304_v23 }
  0x2f   : > { %1939 = vmatprep.mubr.msk.f32.mxu0 %vm2204_vm1, %v2205_v6  ;;  %2053 = vmatprep.mubr.msk.f32.mxu1 %vm2204_vm1, %v2205_v6 }
  0x32   : > { %1940 = vmatmul.mubr.msk.f32.gmra.mrb[16].mxu0 %vm338_vm4, %v267_v24  ;;  %2054 = vmatmul.mubr.msk.f32.gmra.mrb[16].mxu1 %vm338_vm4, %v305_v25 }
  0x33   : > { %1942 = vmatprep.mubr.msk.f32.mxu0 %vm2204_vm1, %v2205_v6  ;;  %2056 = vmatprep.mubr.msk.f32.mxu1 %vm2204_vm1, %v2205_v6 }
  0x36   : > { %1943 = vmatmul.mubr.msk.f32.gmra.mrb[18].mxu0 %vm338_vm4, %v268_v26  ;;  %2057 = vmatmul.mubr.msk.f32.gmra.mrb[18].mxu1 %vm338_vm4, %v306_v27  ;;  %v2589_v27 = vld [vmem:[%s3044_s2] ss:$0 sm:$0xff] }
  0x37   : > { %1945 = vmatprep.mubr.msk.f32.mxu0 %vm2204_vm1, %v2205_v6  ;;  %2059 = vmatprep.mubr.msk.f32.mxu1 %vm2204_vm1, %v2205_v6 }
  0x3a   : > { %1946 = vmatmul.mubr.msk.f32.gmra.mrb[20].mxu0 %vm338_vm4, %v269_v28  ;;  %2060 = vmatmul.mubr.msk.f32.gmra.mrb[20].mxu1 %vm338_vm4, %v307_v29 }
  0x3b   : > { %1948 = vmatprep.mubr.msk.f32.mxu0 %vm2204_vm1, %v2205_v6  ;;  %2062 = vmatprep.mubr.msk.f32.mxu1 %vm2204_vm1, %v2205_v6 }
  0x3e   : > { %1949 = vmatmul.mubr.msk.f32.gmra.mrb[22].mxu0 %vm338_vm4, %v270_v30  ;;  %2063 = vmatmul.mubr.msk.f32.gmra.mrb[22].mxu1 %vm338_vm4, %v308_v31 }
  0x3f   : > { %1951 = vmatprep.mubr.msk.f32.mxu0 %vm2204_vm1, %v2205_v6  ;;  %2065 = vmatprep.mubr.msk.f32.mxu1 %vm2204_vm1, %v2205_v6 }
  0x42   : > { %1952 = vmatmul.mubr.msk.f32.gmra.mrb[24].mxu0 %vm338_vm4, %v271_v32  ;;  %2066 = vmatmul.mubr.msk.f32.gmra.mrb[24].mxu1 %vm338_vm4, %v309_v33 }
  0x43   : > { %1954 = vmatprep.mubr.msk.f32.mxu0 %vm2204_vm1, %v2205_v6  ;;  %2068 = vmatprep.mubr.msk.f32.mxu1 %vm2204_vm1, %v2205_v6 }
  0x46   : > { %1955 = vmatmul.mubr.msk.f32.gmra.mrb[26].mxu0 %vm338_vm4, %v272_v34  ;;  %2069 = vmatmul.mubr.msk.f32.gmra.mrb[26].mxu1 %vm338_vm4, %v310_v35 }
  0x47   : > { %1957 = vmatprep.mubr.msk.f32.mxu0 %vm2204_vm1, %v2205_v6  ;;  %2071 = vmatprep.mubr.msk.f32.mxu1 %vm2204_vm1, %v2205_v6 }
  0x4a   : > { %1958 = vmatmul.mubr.msk.f32.gmra.mrb[28].mxu0 %vm338_vm4, %v273_v36  ;;  %2072 = vmatmul.mubr.msk.f32.gmra.mrb[28].mxu1 %vm338_vm4, %v311_v37 }
  0x4b   : > { %1960 = vmatprep.mubr.msk.f32.mxu0 %vm2204_vm1, %v2205_v6  ;;  %2074 = vmatprep.mubr.msk.f32.mxu1 %vm2204_vm1, %v2205_v6 }
  0x4e   : > { %1961 = vmatmul.mubr.msk.f32.gmra.mrb[30].mxu0 %vm338_vm4, %v274_v38  ;;  %2075 = vmatmul.mubr.msk.f32.gmra.mrb[30].mxu1 %vm338_vm4, %v312_v39 }
  0x4f   : > { %1963 = vmatprep.mubr.msk.f32.mxu0 %vm2204_vm1, %v2205_v6  ;;  %2077 = vmatprep.mubr.msk.f32.mxu1 %vm2204_vm1, %v2205_v6 }
  0x52   : > { %1964 = vmatmul.mubr.msk.f32.gmra.mrb[32].mxu0 %vm338_vm4, %v275_v40  ;;  %2078 = vmatmul.mubr.msk.f32.gmra.mrb[32].mxu1 %vm338_vm4, %v313_v41 }
  0x53   : > { %1966 = vmatprep.mubr.msk.f32.mxu0 %vm2204_vm1, %v2205_v6  ;;  %2080 = vmatprep.mubr.msk.f32.mxu1 %vm2204_vm1, %v2205_v6 }
  0x56   : > { %1967 = vmatmul.mubr.msk.f32.gmra.mrb[34].mxu0 %vm338_vm4, %v276_v42  ;;  %2081 = vmatmul.mubr.msk.f32.gmra.mrb[34].mxu1 %vm338_vm4, %v314_v43 }
  0x57   : > { %1969 = vmatprep.mubr.msk.f32.mxu0 %vm2204_vm1, %v2205_v6  ;;  %2083 = vmatprep.mubr.msk.f32.mxu1 %vm2204_vm1, %v2205_v6 }
  0x5a   : > { %1970 = vmatmul.mubr.msk.f32.gmra.mrb[36].mxu0 %vm338_vm4, %v277_v44  ;;  %2084 = vmatmul.mubr.msk.f32.gmra.mrb[36].mxu1 %vm338_vm4, %v315_v45 }
  0x5b   : > { %1972 = vmatprep.mubr.msk.f32.mxu0 %vm2204_vm1, %v2205_v6  ;;  %2086 = vmatprep.mubr.msk.f32.mxu1 %vm2204_vm1, %v2205_v6 }
  0x5e   : > { %1973 = vmatmul.mubr.msk.f32.gmra.mrb[38].mxu0 %vm338_vm4, %v278_v46  ;;  %2087 = vmatmul.mubr.msk.f32.gmra.mrb[38].mxu1 %vm338_vm4, %v316_v47 }
  0x5f   : > { %1975 = vmatprep.mubr.msk.f32.mxu0 %vm2204_vm1, %v2205_v6  ;;  %2089 = vmatprep.mubr.msk.f32.mxu1 %vm2204_vm1, %v2205_v6 }
  0x62   : > { %1976 = vmatmul.mubr.msk.f32.gmra.mrb[40].mxu0 %vm338_vm4, %v279_v48  ;;  %2090 = vmatmul.mubr.msk.f32.gmra.mrb[40].mxu1 %vm338_vm4, %v317_v49 }
  0x63   : > { %1978 = vmatprep.mubr.msk.f32.mxu0 %vm2204_vm1, %v2205_v6  ;;  %2092 = vmatprep.mubr.msk.f32.mxu1 %vm2204_vm1, %v2205_v6 }
  0x66   : > { %1979 = vmatmul.mubr.msk.f32.gmra.mrb[42].mxu0 %vm338_vm4, %v280_v50  ;;  %2093 = vmatmul.mubr.msk.f32.gmra.mrb[42].mxu1 %vm338_vm4, %v318_v51 }
  0x67   : > { %1981 = vmatprep.mubr.msk.f32.mxu0 %vm2204_vm1, %v2205_v6  ;;  %2095 = vmatprep.mubr.msk.f32.mxu1 %vm2204_vm1, %v2205_v6 }
  0x6a   : > { %1982 = vmatmul.mubr.msk.f32.gmra.mrb[44].mxu0 %vm338_vm4, %v281_v52  ;;  %2096 = vmatmul.mubr.msk.f32.gmra.mrb[44].mxu1 %vm338_vm4, %v319_v53 }
  0x6b   : > { %1984 = vmatprep.mubr.msk.f32.mxu0 %vm2204_vm1, %v2205_v6  ;;  %2098 = vmatprep.mubr.msk.f32.mxu1 %vm2204_vm1, %v2205_v6 }
  0x6e   : > { %1985 = vmatmul.mubr.msk.f32.gmra.mrb[46].mxu0 %vm338_vm4, %v282_v54  ;;  %2099 = vmatmul.mubr.msk.f32.gmra.mrb[46].mxu1 %vm338_vm4, %v320_v55 }
  0x6f   : > { %1987 = vmatprep.mubr.msk.f32.mxu0 %vm2204_vm1, %v2205_v6  ;;  %2101 = vmatprep.mubr.msk.f32.mxu1 %vm2204_vm1, %v2205_v6 }
  0x72   : > { %1988 = vmatmul.mubr.msk.f32.gmra.mrb[48].mxu0 %vm338_vm4, %v283_v56  ;;  %2102 = vmatmul.mubr.msk.f32.gmra.mrb[48].mxu1 %vm338_vm4, %v321_v57 }
  0x73   : > { %1990 = vmatprep.mubr.msk.f32.mxu0 %vm2204_vm1, %v2205_v6  ;;  %2104 = vmatprep.mubr.msk.f32.mxu1 %vm2204_vm1, %v2205_v6 }
  0x76   : > { %1991 = vmatmul.mubr.msk.f32.gmra.mrb[50].mxu0 %vm338_vm4, %v284_v58  ;;  %2105 = vmatmul.mubr.msk.f32.gmra.mrb[50].mxu1 %vm338_vm4, %v322_v59 }
  0x77   : > { %1993 = vmatprep.mubr.msk.f32.mxu0 %vm2204_vm1, %v2205_v6  ;;  %2107 = vmatprep.mubr.msk.f32.mxu1 %vm2204_vm1, %v2205_v6 }
  0x7a   : > { %1994 = vmatmul.mubr.msk.f32.gmra.mrb[52].mxu0 %vm338_vm4, %v285_v60  ;;  %2108 = vmatmul.mubr.msk.f32.gmra.mrb[52].mxu1 %vm338_vm4, %v323_v61 }
  0x7b   : > { %1996 = vmatprep.mubr.msk.f32.mxu0 %vm2204_vm1, %v2205_v6  ;;  %2110 = vmatprep.mubr.msk.f32.mxu1 %vm2204_vm1, %v2205_v6 }
  0x7e   : > { %1997 = vmatmul.mubr.msk.f32.gmra.mrb[54].mxu0 %vm338_vm4, %v286_v62  ;;  %2111 = vmatmul.mubr.msk.f32.gmra.mrb[54].mxu1 %vm338_vm4, %v324_v63 }
  0x7f   : > { %1999 = vmatprep.mubr.msk.f32.mxu0 %vm2204_vm1, %v2205_v6  ;;  %2113 = vmatprep.mubr.msk.f32.mxu1 %vm2204_vm1, %v2205_v6 }
  0x82   : > { %2000 = vmatmul.mubr.msk.f32.gmra.mrb[56].mxu0 %vm338_vm4, %v287_v0  ;;  %2114 = vmatmul.mubr.msk.f32.gmra.mrb[56].mxu1 %vm338_vm4, %v325_v1 }
  0x83   : > { %2002 = vmatprep.mubr.msk.f32.mxu0 %vm2204_vm1, %v2205_v6  ;;  %2116 = vmatprep.mubr.msk.f32.mxu1 %vm2204_vm1, %v2205_v6 }
  0x86   : > { %2003 = vmatmul.mubr.msk.f32.gmra.mrb[58].mxu0 %vm338_vm4, %v288_v2  ;;  %2117 = vmatmul.mubr.msk.f32.gmra.mrb[58].mxu1 %vm338_vm4, %v326_v3 }
  0x87   : > { %2005 = vmatprep.mubr.msk.f32.mxu0 %vm2204_vm1, %v2205_v6  ;;  %2119 = vmatprep.mubr.msk.f32.mxu1 %vm2204_vm1, %v2205_v6 }
  0x8a   : > { %2006 = vmatmul.mubr.msk.f32.gmra.mrb[60].mxu0 %vm338_vm4, %v289_v4  ;;  %2120 = vmatmul.mubr.msk.f32.gmra.mrb[60].mxu1 %vm338_vm4, %v327_v5 }
  0x8b   : > { %2008 = vmatprep.mubr.msk.f32.mxu0 %vm2204_vm1, %v2205_v6  ;;  %2122 = vmatprep.mubr.msk.f32.mxu1 %vm2204_vm1, %v2205_v6 }
  0x8e   : > { %2009 = vmatmul.mubr.msk.f32.gmra.mrb[62].mxu0 %vm338_vm4, %v290_v7  ;;  %2123 = vmatmul.mubr.msk.f32.gmra.mrb[62].mxu1 %vm338_vm4, %v328_v8 }
  0x8f   : > { %2011 = vmatprep.mubr.msk.f32.mxu0 %vm2204_vm1, %v2205_v6  ;;  %2125 = vmatprep.mubr.msk.f32.mxu1 %vm2204_vm1, %v2205_v6 }
  0x92   : > { %2012 = vmatmul.mubr.msk.f32.gmra.mrb[64].mxu0 %vm338_vm4, %v291_v9  ;;  %2126 = vmatmul.mubr.msk.f32.gmra.mrb[64].mxu1 %vm338_vm4, %v329_v10 }
  0x93   : > { %2014 = vmatprep.mubr.msk.f32.mxu0 %vm2204_vm1, %v2205_v6  ;;  %2128 = vmatprep.mubr.msk.f32.mxu1 %vm2204_vm1, %v2205_v6 }
  0x96   : > { %2015 = vmatmul.mubr.msk.f32.gmra.mrb[66].mxu0 %vm338_vm4, %v292_v11  ;;  %2129 = vmatmul.mubr.msk.f32.gmra.mrb[66].mxu1 %vm338_vm4, %v330_v12 }
  0x97   : > { %2017 = vmatprep.mubr.msk.f32.mxu0 %vm2204_vm1, %v2205_v6  ;;  %2131 = vmatprep.mubr.msk.f32.mxu1 %vm2204_vm1, %v2205_v6 }
  0x9a   : > { %2018 = vmatmul.mubr.msk.f32.gmra.mrb[68].mxu0 %vm338_vm4, %v293_v13  ;;  %2132 = vmatmul.mubr.msk.f32.gmra.mrb[68].mxu1 %vm338_vm4, %v331_v14 }
  0x9b   : > { %2020 = vmatprep.mubr.msk.f32.mxu0 %vm2204_vm1, %v2205_v6  ;;  %2134 = vmatprep.mubr.msk.f32.mxu1 %vm2204_vm1, %v2205_v6 }
  0x9e   : > { %2021 = vmatmul.mubr.msk.f32.gmra.mrb[70].mxu0 %vm338_vm4, %v294_v15  ;;  %2135 = vmatmul.mubr.msk.f32.gmra.mrb[70].mxu1 %vm338_vm4, %v332_v16 }
  0x9f   : > { %2023 = vmatprep.mubr.msk.f32.mxu0 %vm2204_vm1, %v2205_v6  ;;  %2137 = vmatprep.mubr.msk.f32.mxu1 %vm2204_vm1, %v2205_v6 }
  0xa2   : > { %2024 = vmatmul.mubr.msk.f32.gmra.mrb[72].mxu0 %vm338_vm4, %v295_v17  ;;  %2138 = vmatmul.mubr.msk.f32.gmra.mrb[72].mxu1 %vm338_vm4, %v333_v18 }
  0xa3   : > { %2026 = vmatprep.mubr.msk.f32.mxu0 %vm2204_vm1, %v2205_v6 }
  0xa6   : > { %2027 = vmatmul.mubr.msk.f32.gmra.mrb[74].mxu0 %vm338_vm4, %v296_v19 }
  0xe5   : > { %v634_v20 = vpop.f32.mrb[0].mxu0  ;;  %v824_v21 = vpop.f32.mrb[0].mxu1 }
  0xe6   : > { %1013 = vst.msk [vmem:[%s2576_s4] sm:$0xff] %vm1012_vm5, %v634_v20  ;;  %v1917_v6 = vpop.f32.mrb[1].mxu0  ;;  %1051 = vst.msk [vmem:[%s2576_s4 + $0x130] sm:$0xff] %vm1012_vm5, %v824_v21  ;;  %v2031_v22 = vpop.f32.mrb[1].mxu1 }
  0xe9   : > { %v639_v23 = vpop.f32.mrb[2].mxu0  ;;  %v829_v24 = vpop.f32.mrb[2].mxu1 }
  0xea   : > { %1014 = vst.msk [vmem:[%s2576_s4 + $0x8] sm:$0xff] %vm1012_vm5, %v639_v23  ;;  %v1920_v25 = vpop.f32.mrb[3].mxu0  ;;  %1052 = vst.msk [vmem:[%s2576_s4 + $0x138] sm:$0xff] %vm1012_vm5, %v829_v24  ;;  %v2034_v26 = vpop.f32.mrb[3].mxu1 }
  0xed   : > { %v1321_v28 = vld [vmem:[%s2576_s4] sm:$0xff]  ;;  %v1359_v29 = vld [vmem:[%s2576_s4 + $0x130] sm:$0xff]  ;;  %v644_v30 = vpop.f32.mrb[4].mxu0  ;;  %v834_v31 = vpop.f32.mrb[4].mxu1 }
  0xee   : > { %v1403_v32 = vadd.f32 %v2589_v27, %v1321_v28  ;;  %v1441_v33 = vadd.f32 %v2589_v27, %v1359_v29  ;;  %1015 = vst.msk [vmem:[%s2576_s4 + $0x10] sm:$0xff] %vm1012_vm5, %v644_v30  ;;  %v1923_v34 = vpop.f32.mrb[5].mxu0  ;;  %1053 = vst.msk [vmem:[%s2576_s4 + $0x140] sm:$0xff] %vm1012_vm5, %v834_v31  ;;  %v2037_v35 = vpop.f32.mrb[5].mxu1 }
  0xf0   : > { %v1478_v36 = vmax.f32 %v1403_v32, 0.0  ;;  %v1516_v37 = vmax.f32 %v1441_v33, 0.0 }
  0xf1   : > { %v1322_v38 = vld [vmem:[%s2576_s4 + $0x8] sm:$0xff]  ;;  %v1360_v39 = vld [vmem:[%s2576_s4 + $0x138] sm:$0xff]  ;;  %v649_v40 = vpop.f32.mrb[6].mxu0  ;;  %v839_v41 = vpop.f32.mrb[6].mxu1 }
  0xf2   : > { %1554 = vst.msk [vmem:[%s2576_s4] sm:$0xff] %vm1012_vm5, %v1478_v36  ;;  %1592 = vst.msk [vmem:[%s2576_s4 + $0x130] sm:$0xff] %vm1012_vm5, %v1516_v37  ;;  %v1404_v42 = vadd.f32 %v2589_v27, %v1322_v38  ;;  %v1442_v43 = vadd.f32 %v2589_v27, %v1360_v39  ;;  %v1926_v44 = vpop.f32.mrb[7].mxu0  ;;  %v2040_v45 = vpop.f32.mrb[7].mxu1 }
  0xf3   : > { %1016 = vst.msk [vmem:[%s2576_s4 + $0x18] sm:$0xff] %vm1012_vm5, %v649_v40  ;;  %1054 = vst.msk [vmem:[%s2576_s4 + $0x148] sm:$0xff] %vm1012_vm5, %v839_v41 }
  0xf4   : > { %v1479_v46 = vmax.f32 %v1404_v42, 0.0  ;;  %v1517_v47 = vmax.f32 %v1442_v43, 0.0 }
  0xf5   : > { %v1323_v48 = vld [vmem:[%s2576_s4 + $0x10] sm:$0xff]  ;;  %v1361_v49 = vld [vmem:[%s2576_s4 + $0x140] sm:$0xff]  ;;  %v654_v50 = vpop.f32.mrb[8].mxu0  ;;  %v844_v51 = vpop.f32.mrb[8].mxu1 }
  0xf6   : > { %1555 = vst.msk [vmem:[%s2576_s4 + $0x8] sm:$0xff] %vm1012_vm5, %v1479_v46  ;;  %1593 = vst.msk [vmem:[%s2576_s4 + $0x138] sm:$0xff] %vm1012_vm5, %v1517_v47  ;;  %v1405_v52 = vadd.f32 %v2589_v27, %v1323_v48  ;;  %v1443_v53 = vadd.f32 %v2589_v27, %v1361_v49  ;;  %v1929_v54 = vpop.f32.mrb[9].mxu0  ;;  %v2043_v55 = vpop.f32.mrb[9].mxu1 }
  0xf7   : > { %1017 = vst.msk [vmem:[%s2576_s4 + $0x20] sm:$0xff] %vm1012_vm5, %v654_v50  ;;  %1055 = vst.msk [vmem:[%s2576_s4 + $0x150] sm:$0xff] %vm1012_vm5, %v844_v51 }
  0xf8   : > { %v1480_v56 = vmax.f32 %v1405_v52, 0.0  ;;  %v1518_v57 = vmax.f32 %v1443_v53, 0.0 }
  0xf9   : > { %v659_v60 = vpop.f32.mrb[10].mxu0  ;;  %v849_v61 = vpop.f32.mrb[10].mxu1 }
  0xfa   : > { %v1324_v58 = vld [vmem:[%s2576_s4 + $0x18] sm:$0xff]  ;;  %v1362_v59 = vld [vmem:[%s2576_s4 + $0x148] sm:$0xff]  ;;  %1556 = vst.msk [vmem:[%s2576_s4 + $0x10] sm:$0xff] %vm1012_vm5, %v1480_v56  ;;  %1594 = vst.msk [vmem:[%s2576_s4 + $0x140] sm:$0xff] %vm1012_vm5, %v1518_v57  ;;  %v1932_v0 = vpop.f32.mrb[11].mxu0  ;;  %v2046_v1 = vpop.f32.mrb[11].mxu1 }
  0xfb   : > { %v1406_v62 = vadd.f32 %v2589_v27, %v1324_v58  ;;  %v1444_v63 = vadd.f32 %v2589_v27, %v1362_v59  ;;  %1018 = vst.msk [vmem:[%s2576_s4 + $0x28] sm:$0xff] %vm1012_vm5, %v659_v60  ;;  %1056 = vst.msk [vmem:[%s2576_s4 + $0x158] sm:$0xff] %vm1012_vm5, %v849_v61 }
  0xfd   : > { %v1481_v2 = vmax.f32 %v1406_v62, 0.0  ;;  %v1519_v3 = vmax.f32 %v1444_v63, 0.0  ;;  %v664_v7 = vpop.f32.mrb[12].mxu0  ;;  %v854_v8 = vpop.f32.mrb[12].mxu1 }
  0xfe   : > { %v1325_v4 = vld [vmem:[%s2576_s4 + $0x20] sm:$0xff]  ;;  %v1363_v5 = vld [vmem:[%s2576_s4 + $0x150] sm:$0xff]  ;;  %1019 = vst.msk [vmem:[%s2576_s4 + $0x30] sm:$0xff] %vm1012_vm5, %v664_v7  ;;  %v1935_v11 = vpop.f32.mrb[13].mxu0  ;;  %1057 = vst.msk [vmem:[%s2576_s4 + $0x160] sm:$0xff] %vm1012_vm5, %v854_v8  ;;  %v2049_v12 = vpop.f32.mrb[13].mxu1 }
  0xff   : > { %1557 = vst.msk [vmem:[%s2576_s4 + $0x18] sm:$0xff] %vm1012_vm5, %v1481_v2  ;;  %1595 = vst.msk [vmem:[%s2576_s4 + $0x148] sm:$0xff] %vm1012_vm5, %v1519_v3  ;;  %v1407_v9 = vadd.f32 %v2589_v27, %v1325_v4  ;;  %v1445_v10 = vadd.f32 %v2589_v27, %v1363_v5 }
 0x101   : > { %v1482_v13 = vmax.f32 %v1407_v9, 0.0  ;;  %v1520_v14 = vmax.f32 %v1445_v10, 0.0  ;;  %v669_v17 = vpop.f32.mrb[14].mxu0  ;;  %v859_v18 = vpop.f32.mrb[14].mxu1 }
 0x102   : > { %v1326_v15 = vld [vmem:[%s2576_s4 + $0x28] sm:$0xff]  ;;  %v1364_v16 = vld [vmem:[%s2576_s4 + $0x158] sm:$0xff]  ;;  %1020 = vst.msk [vmem:[%s2576_s4 + $0x38] sm:$0xff] %vm1012_vm5, %v669_v17  ;;  %v1938_v21 = vpop.f32.mrb[15].mxu0  ;;  %1058 = vst.msk [vmem:[%s2576_s4 + $0x168] sm:$0xff] %vm1012_vm5, %v859_v18  ;;  %v2052_v6 = vpop.f32.mrb[15].mxu1 }
 0x103   : > { %1558 = vst.msk [vmem:[%s2576_s4 + $0x20] sm:$0xff] %vm1012_vm5, %v1482_v13  ;;  %1596 = vst.msk [vmem:[%s2576_s4 + $0x150] sm:$0xff] %vm1012_vm5, %v1520_v14  ;;  %v1408_v19 = vadd.f32 %v2589_v27, %v1326_v15  ;;  %v1446_v20 = vadd.f32 %v2589_v27, %v1364_v16 }
 0x105   : > { %v1483_v22 = vmax.f32 %v1408_v19, 0.0  ;;  %v1521_v23 = vmax.f32 %v1446_v20, 0.0  ;;  %v1327_v24 = vld [vmem:[%s2576_s4 + $0x30] sm:$0xff]  ;;  %v1365_v25 = vld [vmem:[%s2576_s4 + $0x160] sm:$0xff]  ;;  %v674_v26 = vpop.f32.mrb[16].mxu0  ;;  %v864_v28 = vpop.f32.mrb[16].mxu1 }
 0x106   : > { %v1409_v29 = vadd.f32 %v2589_v27, %v1327_v24  ;;  %v1447_v30 = vadd.f32 %v2589_v27, %v1365_v25  ;;  %1021 = vst.msk [vmem:[%s2576_s4 + $0x40] sm:$0xff] %vm1012_vm5, %v674_v26  ;;  %v1941_v31 = vpop.f32.mrb[17].mxu0  ;;  %1059 = vst.msk [vmem:[%s2576_s4 + $0x170] sm:$0xff] %vm1012_vm5, %v864_v28  ;;  %v2055_v32 = vpop.f32.mrb[17].mxu1 }
 0x107   : > { %1559 = vst.msk [vmem:[%s2576_s4 + $0x28] sm:$0xff] %vm1012_vm5, %v1483_v22  ;;  %1597 = vst.msk [vmem:[%s2576_s4 + $0x158] sm:$0xff] %vm1012_vm5, %v1521_v23 }
 0x108   : > { %v1484_v33 = vmax.f32 %v1409_v29, 0.0  ;;  %v1522_v34 = vmax.f32 %v1447_v30, 0.0 }
 0x109   : > { %v1328_v35 = vld [vmem:[%s2576_s4 + $0x38] sm:$0xff]  ;;  %v1366_v36 = vld [vmem:[%s2576_s4 + $0x168] sm:$0xff]  ;;  %v679_v37 = vpop.f32.mrb[18].mxu0  ;;  %v869_v38 = vpop.f32.mrb[18].mxu1 }
 0x10a   : > { %1560 = vst.msk [vmem:[%s2576_s4 + $0x30] sm:$0xff] %vm1012_vm5, %v1484_v33  ;;  %1598 = vst.msk [vmem:[%s2576_s4 + $0x160] sm:$0xff] %vm1012_vm5, %v1522_v34  ;;  %v1410_v39 = vadd.f32 %v2589_v27, %v1328_v35  ;;  %v1448_v40 = vadd.f32 %v2589_v27, %v1366_v36  ;;  %v1944_v41 = vpop.f32.mrb[19].mxu0  ;;  %v2058_v42 = vpop.f32.mrb[19].mxu1 }
 0x10b   : > { %1022 = vst.msk [vmem:[%s2576_s4 + $0x48] sm:$0xff] %vm1012_vm5, %v679_v37  ;;  %1060 = vst.msk [vmem:[%s2576_s4 + $0x178] sm:$0xff] %vm1012_vm5, %v869_v38 }
 0x10c   : > { %v1485_v43 = vmax.f32 %v1410_v39, 0.0  ;;  %v1523_v44 = vmax.f32 %v1448_v40, 0.0 }
 0x10d   : > { %v1329_v45 = vld [vmem:[%s2576_s4 + $0x40] sm:$0xff]  ;;  %v1367_v46 = vld [vmem:[%s2576_s4 + $0x170] sm:$0xff]  ;;  %v684_v47 = vpop.f32.mrb[20].mxu0  ;;  %v874_v48 = vpop.f32.mrb[20].mxu1 }
 0x10e   : > { %1561 = vst.msk [vmem:[%s2576_s4 + $0x38] sm:$0xff] %vm1012_vm5, %v1485_v43  ;;  %1599 = vst.msk [vmem:[%s2576_s4 + $0x168] sm:$0xff] %vm1012_vm5, %v1523_v44  ;;  %v1411_v49 = vadd.f32 %v2589_v27, %v1329_v45  ;;  %v1449_v50 = vadd.f32 %v2589_v27, %v1367_v46  ;;  %v1947_v51 = vpop.f32.mrb[21].mxu0  ;;  %v2061_v52 = vpop.f32.mrb[21].mxu1 }
 0x10f   : > { %1023 = vst.msk [vmem:[%s2576_s4 + $0x50] sm:$0xff] %vm1012_vm5, %v684_v47  ;;  %1061 = vst.msk [vmem:[%s2576_s4 + $0x180] sm:$0xff] %vm1012_vm5, %v874_v48 }
 0x110   : > { %v1486_v53 = vmax.f32 %v1411_v49, 0.0  ;;  %v1524_v54 = vmax.f32 %v1449_v50, 0.0 }
 0x111   : > { %v689_v57 = vpop.f32.mrb[22].mxu0  ;;  %v879_v58 = vpop.f32.mrb[22].mxu1 }
 0x112   : > { %v1330_v55 = vld [vmem:[%s2576_s4 + $0x48] sm:$0xff]  ;;  %v1368_v56 = vld [vmem:[%s2576_s4 + $0x178] sm:$0xff]  ;;  %1562 = vst.msk [vmem:[%s2576_s4 + $0x40] sm:$0xff] %vm1012_vm5, %v1486_v53  ;;  %1600 = vst.msk [vmem:[%s2576_s4 + $0x170] sm:$0xff] %vm1012_vm5, %v1524_v54  ;;  %v1950_v61 = vpop.f32.mrb[23].mxu0  ;;  %v2064_v62 = vpop.f32.mrb[23].mxu1 }
 0x113   : > { %v1412_v59 = vadd.f32 %v2589_v27, %v1330_v55  ;;  %v1450_v60 = vadd.f32 %v2589_v27, %v1368_v56  ;;  %1024 = vst.msk [vmem:[%s2576_s4 + $0x58] sm:$0xff] %vm1012_vm5, %v689_v57  ;;  %1062 = vst.msk [vmem:[%s2576_s4 + $0x188] sm:$0xff] %vm1012_vm5, %v879_v58 }
 0x115   : > { %v1487_v63 = vmax.f32 %v1412_v59, 0.0  ;;  %v1525_v0 = vmax.f32 %v1450_v60, 0.0  ;;  %v694_v3 = vpop.f32.mrb[24].mxu0  ;;  %v884_v4 = vpop.f32.mrb[24].mxu1 }
 0x116   : > { %v1331_v1 = vld [vmem:[%s2576_s4 + $0x50] sm:$0xff]  ;;  %v1369_v2 = vld [vmem:[%s2576_s4 + $0x180] sm:$0xff]  ;;  %1025 = vst.msk [vmem:[%s2576_s4 + $0x60] sm:$0xff] %vm1012_vm5, %v694_v3  ;;  %v1953_v8 = vpop.f32.mrb[25].mxu0  ;;  %1063 = vst.msk [vmem:[%s2576_s4 + $0x190] sm:$0xff] %vm1012_vm5, %v884_v4  ;;  %v2067_v9 = vpop.f32.mrb[25].mxu1 }
 0x117   : > { %1563 = vst.msk [vmem:[%s2576_s4 + $0x48] sm:$0xff] %vm1012_vm5, %v1487_v63  ;;  %1601 = vst.msk [vmem:[%s2576_s4 + $0x178] sm:$0xff] %vm1012_vm5, %v1525_v0  ;;  %v1413_v5 = vadd.f32 %v2589_v27, %v1331_v1  ;;  %v1451_v7 = vadd.f32 %v2589_v27, %v1369_v2 }
 0x119   : > { %v1488_v10 = vmax.f32 %v1413_v5, 0.0  ;;  %v1526_v11 = vmax.f32 %v1451_v7, 0.0  ;;  %v699_v14 = vpop.f32.mrb[26].mxu0  ;;  %v889_v15 = vpop.f32.mrb[26].mxu1 }
 0x11a   : > { %v1332_v12 = vld [vmem:[%s2576_s4 + $0x58] sm:$0xff]  ;;  %v1370_v13 = vld [vmem:[%s2576_s4 + $0x188] sm:$0xff]  ;;  %1026 = vst.msk [vmem:[%s2576_s4 + $0x68] sm:$0xff] %vm1012_vm5, %v699_v14  ;;  %v1956_v18 = vpop.f32.mrb[27].mxu0  ;;  %1064 = vst.msk [vmem:[%s2576_s4 + $0x198] sm:$0xff] %vm1012_vm5, %v889_v15  ;;  %v2070_v19 = vpop.f32.mrb[27].mxu1 }
 0x11b   : > { %1564 = vst.msk [vmem:[%s2576_s4 + $0x50] sm:$0xff] %vm1012_vm5, %v1488_v10  ;;  %1602 = vst.msk [vmem:[%s2576_s4 + $0x180] sm:$0xff] %vm1012_vm5, %v1526_v11  ;;  %v1414_v16 = vadd.f32 %v2589_v27, %v1332_v12  ;;  %v1452_v17 = vadd.f32 %v2589_v27, %v1370_v13 }
 0x11d   : > { %v1489_v20 = vmax.f32 %v1414_v16, 0.0  ;;  %v1527_v21 = vmax.f32 %v1452_v17, 0.0  ;;  %v1333_v6 = vld [vmem:[%s2576_s4 + $0x60] sm:$0xff]  ;;  %v1371_v22 = vld [vmem:[%s2576_s4 + $0x190] sm:$0xff]  ;;  %v704_v23 = vpop.f32.mrb[28].mxu0  ;;  %v894_v24 = vpop.f32.mrb[28].mxu1 }
 0x11e   : > { %v1415_v25 = vadd.f32 %v2589_v27, %v1333_v6  ;;  %v1453_v26 = vadd.f32 %v2589_v27, %v1371_v22  ;;  %1027 = vst.msk [vmem:[%s2576_s4 + $0x70] sm:$0xff] %vm1012_vm5, %v704_v23  ;;  %v1959_v28 = vpop.f32.mrb[29].mxu0  ;;  %1065 = vst.msk [vmem:[%s2576_s4 + $0x1a0] sm:$0xff] %vm1012_vm5, %v894_v24  ;;  %v2073_v29 = vpop.f32.mrb[29].mxu1 }
 0x11f   : > { %1565 = vst.msk [vmem:[%s2576_s4 + $0x58] sm:$0xff] %vm1012_vm5, %v1489_v20  ;;  %1603 = vst.msk [vmem:[%s2576_s4 + $0x188] sm:$0xff] %vm1012_vm5, %v1527_v21 }
 0x120   : > { %v1490_v30 = vmax.f32 %v1415_v25, 0.0  ;;  %v1528_v31 = vmax.f32 %v1453_v26, 0.0 }
 0x121   : > { %v1334_v32 = vld [vmem:[%s2576_s4 + $0x68] sm:$0xff]  ;;  %v1372_v33 = vld [vmem:[%s2576_s4 + $0x198] sm:$0xff]  ;;  %v709_v34 = vpop.f32.mrb[30].mxu0  ;;  %v899_v35 = vpop.f32.mrb[30].mxu1 }
 0x122   : > { %1566 = vst.msk [vmem:[%s2576_s4 + $0x60] sm:$0xff] %vm1012_vm5, %v1490_v30  ;;  %1604 = vst.msk [vmem:[%s2576_s4 + $0x190] sm:$0xff] %vm1012_vm5, %v1528_v31  ;;  %v1416_v36 = vadd.f32 %v2589_v27, %v1334_v32  ;;  %v1454_v37 = vadd.f32 %v2589_v27, %v1372_v33  ;;  %v1962_v38 = vpop.f32.mrb[31].mxu0  ;;  %v2076_v39 = vpop.f32.mrb[31].mxu1 }
 0x123   : > { %1028 = vst.msk [vmem:[%s2576_s4 + $0x78] sm:$0xff] %vm1012_vm5, %v709_v34  ;;  %1066 = vst.msk [vmem:[%s2576_s4 + $0x1a8] sm:$0xff] %vm1012_vm5, %v899_v35 }
 0x124   : > { %v1491_v40 = vmax.f32 %v1416_v36, 0.0  ;;  %v1529_v41 = vmax.f32 %v1454_v37, 0.0 }
 0x125   : > { %v1335_v42 = vld [vmem:[%s2576_s4 + $0x70] sm:$0xff]  ;;  %v1373_v43 = vld [vmem:[%s2576_s4 + $0x1a0] sm:$0xff]  ;;  %v714_v44 = vpop.f32.mrb[32].mxu0  ;;  %v904_v45 = vpop.f32.mrb[32].mxu1 }
 0x126   : > { %1567 = vst.msk [vmem:[%s2576_s4 + $0x68] sm:$0xff] %vm1012_vm5, %v1491_v40  ;;  %1605 = vst.msk [vmem:[%s2576_s4 + $0x198] sm:$0xff] %vm1012_vm5, %v1529_v41  ;;  %v1417_v46 = vadd.f32 %v2589_v27, %v1335_v42  ;;  %v1455_v47 = vadd.f32 %v2589_v27, %v1373_v43  ;;  %v1965_v48 = vpop.f32.mrb[33].mxu0  ;;  %v2079_v49 = vpop.f32.mrb[33].mxu1 }
 0x127   : > { %1029 = vst.msk [vmem:[%s2576_s4 + $0x80] sm:$0xff] %vm1012_vm5, %v714_v44  ;;  %1067 = vst.msk [vmem:[%s2576_s4 + $0x1b0] sm:$0xff] %vm1012_vm5, %v904_v45 }
 0x128   : > { %v1492_v50 = vmax.f32 %v1417_v46, 0.0  ;;  %v1530_v51 = vmax.f32 %v1455_v47, 0.0 }
 0x129   : > { %v719_v54 = vpop.f32.mrb[34].mxu0  ;;  %v909_v55 = vpop.f32.mrb[34].mxu1 }
 0x12a   : > { %v1336_v52 = vld [vmem:[%s2576_s4 + $0x78] sm:$0xff]  ;;  %v1374_v53 = vld [vmem:[%s2576_s4 + $0x1a8] sm:$0xff]  ;;  %1568 = vst.msk [vmem:[%s2576_s4 + $0x70] sm:$0xff] %vm1012_vm5, %v1492_v50  ;;  %1606 = vst.msk [vmem:[%s2576_s4 + $0x1a0] sm:$0xff] %vm1012_vm5, %v1530_v51  ;;  %v1968_v58 = vpop.f32.mrb[35].mxu0  ;;  %v2082_v59 = vpop.f32.mrb[35].mxu1 }
 0x12b   : > { %v1418_v56 = vadd.f32 %v2589_v27, %v1336_v52  ;;  %v1456_v57 = vadd.f32 %v2589_v27, %v1374_v53  ;;  %1030 = vst.msk [vmem:[%s2576_s4 + $0x88] sm:$0xff] %vm1012_vm5, %v719_v54  ;;  %1068 = vst.msk [vmem:[%s2576_s4 + $0x1b8] sm:$0xff] %vm1012_vm5, %v909_v55 }
 0x12d   : > { %v1493_v60 = vmax.f32 %v1418_v56, 0.0  ;;  %v1531_v61 = vmax.f32 %v1456_v57, 0.0  ;;  %v724_v0 = vpop.f32.mrb[36].mxu0  ;;  %v914_v1 = vpop.f32.mrb[36].mxu1 }
 0x12e   : > { %v1337_v62 = vld [vmem:[%s2576_s4 + $0x80] sm:$0xff]  ;;  %v1375_v63 = vld [vmem:[%s2576_s4 + $0x1b0] sm:$0xff]  ;;  %1031 = vst.msk [vmem:[%s2576_s4 + $0x90] sm:$0xff] %vm1012_vm5, %v724_v0  ;;  %v1971_v4 = vpop.f32.mrb[37].mxu0  ;;  %1069 = vst.msk [vmem:[%s2576_s4 + $0x1c0] sm:$0xff] %vm1012_vm5, %v914_v1  ;;  %v2085_v5 = vpop.f32.mrb[37].mxu1 }
 0x12f   : > { %1569 = vst.msk [vmem:[%s2576_s4 + $0x78] sm:$0xff] %vm1012_vm5, %v1493_v60  ;;  %1607 = vst.msk [vmem:[%s2576_s4 + $0x1a8] sm:$0xff] %vm1012_vm5, %v1531_v61  ;;  %v1419_v2 = vadd.f32 %v2589_v27, %v1337_v62  ;;  %v1457_v3 = vadd.f32 %v2589_v27, %v1375_v63 }
 0x131   : > { %v1494_v7 = vmax.f32 %v1419_v2, 0.0  ;;  %v1532_v8 = vmax.f32 %v1457_v3, 0.0  ;;  %v729_v11 = vpop.f32.mrb[38].mxu0  ;;  %v919_v12 = vpop.f32.mrb[38].mxu1 }
 0x132   : > { %v1338_v9 = vld [vmem:[%s2576_s4 + $0x88] sm:$0xff]  ;;  %v1376_v10 = vld [vmem:[%s2576_s4 + $0x1b8] sm:$0xff]  ;;  %1032 = vst.msk [vmem:[%s2576_s4 + $0x98] sm:$0xff] %vm1012_vm5, %v729_v11  ;;  %v1974_v15 = vpop.f32.mrb[39].mxu0  ;;  %1070 = vst.msk [vmem:[%s2576_s4 + $0x1c8] sm:$0xff] %vm1012_vm5, %v919_v12  ;;  %v2088_v16 = vpop.f32.mrb[39].mxu1 }
 0x133   : > { %1570 = vst.msk [vmem:[%s2576_s4 + $0x80] sm:$0xff] %vm1012_vm5, %v1494_v7  ;;  %1608 = vst.msk [vmem:[%s2576_s4 + $0x1b0] sm:$0xff] %vm1012_vm5, %v1532_v8  ;;  %v1420_v13 = vadd.f32 %v2589_v27, %v1338_v9  ;;  %v1458_v14 = vadd.f32 %v2589_v27, %v1376_v10 }
 0x135   : > { %v1495_v17 = vmax.f32 %v1420_v13, 0.0  ;;  %v1533_v18 = vmax.f32 %v1458_v14, 0.0  ;;  %v1339_v19 = vld [vmem:[%s2576_s4 + $0x90] sm:$0xff]  ;;  %v1377_v20 = vld [vmem:[%s2576_s4 + $0x1c0] sm:$0xff]  ;;  %v734_v21 = vpop.f32.mrb[40].mxu0  ;;  %v924_v6 = vpop.f32.mrb[40].mxu1 }
 0x136   : > { %v1421_v22 = vadd.f32 %v2589_v27, %v1339_v19  ;;  %v1459_v23 = vadd.f32 %v2589_v27, %v1377_v20  ;;  %1033 = vst.msk [vmem:[%s2576_s4 + $0xa0] sm:$0xff] %vm1012_vm5, %v734_v21  ;;  %v1977_v24 = vpop.f32.mrb[41].mxu0  ;;  %1071 = vst.msk [vmem:[%s2576_s4 + $0x1d0] sm:$0xff] %vm1012_vm5, %v924_v6  ;;  %v2091_v25 = vpop.f32.mrb[41].mxu1 }
 0x137   : > { %1571 = vst.msk [vmem:[%s2576_s4 + $0x88] sm:$0xff] %vm1012_vm5, %v1495_v17  ;;  %1609 = vst.msk [vmem:[%s2576_s4 + $0x1b8] sm:$0xff] %vm1012_vm5, %v1533_v18 }
 0x138   : > { %v1496_v26 = vmax.f32 %v1421_v22, 0.0  ;;  %v1534_v28 = vmax.f32 %v1459_v23, 0.0 }
 0x139   : > { %v1340_v29 = vld [vmem:[%s2576_s4 + $0x98] sm:$0xff]  ;;  %v1378_v30 = vld [vmem:[%s2576_s4 + $0x1c8] sm:$0xff]  ;;  %v739_v31 = vpop.f32.mrb[42].mxu0  ;;  %v929_v32 = vpop.f32.mrb[42].mxu1 }
 0x13a   : > { %1572 = vst.msk [vmem:[%s2576_s4 + $0x90] sm:$0xff] %vm1012_vm5, %v1496_v26  ;;  %1610 = vst.msk [vmem:[%s2576_s4 + $0x1c0] sm:$0xff] %vm1012_vm5, %v1534_v28  ;;  %v1422_v33 = vadd.f32 %v2589_v27, %v1340_v29  ;;  %v1460_v34 = vadd.f32 %v2589_v27, %v1378_v30  ;;  %v1980_v35 = vpop.f32.mrb[43].mxu0  ;;  %v2094_v36 = vpop.f32.mrb[43].mxu1 }
 0x13b   : > { %1034 = vst.msk [vmem:[%s2576_s4 + $0xa8] sm:$0xff] %vm1012_vm5, %v739_v31  ;;  %1072 = vst.msk [vmem:[%s2576_s4 + $0x1d8] sm:$0xff] %vm1012_vm5, %v929_v32 }
 0x13c   : > { %v1497_v37 = vmax.f32 %v1422_v33, 0.0  ;;  %v1535_v38 = vmax.f32 %v1460_v34, 0.0 }
 0x13d   : > { %v1341_v39 = vld [vmem:[%s2576_s4 + $0xa0] sm:$0xff]  ;;  %v1379_v40 = vld [vmem:[%s2576_s4 + $0x1d0] sm:$0xff]  ;;  %v744_v41 = vpop.f32.mrb[44].mxu0  ;;  %v934_v42 = vpop.f32.mrb[44].mxu1 }
 0x13e   : > { %1573 = vst.msk [vmem:[%s2576_s4 + $0x98] sm:$0xff] %vm1012_vm5, %v1497_v37  ;;  %1611 = vst.msk [vmem:[%s2576_s4 + $0x1c8] sm:$0xff] %vm1012_vm5, %v1535_v38  ;;  %v1423_v43 = vadd.f32 %v2589_v27, %v1341_v39  ;;  %v1461_v44 = vadd.f32 %v2589_v27, %v1379_v40  ;;  %v1983_v45 = vpop.f32.mrb[45].mxu0  ;;  %v2097_v46 = vpop.f32.mrb[45].mxu1 }
 0x13f   : > { %1035 = vst.msk [vmem:[%s2576_s4 + $0xb0] sm:$0xff] %vm1012_vm5, %v744_v41  ;;  %1073 = vst.msk [vmem:[%s2576_s4 + $0x1e0] sm:$0xff] %vm1012_vm5, %v934_v42 }
 0x140   : > { %v1498_v47 = vmax.f32 %v1423_v43, 0.0  ;;  %v1536_v48 = vmax.f32 %v1461_v44, 0.0 }
 0x141   : > { %v749_v51 = vpop.f32.mrb[46].mxu0  ;;  %v939_v52 = vpop.f32.mrb[46].mxu1 }
 0x142   : > { %v1342_v49 = vld [vmem:[%s2576_s4 + $0xa8] sm:$0xff]  ;;  %v1380_v50 = vld [vmem:[%s2576_s4 + $0x1d8] sm:$0xff]  ;;  %1574 = vst.msk [vmem:[%s2576_s4 + $0xa0] sm:$0xff] %vm1012_vm5, %v1498_v47  ;;  %1612 = vst.msk [vmem:[%s2576_s4 + $0x1d0] sm:$0xff] %vm1012_vm5, %v1536_v48  ;;  %v1986_v55 = vpop.f32.mrb[47].mxu0  ;;  %v2100_v56 = vpop.f32.mrb[47].mxu1 }
 0x143   : > { %v1424_v53 = vadd.f32 %v2589_v27, %v1342_v49  ;;  %v1462_v54 = vadd.f32 %v2589_v27, %v1380_v50  ;;  %1036 = vst.msk [vmem:[%s2576_s4 + $0xb8] sm:$0xff] %vm1012_vm5, %v749_v51  ;;  %1074 = vst.msk [vmem:[%s2576_s4 + $0x1e8] sm:$0xff] %vm1012_vm5, %v939_v52 }
 0x145   : > { %v1499_v57 = vmax.f32 %v1424_v53, 0.0  ;;  %v1537_v58 = vmax.f32 %v1462_v54, 0.0  ;;  %v754_v61 = vpop.f32.mrb[48].mxu0  ;;  %v944_v62 = vpop.f32.mrb[48].mxu1 }
 0x146   : > { %v1343_v59 = vld [vmem:[%s2576_s4 + $0xb0] sm:$0xff]  ;;  %v1381_v60 = vld [vmem:[%s2576_s4 + $0x1e0] sm:$0xff]  ;;  %1037 = vst.msk [vmem:[%s2576_s4 + $0xc0] sm:$0xff] %vm1012_vm5, %v754_v61  ;;  %v1989_v1 = vpop.f32.mrb[49].mxu0  ;;  %1075 = vst.msk [vmem:[%s2576_s4 + $0x1f0] sm:$0xff] %vm1012_vm5, %v944_v62  ;;  %v2103_v2 = vpop.f32.mrb[49].mxu1 }
 0x147   : > { %1575 = vst.msk [vmem:[%s2576_s4 + $0xa8] sm:$0xff] %vm1012_vm5, %v1499_v57  ;;  %1613 = vst.msk [vmem:[%s2576_s4 + $0x1d8] sm:$0xff] %vm1012_vm5, %v1537_v58  ;;  %v1425_v63 = vadd.f32 %v2589_v27, %v1343_v59  ;;  %v1463_v0 = vadd.f32 %v2589_v27, %v1381_v60 }
 0x149   : > { %v1500_v3 = vmax.f32 %v1425_v63, 0.0  ;;  %v1538_v4 = vmax.f32 %v1463_v0, 0.0  ;;  %v759_v8 = vpop.f32.mrb[50].mxu0  ;;  %v949_v9 = vpop.f32.mrb[50].mxu1 }
 0x14a   : > { %v1344_v5 = vld [vmem:[%s2576_s4 + $0xb8] sm:$0xff]  ;;  %v1382_v7 = vld [vmem:[%s2576_s4 + $0x1e8] sm:$0xff]  ;;  %1038 = vst.msk [vmem:[%s2576_s4 + $0xc8] sm:$0xff] %vm1012_vm5, %v759_v8  ;;  %v1992_v12 = vpop.f32.mrb[51].mxu0  ;;  %1076 = vst.msk [vmem:[%s2576_s4 + $0x1f8] sm:$0xff] %vm1012_vm5, %v949_v9  ;;  %v2106_v13 = vpop.f32.mrb[51].mxu1 }
 0x14b   : > { %1576 = vst.msk [vmem:[%s2576_s4 + $0xb0] sm:$0xff] %vm1012_vm5, %v1500_v3  ;;  %1614 = vst.msk [vmem:[%s2576_s4 + $0x1e0] sm:$0xff] %vm1012_vm5, %v1538_v4  ;;  %v1426_v10 = vadd.f32 %v2589_v27, %v1344_v5  ;;  %v1464_v11 = vadd.f32 %v2589_v27, %v1382_v7 }
 0x14d   : > { %v1501_v14 = vmax.f32 %v1426_v10, 0.0  ;;  %v1539_v15 = vmax.f32 %v1464_v11, 0.0  ;;  %v1345_v16 = vld [vmem:[%s2576_s4 + $0xc0] sm:$0xff]  ;;  %v1383_v17 = vld [vmem:[%s2576_s4 + $0x1f0] sm:$0xff]  ;;  %v764_v18 = vpop.f32.mrb[52].mxu0  ;;  %v954_v19 = vpop.f32.mrb[52].mxu1 }
 0x14e   : > { %v1427_v20 = vadd.f32 %v2589_v27, %v1345_v16  ;;  %v1465_v21 = vadd.f32 %v2589_v27, %v1383_v17  ;;  %1039 = vst.msk [vmem:[%s2576_s4 + $0xd0] sm:$0xff] %vm1012_vm5, %v764_v18  ;;  %v1995_v6 = vpop.f32.mrb[53].mxu0  ;;  %1077 = vst.msk [vmem:[%s2576_s4 + $0x200] sm:$0xff] %vm1012_vm5, %v954_v19  ;;  %v2109_v22 = vpop.f32.mrb[53].mxu1 }
 0x14f   : > { %1577 = vst.msk [vmem:[%s2576_s4 + $0xb8] sm:$0xff] %vm1012_vm5, %v1501_v14  ;;  %1615 = vst.msk [vmem:[%s2576_s4 + $0x1e8] sm:$0xff] %vm1012_vm5, %v1539_v15 }
 0x150   : > { %v1502_v23 = vmax.f32 %v1427_v20, 0.0  ;;  %v1540_v24 = vmax.f32 %v1465_v21, 0.0 }
 0x151   : > { %v1346_v25 = vld [vmem:[%s2576_s4 + $0xc8] sm:$0xff]  ;;  %v1384_v26 = vld [vmem:[%s2576_s4 + $0x1f8] sm:$0xff]  ;;  %v769_v28 = vpop.f32.mrb[54].mxu0  ;;  %v959_v29 = vpop.f32.mrb[54].mxu1 }
 0x152   : > { %1578 = vst.msk [vmem:[%s2576_s4 + $0xc0] sm:$0xff] %vm1012_vm5, %v1502_v23  ;;  %1616 = vst.msk [vmem:[%s2576_s4 + $0x1f0] sm:$0xff] %vm1012_vm5, %v1540_v24  ;;  %v1428_v30 = vadd.f32 %v2589_v27, %v1346_v25  ;;  %v1466_v31 = vadd.f32 %v2589_v27, %v1384_v26  ;;  %v1998_v32 = vpop.f32.mrb[55].mxu0  ;;  %v2112_v33 = vpop.f32.mrb[55].mxu1 }
 0x153   : > { %1040 = vst.msk [vmem:[%s2576_s4 + $0xd8] sm:$0xff] %vm1012_vm5, %v769_v28  ;;  %1078 = vst.msk [vmem:[%s2576_s4 + $0x208] sm:$0xff] %vm1012_vm5, %v959_v29 }
 0x154   : > { %v1503_v34 = vmax.f32 %v1428_v30, 0.0  ;;  %v1541_v35 = vmax.f32 %v1466_v31, 0.0 }
 0x155   : > { %v1347_v36 = vld [vmem:[%s2576_s4 + $0xd0] sm:$0xff]  ;;  %v1385_v37 = vld [vmem:[%s2576_s4 + $0x200] sm:$0xff]  ;;  %v774_v38 = vpop.f32.mrb[56].mxu0  ;;  %v964_v39 = vpop.f32.mrb[56].mxu1 }
 0x156   : > { %1579 = vst.msk [vmem:[%s2576_s4 + $0xc8] sm:$0xff] %vm1012_vm5, %v1503_v34  ;;  %1617 = vst.msk [vmem:[%s2576_s4 + $0x1f8] sm:$0xff] %vm1012_vm5, %v1541_v35  ;;  %v1429_v40 = vadd.f32 %v2589_v27, %v1347_v36  ;;  %v1467_v41 = vadd.f32 %v2589_v27, %v1385_v37  ;;  %v2001_v42 = vpop.f32.mrb[57].mxu0  ;;  %v2115_v43 = vpop.f32.mrb[57].mxu1 }
 0x157   : > { %1041 = vst.msk [vmem:[%s2576_s4 + $0xe0] sm:$0xff] %vm1012_vm5, %v774_v38  ;;  %1079 = vst.msk [vmem:[%s2576_s4 + $0x210] sm:$0xff] %vm1012_vm5, %v964_v39 }
 0x158   : > { %v1504_v44 = vmax.f32 %v1429_v40, 0.0  ;;  %v1542_v45 = vmax.f32 %v1467_v41, 0.0 }
 0x159   : > { %v779_v48 = vpop.f32.mrb[58].mxu0  ;;  %v969_v49 = vpop.f32.mrb[58].mxu1 }
 0x15a   : > { %v1348_v46 = vld [vmem:[%s2576_s4 + $0xd8] sm:$0xff]  ;;  %v1386_v47 = vld [vmem:[%s2576_s4 + $0x208] sm:$0xff]  ;;  %1580 = vst.msk [vmem:[%s2576_s4 + $0xd0] sm:$0xff] %vm1012_vm5, %v1504_v44  ;;  %1618 = vst.msk [vmem:[%s2576_s4 + $0x200] sm:$0xff] %vm1012_vm5, %v1542_v45  ;;  %v2004_v52 = vpop.f32.mrb[59].mxu0  ;;  %v2118_v53 = vpop.f32.mrb[59].mxu1 }
 0x15b   : > { %v1430_v50 = vadd.f32 %v2589_v27, %v1348_v46  ;;  %v1468_v51 = vadd.f32 %v2589_v27, %v1386_v47  ;;  %1042 = vst.msk [vmem:[%s2576_s4 + $0xe8] sm:$0xff] %vm1012_vm5, %v779_v48  ;;  %1080 = vst.msk [vmem:[%s2576_s4 + $0x218] sm:$0xff] %vm1012_vm5, %v969_v49 }
 0x15d   : > { %v1505_v54 = vmax.f32 %v1430_v50, 0.0  ;;  %v1543_v55 = vmax.f32 %v1468_v51, 0.0  ;;  %v784_v58 = vpop.f32.mrb[60].mxu0  ;;  %v974_v59 = vpop.f32.mrb[60].mxu1 }
 0x15e   : > { %v1349_v56 = vld [vmem:[%s2576_s4 + $0xe0] sm:$0xff]  ;;  %v1387_v57 = vld [vmem:[%s2576_s4 + $0x210] sm:$0xff]  ;;  %1043 = vst.msk [vmem:[%s2576_s4 + $0xf0] sm:$0xff] %vm1012_vm5, %v784_v58  ;;  %v2007_v62 = vpop.f32.mrb[61].mxu0  ;;  %1081 = vst.msk [vmem:[%s2576_s4 + $0x220] sm:$0xff] %vm1012_vm5, %v974_v59  ;;  %v2121_v63 = vpop.f32.mrb[61].mxu1 }
 0x15f   : > { %1581 = vst.msk [vmem:[%s2576_s4 + $0xd8] sm:$0xff] %vm1012_vm5, %v1505_v54  ;;  %1619 = vst.msk [vmem:[%s2576_s4 + $0x208] sm:$0xff] %vm1012_vm5, %v1543_v55  ;;  %v1431_v60 = vadd.f32 %v2589_v27, %v1349_v56  ;;  %v1469_v61 = vadd.f32 %v2589_v27, %v1387_v57 }
 0x161   : > { %v1506_v0 = vmax.f32 %v1431_v60, 0.0  ;;  %v1544_v1 = vmax.f32 %v1469_v61, 0.0  ;;  %v789_v4 = vpop.f32.mrb[62].mxu0  ;;  %v979_v5 = vpop.f32.mrb[62].mxu1 }
 0x162   : > { %v1350_v2 = vld [vmem:[%s2576_s4 + $0xe8] sm:$0xff]  ;;  %v1388_v3 = vld [vmem:[%s2576_s4 + $0x218] sm:$0xff]  ;;  %1044 = vst.msk [vmem:[%s2576_s4 + $0xf8] sm:$0xff] %vm1012_vm5, %v789_v4  ;;  %v2010_v9 = vpop.f32.mrb[63].mxu0  ;;  %1082 = vst.msk [vmem:[%s2576_s4 + $0x228] sm:$0xff] %vm1012_vm5, %v979_v5  ;;  %v2124_v10 = vpop.f32.mrb[63].mxu1 }
 0x163   : > { %1582 = vst.msk [vmem:[%s2576_s4 + $0xe0] sm:$0xff] %vm1012_vm5, %v1506_v0  ;;  %1620 = vst.msk [vmem:[%s2576_s4 + $0x210] sm:$0xff] %vm1012_vm5, %v1544_v1  ;;  %v1432_v7 = vadd.f32 %v2589_v27, %v1350_v2  ;;  %v1470_v8 = vadd.f32 %v2589_v27, %v1388_v3 }
 0x165   : > { %v1507_v11 = vmax.f32 %v1432_v7, 0.0  ;;  %v1545_v12 = vmax.f32 %v1470_v8, 0.0  ;;  %v1351_v13 = vld [vmem:[%s2576_s4 + $0xf0] sm:$0xff]  ;;  %v1389_v14 = vld [vmem:[%s2576_s4 + $0x220] sm:$0xff]  ;;  %v794_v15 = vpop.f32.mrb[64].mxu0  ;;  %v984_v16 = vpop.f32.mrb[64].mxu1 }
 0x166   : > { %v1433_v17 = vadd.f32 %v2589_v27, %v1351_v13  ;;  %v1471_v18 = vadd.f32 %v2589_v27, %v1389_v14  ;;  %1045 = vst.msk [vmem:[%s2576_s4 + $0x100] sm:$0xff] %vm1012_vm5, %v794_v15  ;;  %v2013_v19 = vpop.f32.mrb[65].mxu0  ;;  %1083 = vst.msk [vmem:[%s2576_s4 + $0x230] sm:$0xff] %vm1012_vm5, %v984_v16  ;;  %v2127_v20 = vpop.f32.mrb[65].mxu1 }
 0x167   : > { %1583 = vst.msk [vmem:[%s2576_s4 + $0xe8] sm:$0xff] %vm1012_vm5, %v1507_v11  ;;  %1621 = vst.msk [vmem:[%s2576_s4 + $0x218] sm:$0xff] %vm1012_vm5, %v1545_v12 }
 0x168   : > { %v1508_v21 = vmax.f32 %v1433_v17, 0.0  ;;  %v1546_v6 = vmax.f32 %v1471_v18, 0.0 }
 0x169   : > { %v1352_v22 = vld [vmem:[%s2576_s4 + $0xf8] sm:$0xff]  ;;  %v1390_v23 = vld [vmem:[%s2576_s4 + $0x228] sm:$0xff]  ;;  %v799_v24 = vpop.f32.mrb[66].mxu0  ;;  %v989_v25 = vpop.f32.mrb[66].mxu1 }
 0x16a   : > { %1584 = vst.msk [vmem:[%s2576_s4 + $0xf0] sm:$0xff] %vm1012_vm5, %v1508_v21  ;;  %1622 = vst.msk [vmem:[%s2576_s4 + $0x220] sm:$0xff] %vm1012_vm5, %v1546_v6  ;;  %v1434_v26 = vadd.f32 %v2589_v27, %v1352_v22  ;;  %v1472_v28 = vadd.f32 %v2589_v27, %v1390_v23  ;;  %v2016_v29 = vpop.f32.mrb[67].mxu0  ;;  %v2130_v30 = vpop.f32.mrb[67].mxu1 }
 0x16b   : > { %1046 = vst.msk [vmem:[%s2576_s4 + $0x108] sm:$0xff] %vm1012_vm5, %v799_v24  ;;  %1084 = vst.msk [vmem:[%s2576_s4 + $0x238] sm:$0xff] %vm1012_vm5, %v989_v25 }
 0x16c   : > { %v1509_v31 = vmax.f32 %v1434_v26, 0.0  ;;  %v1547_v32 = vmax.f32 %v1472_v28, 0.0 }
 0x16d   : > { %v1353_v33 = vld [vmem:[%s2576_s4 + $0x100] sm:$0xff]  ;;  %v1391_v34 = vld [vmem:[%s2576_s4 + $0x230] sm:$0xff]  ;;  %v804_v35 = vpop.f32.mrb[68].mxu0  ;;  %v994_v36 = vpop.f32.mrb[68].mxu1 }
 0x16e   : > { %1585 = vst.msk [vmem:[%s2576_s4 + $0xf8] sm:$0xff] %vm1012_vm5, %v1509_v31  ;;  %1623 = vst.msk [vmem:[%s2576_s4 + $0x228] sm:$0xff] %vm1012_vm5, %v1547_v32  ;;  %v1435_v37 = vadd.f32 %v2589_v27, %v1353_v33  ;;  %v1473_v38 = vadd.f32 %v2589_v27, %v1391_v34  ;;  %v2019_v39 = vpop.f32.mrb[69].mxu0  ;;  %v2133_v40 = vpop.f32.mrb[69].mxu1 }
 0x16f   : > { %1047 = vst.msk [vmem:[%s2576_s4 + $0x110] sm:$0xff] %vm1012_vm5, %v804_v35  ;;  %1085 = vst.msk [vmem:[%s2576_s4 + $0x240] sm:$0xff] %vm1012_vm5, %v994_v36 }
 0x170   : > { %v1510_v41 = vmax.f32 %v1435_v37, 0.0  ;;  %v1548_v42 = vmax.f32 %v1473_v38, 0.0 }
 0x171   : > { %v809_v45 = vpop.f32.mrb[70].mxu0  ;;  %v999_v46 = vpop.f32.mrb[70].mxu1 }
 0x172   : > { %v1354_v43 = vld [vmem:[%s2576_s4 + $0x108] sm:$0xff]  ;;  %v1392_v44 = vld [vmem:[%s2576_s4 + $0x238] sm:$0xff]  ;;  %1586 = vst.msk [vmem:[%s2576_s4 + $0x100] sm:$0xff] %vm1012_vm5, %v1510_v41  ;;  %1624 = vst.msk [vmem:[%s2576_s4 + $0x230] sm:$0xff] %vm1012_vm5, %v1548_v42  ;;  %v2022_v49 = vpop.f32.mrb[71].mxu0  ;;  %v2136_v50 = vpop.f32.mrb[71].mxu1 }
 0x173   : > { %v1436_v47 = vadd.f32 %v2589_v27, %v1354_v43  ;;  %v1474_v48 = vadd.f32 %v2589_v27, %v1392_v44  ;;  %1048 = vst.msk [vmem:[%s2576_s4 + $0x118] sm:$0xff] %vm1012_vm5, %v809_v45  ;;  %1086 = vst.msk [vmem:[%s2576_s4 + $0x248] sm:$0xff] %vm1012_vm5, %v999_v46 }
 0x175   : > { %v1511_v51 = vmax.f32 %v1436_v47, 0.0  ;;  %v1549_v52 = vmax.f32 %v1474_v48, 0.0  ;;  %v814_v55 = vpop.f32.mrb[72].mxu0  ;;  %v1004_v56 = vpop.f32.mrb[72].mxu1 }
 0x176   : > { %v1355_v53 = vld [vmem:[%s2576_s4 + $0x110] sm:$0xff]  ;;  %v1393_v54 = vld [vmem:[%s2576_s4 + $0x240] sm:$0xff]  ;;  %1049 = vst.msk [vmem:[%s2576_s4 + $0x120] sm:$0xff] %vm1012_vm5, %v814_v55  ;;  %v2025_v59 = vpop.f32.mrb[73].mxu0  ;;  %1087 = vst.msk [vmem:[%s2576_s4 + $0x250] sm:$0xff] %vm1012_vm5, %v1004_v56  ;;  %v2139_v60 = vpop.f32.mrb[73].mxu1 }
 0x177   : > { %1587 = vst.msk [vmem:[%s2576_s4 + $0x108] sm:$0xff] %vm1012_vm5, %v1511_v51  ;;  %1625 = vst.msk [vmem:[%s2576_s4 + $0x238] sm:$0xff] %vm1012_vm5, %v1549_v52  ;;  %v1437_v57 = vadd.f32 %v2589_v27, %v1355_v53  ;;  %v1475_v58 = vadd.f32 %v2589_v27, %v1393_v54 }
 0x179   : > { %v1512_v61 = vmax.f32 %v1437_v57, 0.0  ;;  %v1550_v62 = vmax.f32 %v1475_v58, 0.0  ;;  %v819_v1 = vpop.f32.mrb[74].mxu0 }
 0x17a   : > { %v1356_v63 = vld [vmem:[%s2576_s4 + $0x118] sm:$0xff]  ;;  %v1394_v0 = vld [vmem:[%s2576_s4 + $0x248] sm:$0xff]  ;;  %1050 = vst.msk [vmem:[%s2576_s4 + $0x128] sm:$0xff] %vm1012_vm5, %v819_v1  ;;  %v2028_v4 = vpop.f32.mrb[75].mxu0 }
 0x17b   : > { %1588 = vst.msk [vmem:[%s2576_s4 + $0x110] sm:$0xff] %vm1012_vm5, %v1512_v61  ;;  %1626 = vst.msk [vmem:[%s2576_s4 + $0x240] sm:$0xff] %vm1012_vm5, %v1550_v62  ;;  %v1438_v2 = vadd.f32 %v2589_v27, %v1356_v63  ;;  %v1476_v3 = vadd.f32 %v2589_v27, %v1394_v0 }
 0x17d   : > { %v1513_v5 = vmax.f32 %v1438_v2, 0.0  ;;  %v1551_v7 = vmax.f32 %v1476_v3, 0.0  ;;  %v1357_v8 = vld [vmem:[%s2576_s4 + $0x120] sm:$0xff]  ;;  %v1395_v9 = vld [vmem:[%s2576_s4 + $0x250] sm:$0xff] }
 0x17e   : > { %v1439_v10 = vadd.f32 %v2589_v27, %v1357_v8  ;;  %v1477_v11 = vadd.f32 %v2589_v27, %v1395_v9 }
 0x17f   : > { %1589 = vst.msk [vmem:[%s2576_s4 + $0x118] sm:$0xff] %vm1012_vm5, %v1513_v5  ;;  %1627 = vst.msk [vmem:[%s2576_s4 + $0x248] sm:$0xff] %vm1012_vm5, %v1551_v7 }
 0x180   : > { %v1514_v12 = vmax.f32 %v1439_v10, 0.0  ;;  %v1552_v13 = vmax.f32 %v1477_v11, 0.0 }
 0x181   : > { %v1358_v14 = vld [vmem:[%s2576_s4 + $0x128] sm:$0xff] }
 0x182   : > { %1590 = vst.msk [vmem:[%s2576_s4 + $0x120] sm:$0xff] %vm1012_vm5, %v1514_v12  ;;  %1628 = vst.msk [vmem:[%s2576_s4 + $0x250] sm:$0xff] %vm1012_vm5, %v1552_v13  ;;  %v1440_v15 = vadd.f32 %v2589_v27, %v1358_v14 }
 0x184   : > { %v1515_v16 = vmax.f32 %v1440_v15, 0.0 }
 0x186   : > { %1591 = vst.msk [vmem:[%s2576_s4 + $0x128] sm:$0xff] %vm1012_vm5, %v1515_v16 }
 0x187 PF: > { %s13_s14 = sadd.s32 1, %s2201_s14   ;;  %s3046_s12 = smov %s2197_s13 }
 0x188   : > { %p10_p5 = scmp.ge.s32.totalorder %s13_s14, 5   ;;  %s3047_s13 = smov %s3049_s15 }
 0x18a   :  { %12 = sbr.rel (!%p10_p5) target bundleno = 2 (0x2), region = 80 }

// kernel: encoder_forward.5
= control target key start
LH: loop header
LB: loop body
LE: loop exit
PB: predicated region body
PF: predicated region fallthrough
CT: control target
= control target key end

     0   :  { %s1546_s12 = smov 0   ;;  %s1548_s13 = smov 0   ;;  %s2105_s0 = inlined_call_operand.vmem [shape: f32[1568,144], index: 0, kind: input, shape index: {}]   ;;  %s2106_s1 = inlined_call_operand.vmem [shape: f32[144,32], index: 1, kind: input, shape index: {}]   ;;  %s2107_s2 = inlined_call_operand.vmem [shape: f32[1,32], index: 2, kind: input, shape index: {}]   ;;  %s2108_s3 = inlined_call_operand.vmem [shape: f32[1568,32], index: 3, kind: output, shape index: {}]  }
   0x1   :  { %s1550_s14 = smov 0  }
   0x2 LB: > { %s32_s15 = sadd.s32 1, %s1519_s13  ;;  %p1374_p0 = scmp.ge.s32.totalorder %s1523_s14, 1  ;;  %s1523_s14 = sphi %s1550_s14, %s13_s14   ;;  %s1519_s13 = sphi %s1548_s13, %s2110_s13   ;;  %s1515_s12 = sphi %s1546_s12, %s2109_s12  }
   0x3   : > { %p34_p1 = scmp.ge.s32.totalorder %s32_s15, 4  ;;  %p191_p2 = scmp.lt.s32.totalorder %s1523_s14, 5 }
   0x5   : > { %s2112_s15 = smov (%p34_p1, %s32_s15), 0  ;;  %p192_p3 = pnand %p1374_p0, %p191_p2 }
   0x6   : > { %v365_v0 = vld [vmem:[%s2106_s1] sm:$0xff] (!%p192_p3)  ;;  %v366_v1 = vld [vmem:[%s2106_s1 + $0x8] sm:$0xff] (!%p192_p3)  ;;  %v367_v2 = vld [vmem:[%s2106_s1 + $0x10] sm:$0xff] (!%p192_p3)  ;;  %s234_s22 = smul.u32 (!%p192_p3), 49, %s1515_s12  ;;  %v1525_v3 = vmov (!%p192_p3), 0.0|0.0   ;;  %vm383_vm0 = vcmask (!%p192_p3), 130048  }
   0x7   : > { %195 = sbr.rel (%p192_p3) target bundleno = 365 (0x16d), region = 32  ;;  %1431 = vmatprep.subr.bf16.mxu0 (!%p192_p3), %v1525_v3  ;;  %v1432_v4 = vpack.c.bf16 (!%p192_p3), %v366_v1, %v365_v0  ;;  %1458 = vmatprep.subr.bf16.mxu1 (!%p192_p3), %v1525_v3  ;;  %v368_v5 = vld [vmem:[%s2106_s1 + $0x18] sm:$0xff] (!%p192_p3)  ;;  %v369_v7 = vld [vmem:[%s2106_s1 + $0x20] sm:$0xff] (!%p192_p3)  ;;  %v370_v8 = vld [vmem:[%s2106_s1 + $0x28] sm:$0xff] (!%p192_p3)  ;;  %vm845_vm1 = vcmask (!%p192_p3), 261120  }
   0x8   : > { %p236_p4 = scmp.lt.s32.totalorder (!%p192_p3), %s234_s22, 195  ;;  %v1435_v6 = vpack.c.bf16 (!%p192_p3), %v368_v5, %v367_v2  ;;  %v1438_v9 = vpack.c.bf16 (!%p192_p3), %v370_v8, %v369_v7  ;;  %v371_v10 = vld [vmem:[%s2106_s1 + $0x30] sm:$0xff] (!%p192_p3)  ;;  %v372_v11 = vld [vmem:[%s2106_s1 + $0x38] sm:$0xff] (!%p192_p3)  ;;  %v373_v15 = vld [vmem:[%s2106_s1 + $0x40] sm:$0xff] (!%p192_p3) }
   0x9   : > { %1433 = vmatpush1.bf16.msra.mxu0 (!%p192_p3), %v1432_v4  ;;  %1467 = vmatpush1.bf16.msra.mxu1 (!%p192_p3), %v1432_v4  ;;  %v1441_v14 = vpack.c.bf16 (!%p192_p3), %v372_v11, %v371_v10  ;;  %v374_v16 = vld [vmem:[%s2106_s1 + $0x48] sm:$0xff] (!%p192_p3)  ;;  %v375_v18 = vld [vmem:[%s2106_s1 + $0x50] sm:$0xff] (!%p192_p3)  ;;  %v376_v19 = vld [vmem:[%s2106_s1 + $0x58] sm:$0xff] (!%p192_p3) }
   0xa   : > { %1434 = vmatprep.subr.bf16.mxu0 (!%p192_p3), %v1525_v3  ;;  %1459 = vmatprep.subr.bf16.mxu1 (!%p192_p3), %v1525_v3  ;;  %v1444_v17 = vpack.c.bf16 (!%p192_p3), %v374_v16, %v373_v15  ;;  %v1447_v20 = vpack.c.bf16 (!%p192_p3), %v376_v19, %v375_v18  ;;  %v377_v21 = vld [vmem:[%s2106_s1 + $0x60] sm:$0xff] (!%p192_p3)  ;;  %v378_v22 = vld [vmem:[%s2106_s1 + $0x68] sm:$0xff] (!%p192_p3)  ;;  %v379_v24 = vld [vmem:[%s2106_s1 + $0x70] sm:$0xff] (!%p192_p3) }
   0xb   : > { %v1450_v23 = vpack.c.bf16 (!%p192_p3), %v378_v22, %v377_v21  ;;  %v380_v25 = vld [vmem:[%s2106_s1 + $0x78] sm:$0xff] (!%p192_p3)  ;;  %v381_v27 = vld [vmem:[%s2106_s1 + $0x80] sm:$0xff] (!%p192_p3)  ;;  %v382_v28 = vld [vmem:[%s2106_s1 + $0x88] sm:$0xff] (!%p192_p3) }
   0xc   : > { %v1453_v26 = vpack.c.bf16 (!%p192_p3), %v380_v25, %v379_v24  ;;  %v1456_v29 = vpack.c.bf16 (!%p192_p3), %v382_v28, %v381_v27 }
   0xd   : > { %1436 = vmatpush1.bf16.msra.mxu0 (!%p192_p3), %v1435_v6  ;;  %1468 = vmatpush1.bf16.msra.mxu1 (!%p192_p3), %v1435_v6 }
   0xe   : > { %s2114_s22 = smov (!%p236_p4, %s234_s22), 195  ;;  %1437 = vmatprep.subr.bf16.mxu0 %v1525_v3  ;;  %1460 = vmatprep.subr.bf16.mxu1 %v1525_v3 }
   0xf   : > { %s1430_s29 = sshll.u32 %s2114_s22, 4  ;;  %s1377_s8 = sshll.u32 %s2114_s22, 3 }
  0x10   : > { %s1595_s7 = scalar_lea.vmem %s2105_s0, %s1430_s29  ;;  %s1795_s11 = scalar_lea.vmem %s2108_s3, %s1377_s8 }
  0x11   : > { %v268_v12 = vld [vmem:[%s1595_s7 + $0x8] sm:$0xff]  ;;  %v318_v13 = vld [vmem:[%s1595_s7 + $0x198] sm:$0xff]  ;;  %1439 = vmatpush1.bf16.msra.mxu0 %v1438_v9  ;;  %1469 = vmatpush1.bf16.msra.mxu1 %v1438_v9  ;;  %v267_v30 = vld [vmem:[%s1595_s7] sm:$0xff] }
  0x12   : > { %1378 = vmatprep.mubr.msk.f32.mxu0 %vm383_vm0, %v268_v12  ;;  %1403 = vmatprep.mubr.msk.f32.mxu1 %vm383_vm0, %v318_v13  ;;  %v317_v31 = vld [vmem:[%s1595_s7 + $0x190] sm:$0xff]  ;;  %v270_v32 = vld [vmem:[%s1595_s7 + $0x18] sm:$0xff]  ;;  %v320_v33 = vld [vmem:[%s1595_s7 + $0x1a8] sm:$0xff] }
  0x13   : > { %1440 = vmatprep.subr.bf16.mxu0 %v1525_v3  ;;  %1461 = vmatprep.subr.bf16.mxu1 %v1525_v3  ;;  %v269_v34 = vld [vmem:[%s1595_s7 + $0x10] sm:$0xff]  ;;  %v319_v35 = vld [vmem:[%s1595_s7 + $0x1a0] sm:$0xff]  ;;  %v272_v36 = vld [vmem:[%s1595_s7 + $0x28] sm:$0xff] }
  0x14   : > { %v322_v37 = vld [vmem:[%s1595_s7 + $0x1b8] sm:$0xff]  ;;  %v271_v38 = vld [vmem:[%s1595_s7 + $0x20] sm:$0xff]  ;;  %v321_v39 = vld [vmem:[%s1595_s7 + $0x1b0] sm:$0xff] }
  0x15   : > { %1442 = vmatpush1.bf16.msra.mxu0 %v1441_v14  ;;  %1470 = vmatpush1.bf16.msra.mxu1 %v1441_v14  ;;  %v274_v40 = vld [vmem:[%s1595_s7 + $0x38] sm:$0xff]  ;;  %v324_v41 = vld [vmem:[%s1595_s7 + $0x1c8] sm:$0xff]  ;;  %v273_v42 = vld [vmem:[%s1595_s7 + $0x30] sm:$0xff] }
  0x16   : > { %1443 = vmatprep.subr.bf16.mxu0 %v1525_v3  ;;  %1462 = vmatprep.subr.bf16.mxu1 %v1525_v3  ;;  %v323_v43 = vld [vmem:[%s1595_s7 + $0x1c0] sm:$0xff]  ;;  %v276_v44 = vld [vmem:[%s1595_s7 + $0x48] sm:$0xff]  ;;  %v326_v45 = vld [vmem:[%s1595_s7 + $0x1d8] sm:$0xff] }
  0x17   : > { %v275_v46 = vld [vmem:[%s1595_s7 + $0x40] sm:$0xff]  ;;  %v325_v47 = vld [vmem:[%s1595_s7 + $0x1d0] sm:$0xff]  ;;  %v278_v48 = vld [vmem:[%s1595_s7 + $0x58] sm:$0xff] }
  0x18   : > { %v328_v49 = vld [vmem:[%s1595_s7 + $0x1e8] sm:$0xff]  ;;  %v277_v50 = vld [vmem:[%s1595_s7 + $0x50] sm:$0xff]  ;;  %v327_v51 = vld [vmem:[%s1595_s7 + $0x1e0] sm:$0xff] }
  0x19   : > { %1445 = vmatpush1.bf16.msra.mxu0 %v1444_v17  ;;  %1471 = vmatpush1.bf16.msra.mxu1 %v1444_v17  ;;  %v280_v52 = vld [vmem:[%s1595_s7 + $0x68] sm:$0xff]  ;;  %v330_v53 = vld [vmem:[%s1595_s7 + $0x1f8] sm:$0xff]  ;;  %v279_v54 = vld [vmem:[%s1595_s7 + $0x60] sm:$0xff] }
  0x1a   : > { %1446 = vmatprep.subr.bf16.mxu0 %v1525_v3  ;;  %1463 = vmatprep.subr.bf16.mxu1 %v1525_v3  ;;  %v329_v55 = vld [vmem:[%s1595_s7 + $0x1f0] sm:$0xff]  ;;  %v282_v56 = vld [vmem:[%s1595_s7 + $0x78] sm:$0xff]  ;;  %v332_v57 = vld [vmem:[%s1595_s7 + $0x208] sm:$0xff] }
  0x1b   : > { %v281_v58 = vld [vmem:[%s1595_s7 + $0x70] sm:$0xff]  ;;  %v331_v59 = vld [vmem:[%s1595_s7 + $0x200] sm:$0xff]  ;;  %v284_v60 = vld [vmem:[%s1595_s7 + $0x88] sm:$0xff] }
  0x1c   : > { %v334_v61 = vld [vmem:[%s1595_s7 + $0x218] sm:$0xff]  ;;  %v283_v62 = vld [vmem:[%s1595_s7 + $0x80] sm:$0xff]  ;;  %v333_v63 = vld [vmem:[%s1595_s7 + $0x210] sm:$0xff] }
  0x1d   : > { %1448 = vmatpush1.bf16.msra.mxu0 %v1447_v20  ;;  %1472 = vmatpush1.bf16.msra.mxu1 %v1447_v20  ;;  %v286_v0 = vld [vmem:[%s1595_s7 + $0x98] sm:$0xff]  ;;  %v336_v1 = vld [vmem:[%s1595_s7 + $0x228] sm:$0xff]  ;;  %v285_v2 = vld [vmem:[%s1595_s7 + $0x90] sm:$0xff] }
  0x1e   : > { %1449 = vmatprep.subr.bf16.mxu0 %v1525_v3  ;;  %1464 = vmatprep.subr.bf16.mxu1 %v1525_v3  ;;  %v288_v4 = vld [vmem:[%s1595_s7 + $0xa8] sm:$0xff]  ;;  %v338_v5 = vld [vmem:[%s1595_s7 + $0x238] sm:$0xff]  ;;  %v287_v6 = vld [vmem:[%s1595_s7 + $0xa0] sm:$0xff] }
  0x1f   : > { %v337_v7 = vld [vmem:[%s1595_s7 + $0x230] sm:$0xff]  ;;  %v290_v8 = vld [vmem:[%s1595_s7 + $0xb8] sm:$0xff]  ;;  %v340_v9 = vld [vmem:[%s1595_s7 + $0x248] sm:$0xff] }
  0x20   : > { %v289_v10 = vld [vmem:[%s1595_s7 + $0xb0] sm:$0xff]  ;;  %v339_v11 = vld [vmem:[%s1595_s7 + $0x240] sm:$0xff]  ;;  %v292_v12 = vld [vmem:[%s1595_s7 + $0xc8] sm:$0xff] }
  0x21   : > { %1451 = vmatpush1.bf16.msra.mxu0 %v1450_v23  ;;  %1473 = vmatpush1.bf16.msra.mxu1 %v1450_v23  ;;  %v342_v13 = vld [vmem:[%s1595_s7 + $0x258] sm:$0xff]  ;;  %v291_v14 = vld [vmem:[%s1595_s7 + $0xc0] sm:$0xff]  ;;  %v341_v15 = vld [vmem:[%s1595_s7 + $0x250] sm:$0xff] }
  0x22   : > { %1452 = vmatprep.subr.bf16.mxu0 %v1525_v3  ;;  %1465 = vmatprep.subr.bf16.mxu1 %v1525_v3  ;;  %v294_v16 = vld [vmem:[%s1595_s7 + $0xd8] sm:$0xff]  ;;  %v344_v17 = vld [vmem:[%s1595_s7 + $0x268] sm:$0xff]  ;;  %v293_v18 = vld [vmem:[%s1595_s7 + $0xd0] sm:$0xff] }
  0x23   : > { %v343_v19 = vld [vmem:[%s1595_s7 + $0x260] sm:$0xff]  ;;  %v296_v20 = vld [vmem:[%s1595_s7 + $0xe8] sm:$0xff]  ;;  %v346_v21 = vld [vmem:[%s1595_s7 + $0x278] sm:$0xff] }
  0x24   : > { %v295_v22 = vld [vmem:[%s1595_s7 + $0xe0] sm:$0xff]  ;;  %v345_v23 = vld [vmem:[%s1595_s7 + $0x270] sm:$0xff]  ;;  %v298_v24 = vld [vmem:[%s1595_s7 + $0xf8] sm:$0xff] }
  0x25   : > { %1454 = vmatpush1.bf16.msra.mxu0 %v1453_v26  ;;  %1474 = vmatpush1.bf16.msra.mxu1 %v1453_v26  ;;  %v348_v25 = vld [vmem:[%s1595_s7 + $0x288] sm:$0xff]  ;;  %v297_v26 = vld [vmem:[%s1595_s7 + $0xf0] sm:$0xff]  ;;  %v347_v27 = vld [vmem:[%s1595_s7 + $0x280] sm:$0xff] }
  0x26   : > { %1455 = vmatprep.subr.bf16.mxu0 %v1525_v3  ;;  %1466 = vmatprep.subr.bf16.mxu1 %v1525_v3  ;;  %v335_v3 = vld [vmem:[%s1595_s7 + $0x220] sm:$0xff]  ;;  %v300_v28 = vld [vmem:[%s1595_s7 + $0x108] sm:$0xff] }
  0x29   : > { %1457 = vmatpush1.bf16.msra.mxu0 %v1456_v29  ;;  %1475 = vmatpush1.bf16.msra.mxu1 %v1456_v29  ;;  %v350_v29 = vld [vmem:[%s1595_s7 + $0x298] sm:$0xff] }
  0x2c   : > { %596 = vmatmul.mubr.f32.vlgmr.msra.gmra.mrb[0].mxu0 %v267_v30  ;;  %721 = vmatmul.mubr.f32.vlgmr.msra.gmra.mrb[0].mxu1 %v317_v31  ;;  %v299_v30 = vld [vmem:[%s1595_s7 + $0x100] sm:$0xff]  ;;  %v349_v31 = vld [vmem:[%s1595_s7 + $0x290] sm:$0xff] }
  0x2d   : > { %1379 = vmatprep.mubr.msk.f32.mxu0 %vm383_vm0, %v270_v32  ;;  %1404 = vmatprep.mubr.msk.f32.mxu1 %vm383_vm0, %v320_v33  ;;  %v302_v32 = vld [vmem:[%s1595_s7 + $0x118] sm:$0xff]  ;;  %v352_v33 = vld [vmem:[%s1595_s7 + $0x2a8] sm:$0xff] }
  0x30   : > { %601 = vmatmul.mubr.f32.gmra.mrb[2].mxu0 %v269_v34  ;;  %726 = vmatmul.mubr.f32.gmra.mrb[2].mxu1 %v319_v35  ;;  %v301_v34 = vld [vmem:[%s1595_s7 + $0x110] sm:$0xff]  ;;  %v351_v35 = vld [vmem:[%s1595_s7 + $0x2a0] sm:$0xff] }
  0x31   : > { %1380 = vmatprep.mubr.msk.f32.mxu0 %vm383_vm0, %v272_v36  ;;  %1405 = vmatprep.mubr.msk.f32.mxu1 %vm383_vm0, %v322_v37  ;;  %v304_v36 = vld [vmem:[%s1595_s7 + $0x128] sm:$0xff]  ;;  %v354_v37 = vld [vmem:[%s1595_s7 + $0x2b8] sm:$0xff] }
  0x34   : > { %606 = vmatmul.mubr.f32.gmra.mrb[4].mxu0 %v271_v38  ;;  %731 = vmatmul.mubr.f32.gmra.mrb[4].mxu1 %v321_v39  ;;  %v303_v38 = vld [vmem:[%s1595_s7 + $0x120] sm:$0xff]  ;;  %v353_v39 = vld [vmem:[%s1595_s7 + $0x2b0] sm:$0xff] }
  0x35   : > { %1381 = vmatprep.mubr.msk.f32.mxu0 %vm383_vm0, %v274_v40  ;;  %1406 = vmatprep.mubr.msk.f32.mxu1 %vm383_vm0, %v324_v41  ;;  %v306_v40 = vld [vmem:[%s1595_s7 + $0x138] sm:$0xff]  ;;  %v356_v41 = vld [vmem:[%s1595_s7 + $0x2c8] sm:$0xff] }
  0x38   : > { %611 = vmatmul.mubr.f32.gmra.mrb[6].mxu0 %v273_v42  ;;  %736 = vmatmul.mubr.f32.gmra.mrb[6].mxu1 %v323_v43  ;;  %v305_v42 = vld [vmem:[%s1595_s7 + $0x130] sm:$0xff]  ;;  %v355_v43 = vld [vmem:[%s1595_s7 + $0x2c0] sm:$0xff] }
  0x39   : > { %1382 = vmatprep.mubr.msk.f32.mxu0 %vm383_vm0, %v276_v44  ;;  %1407 = vmatprep.mubr.msk.f32.mxu1 %vm383_vm0, %v326_v45  ;;  %v308_v44 = vld [vmem:[%s1595_s7 + $0x148] sm:$0xff]  ;;  %v358_v45 = vld [vmem:[%s1595_s7 + $0x2d8] sm:$0xff] }
  0x3c   : > { %616 = vmatmul.mubr.f32.gmra.mrb[8].mxu0 %v275_v46  ;;  %741 = vmatmul.mubr.f32.gmra.mrb[8].mxu1 %v325_v47  ;;  %v307_v46 = vld [vmem:[%s1595_s7 + $0x140] sm:$0xff]  ;;  %v357_v47 = vld [vmem:[%s1595_s7 + $0x2d0] sm:$0xff] }
  0x3d   : > { %1383 = vmatprep.mubr.msk.f32.mxu0 %vm383_vm0, %v278_v48  ;;  %1408 = vmatprep.mubr.msk.f32.mxu1 %vm383_vm0, %v328_v49  ;;  %v310_v48 = vld [vmem:[%s1595_s7 + $0x158] sm:$0xff]  ;;  %v360_v49 = vld [vmem:[%s1595_s7 + $0x2e8] sm:$0xff] }
  0x40   : > { %621 = vmatmul.mubr.f32.gmra.mrb[10].mxu0 %v277_v50  ;;  %746 = vmatmul.mubr.f32.gmra.mrb[10].mxu1 %v327_v51  ;;  %v309_v50 = vld [vmem:[%s1595_s7 + $0x150] sm:$0xff]  ;;  %v359_v51 = vld [vmem:[%s1595_s7 + $0x2e0] sm:$0xff] }
  0x41   : > { %1384 = vmatprep.mubr.msk.f32.mxu0 %vm383_vm0, %v280_v52  ;;  %1409 = vmatprep.mubr.msk.f32.mxu1 %vm383_vm0, %v330_v53  ;;  %v312_v52 = vld [vmem:[%s1595_s7 + $0x168] sm:$0xff]  ;;  %v362_v53 = vld [vmem:[%s1595_s7 + $0x2f8] sm:$0xff] }
  0x44   : > { %626 = vmatmul.mubr.f32.gmra.mrb[12].mxu0 %v279_v54  ;;  %751 = vmatmul.mubr.f32.gmra.mrb[12].mxu1 %v329_v55  ;;  %v311_v54 = vld [vmem:[%s1595_s7 + $0x160] sm:$0xff]  ;;  %v361_v55 = vld [vmem:[%s1595_s7 + $0x2f0] sm:$0xff] }
  0x45   : > { %1385 = vmatprep.mubr.msk.f32.mxu0 %vm383_vm0, %v282_v56  ;;  %1410 = vmatprep.mubr.msk.f32.mxu1 %vm383_vm0, %v332_v57  ;;  %v314_v56 = vld [vmem:[%s1595_s7 + $0x178] sm:$0xff]  ;;  %v364_v57 = vld [vmem:[%s1595_s7 + $0x308] sm:$0xff] }
  0x48   : > { %631 = vmatmul.mubr.f32.gmra.mrb[14].mxu0 %v281_v58  ;;  %756 = vmatmul.mubr.f32.gmra.mrb[14].mxu1 %v331_v59  ;;  %v313_v58 = vld [vmem:[%s1595_s7 + $0x170] sm:$0xff]  ;;  %v363_v59 = vld [vmem:[%s1595_s7 + $0x300] sm:$0xff] }
  0x49   : > { %1386 = vmatprep.mubr.msk.f32.mxu0 %vm383_vm0, %v284_v60  ;;  %1411 = vmatprep.mubr.msk.f32.mxu1 %vm383_vm0, %v334_v61  ;;  %v316_v60 = vld [vmem:[%s1595_s7 + $0x188] sm:$0xff]  ;;  %v315_v61 = vld [vmem:[%s1595_s7 + $0x180] sm:$0xff] }
  0x4c   : > { %636 = vmatmul.mubr.f32.gmra.mrb[16].mxu0 %v283_v62  ;;  %761 = vmatmul.mubr.f32.gmra.mrb[16].mxu1 %v333_v63 }
  0x4d   : > { %1387 = vmatprep.mubr.msk.f32.mxu0 %vm383_vm0, %v286_v0  ;;  %1412 = vmatprep.mubr.msk.f32.mxu1 %vm383_vm0, %v336_v1 }
  0x50   : > { %641 = vmatmul.mubr.f32.gmra.mrb[18].mxu0 %v285_v2  ;;  %766 = vmatmul.mubr.f32.gmra.mrb[18].mxu1 %v335_v3 }
  0x51   : > { %1388 = vmatprep.mubr.msk.f32.mxu0 %vm383_vm0, %v288_v4  ;;  %1413 = vmatprep.mubr.msk.f32.mxu1 %vm383_vm0, %v338_v5 }
  0x54   : > { %646 = vmatmul.mubr.f32.gmra.mrb[20].mxu0 %v287_v6  ;;  %771 = vmatmul.mubr.f32.gmra.mrb[20].mxu1 %v337_v7  ;;  %v1808_v6 = vld [vmem:[%s2107_s2] ss:$0 sm:$0xff] }
  0x55   : > { %1389 = vmatprep.mubr.msk.f32.mxu0 %vm383_vm0, %v290_v8  ;;  %1414 = vmatprep.mubr.msk.f32.mxu1 %vm383_vm0, %v340_v9 }
  0x58   : > { %651 = vmatmul.mubr.f32.gmra.mrb[22].mxu0 %v289_v10  ;;  %776 = vmatmul.mubr.f32.gmra.mrb[22].mxu1 %v339_v11 }
  0x59   : > { %1390 = vmatprep.mubr.msk.f32.mxu0 %vm383_vm0, %v292_v12  ;;  %1415 = vmatprep.mubr.msk.f32.mxu1 %vm383_vm0, %v342_v13 }
  0x5c   : > { %656 = vmatmul.mubr.f32.gmra.mrb[24].mxu0 %v291_v14  ;;  %781 = vmatmul.mubr.f32.gmra.mrb[24].mxu1 %v341_v15 }
  0x5d   : > { %1391 = vmatprep.mubr.msk.f32.mxu0 %vm383_vm0, %v294_v16  ;;  %1416 = vmatprep.mubr.msk.f32.mxu1 %vm383_vm0, %v344_v17 }
  0x60   : > { %661 = vmatmul.mubr.f32.gmra.mrb[26].mxu0 %v293_v18  ;;  %786 = vmatmul.mubr.f32.gmra.mrb[26].mxu1 %v343_v19 }
  0x61   : > { %1392 = vmatprep.mubr.msk.f32.mxu0 %vm383_vm0, %v296_v20  ;;  %1417 = vmatprep.mubr.msk.f32.mxu1 %vm383_vm0, %v346_v21 }
  0x64   : > { %666 = vmatmul.mubr.f32.gmra.mrb[28].mxu0 %v295_v22  ;;  %791 = vmatmul.mubr.f32.gmra.mrb[28].mxu1 %v345_v23 }
  0x65   : > { %1393 = vmatprep.mubr.msk.f32.mxu0 %vm383_vm0, %v298_v24  ;;  %1418 = vmatprep.mubr.msk.f32.mxu1 %vm383_vm0, %v348_v25 }
  0x68   : > { %671 = vmatmul.mubr.f32.gmra.mrb[30].mxu0 %v297_v26  ;;  %796 = vmatmul.mubr.f32.gmra.mrb[30].mxu1 %v347_v27 }
  0x69   : > { %1394 = vmatprep.mubr.msk.f32.mxu0 %vm383_vm0, %v300_v28  ;;  %1419 = vmatprep.mubr.msk.f32.mxu1 %vm383_vm0, %v350_v29 }
  0x6c   : > { %676 = vmatmul.mubr.f32.gmra.mrb[32].mxu0 %v299_v30  ;;  %801 = vmatmul.mubr.f32.gmra.mrb[32].mxu1 %v349_v31 }
  0x6d   : > { %1395 = vmatprep.mubr.msk.f32.mxu0 %vm383_vm0, %v302_v32  ;;  %1420 = vmatprep.mubr.msk.f32.mxu1 %vm383_vm0, %v352_v33 }
  0x70   : > { %681 = vmatmul.mubr.f32.gmra.mrb[34].mxu0 %v301_v34  ;;  %806 = vmatmul.mubr.f32.gmra.mrb[34].mxu1 %v351_v35 }
  0x71   : > { %1396 = vmatprep.mubr.msk.f32.mxu0 %vm383_vm0, %v304_v36  ;;  %1421 = vmatprep.mubr.msk.f32.mxu1 %vm383_vm0, %v354_v37 }
  0x74   : > { %686 = vmatmul.mubr.f32.gmra.mrb[36].mxu0 %v303_v38  ;;  %811 = vmatmul.mubr.f32.gmra.mrb[36].mxu1 %v353_v39 }
  0x75   : > { %1397 = vmatprep.mubr.msk.f32.mxu0 %vm383_vm0, %v306_v40  ;;  %1422 = vmatprep.mubr.msk.f32.mxu1 %vm383_vm0, %v356_v41 }
  0x78   : > { %691 = vmatmul.mubr.f32.gmra.mrb[38].mxu0 %v305_v42  ;;  %816 = vmatmul.mubr.f32.gmra.mrb[38].mxu1 %v355_v43 }
  0x79   : > { %1398 = vmatprep.mubr.msk.f32.mxu0 %vm383_vm0, %v308_v44  ;;  %1423 = vmatprep.mubr.msk.f32.mxu1 %vm383_vm0, %v358_v45 }
  0x7c   : > { %696 = vmatmul.mubr.f32.gmra.mrb[40].mxu0 %v307_v46  ;;  %821 = vmatmul.mubr.f32.gmra.mrb[40].mxu1 %v357_v47 }
  0x7d   : > { %1399 = vmatprep.mubr.msk.f32.mxu0 %vm383_vm0, %v310_v48  ;;  %1424 = vmatprep.mubr.msk.f32.mxu1 %vm383_vm0, %v360_v49 }
  0x80   : > { %701 = vmatmul.mubr.f32.gmra.mrb[42].mxu0 %v309_v50  ;;  %826 = vmatmul.mubr.f32.gmra.mrb[42].mxu1 %v359_v51 }
  0x81   : > { %1400 = vmatprep.mubr.msk.f32.mxu0 %vm383_vm0, %v312_v52  ;;  %1425 = vmatprep.mubr.msk.f32.mxu1 %vm383_vm0, %v362_v53 }
  0x84   : > { %706 = vmatmul.mubr.f32.gmra.mrb[44].mxu0 %v311_v54  ;;  %831 = vmatmul.mubr.f32.gmra.mrb[44].mxu1 %v361_v55 }
  0x85   : > { %1401 = vmatprep.mubr.msk.f32.mxu0 %vm383_vm0, %v314_v56  ;;  %1426 = vmatprep.mubr.msk.f32.mxu1 %vm383_vm0, %v364_v57 }
  0x88   : > { %711 = vmatmul.mubr.f32.gmra.mrb[46].mxu0 %v313_v58  ;;  %836 = vmatmul.mubr.f32.gmra.mrb[46].mxu1 %v363_v59 }
  0x89   : > { %1402 = vmatprep.mubr.msk.f32.mxu0 %vm383_vm0, %v316_v60 }
  0x8c   : > { %716 = vmatmul.mubr.f32.gmra.mrb[48].mxu0 %v315_v61 }
  0xff   : > { %v597_v62 = vpop.f32.mrb[0].mxu0  ;;  %v722_v63 = vpop.f32.mrb[0].mxu1 }
 0x100   : > { %846 = vst.msk [vmem:[%s1795_s11] sm:$0xff] %vm845_vm1, %v597_v62  ;;  %v599_v0 = vpop.f32.mrb[1].mxu0  ;;  %871 = vst.msk [vmem:[%s1795_s11 + $0xc8] sm:$0xff] %vm845_vm1, %v722_v63  ;;  %v724_v1 = vpop.f32.mrb[1].mxu1 }
 0x103   : > { %v602_v2 = vpop.f32.mrb[2].mxu0  ;;  %v727_v3 = vpop.f32.mrb[2].mxu1 }
 0x104   : > { %847 = vst.msk [vmem:[%s1795_s11 + $0x8] sm:$0xff] %vm845_vm1, %v602_v2  ;;  %v604_v4 = vpop.f32.mrb[3].mxu0  ;;  %872 = vst.msk [vmem:[%s1795_s11 + $0xd0] sm:$0xff] %vm845_vm1, %v727_v3  ;;  %v729_v5 = vpop.f32.mrb[3].mxu1 }
 0x107   : > { %v1050_v7 = vld [vmem:[%s1795_s11] sm:$0xff]  ;;  %v1075_v8 = vld [vmem:[%s1795_s11 + $0xc8] sm:$0xff]  ;;  %v607_v9 = vpop.f32.mrb[4].mxu0  ;;  %v732_v10 = vpop.f32.mrb[4].mxu1 }
 0x108   : > { %v1106_v11 = vadd.f32 %v1808_v6, %v1050_v7  ;;  %v1131_v12 = vadd.f32 %v1808_v6, %v1075_v8  ;;  %848 = vst.msk [vmem:[%s1795_s11 + $0x10] sm:$0xff] %vm845_vm1, %v607_v9  ;;  %v609_v13 = vpop.f32.mrb[5].mxu0  ;;  %873 = vst.msk [vmem:[%s1795_s11 + $0xd8] sm:$0xff] %vm845_vm1, %v732_v10  ;;  %v734_v14 = vpop.f32.mrb[5].mxu1 }
 0x10a   : > { %v1155_v15 = vmax.f32 %v1106_v11, 0.0  ;;  %v1180_v16 = vmax.f32 %v1131_v12, 0.0 }
 0x10b   : > { %v1051_v17 = vld [vmem:[%s1795_s11 + $0x8] sm:$0xff]  ;;  %v1076_v18 = vld [vmem:[%s1795_s11 + $0xd0] sm:$0xff]  ;;  %v612_v19 = vpop.f32.mrb[6].mxu0  ;;  %v737_v20 = vpop.f32.mrb[6].mxu1 }
 0x10c   : > { %1205 = vst.msk [vmem:[%s1795_s11] sm:$0xff] %vm845_vm1, %v1155_v15  ;;  %1230 = vst.msk [vmem:[%s1795_s11 + $0xc8] sm:$0xff] %vm845_vm1, %v1180_v16  ;;  %v1107_v21 = vadd.f32 %v1808_v6, %v1051_v17  ;;  %v1132_v22 = vadd.f32 %v1808_v6, %v1076_v18  ;;  %v614_v23 = vpop.f32.mrb[7].mxu0  ;;  %v739_v24 = vpop.f32.mrb[7].mxu1 }
 0x10d   : > { %849 = vst.msk [vmem:[%s1795_s11 + $0x18] sm:$0xff] %vm845_vm1, %v612_v19  ;;  %874 = vst.msk [vmem:[%s1795_s11 + $0xe0] sm:$0xff] %vm845_vm1, %v737_v20 }
 0x10e   : > { %v1156_v25 = vmax.f32 %v1107_v21, 0.0  ;;  %v1181_v26 = vmax.f32 %v1132_v22, 0.0 }
 0x10f   : > { %v1052_v27 = vld [vmem:[%s1795_s11 + $0x10] sm:$0xff]  ;;  %v1077_v28 = vld [vmem:[%s1795_s11 + $0xd8] sm:$0xff]  ;;  %v617_v29 = vpop.f32.mrb[8].mxu0  ;;  %v742_v30 = vpop.f32.mrb[8].mxu1 }
 0x110   : > { %1206 = vst.msk [vmem:[%s1795_s11 + $0x8] sm:$0xff] %vm845_vm1, %v1156_v25  ;;  %1231 = vst.msk [vmem:[%s1795_s11 + $0xd0] sm:$0xff] %vm845_vm1, %v1181_v26  ;;  %v1108_v31 = vadd.f32 %v1808_v6, %v1052_v27  ;;  %v1133_v32 = vadd.f32 %v1808_v6, %v1077_v28  ;;  %v619_v33 = vpop.f32.mrb[9].mxu0  ;;  %v744_v34 = vpop.f32.mrb[9].mxu1 }
 0x111   : > { %850 = vst.msk [vmem:[%s1795_s11 + $0x20] sm:$0xff] %vm845_vm1, %v617_v29  ;;  %875 = vst.msk [vmem:[%s1795_s11 + $0xe8] sm:$0xff] %vm845_vm1, %v742_v30 }
 0x112   : > { %v1157_v35 = vmax.f32 %v1108_v31, 0.0  ;;  %v1182_v36 = vmax.f32 %v1133_v32, 0.0 }
 0x113   : > { %v622_v39 = vpop.f32.mrb[10].mxu0  ;;  %v747_v40 = vpop.f32.mrb[10].mxu1 }
 0x114   : > { %v1053_v37 = vld [vmem:[%s1795_s11 + $0x18] sm:$0xff]  ;;  %v1078_v38 = vld [vmem:[%s1795_s11 + $0xe0] sm:$0xff]  ;;  %1207 = vst.msk [vmem:[%s1795_s11 + $0x10] sm:$0xff] %vm845_vm1, %v1157_v35  ;;  %1232 = vst.msk [vmem:[%s1795_s11 + $0xd8] sm:$0xff] %vm845_vm1, %v1182_v36  ;;  %v624_v43 = vpop.f32.mrb[11].mxu0  ;;  %v749_v44 = vpop.f32.mrb[11].mxu1 }
 0x115   : > { %v1109_v41 = vadd.f32 %v1808_v6, %v1053_v37  ;;  %v1134_v42 = vadd.f32 %v1808_v6, %v1078_v38  ;;  %851 = vst.msk [vmem:[%s1795_s11 + $0x28] sm:$0xff] %vm845_vm1, %v622_v39  ;;  %876 = vst.msk [vmem:[%s1795_s11 + $0xf0] sm:$0xff] %vm845_vm1, %v747_v40 }
 0x117   : > { %v1158_v45 = vmax.f32 %v1109_v41, 0.0  ;;  %v1183_v46 = vmax.f32 %v1134_v42, 0.0  ;;  %v627_v49 = vpop.f32.mrb[12].mxu0  ;;  %v752_v50 = vpop.f32.mrb[12].mxu1 }
 0x118   : > { %v1054_v47 = vld [vmem:[%s1795_s11 + $0x20] sm:$0xff]  ;;  %v1079_v48 = vld [vmem:[%s1795_s11 + $0xe8] sm:$0xff]  ;;  %852 = vst.msk [vmem:[%s1795_s11 + $0x30] sm:$0xff] %vm845_vm1, %v627_v49  ;;  %v629_v53 = vpop.f32.mrb[13].mxu0  ;;  %877 = vst.msk [vmem:[%s1795_s11 + $0xf8] sm:$0xff] %vm845_vm1, %v752_v50  ;;  %v754_v54 = vpop.f32.mrb[13].mxu1 }
 0x119   : > { %1208 = vst.msk [vmem:[%s1795_s11 + $0x18] sm:$0xff] %vm845_vm1, %v1158_v45  ;;  %1233 = vst.msk [vmem:[%s1795_s11 + $0xe0] sm:$0xff] %vm845_vm1, %v1183_v46  ;;  %v1110_v51 = vadd.f32 %v1808_v6, %v1054_v47  ;;  %v1135_v52 = vadd.f32 %v1808_v6, %v1079_v48 }
 0x11b   : > { %v1159_v55 = vmax.f32 %v1110_v51, 0.0  ;;  %v1184_v56 = vmax.f32 %v1135_v52, 0.0  ;;  %v632_v59 = vpop.f32.mrb[14].mxu0  ;;  %v757_v60 = vpop.f32.mrb[14].mxu1 }
 0x11c   : > { %v1055_v57 = vld [vmem:[%s1795_s11 + $0x28] sm:$0xff]  ;;  %v1080_v58 = vld [vmem:[%s1795_s11 + $0xf0] sm:$0xff]  ;;  %853 = vst.msk [vmem:[%s1795_s11 + $0x38] sm:$0xff] %vm845_vm1, %v632_v59  ;;  %v634_v63 = vpop.f32.mrb[15].mxu0  ;;  %878 = vst.msk [vmem:[%s1795_s11 + $0x100] sm:$0xff] %vm845_vm1, %v757_v60  ;;  %v759_v0 = vpop.f32.mrb[15].mxu1 }
 0x11d   : > { %1209 = vst.msk [vmem:[%s1795_s11 + $0x20] sm:$0xff] %vm845_vm1, %v1159_v55  ;;  %1234 = vst.msk [vmem:[%s1795_s11 + $0xe8] sm:$0xff] %vm845_vm1, %v1184_v56  ;;  %v1111_v61 = vadd.f32 %v1808_v6, %v1055_v57  ;;  %v1136_v62 = vadd.f32 %v1808_v6, %v1080_v58 }
 0x11f   : > { %v1160_v1 = vmax.f32 %v1111_v61, 0.0  ;;  %v1185_v2 = vmax.f32 %v1136_v62, 0.0  ;;  %v1056_v3 = vld [vmem:[%s1795_s11 + $0x30] sm:$0xff]  ;;  %v1081_v4 = vld [vmem:[%s1795_s11 + $0xf8] sm:$0xff]  ;;  %v637_v5 = vpop.f32.mrb[16].mxu0  ;;  %v762_v7 = vpop.f32.mrb[16].mxu1 }
 0x120   : > { %v1112_v8 = vadd.f32 %v1808_v6, %v1056_v3  ;;  %v1137_v9 = vadd.f32 %v1808_v6, %v1081_v4  ;;  %854 = vst.msk [vmem:[%s1795_s11 + $0x40] sm:$0xff] %vm845_vm1, %v637_v5  ;;  %v639_v10 = vpop.f32.mrb[17].mxu0  ;;  %879 = vst.msk [vmem:[%s1795_s11 + $0x108] sm:$0xff] %vm845_vm1, %v762_v7  ;;  %v764_v11 = vpop.f32.mrb[17].mxu1 }
 0x121   : > { %1210 = vst.msk [vmem:[%s1795_s11 + $0x28] sm:$0xff] %vm845_vm1, %v1160_v1  ;;  %1235 = vst.msk [vmem:[%s1795_s11 + $0xf0] sm:$0xff] %vm845_vm1, %v1185_v2 }
 0x122   : > { %v1161_v12 = vmax.f32 %v1112_v8, 0.0  ;;  %v1186_v13 = vmax.f32 %v1137_v9, 0.0 }
 0x123   : > { %v1057_v14 = vld [vmem:[%s1795_s11 + $0x38] sm:$0xff]  ;;  %v1082_v15 = vld [vmem:[%s1795_s11 + $0x100] sm:$0xff]  ;;  %v642_v16 = vpop.f32.mrb[18].mxu0  ;;  %v767_v17 = vpop.f32.mrb[18].mxu1 }
 0x124   : > { %1211 = vst.msk [vmem:[%s1795_s11 + $0x30] sm:$0xff] %vm845_vm1, %v1161_v12  ;;  %1236 = vst.msk [vmem:[%s1795_s11 + $0xf8] sm:$0xff] %vm845_vm1, %v1186_v13  ;;  %v1113_v18 = vadd.f32 %v1808_v6, %v1057_v14  ;;  %v1138_v19 = vadd.f32 %v1808_v6, %v1082_v15  ;;  %v644_v20 = vpop.f32.mrb[19].mxu0  ;;  %v769_v21 = vpop.f32.mrb[19].mxu1 }
 0x125   : > { %855 = vst.msk [vmem:[%s1795_s11 + $0x48] sm:$0xff] %vm845_vm1, %v642_v16  ;;  %880 = vst.msk [vmem:[%s1795_s11 + $0x110] sm:$0xff] %vm845_vm1, %v767_v17 }
 0x126   : > { %v1162_v22 = vmax.f32 %v1113_v18, 0.0  ;;  %v1187_v23 = vmax.f32 %v1138_v19, 0.0 }
 0x127   : > { %v1058_v24 = vld [vmem:[%s1795_s11 + $0x40] sm:$0xff]  ;;  %v1083_v25 = vld [vmem:[%s1795_s11 + $0x108] sm:$0xff]  ;;  %v647_v26 = vpop.f32.mrb[20].mxu0  ;;  %v772_v27 = vpop.f32.mrb[20].mxu1 }
 0x128   : > { %1212 = vst.msk [vmem:[%s1795_s11 + $0x38] sm:$0xff] %vm845_vm1, %v1162_v22  ;;  %1237 = vst.msk [vmem:[%s1795_s11 + $0x100] sm:$0xff] %vm845_vm1, %v1187_v23  ;;  %v1114_v28 = vadd.f32 %v1808_v6, %v1058_v24  ;;  %v1139_v29 = vadd.f32 %v1808_v6, %v1083_v25  ;;  %v649_v30 = vpop.f32.mrb[21].mxu0  ;;  %v774_v31 = vpop.f32.mrb[21].mxu1 }
 0x129   : > { %856 = vst.msk [vmem:[%s1795_s11 + $0x50] sm:$0xff] %vm845_vm1, %v647_v26  ;;  %881 = vst.msk [vmem:[%s1795_s11 + $0x118] sm:$0xff] %vm845_vm1, %v772_v27 }
 0x12a   : > { %v1163_v32 = vmax.f32 %v1114_v28, 0.0  ;;  %v1188_v33 = vmax.f32 %v1139_v29, 0.0 }
 0x12b   : > { %v652_v36 = vpop.f32.mrb[22].mxu0  ;;  %v777_v37 = vpop.f32.mrb[22].mxu1 }
 0x12c   : > { %v1059_v34 = vld [vmem:[%s1795_s11 + $0x48] sm:$0xff]  ;;  %v1084_v35 = vld [vmem:[%s1795_s11 + $0x110] sm:$0xff]  ;;  %1213 = vst.msk [vmem:[%s1795_s11 + $0x40] sm:$0xff] %vm845_vm1, %v1163_v32  ;;  %1238 = vst.msk [vmem:[%s1795_s11 + $0x108] sm:$0xff] %vm845_vm1, %v1188_v33  ;;  %v654_v40 = vpop.f32.mrb[23].mxu0  ;;  %v779_v41 = vpop.f32.mrb[23].mxu1 }
 0x12d   : > { %v1115_v38 = vadd.f32 %v1808_v6, %v1059_v34  ;;  %v1140_v39 = vadd.f32 %v1808_v6, %v1084_v35  ;;  %857 = vst.msk [vmem:[%s1795_s11 + $0x58] sm:$0xff] %vm845_vm1, %v652_v36  ;;  %882 = vst.msk [vmem:[%s1795_s11 + $0x120] sm:$0xff] %vm845_vm1, %v777_v37 }
 0x12f   : > { %v1164_v42 = vmax.f32 %v1115_v38, 0.0  ;;  %v1189_v43 = vmax.f32 %v1140_v39, 0.0  ;;  %v657_v46 = vpop.f32.mrb[24].mxu0  ;;  %v782_v47 = vpop.f32.mrb[24].mxu1 }
 0x130   : > { %v1060_v44 = vld [vmem:[%s1795_s11 + $0x50] sm:$0xff]  ;;  %v1085_v45 = vld [vmem:[%s1795_s11 + $0x118] sm:$0xff]  ;;  %858 = vst.msk [vmem:[%s1795_s11 + $0x60] sm:$0xff] %vm845_vm1, %v657_v46  ;;  %v659_v50 = vpop.f32.mrb[25].mxu0  ;;  %883 = vst.msk [vmem:[%s1795_s11 + $0x128] sm:$0xff] %vm845_vm1, %v782_v47  ;;  %v784_v51 = vpop.f32.mrb[25].mxu1 }
 0x131   : > { %1214 = vst.msk [vmem:[%s1795_s11 + $0x48] sm:$0xff] %vm845_vm1, %v1164_v42  ;;  %1239 = vst.msk [vmem:[%s1795_s11 + $0x110] sm:$0xff] %vm845_vm1, %v1189_v43  ;;  %v1116_v48 = vadd.f32 %v1808_v6, %v1060_v44  ;;  %v1141_v49 = vadd.f32 %v1808_v6, %v1085_v45 }
 0x133   : > { %v1165_v52 = vmax.f32 %v1116_v48, 0.0  ;;  %v1190_v53 = vmax.f32 %v1141_v49, 0.0  ;;  %v662_v56 = vpop.f32.mrb[26].mxu0  ;;  %v787_v57 = vpop.f32.mrb[26].mxu1 }
 0x134   : > { %v1061_v54 = vld [vmem:[%s1795_s11 + $0x58] sm:$0xff]  ;;  %v1086_v55 = vld [vmem:[%s1795_s11 + $0x120] sm:$0xff]  ;;  %859 = vst.msk [vmem:[%s1795_s11 + $0x68] sm:$0xff] %vm845_vm1, %v662_v56  ;;  %v664_v60 = vpop.f32.mrb[27].mxu0  ;;  %884 = vst.msk [vmem:[%s1795_s11 + $0x130] sm:$0xff] %vm845_vm1, %v787_v57  ;;  %v789_v61 = vpop.f32.mrb[27].mxu1 }
 0x135   : > { %1215 = vst.msk [vmem:[%s1795_s11 + $0x50] sm:$0xff] %vm845_vm1, %v1165_v52  ;;  %1240 = vst.msk [vmem:[%s1795_s11 + $0x118] sm:$0xff] %vm845_vm1, %v1190_v53  ;;  %v1117_v58 = vadd.f32 %v1808_v6, %v1061_v54  ;;  %v1142_v59 = vadd.f32 %v1808_v6, %v1086_v55 }
 0x137   : > { %v1166_v62 = vmax.f32 %v1117_v58, 0.0  ;;  %v1191_v63 = vmax.f32 %v1142_v59, 0.0  ;;  %v1062_v0 = vld [vmem:[%s1795_s11 + $0x60] sm:$0xff]  ;;  %v1087_v1 = vld [vmem:[%s1795_s11 + $0x128] sm:$0xff]  ;;  %v667_v2 = vpop.f32.mrb[28].mxu0  ;;  %v792_v3 = vpop.f32.mrb[28].mxu1 }
 0x138   : > { %v1118_v4 = vadd.f32 %v1808_v6, %v1062_v0  ;;  %v1143_v5 = vadd.f32 %v1808_v6, %v1087_v1  ;;  %860 = vst.msk [vmem:[%s1795_s11 + $0x70] sm:$0xff] %vm845_vm1, %v667_v2  ;;  %v669_v7 = vpop.f32.mrb[29].mxu0  ;;  %885 = vst.msk [vmem:[%s1795_s11 + $0x138] sm:$0xff] %vm845_vm1, %v792_v3  ;;  %v794_v8 = vpop.f32.mrb[29].mxu1 }
 0x139   : > { %1216 = vst.msk [vmem:[%s1795_s11 + $0x58] sm:$0xff] %vm845_vm1, %v1166_v62  ;;  %1241 = vst.msk [vmem:[%s1795_s11 + $0x120] sm:$0xff] %vm845_vm1, %v1191_v63 }
 0x13a   : > { %v1167_v9 = vmax.f32 %v1118_v4, 0.0  ;;  %v1192_v10 = vmax.f32 %v1143_v5, 0.0 }
 0x13b   : > { %v1063_v11 = vld [vmem:[%s1795_s11 + $0x68] sm:$0xff]  ;;  %v1088_v12 = vld [vmem:[%s1795_s11 + $0x130] sm:$0xff]  ;;  %v672_v13 = vpop.f32.mrb[30].mxu0  ;;  %v797_v14 = vpop.f32.mrb[30].mxu1 }
 0x13c   : > { %1217 = vst.msk [vmem:[%s1795_s11 + $0x60] sm:$0xff] %vm845_vm1, %v1167_v9  ;;  %1242 = vst.msk [vmem:[%s1795_s11 + $0x128] sm:$0xff] %vm845_vm1, %v1192_v10  ;;  %v1119_v15 = vadd.f32 %v1808_v6, %v1063_v11  ;;  %v1144_v16 = vadd.f32 %v1808_v6, %v1088_v12  ;;  %v674_v17 = vpop.f32.mrb[31].mxu0  ;;  %v799_v18 = vpop.f32.mrb[31].mxu1 }
 0x13d   : > { %861 = vst.msk [vmem:[%s1795_s11 + $0x78] sm:$0xff] %vm845_vm1, %v672_v13  ;;  %886 = vst.msk [vmem:[%s1795_s11 + $0x140] sm:$0xff] %vm845_vm1, %v797_v14 }
 0x13e   : > { %v1168_v19 = vmax.f32 %v1119_v15, 0.0  ;;  %v1193_v20 = vmax.f32 %v1144_v16, 0.0 }
 0x13f   : > { %v1064_v21 = vld [vmem:[%s1795_s11 + $0x70] sm:$0xff]  ;;  %v1089_v22 = vld [vmem:[%s1795_s11 + $0x138] sm:$0xff]  ;;  %v677_v23 = vpop.f32.mrb[32].mxu0  ;;  %v802_v24 = vpop.f32.mrb[32].mxu1 }
 0x140   : > { %1218 = vst.msk [vmem:[%s1795_s11 + $0x68] sm:$0xff] %vm845_vm1, %v1168_v19  ;;  %1243 = vst.msk [vmem:[%s1795_s11 + $0x130] sm:$0xff] %vm845_vm1, %v1193_v20  ;;  %v1120_v25 = vadd.f32 %v1808_v6, %v1064_v21  ;;  %v1145_v26 = vadd.f32 %v1808_v6, %v1089_v22  ;;  %v679_v27 = vpop.f32.mrb[33].mxu0  ;;  %v804_v28 = vpop.f32.mrb[33].mxu1 }
 0x141   : > { %862 = vst.msk [vmem:[%s1795_s11 + $0x80] sm:$0xff] %vm845_vm1, %v677_v23  ;;  %887 = vst.msk [vmem:[%s1795_s11 + $0x148] sm:$0xff] %vm845_vm1, %v802_v24 }
 0x142   : > { %v1169_v29 = vmax.f32 %v1120_v25, 0.0  ;;  %v1194_v30 = vmax.f32 %v1145_v26, 0.0 }
 0x143   : > { %v682_v33 = vpop.f32.mrb[34].mxu0  ;;  %v807_v34 = vpop.f32.mrb[34].mxu1 }
 0x144   : > { %v1065_v31 = vld [vmem:[%s1795_s11 + $0x78] sm:$0xff]  ;;  %v1090_v32 = vld [vmem:[%s1795_s11 + $0x140] sm:$0xff]  ;;  %1219 = vst.msk [vmem:[%s1795_s11 + $0x70] sm:$0xff] %vm845_vm1, %v1169_v29  ;;  %1244 = vst.msk [vmem:[%s1795_s11 + $0x138] sm:$0xff] %vm845_vm1, %v1194_v30  ;;  %v684_v37 = vpop.f32.mrb[35].mxu0  ;;  %v809_v38 = vpop.f32.mrb[35].mxu1 }
 0x145   : > { %v1121_v35 = vadd.f32 %v1808_v6, %v1065_v31  ;;  %v1146_v36 = vadd.f32 %v1808_v6, %v1090_v32  ;;  %863 = vst.msk [vmem:[%s1795_s11 + $0x88] sm:$0xff] %vm845_vm1, %v682_v33  ;;  %888 = vst.msk [vmem:[%s1795_s11 + $0x150] sm:$0xff] %vm845_vm1, %v807_v34 }
 0x147   : > { %v1170_v39 = vmax.f32 %v1121_v35, 0.0  ;;  %v1195_v40 = vmax.f32 %v1146_v36, 0.0  ;;  %v687_v43 = vpop.f32.mrb[36].mxu0  ;;  %v812_v44 = vpop.f32.mrb[36].mxu1 }
 0x148   : > { %v1066_v41 = vld [vmem:[%s1795_s11 + $0x80] sm:$0xff]  ;;  %v1091_v42 = vld [vmem:[%s1795_s11 + $0x148] sm:$0xff]  ;;  %864 = vst.msk [vmem:[%s1795_s11 + $0x90] sm:$0xff] %vm845_vm1, %v687_v43  ;;  %v689_v47 = vpop.f32.mrb[37].mxu0  ;;  %889 = vst.msk [vmem:[%s1795_s11 + $0x158] sm:$0xff] %vm845_vm1, %v812_v44  ;;  %v814_v48 = vpop.f32.mrb[37].mxu1 }
 0x149   : > { %1220 = vst.msk [vmem:[%s1795_s11 + $0x78] sm:$0xff] %vm845_vm1, %v1170_v39  ;;  %1245 = vst.msk [vmem:[%s1795_s11 + $0x140] sm:$0xff] %vm845_vm1, %v1195_v40  ;;  %v1122_v45 = vadd.f32 %v1808_v6, %v1066_v41  ;;  %v1147_v46 = vadd.f32 %v1808_v6, %v1091_v42 }
 0x14b   : > { %v1171_v49 = vmax.f32 %v1122_v45, 0.0  ;;  %v1196_v50 = vmax.f32 %v1147_v46, 0.0  ;;  %v692_v53 = vpop.f32.mrb[38].mxu0  ;;  %v817_v54 = vpop.f32.mrb[38].mxu1 }
 0x14c   : > { %v1067_v51 = vld [vmem:[%s1795_s11 + $0x88] sm:$0xff]  ;;  %v1092_v52 = vld [vmem:[%s1795_s11 + $0x150] sm:$0xff]  ;;  %865 = vst.msk [vmem:[%s1795_s11 + $0x98] sm:$0xff] %vm845_vm1, %v692_v53  ;;  %v694_v57 = vpop.f32.mrb[39].mxu0  ;;  %890 = vst.msk [vmem:[%s1795_s11 + $0x160] sm:$0xff] %vm845_vm1, %v817_v54  ;;  %v819_v58 = vpop.f32.mrb[39].mxu1 }
 0x14d   : > { %1221 = vst.msk [vmem:[%s1795_s11 + $0x80] sm:$0xff] %vm845_vm1, %v1171_v49  ;;  %1246 = vst.msk [vmem:[%s1795_s11 + $0x148] sm:$0xff] %vm845_vm1, %v1196_v50  ;;  %v1123_v55 = vadd.f32 %v1808_v6, %v1067_v51  ;;  %v1148_v56 = vadd.f32 %v1808_v6, %v1092_v52 }
 0x14f   : > { %v1172_v59 = vmax.f32 %v1123_v55, 0.0  ;;  %v1197_v60 = vmax.f32 %v1148_v56, 0.0  ;;  %v1068_v61 = vld [vmem:[%s1795_s11 + $0x90] sm:$0xff]  ;;  %v1093_v62 = vld [vmem:[%s1795_s11 + $0x158] sm:$0xff]  ;;  %v697_v63 = vpop.f32.mrb[40].mxu0  ;;  %v822_v0 = vpop.f32.mrb[40].mxu1 }
 0x150   : > { %v1124_v1 = vadd.f32 %v1808_v6, %v1068_v61  ;;  %v1149_v2 = vadd.f32 %v1808_v6, %v1093_v62  ;;  %866 = vst.msk [vmem:[%s1795_s11 + $0xa0] sm:$0xff] %vm845_vm1, %v697_v63  ;;  %v699_v3 = vpop.f32.mrb[41].mxu0  ;;  %891 = vst.msk [vmem:[%s1795_s11 + $0x168] sm:$0xff] %vm845_vm1, %v822_v0  ;;  %v824_v4 = vpop.f32.mrb[41].mxu1 }
 0x151   : > { %1222 = vst.msk [vmem:[%s1795_s11 + $0x88] sm:$0xff] %vm845_vm1, %v1172_v59  ;;  %1247 = vst.msk [vmem:[%s1795_s11 + $0x150] sm:$0xff] %vm845_vm1, %v1197_v60 }
 0x152   : > { %v1173_v5 = vmax.f32 %v1124_v1, 0.0  ;;  %v1198_v7 = vmax.f32 %v1149_v2, 0.0 }
 0x153   : > { %v1069_v8 = vld [vmem:[%s1795_s11 + $0x98] sm:$0xff]  ;;  %v1094_v9 = vld [vmem:[%s1795_s11 + $0x160] sm:$0xff]  ;;  %v702_v10 = vpop.f32.mrb[42].mxu0  ;;  %v827_v11 = vpop.f32.mrb[42].mxu1 }
 0x154   : > { %1223 = vst.msk [vmem:[%s1795_s11 + $0x90] sm:$0xff] %vm845_vm1, %v1173_v5  ;;  %1248 = vst.msk [vmem:[%s1795_s11 + $0x158] sm:$0xff] %vm845_vm1, %v1198_v7  ;;  %v1125_v12 = vadd.f32 %v1808_v6, %v1069_v8  ;;  %v1150_v13 = vadd.f32 %v1808_v6, %v1094_v9  ;;  %v704_v14 = vpop.f32.mrb[43].mxu0  ;;  %v829_v15 = vpop.f32.mrb[43].mxu1 }
 0x155   : > { %867 = vst.msk [vmem:[%s1795_s11 + $0xa8] sm:$0xff] %vm845_vm1, %v702_v10  ;;  %892 = vst.msk [vmem:[%s1795_s11 + $0x170] sm:$0xff] %vm845_vm1, %v827_v11 }
 0x156   : > { %v1174_v16 = vmax.f32 %v1125_v12, 0.0  ;;  %v1199_v17 = vmax.f32 %v1150_v13, 0.0 }
 0x157   : > { %v1070_v18 = vld [vmem:[%s1795_s11 + $0xa0] sm:$0xff]  ;;  %v1095_v19 = vld [vmem:[%s1795_s11 + $0x168] sm:$0xff]  ;;  %v707_v20 = vpop.f32.mrb[44].mxu0  ;;  %v832_v21 = vpop.f32.mrb[44].mxu1 }
 0x158   : > { %1224 = vst.msk [vmem:[%s1795_s11 + $0x98] sm:$0xff] %vm845_vm1, %v1174_v16  ;;  %1249 = vst.msk [vmem:[%s1795_s11 + $0x160] sm:$0xff] %vm845_vm1, %v1199_v17  ;;  %v1126_v22 = vadd.f32 %v1808_v6, %v1070_v18  ;;  %v1151_v23 = vadd.f32 %v1808_v6, %v1095_v19  ;;  %v709_v24 = vpop.f32.mrb[45].mxu0  ;;  %v834_v25 = vpop.f32.mrb[45].mxu1 }
 0x159   : > { %868 = vst.msk [vmem:[%s1795_s11 + $0xb0] sm:$0xff] %vm845_vm1, %v707_v20  ;;  %893 = vst.msk [vmem:[%s1795_s11 + $0x178] sm:$0xff] %vm845_vm1, %v832_v21 }
 0x15a   : > { %v1175_v26 = vmax.f32 %v1126_v22, 0.0  ;;  %v1200_v27 = vmax.f32 %v1151_v23, 0.0 }
 0x15b   : > { %v712_v30 = vpop.f32.mrb[46].mxu0  ;;  %v837_v31 = vpop.f32.mrb[46].mxu1 }
 0x15c   : > { %v1071_v28 = vld [vmem:[%s1795_s11 + $0xa8] sm:$0xff]  ;;  %v1096_v29 = vld [vmem:[%s1795_s11 + $0x170] sm:$0xff]  ;;  %1225 = vst.msk [vmem:[%s1795_s11 + $0xa0] sm:$0xff] %vm845_vm1, %v1175_v26  ;;  %1250 = vst.msk [vmem:[%s1795_s11 + $0x168] sm:$0xff] %vm845_vm1, %v1200_v27  ;;  %v714_v34 = vpop.f32.mrb[47].mxu0  ;;  %v839_v35 = vpop.f32.mrb[47].mxu1 }
 0x15d   : > { %v1127_v32 = vadd.f32 %v1808_v6, %v1071_v28  ;;  %v1152_v33 = vadd.f32 %v1808_v6, %v1096_v29  ;;  %869 = vst.msk [vmem:[%s1795_s11 + $0xb8] sm:$0xff] %vm845_vm1, %v712_v30  ;;  %894 = vst.msk [vmem:[%s1795_s11 + $0x180] sm:$0xff] %vm845_vm1, %v837_v31 }
 0x15f   : > { %v1176_v36 = vmax.f32 %v1127_v32, 0.0  ;;  %v1201_v37 = vmax.f32 %v1152_v33, 0.0  ;;  %v717_v40 = vpop.f32.mrb[48].mxu0 }
 0x160   : > { %v1072_v38 = vld [vmem:[%s1795_s11 + $0xb0] sm:$0xff]  ;;  %v1097_v39 = vld [vmem:[%s1795_s11 + $0x178] sm:$0xff]  ;;  %870 = vst.msk [vmem:[%s1795_s11 + $0xc0] sm:$0xff] %vm845_vm1, %v717_v40  ;;  %v719_v43 = vpop.f32.mrb[49].mxu0 }
 0x161   : > { %1226 = vst.msk [vmem:[%s1795_s11 + $0xa8] sm:$0xff] %vm845_vm1, %v1176_v36  ;;  %1251 = vst.msk [vmem:[%s1795_s11 + $0x170] sm:$0xff] %vm845_vm1, %v1201_v37  ;;  %v1128_v41 = vadd.f32 %v1808_v6, %v1072_v38  ;;  %v1153_v42 = vadd.f32 %v1808_v6, %v1097_v39 }
 0x163   : > { %v1177_v44 = vmax.f32 %v1128_v41, 0.0  ;;  %v1202_v45 = vmax.f32 %v1153_v42, 0.0 }
 0x164   : > { %v1073_v46 = vld [vmem:[%s1795_s11 + $0xb8] sm:$0xff]  ;;  %v1098_v47 = vld [vmem:[%s1795_s11 + $0x180] sm:$0xff] }
 0x165   : > { %1227 = vst.msk [vmem:[%s1795_s11 + $0xb0] sm:$0xff] %vm845_vm1, %v1177_v44  ;;  %1252 = vst.msk [vmem:[%s1795_s11 + $0x178] sm:$0xff] %vm845_vm1, %v1202_v45  ;;  %v1129_v48 = vadd.f32 %v1808_v6, %v1073_v46  ;;  %v1154_v49 = vadd.f32 %v1808_v6, %v1098_v47 }
 0x167   : > { %v1178_v50 = vmax.f32 %v1129_v48, 0.0  ;;  %v1203_v51 = vmax.f32 %v1154_v49, 0.0  ;;  %v1074_v52 = vld [vmem:[%s1795_s11 + $0xc0] sm:$0xff] }
 0x168   : > { %v1130_v53 = vadd.f32 %v1808_v6, %v1074_v52 }
 0x169   : > { %1228 = vst.msk [vmem:[%s1795_s11 + $0xb8] sm:$0xff] %vm845_vm1, %v1178_v50  ;;  %1253 = vst.msk [vmem:[%s1795_s11 + $0x180] sm:$0xff] %vm845_vm1, %v1203_v51 }
 0x16a   : > { %v1179_v54 = vmax.f32 %v1130_v53, 0.0 }
 0x16c   : > { %1229 = vst.msk [vmem:[%s1795_s11 + $0xc0] sm:$0xff] %vm845_vm1, %v1179_v54 }
 0x16d PF: > { %s13_s14 = sadd.s32 1, %s1523_s14   ;;  %s2109_s12 = smov %s1519_s13 }
 0x16e   : > { %p10_p5 = scmp.ge.s32.totalorder %s13_s14, 6   ;;  %s2110_s13 = smov %s2112_s15 }
 0x170   :  { %12 = sbr.rel (!%p10_p5) target bundleno = 2 (0x2), region = 80 }

// kernel: encoder_forward.7
= control target key start
LH: loop header
LB: loop body
LE: loop exit
PB: predicated region body
PF: predicated region fallthrough
CT: control target
= control target key end

     0   :  { %v410_v47 = vmov 1983009808   ;;  %v84_v49 = vlaneseq  ;;  %vm245_vm0 = vcmask 254976   ;;  %s638_s1 = inlined_call_operand.vmem [shape: f32[512,32], index: 1, kind: input, shape index: {}]   ;;  %s639_s0 = inlined_call_operand.vmem [shape: f32[2,512], index: 0, kind: input, shape index: {}]   ;;  %s640_s3 = inlined_call_operand.vmem [shape: f32[2,32], index: 3, kind: output, shape index: {}]   ;;  %s641_s2 = inlined_call_operand.vmem [shape: f32[1,32], index: 2, kind: input, shape index: {}]  }
   0x1   :  { %v31_v0 = vld [vmem:[%s638_s1 + $0x80] sm:$0xff]  ;;  %v32_v1 = vld [vmem:[%s638_s1 + $0x88] sm:$0xff]  ;;  %v33_v11 = vld [vmem:[%s638_s1 + $0x90] sm:$0xff]  ;;  %v82_v48 = vunpack.c.l.s4 %v410_v47 }
   0x2   :  { %v63_v2 = vld [vmem:[%s638_s1 + $0x180] sm:$0xff]  ;;  %v344_v3 = vpack.c.bf16 %v32_v1, %v31_v0  ;;  %v64_v4 = vld [vmem:[%s638_s1 + $0x188] sm:$0xff]  ;;  %v34_v13 = vld [vmem:[%s638_s1 + $0x98] sm:$0xff]  ;;  %v85_v0 = vshrl.u32 %v84_v49, 7 }
   0x3   :  { %v15_v5 = vld [vmem:[%s638_s1] sm:$0xff]  ;;  %v16_v6 = vld [vmem:[%s638_s1 + $0x8] sm:$0xff]  ;;  %v376_v7 = vpack.c.bf16 %v64_v4, %v63_v2  ;;  %v65_v14 = vld [vmem:[%s638_s1 + $0x190] sm:$0xff]  ;;  %v348_v16 = vpack.c.bf16 %v34_v13, %v33_v11  ;;  %v83_v63 = vunpack.c.0.s8 %v82_v48 }
   0x4   :  { %v346_v8 = vpack.c.bf16 %v16_v6, %v15_v5  ;;  %v47_v9 = vld [vmem:[%s638_s1 + $0x100] sm:$0xff]  ;;  %v48_v10 = vld [vmem:[%s638_s1 + $0x108] sm:$0xff]  ;;  %345 = vmatprep.subr.bf16.mxu0 %v344_v3  ;;  %v66_v15 = vld [vmem:[%s638_s1 + $0x198] sm:$0xff] }
   0x5   :  { %v378_v12 = vpack.c.bf16 %v48_v10, %v47_v9  ;;  %377 = vmatprep.subr.bf16.mxu1 %v376_v7  ;;  %v380_v17 = vpack.c.bf16 %v66_v15, %v65_v14  ;;  %v17_v18 = vld [vmem:[%s638_s1 + $0x10] sm:$0xff]  ;;  %v18_v19 = vld [vmem:[%s638_s1 + $0x18] sm:$0xff]  ;;  %v35_v23 = vld [vmem:[%s638_s1 + $0xa0] sm:$0xff]  ;;  %v86_v13 = vsub.s32 %v83_v63, %v85_v0 }
   0x6   :  { %347 = vmatpush3.bf16.msra.mxu0 %v346_v8  ;;  %v49_v20 = vld [vmem:[%s638_s1 + $0x110] sm:$0xff]  ;;  %v350_v21 = vpack.c.bf16 %v18_v19, %v17_v18  ;;  %v50_v22 = vld [vmem:[%s638_s1 + $0x118] sm:$0xff]  ;;  %v36_v24 = vld [vmem:[%s638_s1 + $0xa8] sm:$0xff] }
   0x7   :  { %379 = vmatpush3.bf16.msra.mxu1 %v378_v12  ;;  %349 = vmatprep.subr.bf16.mxu0 %v348_v16  ;;  %v382_v25 = vpack.c.bf16 %v50_v22, %v49_v20  ;;  %v352_v26 = vpack.c.bf16 %v36_v24, %v35_v23  ;;  %v67_v27 = vld [vmem:[%s638_s1 + $0x1a0] sm:$0xff]  ;;  %v68_v28 = vld [vmem:[%s638_s1 + $0x1a8] sm:$0xff]  ;;  %v37_v35 = vld [vmem:[%s638_s1 + $0xb0] sm:$0xff] }
   0x8   :  { %381 = vmatprep.subr.bf16.mxu1 %v380_v17  ;;  %v19_v29 = vld [vmem:[%s638_s1 + $0x20] sm:$0xff]  ;;  %v384_v30 = vpack.c.bf16 %v68_v28, %v67_v27  ;;  %v20_v31 = vld [vmem:[%s638_s1 + $0x28] sm:$0xff]  ;;  %v38_v36 = vld [vmem:[%s638_s1 + $0xb8] sm:$0xff] }
   0x9   :  { %v51_v32 = vld [vmem:[%s638_s1 + $0x120] sm:$0xff]  ;;  %v52_v33 = vld [vmem:[%s638_s1 + $0x128] sm:$0xff]  ;;  %v354_v34 = vpack.c.bf16 %v20_v31, %v19_v29  ;;  %v69_v37 = vld [vmem:[%s638_s1 + $0x1b0] sm:$0xff]  ;;  %v356_v39 = vpack.c.bf16 %v38_v36, %v37_v35 }
   0xa   :  { %351 = vmatpush3.bf16.msra.mxu0 %v350_v21  ;;  %v386_v38 = vpack.c.bf16 %v52_v33, %v51_v32  ;;  %v70_v40 = vld [vmem:[%s638_s1 + $0x1b8] sm:$0xff]  ;;  %v21_v41 = vld [vmem:[%s638_s1 + $0x30] sm:$0xff]  ;;  %v39_v46 = vld [vmem:[%s638_s1 + $0xc0] sm:$0xff] }
   0xb   :  { %383 = vmatpush3.bf16.msra.mxu1 %v382_v25  ;;  %353 = vmatprep.subr.bf16.mxu0 %v352_v26  ;;  %v22_v42 = vld [vmem:[%s638_s1 + $0x38] sm:$0xff]  ;;  %v388_v43 = vpack.c.bf16 %v70_v40, %v69_v37  ;;  %v53_v44 = vld [vmem:[%s638_s1 + $0x130] sm:$0xff]  ;;  %v40_v50 = vld [vmem:[%s638_s1 + $0xc8] sm:$0xff] }
   0xc   :  { %385 = vmatprep.subr.bf16.mxu1 %v384_v30  ;;  %v54_v45 = vld [vmem:[%s638_s1 + $0x138] sm:$0xff]  ;;  %v71_v51 = vld [vmem:[%s638_s1 + $0x1c0] sm:$0xff]  ;;  %v72_v52 = vld [vmem:[%s638_s1 + $0x1c8] sm:$0xff]  ;;  %v358_v53 = vpack.c.bf16 %v22_v42, %v21_v41  ;;  %v360_v55 = vpack.c.bf16 %v40_v50, %v39_v46 }
   0xd   :  { %v390_v54 = vpack.c.bf16 %v54_v45, %v53_v44  ;;  %v23_v56 = vld [vmem:[%s638_s1 + $0x40] sm:$0xff]  ;;  %v24_v57 = vld [vmem:[%s638_s1 + $0x48] sm:$0xff]  ;;  %v392_v59 = vpack.c.bf16 %v72_v52, %v71_v51  ;;  %v41_v61 = vld [vmem:[%s638_s1 + $0xd0] sm:$0xff] }
   0xe   :  { %355 = vmatpush3.bf16.msra.mxu0 %v354_v34  ;;  %v55_v58 = vld [vmem:[%s638_s1 + $0x140] sm:$0xff]  ;;  %v56_v60 = vld [vmem:[%s638_s1 + $0x148] sm:$0xff]  ;;  %v42_v62 = vld [vmem:[%s638_s1 + $0xd8] sm:$0xff]  ;;  %v362_v3 = vpack.c.bf16 %v24_v57, %v23_v56 }
   0xf   :  { %387 = vmatpush3.bf16.msra.mxu1 %v386_v38  ;;  %357 = vmatprep.subr.bf16.mxu0 %v356_v39  ;;  %v73_v1 = vld [vmem:[%s638_s1 + $0x1d0] sm:$0xff]  ;;  %v74_v2 = vld [vmem:[%s638_s1 + $0x1d8] sm:$0xff]  ;;  %v394_v4 = vpack.c.bf16 %v56_v60, %v55_v58  ;;  %v364_v5 = vpack.c.bf16 %v42_v62, %v41_v61  ;;  %v43_v11 = vld [vmem:[%s638_s1 + $0xe0] sm:$0xff] }
  0x10   :  { %389 = vmatprep.subr.bf16.mxu1 %v388_v43  ;;  %v25_v6 = vld [vmem:[%s638_s1 + $0x50] sm:$0xff]  ;;  %v26_v7 = vld [vmem:[%s638_s1 + $0x58] sm:$0xff]  ;;  %v396_v9 = vpack.c.bf16 %v74_v2, %v73_v1  ;;  %v44_v12 = vld [vmem:[%s638_s1 + $0xe8] sm:$0xff] }
  0x11   :  { %v57_v8 = vld [vmem:[%s638_s1 + $0x150] sm:$0xff]  ;;  %v58_v10 = vld [vmem:[%s638_s1 + $0x158] sm:$0xff]  ;;  %v75_v14 = vld [vmem:[%s638_s1 + $0x1e0] sm:$0xff]  ;;  %v366_v16 = vpack.c.bf16 %v26_v7, %v25_v6  ;;  %v368_v19 = vpack.c.bf16 %v44_v12, %v43_v11 }
  0x12   :  { %359 = vmatpush3.bf16.msra.mxu0 %v358_v53  ;;  %v76_v15 = vld [vmem:[%s638_s1 + $0x1e8] sm:$0xff]  ;;  %v27_v17 = vld [vmem:[%s638_s1 + $0x60] sm:$0xff]  ;;  %v398_v18 = vpack.c.bf16 %v58_v10, %v57_v8  ;;  %v45_v25 = vld [vmem:[%s638_s1 + $0xf0] sm:$0xff] }
  0x13   :  { %391 = vmatpush3.bf16.msra.mxu1 %v390_v54  ;;  %361 = vmatprep.subr.bf16.mxu0 %v360_v55  ;;  %v28_v20 = vld [vmem:[%s638_s1 + $0x68] sm:$0xff]  ;;  %v59_v21 = vld [vmem:[%s638_s1 + $0x160] sm:$0xff]  ;;  %v400_v23 = vpack.c.bf16 %v76_v15, %v75_v14  ;;  %v46_v26 = vld [vmem:[%s638_s1 + $0xf8] sm:$0xff] }
  0x14   :  { %393 = vmatprep.subr.bf16.mxu1 %v392_v59  ;;  %v14_v22 = vld [vmem:[%s639_s0] sm:$0xff]  ;;  %v60_v24 = vld [vmem:[%s638_s1 + $0x168] sm:$0xff]  ;;  %v77_v29 = vld [vmem:[%s638_s1 + $0x1f0] sm:$0xff]  ;;  %v370_v31 = vpack.c.bf16 %v28_v20, %v27_v17  ;;  %v372_v35 = vpack.c.bf16 %v46_v26, %v45_v25 }
  0x15   :  { %v87_v27 = vrot.slane %v14_v22, %v86_v13  ;;  %v80_v28 = vcombine.high %v14_v22, %v14_v22  ;;  %v78_v30 = vld [vmem:[%s638_s1 + $0x1f8] sm:$0xff]  ;;  %v402_v34 = vpack.c.bf16 %v60_v24, %v59_v21  ;;  %v29_v36 = vld [vmem:[%s638_s1 + $0x70] sm:$0xff]  ;;  %v273_v51 = vld [vmem:[%s641_s2] ss:$0 sm:$0xff] }
  0x16   :  { %363 = vmatpush3.bf16.msra.mxu0 %v362_v3  ;;  %v30_v37 = vld [vmem:[%s638_s1 + $0x78] sm:$0xff]  ;;  %v404_v38 = vpack.c.bf16 %v78_v30, %v77_v29  ;;  %v61_v39 = vld [vmem:[%s638_s1 + $0x170] sm:$0xff] }
  0x17   :  { %395 = vmatpush3.bf16.msra.mxu1 %v394_v4  ;;  %365 = vmatprep.subr.bf16.mxu0 %v364_v5  ;;  %v95_v32 = vcombine.high %v87_v27, %v87_v27  ;;  %v94_v33 = vrot.slane %v80_v28, %v86_v13  ;;  %v62_v40 = vld [vmem:[%s638_s1 + $0x178] sm:$0xff]  ;;  %v374_v42 = vpack.c.bf16 %v30_v37, %v29_v36 }
  0x18   :  { %397 = vmatprep.subr.bf16.mxu1 %v396_v9  ;;  %v406_v43 = vpack.c.bf16 %v62_v40, %v61_v39 }
  0x19   :  { %165 = vmatprep.mubr.f32.mxu0 %v95_v32  ;;  %v96_v41 = vcombine.high %v94_v33, %v94_v33 }
  0x1a   :  { %367 = vmatpush3.bf16.msra.mxu0 %v366_v16 }
  0x1b   :  { %399 = vmatpush3.bf16.msra.mxu1 %v398_v18  ;;  %369 = vmatprep.subr.bf16.mxu0 %v368_v19 }
  0x1c   :  { %401 = vmatprep.subr.bf16.mxu1 %v400_v23  ;;  %235 = vmatprep.mubr.f32.mxu1 %v96_v41 }
  0x1e   :  { %371 = vmatpush3.bf16.msra.mxu0 %v370_v31 }
  0x1f   :  { %403 = vmatpush3.bf16.msra.mxu1 %v402_v34  ;;  %373 = vmatprep.subr.bf16.mxu0 %v372_v35 }
  0x20   :  { %405 = vmatprep.subr.bf16.mxu1 %v404_v38 }
  0x22   :  { %375 = vmatpush3.bf16.msra.mxu0 %v374_v42 }
  0x23   :  { %407 = vmatpush3.bf16.msra.mxu1 %v406_v43 }
  0x25   :  { %166 = vmatmul.mubr.f32.vlgmr.msra.gmra.mrb[0].mxu0 %v87_v27 }
  0x26   :  { %236 = vmatmul.mubr.f32.vlgmr.msra.gmra.mrb[0].mxu1 %v94_v33 }
  0xf8   :  { %v306_v44 = vpop.f32.mrb[0].mxu0 }
  0xf9   :  { %v341_v45 = vpop.f32.mrb[0].mxu1  ;;  %v307_v46 = vpop.f32.mrb[1].mxu0 }
  0xfa   :  { %v308_v47 = vadd.f32 %v307_v46, %v306_v44  ;;  %v342_v48 = vpop.f32.mrb[1].mxu1 }
  0xfb   :  { %v343_v49 = vadd.f32 %v342_v48, %v341_v45 }
  0xfd   :  { %v238_v50 = vadd.f32 %v343_v49, %v308_v47 }
  0xff   :  { %246 = vst.msk [vmem:[%s640_s3] sm:$0x3] %vm245_vm0, %v238_v50 }
 0x106   :  { %v258_v52 = vld [vmem:[%s640_s3] sm:$0x3] }
 0x107   :  { %v266_v53 = vadd.f32 %v273_v51, %v258_v52 }
 0x109   :  { %268 = vst.msk [vmem:[%s640_s3] sm:$0x3] %vm245_vm0, %v266_v53 }

// kernel: encoder_forward.6
= control target key start
LH: loop header
LB: loop body
LE: loop exit
PB: predicated region body
PF: predicated region fallthrough
CT: control target
= control target key end

     0   :  { %s8739_s12 = smov 0   ;;  %s8741_s13 = smov 0   ;;  %s9841_s0 = inlined_call_operand.vmem [shape: bf16[2,25088], index: 0, kind: input, shape index: {}]   ;;  %s9842_s1 = inlined_call_operand.vmem [shape: bf16[2,4,6272,256], index: 1, kind: input, shape index: {}]   ;;  %s9843_s2 = inlined_call_operand.vmem [shape: f32[1,512], index: 2, kind: input, shape index: {}]   ;;  %s9844_s3 = inlined_call_operand.vmem [shape: f32[2,512], index: 3, kind: output, shape index: {}]  }
   0x1   :  { %s8743_s14 = smov 0   ;;  %s8745_s15 = smov 0  }
   0x2   :  { %s8747_s16 = smov 0  }
   0x3 LB: > { %s25_s17 = sadd.s32 1, %s8705_s14  ;;  %s28_s18 = sadd.s32 1, %s8709_s15  ;;  %s8713_s16 = sphi %s8747_s16, %s13_s16   ;;  %s8709_s15 = sphi %s8745_s15, %s9848_s15   ;;  %s8705_s14 = sphi %s8743_s14, %s9847_s14   ;;  %s8701_s13 = sphi %s8741_s13, %s9846_s13   ;;  %s8697_s12 = sphi %s8739_s12, %s9845_s12  }
   0x4   : > { %p26_p0 = scmp.ge.s32.totalorder %s25_s17, 4  ;;  %p6553_p1 = scmp.ge.s32.totalorder %s8713_s16, 1 }
   0x5   : > { %p190_p2 = scmp.lt.s32.totalorder %s8713_s16, 9 }
   0x6   : > { %s9850_s17 = smov (%p26_p0, %s25_s17), 0  ;;  %s9852_s18 = smov (!%p26_p0, %s28_s18), %s8709_s15 }
   0x7   : > { %p191_p3 = pnand %p6553_p1, %p190_p2  ;;  %p30_p4 = scmp.ge.s32.totalorder %s9852_s18, 2 }
   0x8   : > { %p243_p5 = scmp.lt.s32.totalorder (!%p191_p3), %s8701_s13, 1  ;;  %p245_p6 = scmp.lt.s32.totalorder (!%p191_p3), %s8697_s12, 3  ;;  %v8715_v36 = vmov (!%p191_p3), 1966171168   ;;  %v1070_v38 = vlaneseq (!%p191_p3) }
   0x9   : > { %s9854_s18 = smov (%p30_p4, %s9852_s18), 0  ;;  %194 = sbr.rel (%p191_p3) target bundleno = 1072 (0x430), region = 32 }
   0xa   : > { %s6555_s19 = sshll.u32 (!%p191_p3), %s8701_s13, 1  ;;  %s234_s8 = smul.u32 (!%p191_p3), 49, %s8697_s12  ;;  %v1068_v37 = vunpack.c.l.s4 (!%p191_p3), %v8715_v36  ;;  %v8830_v43 = vshrl.u32 (!%p191_p3), %v1070_v38, 7 }
   0xb   : > { %p253_p7 = scmp.lt.s32.totalorder (!%p191_p3), %s6555_s19, 3  ;;  %p7343_p9 = scmp.ne.s32.totalorder (!%p191_p3), %s8697_s12, 0 }
   0xc   : > { %p237_p8 = scmp.lt.s32.totalorder (!%p191_p3), %s234_s8, 195  ;;  %v1069_v42 = vunpack.c.0.s8 (!%p191_p3), %v1068_v37 }
   0xe   : > { %v8843_v49 = vsub.s32 (!%p191_p3), %v1069_v42, %v8830_v43 }
  0x10   : > { %s9856_s13 = smov (!%p243_p5, %s8701_s13), 1  ;;  %s9858_s19 = smov (!%p253_p7, %s6555_s19), 3 }
  0x11   : > { %s246_s20 = scalar_select %p245_p6, %s8697_s12, 3 }
  0x12   : > { %s7444_s21 = smul.u32 6272, %s9856_s13  ;;  %s255_s27 = scalar_lea.vmem %s9843_s2, %s9858_s19 }
  0x13   : > { %s7443_s22 = smul.u32 1568, %s246_s20  ;;  %s6557_s4 = sshll.u32 %s9858_s19, 1 }
  0x14   : > { %s8788_s7 = scalar_lea.vmem %s9844_s3, %s6557_s4  ;;  %s9860_s8 = smov (!%p237_p8, %s234_s8), 195 }
  0x15   : > { %s249_s23 = sadd.s32 %s7444_s21, %s7443_s22  ;;  %s8840_s11 = scalar_lea.vmem %s9841_s0, %s9860_s8 }
  0x16   : > { %s6554_s24 = sshll.u32 %s249_s23, 2  ;;  %v8848_v52 = vld [vmem:[%s8840_s11] sm:$0xff]  ;;  %v8855_v56 = vld [vmem:[%s8840_s11 + $0x18] sm:$0xff] }
  0x17   : > { %s8782_s30 = scalar_lea.vmem %s9842_s1, %s6554_s24  ;;  %v1073_v54 = vrot.slane %v8848_v52, %v8843_v49  ;;  %v1220_v60 = vrot.slane %v8855_v56, %v8843_v49 }
  0x18   : > { %v7489_v0 = vld [vmem:[%s8782_s30 + $0x4] ss:$8 sps:$4 sm:$0xff]   ;;  %v7493_v2 = vld [vmem:[%s8782_s30] ss:$8 sps:$4 sm:$0xff]   ;;  %v7495_v4 = vld [vmem:[%s8782_s30 + $0x14] ss:$8 sps:$4 sm:$0xff]  }
  0x19   : > { %v7491_v1 = vld [vmem:[%s8782_s30 + $0xc04] ss:$8 sps:$4 sm:$0xff]   ;;  %5343 = vmatprep.subr.bf16.mxu1 %v7489_v0  ;;  %v7494_v3 = vld [vmem:[%s8782_s30 + $0xc00] ss:$8 sps:$4 sm:$0xff]   ;;  %v7497_v5 = vld [vmem:[%s8782_s30 + $0xc14] ss:$8 sps:$4 sm:$0xff]   ;;  %v1081_v59 = vcombine.high %v1073_v54, %v1073_v54  ;;  %v1228_v62 = vcombine.high %v1220_v60, %v1220_v60 }
  0x1a   : > { %5835 = vmatprep.subr.bf16.mxu0 %v7491_v1  ;;  %5344 = vmatpush1.bf16.msra.mxu1 %v7493_v2  ;;  %v7499_v6 = vld [vmem:[%s8782_s30 + $0x10] ss:$8 sps:$4 sm:$0xff]   ;;  %v7501_v8 = vld [vmem:[%s8782_s30 + $0x24] ss:$8 sps:$4 sm:$0xff]   ;;  %v7505_v10 = vld [vmem:[%s8782_s30 + $0x20] ss:$8 sps:$4 sm:$0xff]  }
  0x1b   : > { %5836 = vmatpush1.bf16.msra.mxu0 %v7494_v3  ;;  %5345 = vmatprep.subr.bf16.mxu1 %v7495_v4  ;;  %v7500_v7 = vld [vmem:[%s8782_s30 + $0xc10] ss:$8 sps:$4 sm:$0xff]   ;;  %v7503_v9 = vld [vmem:[%s8782_s30 + $0xc24] ss:$8 sps:$4 sm:$0xff]   ;;  %v7506_v11 = vld [vmem:[%s8782_s30 + $0xc20] ss:$8 sps:$4 sm:$0xff]   ;;  %v1103_v61 = vrot.slane %v1081_v59, %v8843_v49  ;;  %v1250_v3 = vrot.slane %v1228_v62, %v8843_v49 }
  0x1c   : > { %5837 = vmatprep.subr.bf16.mxu0 %v7497_v5  ;;  %v7507_v12 = vld [vmem:[%s8782_s30 + $0x34] ss:$8 sps:$4 sm:$0xff]   ;;  %v7511_v14 = vld [vmem:[%s8782_s30 + $0x30] ss:$8 sps:$4 sm:$0xff]   ;;  %v7513_v16 = vld [vmem:[%s8782_s30 + $0x44] ss:$8 sps:$4 sm:$0xff]  }
  0x1d   : > { %v7509_v13 = vld [vmem:[%s8782_s30 + $0xc34] ss:$8 sps:$4 sm:$0xff]   ;;  %v7512_v15 = vld [vmem:[%s8782_s30 + $0xc30] ss:$8 sps:$4 sm:$0xff]   ;;  %v7515_v17 = vld [vmem:[%s8782_s30 + $0xc44] ss:$8 sps:$4 sm:$0xff]   ;;  %5375 = vmatprep.mubr.bf16.mxu1 %v1103_v61  ;;  %5867 = vmatprep.mubr.bf16.mxu0 %v1250_v3 }
  0x1e   : > { %5346 = vmatpush1.bf16.msra.mxu1 %v7499_v6  ;;  %v7517_v18 = vld [vmem:[%s8782_s30 + $0x40] ss:$8 sps:$4 sm:$0xff]   ;;  %v7519_v20 = vld [vmem:[%s8782_s30 + $0x54] ss:$8 sps:$4 sm:$0xff]   ;;  %v7523_v22 = vld [vmem:[%s8782_s30 + $0x50] ss:$8 sps:$4 sm:$0xff]  }
  0x1f   : > { %5838 = vmatpush1.bf16.msra.mxu0 %v7500_v7  ;;  %5347 = vmatprep.subr.bf16.mxu1 %v7501_v8  ;;  %v7518_v19 = vld [vmem:[%s8782_s30 + $0xc40] ss:$8 sps:$4 sm:$0xff]   ;;  %v7521_v21 = vld [vmem:[%s8782_s30 + $0xc54] ss:$8 sps:$4 sm:$0xff]   ;;  %v7524_v23 = vld [vmem:[%s8782_s30 + $0xc50] ss:$8 sps:$4 sm:$0xff]  }
  0x20   : > { %5839 = vmatprep.subr.bf16.mxu0 %v7503_v9  ;;  %v7525_v24 = vld [vmem:[%s8782_s30 + $0x64] ss:$8 sps:$4 sm:$0xff]   ;;  %v7529_v26 = vld [vmem:[%s8782_s30 + $0x60] ss:$8 sps:$4 sm:$0xff]   ;;  %v7531_v28 = vld [vmem:[%s8782_s30 + $0x74] ss:$8 sps:$4 sm:$0xff]  }
  0x21   : > { %v7527_v25 = vld [vmem:[%s8782_s30 + $0xc64] ss:$8 sps:$4 sm:$0xff]   ;;  %v7530_v27 = vld [vmem:[%s8782_s30 + $0xc60] ss:$8 sps:$4 sm:$0xff]   ;;  %v7533_v29 = vld [vmem:[%s8782_s30 + $0xc74] ss:$8 sps:$4 sm:$0xff]  }
  0x22   : > { %5348 = vmatpush1.bf16.msra.mxu1 %v7505_v10  ;;  %v7535_v30 = vld [vmem:[%s8782_s30 + $0x70] ss:$8 sps:$4 sm:$0xff]   ;;  %v7537_v32 = vld [vmem:[%s8782_s30 + $0x84] ss:$8 sps:$4 sm:$0xff]   ;;  %v7541_v34 = vld [vmem:[%s8782_s30 + $0x80] ss:$8 sps:$4 sm:$0xff]  }
  0x23   : > { %5840 = vmatpush1.bf16.msra.mxu0 %v7506_v11  ;;  %5349 = vmatprep.subr.bf16.mxu1 %v7507_v12  ;;  %v7536_v31 = vld [vmem:[%s8782_s30 + $0xc70] ss:$8 sps:$4 sm:$0xff]   ;;  %v7539_v33 = vld [vmem:[%s8782_s30 + $0xc84] ss:$8 sps:$4 sm:$0xff]   ;;  %v7542_v35 = vld [vmem:[%s8782_s30 + $0xc80] ss:$8 sps:$4 sm:$0xff]  }
  0x24   : > { %5841 = vmatprep.subr.bf16.mxu0 %v7509_v13  ;;  %v7543_v39 = vld [vmem:[%s8782_s30 + $0x94] ss:$8 sps:$4 sm:$0xff]   ;;  %v7547_v41 = vld [vmem:[%s8782_s30 + $0x90] ss:$8 sps:$4 sm:$0xff]   ;;  %v7549_v45 = vld [vmem:[%s8782_s30 + $0xa4] ss:$8 sps:$4 sm:$0xff]  }
  0x25   : > { %v7545_v40 = vld [vmem:[%s8782_s30 + $0xc94] ss:$8 sps:$4 sm:$0xff]   ;;  %v7548_v44 = vld [vmem:[%s8782_s30 + $0xc90] ss:$8 sps:$4 sm:$0xff]   ;;  %v7551_v46 = vld [vmem:[%s8782_s30 + $0xca4] ss:$8 sps:$4 sm:$0xff]  }
  0x26   : > { %5350 = vmatpush1.bf16.msra.mxu1 %v7511_v14  ;;  %v7553_v47 = vld [vmem:[%s8782_s30 + $0xa0] ss:$8 sps:$4 sm:$0xff]   ;;  %v7555_v50 = vld [vmem:[%s8782_s30 + $0xb4] ss:$8 sps:$4 sm:$0xff]   ;;  %v7559_v53 = vld [vmem:[%s8782_s30 + $0xb0] ss:$8 sps:$4 sm:$0xff]  }
  0x27   : > { %5842 = vmatpush1.bf16.msra.mxu0 %v7512_v15  ;;  %5351 = vmatprep.subr.bf16.mxu1 %v7513_v16  ;;  %v7554_v48 = vld [vmem:[%s8782_s30 + $0xca0] ss:$8 sps:$4 sm:$0xff]   ;;  %v7557_v51 = vld [vmem:[%s8782_s30 + $0xcb4] ss:$8 sps:$4 sm:$0xff]   ;;  %v7560_v55 = vld [vmem:[%s8782_s30 + $0xcb0] ss:$8 sps:$4 sm:$0xff]   ;;  %v8880_v16 = vrot.slane %v1073_v54, %v8843_v49 }
  0x28   : > { %5843 = vmatprep.subr.bf16.mxu0 %v7515_v17  ;;  %v7561_v57 = vld [vmem:[%s8782_s30 + $0xc4] ss:$8 sps:$4 sm:$0xff]   ;;  %v7565_v63 = vld [vmem:[%s8782_s30 + $0xc0] ss:$8 sps:$4 sm:$0xff]   ;;  %v7567_v1 = vld [vmem:[%s8782_s30 + $0xd4] ss:$8 sps:$4 sm:$0xff]   ;;  %v8883_v17 = vrot.slane %v1220_v60, %v8843_v49 }
  0x29   : > { %v7563_v58 = vld [vmem:[%s8782_s30 + $0xcc4] ss:$8 sps:$4 sm:$0xff]   ;;  %v7566_v0 = vld [vmem:[%s8782_s30 + $0xcc0] ss:$8 sps:$4 sm:$0xff]   ;;  %v7569_v2 = vld [vmem:[%s8782_s30 + $0xcd4] ss:$8 sps:$4 sm:$0xff]  }
  0x2a   : > { %5352 = vmatpush1.bf16.msra.mxu1 %v7517_v18  ;;  %v7571_v4 = vld [vmem:[%s8782_s30 + $0xd0] ss:$8 sps:$4 sm:$0xff]   ;;  %v7573_v6 = vld [vmem:[%s8782_s30 + $0xe4] ss:$8 sps:$4 sm:$0xff]   ;;  %v7577_v8 = vld [vmem:[%s8782_s30 + $0xe0] ss:$8 sps:$4 sm:$0xff]  }
  0x2b   : > { %5844 = vmatpush1.bf16.msra.mxu0 %v7518_v19  ;;  %5353 = vmatprep.subr.bf16.mxu1 %v7519_v20  ;;  %v7572_v5 = vld [vmem:[%s8782_s30 + $0xcd0] ss:$8 sps:$4 sm:$0xff]   ;;  %v7575_v7 = vld [vmem:[%s8782_s30 + $0xce4] ss:$8 sps:$4 sm:$0xff]   ;;  %v7578_v9 = vld [vmem:[%s8782_s30 + $0xce0] ss:$8 sps:$4 sm:$0xff]  }
  0x2c   : > { %5845 = vmatprep.subr.bf16.mxu0 %v7521_v21  ;;  %v7579_v10 = vld [vmem:[%s8782_s30 + $0xf4] ss:$8 sps:$4 sm:$0xff]   ;;  %v7583_v12 = vld [vmem:[%s8782_s30 + $0xf0] ss:$8 sps:$4 sm:$0xff]   ;;  %v7588_v14 = vld [vmem:[%s8782_s30 + $0x104] ss:$8 sps:$4 sm:$0xff]  }
  0x2d   : > { %v7581_v11 = vld [vmem:[%s8782_s30 + $0xcf4] ss:$8 sps:$4 sm:$0xff]   ;;  %v7584_v13 = vld [vmem:[%s8782_s30 + $0xcf0] ss:$8 sps:$4 sm:$0xff]   ;;  %v7592_v15 = vld [vmem:[%s8782_s30 + $0xd04] ss:$8 sps:$4 sm:$0xff]  }
  0x2e   : > { %5354 = vmatpush1.bf16.msra.mxu1 %v7523_v22  ;;  %v7586_v18 = vld [vmem:[%s8782_s30 + $0x100] ss:$8 sps:$4 sm:$0xff]   ;;  %v7595_v20 = vld [vmem:[%s8782_s30 + $0x114] ss:$8 sps:$4 sm:$0xff]   ;;  %v1113_v22 = vcombine.high %v1103_v61, %v1103_v61  ;;  %v7625_v42 = vld [vmem:[%s8782_s30 + $0x164] ss:$8 sps:$4 sm:$0xff]  }
  0x2f   : > { %5846 = vmatpush1.bf16.msra.mxu0 %v7524_v23  ;;  %5355 = vmatprep.subr.bf16.mxu1 %v7525_v24  ;;  %v7590_v19 = vld [vmem:[%s8782_s30 + $0xd00] ss:$8 sps:$4 sm:$0xff]   ;;  %v7598_v21 = vld [vmem:[%s8782_s30 + $0xd14] ss:$8 sps:$4 sm:$0xff]   ;;  %v1260_v23 = vcombine.high %v1250_v3, %v1250_v3  ;;  %v7593_v24 = vld [vmem:[%s8782_s30 + $0x110] ss:$8 sps:$4 sm:$0xff]  }
  0x30   : > { %5847 = vmatprep.subr.bf16.mxu0 %v7527_v25  ;;  %v7596_v25 = vld [vmem:[%s8782_s30 + $0xd10] ss:$8 sps:$4 sm:$0xff]   ;;  %v7611_v36 = vld [vmem:[%s8782_s30 + $0x140] ss:$8 sps:$4 sm:$0xff]   ;;  %v7619_v38 = vld [vmem:[%s8782_s30 + $0x154] ss:$8 sps:$4 sm:$0xff]  }
  0x31   : > { %v7614_v37 = vld [vmem:[%s8782_s30 + $0xd40] ss:$8 sps:$4 sm:$0xff]   ;;  %v7640_v54 = vld [vmem:[%s8782_s30 + $0xd84] ss:$8 sps:$4 sm:$0xff]   ;;  %v7646_v59 = vld [vmem:[%s8782_s30 + $0xd94] ss:$8 sps:$4 sm:$0xff]  }
  0x32   : > { %5356 = vmatpush1.bf16.msra.mxu1 %v7529_v26  ;;  %v7601_v26 = vld [vmem:[%s8782_s30 + $0x124] ss:$8 sps:$4 sm:$0xff]   ;;  %v7641_v60 = vld [vmem:[%s8782_s30 + $0x190] ss:$8 sps:$4 sm:$0xff]   ;;  %v7658_v3 = vld [vmem:[%s8782_s30 + $0xdb4] ss:$8 sps:$4 sm:$0xff]  }
  0x33   : > { %5848 = vmatpush1.bf16.msra.mxu0 %v7530_v27  ;;  %5357 = vmatprep.subr.bf16.mxu1 %v7531_v28  ;;  %v7604_v27 = vld [vmem:[%s8782_s30 + $0xd24] ss:$8 sps:$4 sm:$0xff]   ;;  %v7599_v28 = vld [vmem:[%s8782_s30 + $0x120] ss:$8 sps:$4 sm:$0xff]   ;;  %v7644_v61 = vld [vmem:[%s8782_s30 + $0xd90] ss:$8 sps:$4 sm:$0xff]  }
  0x34   : > { %5849 = vmatprep.subr.bf16.mxu0 %v7533_v29  ;;  %v7602_v29 = vld [vmem:[%s8782_s30 + $0xd20] ss:$8 sps:$4 sm:$0xff]   ;;  %v7649_v62 = vld [vmem:[%s8782_s30 + $0x1a4] ss:$8 sps:$4 sm:$0xff]  }
  0x36   : > { %5358 = vmatpush1.bf16.msra.mxu1 %v7535_v30  ;;  %v7607_v30 = vld [vmem:[%s8782_s30 + $0x134] ss:$8 sps:$4 sm:$0xff]  }
  0x37   : > { %5850 = vmatpush1.bf16.msra.mxu0 %v7536_v31  ;;  %5359 = vmatprep.subr.bf16.mxu1 %v7537_v32  ;;  %v7610_v31 = vld [vmem:[%s8782_s30 + $0xd34] ss:$8 sps:$4 sm:$0xff]   ;;  %v7605_v32 = vld [vmem:[%s8782_s30 + $0x130] ss:$8 sps:$4 sm:$0xff]  }
  0x38   : > { %5851 = vmatprep.subr.bf16.mxu0 %v7539_v33  ;;  %v7608_v33 = vld [vmem:[%s8782_s30 + $0xd30] ss:$8 sps:$4 sm:$0xff]  }
  0x3a   : > { %5360 = vmatpush1.bf16.msra.mxu1 %v7541_v34  ;;  %v7613_v34 = vld [vmem:[%s8782_s30 + $0x144] ss:$8 sps:$4 sm:$0xff]  }
  0x3b   : > { %5852 = vmatpush1.bf16.msra.mxu0 %v7542_v35  ;;  %5361 = vmatprep.subr.bf16.mxu1 %v7543_v39  ;;  %v7616_v35 = vld [vmem:[%s8782_s30 + $0xd44] ss:$8 sps:$4 sm:$0xff]   ;;  %v7622_v39 = vld [vmem:[%s8782_s30 + $0xd54] ss:$8 sps:$4 sm:$0xff]  }
  0x3c   : > { %5853 = vmatprep.subr.bf16.mxu0 %v7545_v40  ;;  %v7617_v40 = vld [vmem:[%s8782_s30 + $0x150] ss:$8 sps:$4 sm:$0xff]  }
  0x3e   : > { %5362 = vmatpush1.bf16.msra.mxu1 %v7547_v41  ;;  %v7620_v41 = vld [vmem:[%s8782_s30 + $0xd50] ss:$8 sps:$4 sm:$0xff]  }
  0x3f   : > { %5854 = vmatpush1.bf16.msra.mxu0 %v7548_v44  ;;  %5363 = vmatprep.subr.bf16.mxu1 %v7549_v45  ;;  %v7628_v44 = vld [vmem:[%s8782_s30 + $0xd64] ss:$8 sps:$4 sm:$0xff]   ;;  %v7623_v45 = vld [vmem:[%s8782_s30 + $0x160] ss:$8 sps:$4 sm:$0xff]  }
  0x40   : > { %5855 = vmatprep.subr.bf16.mxu0 %v7551_v46  ;;  %v7626_v46 = vld [vmem:[%s8782_s30 + $0xd60] ss:$8 sps:$4 sm:$0xff]  }
  0x42   : > { %5364 = vmatpush1.bf16.msra.mxu1 %v7553_v47  ;;  %v7631_v47 = vld [vmem:[%s8782_s30 + $0x174] ss:$8 sps:$4 sm:$0xff]  }
  0x43   : > { %5856 = vmatpush1.bf16.msra.mxu0 %v7554_v48  ;;  %5365 = vmatprep.subr.bf16.mxu1 %v7555_v50  ;;  %v7634_v48 = vld [vmem:[%s8782_s30 + $0xd74] ss:$8 sps:$4 sm:$0xff]   ;;  %v7629_v50 = vld [vmem:[%s8782_s30 + $0x170] ss:$8 sps:$4 sm:$0xff]  }
  0x44   : > { %5857 = vmatprep.subr.bf16.mxu0 %v7557_v51  ;;  %v7632_v51 = vld [vmem:[%s8782_s30 + $0xd70] ss:$8 sps:$4 sm:$0xff]  }
  0x46   : > { %5366 = vmatpush1.bf16.msra.mxu1 %v7559_v53  ;;  %v7637_v53 = vld [vmem:[%s8782_s30 + $0x184] ss:$8 sps:$4 sm:$0xff]  }
  0x47   : > { %5858 = vmatpush1.bf16.msra.mxu0 %v7560_v55  ;;  %5367 = vmatprep.subr.bf16.mxu1 %v7561_v57  ;;  %v7635_v55 = vld [vmem:[%s8782_s30 + $0x180] ss:$8 sps:$4 sm:$0xff]  }
  0x48   : > { %5859 = vmatprep.subr.bf16.mxu0 %v7563_v58  ;;  %v7638_v57 = vld [vmem:[%s8782_s30 + $0xd80] ss:$8 sps:$4 sm:$0xff]   ;;  %v7643_v58 = vld [vmem:[%s8782_s30 + $0x194] ss:$8 sps:$4 sm:$0xff]  }
  0x4a   : > { %5368 = vmatpush1.bf16.msra.mxu1 %v7565_v63  ;;  %v7652_v63 = vld [vmem:[%s8782_s30 + $0xda4] ss:$8 sps:$4 sm:$0xff]  }
  0x4b   : > { %5860 = vmatpush1.bf16.msra.mxu0 %v7566_v0  ;;  %5369 = vmatprep.subr.bf16.mxu1 %v7567_v1  ;;  %v7647_v0 = vld [vmem:[%s8782_s30 + $0x1a0] ss:$8 sps:$4 sm:$0xff]  }
  0x4c   : > { %5861 = vmatprep.subr.bf16.mxu0 %v7569_v2  ;;  %v7650_v1 = vld [vmem:[%s8782_s30 + $0xda0] ss:$8 sps:$4 sm:$0xff]   ;;  %v7655_v2 = vld [vmem:[%s8782_s30 + $0x1b4] ss:$8 sps:$4 sm:$0xff]  }
  0x4e   : > { %5370 = vmatpush1.bf16.msra.mxu1 %v7571_v4  ;;  %v7653_v4 = vld [vmem:[%s8782_s30 + $0x1b0] ss:$8 sps:$4 sm:$0xff]  }
  0x4f   : > { %5862 = vmatpush1.bf16.msra.mxu0 %v7572_v5  ;;  %5371 = vmatprep.subr.bf16.mxu1 %v7573_v6  ;;  %v7656_v5 = vld [vmem:[%s8782_s30 + $0xdb0] ss:$8 sps:$4 sm:$0xff]   ;;  %v7661_v6 = vld [vmem:[%s8782_s30 + $0x1c4] ss:$8 sps:$4 sm:$0xff]  }
  0x50   : > { %5863 = vmatprep.subr.bf16.mxu0 %v7575_v7  ;;  %v7664_v7 = vld [vmem:[%s8782_s30 + $0xdc4] ss:$8 sps:$4 sm:$0xff]  }
  0x52   : > { %5372 = vmatpush1.bf16.msra.mxu1 %v7577_v8  ;;  %v7659_v8 = vld [vmem:[%s8782_s30 + $0x1c0] ss:$8 sps:$4 sm:$0xff]  }
  0x53   : > { %5864 = vmatpush1.bf16.msra.mxu0 %v7578_v9  ;;  %5373 = vmatprep.subr.bf16.mxu1 %v7579_v10  ;;  %v7662_v9 = vld [vmem:[%s8782_s30 + $0xdc0] ss:$8 sps:$4 sm:$0xff]   ;;  %v7667_v10 = vld [vmem:[%s8782_s30 + $0x1d4] ss:$8 sps:$4 sm:$0xff]  }
  0x54   : > { %5865 = vmatprep.subr.bf16.mxu0 %v7581_v11  ;;  %v7670_v11 = vld [vmem:[%s8782_s30 + $0xdd4] ss:$8 sps:$4 sm:$0xff]  }
  0x56   : > { %5374 = vmatpush1.bf16.msra.mxu1 %v7583_v12  ;;  %v7665_v12 = vld [vmem:[%s8782_s30 + $0x1d0] ss:$8 sps:$4 sm:$0xff]  }
  0x57   : > { %5866 = vmatpush1.bf16.msra.mxu0 %v7584_v13  ;;  %5384 = vmatprep.subr.bf16.mxu1 %v7588_v14  ;;  %v7668_v13 = vld [vmem:[%s8782_s30 + $0xdd0] ss:$8 sps:$4 sm:$0xff]   ;;  %v7673_v14 = vld [vmem:[%s8782_s30 + $0x1e4] ss:$8 sps:$4 sm:$0xff]  }
  0x58   : > { %5876 = vmatprep.subr.bf16.mxu0 %v7592_v15  ;;  %v7676_v15 = vld [vmem:[%s8782_s30 + $0xde4] ss:$8 sps:$4 sm:$0xff]  }
  0x59   : > { %5376 = vmatmul.mubr.bf16.vlgmr.msra.gmra.mrb[0].mxu1 %v8880_v16 }
  0x5a   : > { %5868 = vmatmul.mubr.bf16.vlgmr.msra.gmra.mrb[0].mxu0 %v8883_v17  ;;  %5385 = vmatpush1.bf16.msra.mxu1 %v7586_v18  ;;  %v1066_v18 = vcombine.high %v8848_v52, %v8848_v52  ;;  %v7677_v52 = vld [vmem:[%s8782_s30 + $0x1f0] ss:$8 sps:$4 sm:$0xff]  }
  0x5b   : > { %5877 = vmatpush1.bf16.msra.mxu0 %v7590_v19  ;;  %5386 = vmatprep.subr.bf16.mxu1 %v7595_v20  ;;  %v1213_v19 = vcombine.high %v8855_v56, %v8855_v56  ;;  %v7671_v20 = vld [vmem:[%s8782_s30 + $0x1e0] ss:$8 sps:$4 sm:$0xff]   ;;  %v7680_v56 = vld [vmem:[%s8782_s30 + $0xdf0] ss:$8 sps:$4 sm:$0xff]  }
  0x5c   : > { %5878 = vmatprep.subr.bf16.mxu0 %v7598_v21  ;;  %5416 = vmatprep.mubr.bf16.mxu1 %v1113_v22  ;;  %v7674_v21 = vld [vmem:[%s8782_s30 + $0xde0] ss:$8 sps:$4 sm:$0xff]   ;;  %v7679_v22 = vld [vmem:[%s8782_s30 + $0x1f4] ss:$8 sps:$4 sm:$0xff]  }
  0x5d   : > { %5908 = vmatprep.mubr.bf16.mxu0 %v1260_v23  ;;  %v7682_v23 = vld [vmem:[%s8782_s30 + $0xdf4] ss:$8 sps:$4 sm:$0xff]  }
  0x5e   : > { %5387 = vmatpush1.bf16.msra.mxu1 %v7593_v24  ;;  %v8952_v24 = vrot.slane %v1066_v18, %v8843_v49  ;;  %v7749_v18 = vld [vmem:[%s8782_s30 + $0x2b0] ss:$8 sps:$4 sm:$0xff]  }
  0x5f   : > { %5879 = vmatpush1.bf16.msra.mxu0 %v7596_v25  ;;  %5388 = vmatprep.subr.bf16.mxu1 %v7601_v26  ;;  %v8955_v25 = vrot.slane %v1213_v19, %v8843_v49  ;;  %v7685_v26 = vld [vmem:[%s8782_s30 + $0x204] ss:$8 sps:$4 sm:$0xff]   ;;  %v7752_v19 = vld [vmem:[%s8782_s30 + $0xeb0] ss:$8 sps:$4 sm:$0xff]  }
  0x60   : > { %5880 = vmatprep.subr.bf16.mxu0 %v7604_v27  ;;  %v7688_v27 = vld [vmem:[%s8782_s30 + $0xe04] ss:$8 sps:$4 sm:$0xff]  }
  0x62   : > { %5389 = vmatpush1.bf16.msra.mxu1 %v7599_v28  ;;  %v1082_v28 = vcombine.high %v8952_v24, %v8952_v24 }
  0x63   : > { %5881 = vmatpush1.bf16.msra.mxu0 %v7602_v29  ;;  %5390 = vmatprep.subr.bf16.mxu1 %v7607_v30  ;;  %v1229_v29 = vcombine.high %v8955_v25, %v8955_v25  ;;  %v1111_v30 = vcombine.high %v8880_v16, %v8880_v16 }
  0x64   : > { %5882 = vmatprep.subr.bf16.mxu0 %v7610_v31  ;;  %v1258_v31 = vcombine.high %v8883_v17, %v8883_v17  ;;  %v7689_v17 = vld [vmem:[%s8782_s30 + $0x210] ss:$8 sps:$4 sm:$0xff]  }
  0x65   : > { %v8977_v16 = vrot.slane %v1229_v29, %v8843_v49  ;;  %v7772_v29 = vld [vmem:[%s8782_s30 + $0xee4] ss:$8 sps:$4 sm:$0xff]  }
  0x66   : > { %5391 = vmatpush1.bf16.msra.mxu1 %v7605_v32  ;;  %v7683_v32 = vld [vmem:[%s8782_s30 + $0x200] ss:$8 sps:$4 sm:$0xff]  }
  0x67   : > { %5883 = vmatpush1.bf16.msra.mxu0 %v7608_v33  ;;  %5392 = vmatprep.subr.bf16.mxu1 %v7613_v34  ;;  %v7686_v33 = vld [vmem:[%s8782_s30 + $0xe00] ss:$8 sps:$4 sm:$0xff]   ;;  %v7691_v34 = vld [vmem:[%s8782_s30 + $0x214] ss:$8 sps:$4 sm:$0xff]  }
  0x68   : > { %5884 = vmatprep.subr.bf16.mxu0 %v7616_v35  ;;  %v7694_v35 = vld [vmem:[%s8782_s30 + $0xe14] ss:$8 sps:$4 sm:$0xff]  }
  0x6a   : > { %5393 = vmatpush1.bf16.msra.mxu1 %v7611_v36  ;;  %v8974_v36 = vrot.slane %v1082_v28, %v8843_v49  ;;  %v7769_v28 = vld [vmem:[%s8782_s30 + $0x2e4] ss:$8 sps:$4 sm:$0xff]  }
  0x6b   : > { %5885 = vmatpush1.bf16.msra.mxu0 %v7614_v37  ;;  %5394 = vmatprep.subr.bf16.mxu1 %v7619_v38  ;;  %v7692_v37 = vld [vmem:[%s8782_s30 + $0xe10] ss:$8 sps:$4 sm:$0xff]   ;;  %v7697_v38 = vld [vmem:[%s8782_s30 + $0x224] ss:$8 sps:$4 sm:$0xff]  }
  0x6c   : > { %5886 = vmatprep.subr.bf16.mxu0 %v7622_v39  ;;  %v7700_v39 = vld [vmem:[%s8782_s30 + $0xe24] ss:$8 sps:$4 sm:$0xff]  }
  0x6e   : > { %5395 = vmatpush1.bf16.msra.mxu1 %v7617_v40  ;;  %v7695_v40 = vld [vmem:[%s8782_s30 + $0x220] ss:$8 sps:$4 sm:$0xff]  }
  0x6f   : > { %5887 = vmatpush1.bf16.msra.mxu0 %v7620_v41  ;;  %5396 = vmatprep.subr.bf16.mxu1 %v7625_v42  ;;  %v7698_v41 = vld [vmem:[%s8782_s30 + $0xe20] ss:$8 sps:$4 sm:$0xff]   ;;  %v7703_v42 = vld [vmem:[%s8782_s30 + $0x234] ss:$8 sps:$4 sm:$0xff]  }
  0x70   : > { %5888 = vmatprep.subr.bf16.mxu0 %v7628_v44  ;;  %v7706_v44 = vld [vmem:[%s8782_s30 + $0xe34] ss:$8 sps:$4 sm:$0xff]  }
  0x72   : > { %5397 = vmatpush1.bf16.msra.mxu1 %v7623_v45  ;;  %v7701_v45 = vld [vmem:[%s8782_s30 + $0x230] ss:$8 sps:$4 sm:$0xff]  }
  0x73   : > { %5889 = vmatpush1.bf16.msra.mxu0 %v7626_v46  ;;  %5398 = vmatprep.subr.bf16.mxu1 %v7631_v47  ;;  %v7704_v46 = vld [vmem:[%s8782_s30 + $0xe30] ss:$8 sps:$4 sm:$0xff]   ;;  %v7709_v47 = vld [vmem:[%s8782_s30 + $0x244] ss:$8 sps:$4 sm:$0xff]  }
  0x74   : > { %5890 = vmatprep.subr.bf16.mxu0 %v7634_v48  ;;  %v7712_v48 = vld [vmem:[%s8782_s30 + $0xe44] ss:$8 sps:$4 sm:$0xff]  }
  0x76   : > { %5399 = vmatpush1.bf16.msra.mxu1 %v7629_v50  ;;  %v7707_v50 = vld [vmem:[%s8782_s30 + $0x240] ss:$8 sps:$4 sm:$0xff]  }
  0x77   : > { %5891 = vmatpush1.bf16.msra.mxu0 %v7632_v51  ;;  %5400 = vmatprep.subr.bf16.mxu1 %v7637_v53  ;;  %v7710_v51 = vld [vmem:[%s8782_s30 + $0xe40] ss:$8 sps:$4 sm:$0xff]   ;;  %v7715_v53 = vld [vmem:[%s8782_s30 + $0x254] ss:$8 sps:$4 sm:$0xff]  }
  0x78   : > { %5892 = vmatprep.subr.bf16.mxu0 %v7640_v54  ;;  %v7718_v54 = vld [vmem:[%s8782_s30 + $0xe54] ss:$8 sps:$4 sm:$0xff]  }
  0x7a   : > { %5401 = vmatpush1.bf16.msra.mxu1 %v7635_v55  ;;  %v7713_v55 = vld [vmem:[%s8782_s30 + $0x250] ss:$8 sps:$4 sm:$0xff]  }
  0x7b   : > { %5893 = vmatpush1.bf16.msra.mxu0 %v7638_v57  ;;  %5402 = vmatprep.subr.bf16.mxu1 %v7643_v58  ;;  %v7716_v57 = vld [vmem:[%s8782_s30 + $0xe50] ss:$8 sps:$4 sm:$0xff]   ;;  %v7721_v58 = vld [vmem:[%s8782_s30 + $0x264] ss:$8 sps:$4 sm:$0xff]  }
  0x7c   : > { %5894 = vmatprep.subr.bf16.mxu0 %v7646_v59  ;;  %v7724_v59 = vld [vmem:[%s8782_s30 + $0xe64] ss:$8 sps:$4 sm:$0xff]  }
  0x7e   : > { %5403 = vmatpush1.bf16.msra.mxu1 %v7641_v60  ;;  %v7719_v60 = vld [vmem:[%s8782_s30 + $0x260] ss:$8 sps:$4 sm:$0xff]  }
  0x7f   : > { %5895 = vmatpush1.bf16.msra.mxu0 %v7644_v61  ;;  %5404 = vmatprep.subr.bf16.mxu1 %v7649_v62  ;;  %v7722_v61 = vld [vmem:[%s8782_s30 + $0xe60] ss:$8 sps:$4 sm:$0xff]   ;;  %v7727_v62 = vld [vmem:[%s8782_s30 + $0x274] ss:$8 sps:$4 sm:$0xff]  }
  0x80   : > { %5896 = vmatprep.subr.bf16.mxu0 %v7652_v63  ;;  %v7730_v63 = vld [vmem:[%s8782_s30 + $0xe74] ss:$8 sps:$4 sm:$0xff]  }
  0x82   : > { %5405 = vmatpush1.bf16.msra.mxu1 %v7647_v0  ;;  %v7725_v0 = vld [vmem:[%s8782_s30 + $0x270] ss:$8 sps:$4 sm:$0xff]  }
  0x83   : > { %5897 = vmatpush1.bf16.msra.mxu0 %v7650_v1  ;;  %5406 = vmatprep.subr.bf16.mxu1 %v7655_v2  ;;  %v7728_v1 = vld [vmem:[%s8782_s30 + $0xe70] ss:$8 sps:$4 sm:$0xff]   ;;  %v7733_v2 = vld [vmem:[%s8782_s30 + $0x284] ss:$8 sps:$4 sm:$0xff]  }
  0x84   : > { %5898 = vmatprep.subr.bf16.mxu0 %v7658_v3  ;;  %v7736_v3 = vld [vmem:[%s8782_s30 + $0xe84] ss:$8 sps:$4 sm:$0xff]  }
  0x86   : > { %5407 = vmatpush1.bf16.msra.mxu1 %v7653_v4  ;;  %v7731_v4 = vld [vmem:[%s8782_s30 + $0x280] ss:$8 sps:$4 sm:$0xff]  }
  0x87   : > { %5899 = vmatpush1.bf16.msra.mxu0 %v7656_v5  ;;  %5408 = vmatprep.subr.bf16.mxu1 %v7661_v6  ;;  %v7734_v5 = vld [vmem:[%s8782_s30 + $0xe80] ss:$8 sps:$4 sm:$0xff]   ;;  %v7739_v6 = vld [vmem:[%s8782_s30 + $0x294] ss:$8 sps:$4 sm:$0xff]  }
  0x88   : > { %5900 = vmatprep.subr.bf16.mxu0 %v7664_v7  ;;  %v7742_v7 = vld [vmem:[%s8782_s30 + $0xe94] ss:$8 sps:$4 sm:$0xff]  }
  0x8a   : > { %5409 = vmatpush1.bf16.msra.mxu1 %v7659_v8  ;;  %v7737_v8 = vld [vmem:[%s8782_s30 + $0x290] ss:$8 sps:$4 sm:$0xff]  }
  0x8b   : > { %5901 = vmatpush1.bf16.msra.mxu0 %v7662_v9  ;;  %5410 = vmatprep.subr.bf16.mxu1 %v7667_v10  ;;  %v7740_v9 = vld [vmem:[%s8782_s30 + $0xe90] ss:$8 sps:$4 sm:$0xff]   ;;  %v7745_v10 = vld [vmem:[%s8782_s30 + $0x2a4] ss:$8 sps:$4 sm:$0xff]  }
  0x8c   : > { %5902 = vmatprep.subr.bf16.mxu0 %v7670_v11  ;;  %v7748_v11 = vld [vmem:[%s8782_s30 + $0xea4] ss:$8 sps:$4 sm:$0xff]  }
  0x8e   : > { %5411 = vmatpush1.bf16.msra.mxu1 %v7665_v12  ;;  %v7743_v12 = vld [vmem:[%s8782_s30 + $0x2a0] ss:$8 sps:$4 sm:$0xff]  }
  0x8f   : > { %5903 = vmatpush1.bf16.msra.mxu0 %v7668_v13  ;;  %5412 = vmatprep.subr.bf16.mxu1 %v7673_v14  ;;  %v7746_v13 = vld [vmem:[%s8782_s30 + $0xea0] ss:$8 sps:$4 sm:$0xff]   ;;  %v7751_v14 = vld [vmem:[%s8782_s30 + $0x2b4] ss:$8 sps:$4 sm:$0xff]  }
  0x90   : > { %5904 = vmatprep.subr.bf16.mxu0 %v7676_v15  ;;  %v7754_v15 = vld [vmem:[%s8782_s30 + $0xeb4] ss:$8 sps:$4 sm:$0xff]  }
  0x92   : > { %5413 = vmatpush1.bf16.msra.mxu1 %v7671_v20  ;;  %v7757_v20 = vld [vmem:[%s8782_s30 + $0x2c4] ss:$8 sps:$4 sm:$0xff]  }
  0x93   : > { %5905 = vmatpush1.bf16.msra.mxu0 %v7674_v21  ;;  %5414 = vmatprep.subr.bf16.mxu1 %v7679_v22  ;;  %v7760_v21 = vld [vmem:[%s8782_s30 + $0xec4] ss:$8 sps:$4 sm:$0xff]   ;;  %v7755_v22 = vld [vmem:[%s8782_s30 + $0x2c0] ss:$8 sps:$4 sm:$0xff]  }
  0x94   : > { %5906 = vmatprep.subr.bf16.mxu0 %v7682_v23  ;;  %v7758_v23 = vld [vmem:[%s8782_s30 + $0xec0] ss:$8 sps:$4 sm:$0xff]  }
  0x96   : > { %5415 = vmatpush1.bf16.msra.mxu1 %v7677_v52  ;;  %v7763_v52 = vld [vmem:[%s8782_s30 + $0x2d4] ss:$8 sps:$4 sm:$0xff]  }
  0x97   : > { %5907 = vmatpush1.bf16.msra.mxu0 %v7680_v56  ;;  %5425 = vmatprep.subr.bf16.mxu1 %v7685_v26  ;;  %v7766_v56 = vld [vmem:[%s8782_s30 + $0xed4] ss:$8 sps:$4 sm:$0xff]   ;;  %v7761_v26 = vld [vmem:[%s8782_s30 + $0x2d0] ss:$8 sps:$4 sm:$0xff]  }
  0x98   : > { %5917 = vmatprep.subr.bf16.mxu0 %v7688_v27  ;;  %v7764_v27 = vld [vmem:[%s8782_s30 + $0xed0] ss:$8 sps:$4 sm:$0xff]  }
  0x99   : > { %5417 = vmatmul.mubr.bf16.vlgmr.msra.gmra.mrb[0].mxu1 %v1111_v30  ;;  %v7767_v30 = vld [vmem:[%s8782_s30 + $0x2e0] ss:$8 sps:$4 sm:$0xff]  }
  0x9a   : > { %5909 = vmatmul.mubr.bf16.vlgmr.msra.gmra.mrb[0].mxu0 %v1258_v31  ;;  %5426 = vmatpush1.bf16.msra.mxu1 %v7683_v32  ;;  %v7770_v31 = vld [vmem:[%s8782_s30 + $0xee0] ss:$8 sps:$4 sm:$0xff]   ;;  %v7775_v32 = vld [vmem:[%s8782_s30 + $0x2f4] ss:$8 sps:$4 sm:$0xff]  }
  0x9b   : > { %5918 = vmatpush1.bf16.msra.mxu0 %v7686_v33  ;;  %5427 = vmatprep.subr.bf16.mxu1 %v7691_v34  ;;  %v7778_v33 = vld [vmem:[%s8782_s30 + $0xef4] ss:$8 sps:$4 sm:$0xff]   ;;  %v7773_v34 = vld [vmem:[%s8782_s30 + $0x2f0] ss:$8 sps:$4 sm:$0xff]  }
  0x9c   : > { %5919 = vmatprep.subr.bf16.mxu0 %v7694_v35  ;;  %5457 = vmatprep.mubr.bf16.mxu1 %v8974_v36  ;;  %v7776_v35 = vld [vmem:[%s8782_s30 + $0xef0] ss:$8 sps:$4 sm:$0xff]  }
  0x9d   : > { %5949 = vmatprep.mubr.bf16.mxu0 %v8977_v16 }
  0x9e   : > { %5428 = vmatpush1.bf16.msra.mxu1 %v7689_v17  ;;  %v7781_v17 = vld [vmem:[%s8782_s30 + $0x304] ss:$8 sps:$4 sm:$0xff]  }
  0x9f   : > { %5920 = vmatpush1.bf16.msra.mxu0 %v7692_v37  ;;  %5429 = vmatprep.subr.bf16.mxu1 %v7697_v38  ;;  %v7784_v37 = vld [vmem:[%s8782_s30 + $0xf04] ss:$8 sps:$4 sm:$0xff]   ;;  %v9043_v38 = vrot.slane %v8952_v24, %v8843_v49  ;;  %v1114_v24 = vcombine.high %v8974_v36, %v8974_v36 }
  0xa0   : > { %5921 = vmatprep.subr.bf16.mxu0 %v7700_v39  ;;  %v9047_v39 = vrot.slane %v8955_v25, %v8843_v49  ;;  %v7785_v25 = vld [vmem:[%s8782_s30 + $0x310] ss:$8 sps:$4 sm:$0xff]   ;;  %v7793_v36 = vld [vmem:[%s8782_s30 + $0x324] ss:$8 sps:$4 sm:$0xff]  }
  0xa2   : > { %5430 = vmatpush1.bf16.msra.mxu1 %v7695_v40  ;;  %v7779_v40 = vld [vmem:[%s8782_s30 + $0x300] ss:$8 sps:$4 sm:$0xff]  }
  0xa3   : > { %5922 = vmatpush1.bf16.msra.mxu0 %v7698_v41  ;;  %5431 = vmatprep.subr.bf16.mxu1 %v7703_v42  ;;  %v7782_v41 = vld [vmem:[%s8782_s30 + $0xf00] ss:$8 sps:$4 sm:$0xff]   ;;  %v7787_v42 = vld [vmem:[%s8782_s30 + $0x314] ss:$8 sps:$4 sm:$0xff]  }
  0xa4   : > { %5923 = vmatprep.subr.bf16.mxu0 %v7706_v44  ;;  %v7790_v44 = vld [vmem:[%s8782_s30 + $0xf14] ss:$8 sps:$4 sm:$0xff]  }
  0xa6   : > { %5432 = vmatpush1.bf16.msra.mxu1 %v7701_v45  ;;  %v1261_v45 = vcombine.high %v8977_v16, %v8977_v16  ;;  %v7791_v16 = vld [vmem:[%s8782_s30 + $0x320] ss:$8 sps:$4 sm:$0xff]  }
  0xa7   : > { %5924 = vmatpush1.bf16.msra.mxu0 %v7704_v46  ;;  %5433 = vmatprep.subr.bf16.mxu1 %v7709_v47  ;;  %v7788_v46 = vld [vmem:[%s8782_s30 + $0xf10] ss:$8 sps:$4 sm:$0xff]   ;;  %v7796_v47 = vld [vmem:[%s8782_s30 + $0xf24] ss:$8 sps:$4 sm:$0xff]  }
  0xa8   : > { %5925 = vmatprep.subr.bf16.mxu0 %v7712_v48  ;;  %v7794_v48 = vld [vmem:[%s8782_s30 + $0xf20] ss:$8 sps:$4 sm:$0xff]  }
  0xaa   : > { %5434 = vmatpush1.bf16.msra.mxu1 %v7707_v50  ;;  %v7799_v50 = vld [vmem:[%s8782_s30 + $0x334] ss:$8 sps:$4 sm:$0xff]  }
  0xab   : > { %5926 = vmatpush1.bf16.msra.mxu0 %v7710_v51  ;;  %5435 = vmatprep.subr.bf16.mxu1 %v7715_v53  ;;  %v7802_v51 = vld [vmem:[%s8782_s30 + $0xf34] ss:$8 sps:$4 sm:$0xff]   ;;  %v7797_v53 = vld [vmem:[%s8782_s30 + $0x330] ss:$8 sps:$4 sm:$0xff]  }
  0xac   : > { %5927 = vmatprep.subr.bf16.mxu0 %v7718_v54  ;;  %v7800_v54 = vld [vmem:[%s8782_s30 + $0xf30] ss:$8 sps:$4 sm:$0xff]  }
  0xae   : > { %5436 = vmatpush1.bf16.msra.mxu1 %v7713_v55  ;;  %v7805_v55 = vld [vmem:[%s8782_s30 + $0x344] ss:$8 sps:$4 sm:$0xff]  }
  0xaf   : > { %5928 = vmatpush1.bf16.msra.mxu0 %v7716_v57  ;;  %5437 = vmatprep.subr.bf16.mxu1 %v7721_v58  ;;  %v7808_v57 = vld [vmem:[%s8782_s30 + $0xf44] ss:$8 sps:$4 sm:$0xff]   ;;  %v7803_v58 = vld [vmem:[%s8782_s30 + $0x340] ss:$8 sps:$4 sm:$0xff]  }
  0xb0   : > { %5929 = vmatprep.subr.bf16.mxu0 %v7724_v59  ;;  %v7806_v59 = vld [vmem:[%s8782_s30 + $0xf40] ss:$8 sps:$4 sm:$0xff]  }
  0xb2   : > { %5438 = vmatpush1.bf16.msra.mxu1 %v7719_v60  ;;  %v7811_v60 = vld [vmem:[%s8782_s30 + $0x354] ss:$8 sps:$4 sm:$0xff]  }
  0xb3   : > { %5930 = vmatpush1.bf16.msra.mxu0 %v7722_v61  ;;  %5439 = vmatprep.subr.bf16.mxu1 %v7727_v62  ;;  %v7814_v61 = vld [vmem:[%s8782_s30 + $0xf54] ss:$8 sps:$4 sm:$0xff]   ;;  %v7809_v62 = vld [vmem:[%s8782_s30 + $0x350] ss:$8 sps:$4 sm:$0xff]  }
  0xb4   : > { %5931 = vmatprep.subr.bf16.mxu0 %v7730_v63  ;;  %v7812_v63 = vld [vmem:[%s8782_s30 + $0xf50] ss:$8 sps:$4 sm:$0xff]  }
  0xb6   : > { %5440 = vmatpush1.bf16.msra.mxu1 %v7725_v0  ;;  %v7817_v0 = vld [vmem:[%s8782_s30 + $0x364] ss:$8 sps:$4 sm:$0xff]  }
  0xb7   : > { %5932 = vmatpush1.bf16.msra.mxu0 %v7728_v1  ;;  %5441 = vmatprep.subr.bf16.mxu1 %v7733_v2  ;;  %v7820_v1 = vld [vmem:[%s8782_s30 + $0xf64] ss:$8 sps:$4 sm:$0xff]   ;;  %v7815_v2 = vld [vmem:[%s8782_s30 + $0x360] ss:$8 sps:$4 sm:$0xff]  }
  0xb8   : > { %5933 = vmatprep.subr.bf16.mxu0 %v7736_v3  ;;  %v7818_v3 = vld [vmem:[%s8782_s30 + $0xf60] ss:$8 sps:$4 sm:$0xff]  }
  0xba   : > { %5442 = vmatpush1.bf16.msra.mxu1 %v7731_v4  ;;  %v7823_v4 = vld [vmem:[%s8782_s30 + $0x374] ss:$8 sps:$4 sm:$0xff]  }
  0xbb   : > { %5934 = vmatpush1.bf16.msra.mxu0 %v7734_v5  ;;  %5443 = vmatprep.subr.bf16.mxu1 %v7739_v6  ;;  %v7826_v5 = vld [vmem:[%s8782_s30 + $0xf74] ss:$8 sps:$4 sm:$0xff]   ;;  %v7821_v6 = vld [vmem:[%s8782_s30 + $0x370] ss:$8 sps:$4 sm:$0xff]  }
  0xbc   : > { %5935 = vmatprep.subr.bf16.mxu0 %v7742_v7  ;;  %v7824_v7 = vld [vmem:[%s8782_s30 + $0xf70] ss:$8 sps:$4 sm:$0xff]  }
  0xbe   : > { %5444 = vmatpush1.bf16.msra.mxu1 %v7737_v8  ;;  %v7829_v8 = vld [vmem:[%s8782_s30 + $0x384] ss:$8 sps:$4 sm:$0xff]  }
  0xbf   : > { %5936 = vmatpush1.bf16.msra.mxu0 %v7740_v9  ;;  %5445 = vmatprep.subr.bf16.mxu1 %v7745_v10  ;;  %v7832_v9 = vld [vmem:[%s8782_s30 + $0xf84] ss:$8 sps:$4 sm:$0xff]   ;;  %v7827_v10 = vld [vmem:[%s8782_s30 + $0x380] ss:$8 sps:$4 sm:$0xff]  }
  0xc0   : > { %5937 = vmatprep.subr.bf16.mxu0 %v7748_v11  ;;  %v7830_v11 = vld [vmem:[%s8782_s30 + $0xf80] ss:$8 sps:$4 sm:$0xff]  }
  0xc2   : > { %5446 = vmatpush1.bf16.msra.mxu1 %v7743_v12  ;;  %v7835_v12 = vld [vmem:[%s8782_s30 + $0x394] ss:$8 sps:$4 sm:$0xff]  }
  0xc3   : > { %5938 = vmatpush1.bf16.msra.mxu0 %v7746_v13  ;;  %5447 = vmatprep.subr.bf16.mxu1 %v7751_v14  ;;  %v7838_v13 = vld [vmem:[%s8782_s30 + $0xf94] ss:$8 sps:$4 sm:$0xff]   ;;  %v7833_v14 = vld [vmem:[%s8782_s30 + $0x390] ss:$8 sps:$4 sm:$0xff]  }
  0xc4   : > { %5939 = vmatprep.subr.bf16.mxu0 %v7754_v15  ;;  %v7836_v15 = vld [vmem:[%s8782_s30 + $0xf90] ss:$8 sps:$4 sm:$0xff]  }
  0xc6   : > { %5448 = vmatpush1.bf16.msra.mxu1 %v7749_v18  ;;  %v7841_v18 = vld [vmem:[%s8782_s30 + $0x3a4] ss:$8 sps:$4 sm:$0xff]  }
  0xc7   : > { %5940 = vmatpush1.bf16.msra.mxu0 %v7752_v19  ;;  %5449 = vmatprep.subr.bf16.mxu1 %v7757_v20  ;;  %v7844_v19 = vld [vmem:[%s8782_s30 + $0xfa4] ss:$8 sps:$4 sm:$0xff]   ;;  %v7839_v20 = vld [vmem:[%s8782_s30 + $0x3a0] ss:$8 sps:$4 sm:$0xff]  }
  0xc8   : > { %5941 = vmatprep.subr.bf16.mxu0 %v7760_v21  ;;  %v7842_v21 = vld [vmem:[%s8782_s30 + $0xfa0] ss:$8 sps:$4 sm:$0xff]  }
  0xca   : > { %5450 = vmatpush1.bf16.msra.mxu1 %v7755_v22  ;;  %v7847_v22 = vld [vmem:[%s8782_s30 + $0x3b4] ss:$8 sps:$4 sm:$0xff]  }
  0xcb   : > { %5942 = vmatpush1.bf16.msra.mxu0 %v7758_v23  ;;  %5451 = vmatprep.subr.bf16.mxu1 %v7763_v52  ;;  %v7850_v23 = vld [vmem:[%s8782_s30 + $0xfb4] ss:$8 sps:$4 sm:$0xff]   ;;  %v7845_v52 = vld [vmem:[%s8782_s30 + $0x3b0] ss:$8 sps:$4 sm:$0xff]  }
  0xcc   : > { %5943 = vmatprep.subr.bf16.mxu0 %v7766_v56  ;;  %v7848_v56 = vld [vmem:[%s8782_s30 + $0xfb0] ss:$8 sps:$4 sm:$0xff]  }
  0xce   : > { %5452 = vmatpush1.bf16.msra.mxu1 %v7761_v26  ;;  %v7853_v26 = vld [vmem:[%s8782_s30 + $0x3c4] ss:$8 sps:$4 sm:$0xff]  }
  0xcf   : > { %5944 = vmatpush1.bf16.msra.mxu0 %v7764_v27  ;;  %5453 = vmatprep.subr.bf16.mxu1 %v7769_v28  ;;  %v7856_v27 = vld [vmem:[%s8782_s30 + $0xfc4] ss:$8 sps:$4 sm:$0xff]   ;;  %v7851_v28 = vld [vmem:[%s8782_s30 + $0x3c0] ss:$8 sps:$4 sm:$0xff]  }
  0xd0   : > { %5945 = vmatprep.subr.bf16.mxu0 %v7772_v29  ;;  %v7854_v29 = vld [vmem:[%s8782_s30 + $0xfc0] ss:$8 sps:$4 sm:$0xff]  }
  0xd2   : > { %5454 = vmatpush1.bf16.msra.mxu1 %v7767_v30  ;;  %v7859_v30 = vld [vmem:[%s8782_s30 + $0x3d4] ss:$8 sps:$4 sm:$0xff]  }
  0xd3   : > { %5946 = vmatpush1.bf16.msra.mxu0 %v7770_v31  ;;  %5455 = vmatprep.subr.bf16.mxu1 %v7775_v32  ;;  %v7862_v31 = vld [vmem:[%s8782_s30 + $0xfd4] ss:$8 sps:$4 sm:$0xff]   ;;  %v7857_v32 = vld [vmem:[%s8782_s30 + $0x3d0] ss:$8 sps:$4 sm:$0xff]  }
  0xd4   : > { %5947 = vmatprep.subr.bf16.mxu0 %v7778_v33  ;;  %v7860_v33 = vld [vmem:[%s8782_s30 + $0xfd0] ss:$8 sps:$4 sm:$0xff]  }
  0xd6   : > { %5456 = vmatpush1.bf16.msra.mxu1 %v7773_v34  ;;  %v7865_v34 = vld [vmem:[%s8782_s30 + $0x3e4] ss:$8 sps:$4 sm:$0xff]  }
  0xd7   : > { %5948 = vmatpush1.bf16.msra.mxu0 %v7776_v35  ;;  %5466 = vmatprep.subr.bf16.mxu1 %v7781_v17  ;;  %v7868_v35 = vld [vmem:[%s8782_s30 + $0xfe4] ss:$8 sps:$4 sm:$0xff]   ;;  %v7863_v17 = vld [vmem:[%s8782_s30 + $0x3e0] ss:$8 sps:$4 sm:$0xff]  }
  0xd8   : > { %5958 = vmatprep.subr.bf16.mxu0 %v7784_v37  ;;  %v7866_v37 = vld [vmem:[%s8782_s30 + $0xfe0] ss:$8 sps:$4 sm:$0xff]  }
  0xd9   : > { %5458 = vmatmul.mubr.bf16.vlgmr.msra.gmra.mrb[0].mxu1 %v9043_v38 }
  0xda   : > { %5950 = vmatmul.mubr.bf16.vlgmr.msra.gmra.mrb[0].mxu0 %v9047_v39  ;;  %5467 = vmatpush1.bf16.msra.mxu1 %v7779_v40  ;;  %v9114_v40 = vld.sshfl [vmem:[%s8840_s11 + $0x8] sm:$0xff pattern:$0x75316420] }
  0xdb   : > { %5959 = vmatpush1.bf16.msra.mxu0 %v7782_v41  ;;  %5468 = vmatprep.subr.bf16.mxu1 %v7787_v42  ;;  %v9117_v41 = vld.sshfl [vmem:[%s8840_s11 + $0x20] sm:$0xff pattern:$0x75316420]  ;;  %v7871_v42 = vld [vmem:[%s8782_s30 + $0x3f4] ss:$8 sps:$4 sm:$0xff]  }
  0xdc   : > { %5960 = vmatprep.subr.bf16.mxu0 %v7790_v44  ;;  %5498 = vmatprep.mubr.bf16.mxu1 %v1114_v24  ;;  %v7874_v44 = vld [vmem:[%s8782_s30 + $0xff4] ss:$8 sps:$4 sm:$0xff]   ;;  %v7869_v24 = vld [vmem:[%s8782_s30 + $0x3f0] ss:$8 sps:$4 sm:$0xff]  }
  0xdd   : > { %5990 = vmatprep.mubr.bf16.mxu0 %v1261_v45  ;;  %v7872_v45 = vld [vmem:[%s8782_s30 + $0xff0] ss:$8 sps:$4 sm:$0xff]  }
  0xde   : > { %5469 = vmatpush1.bf16.msra.mxu1 %v7785_v25  ;;  %v7877_v25 = vld [vmem:[%s8782_s30 + $0x404] ss:$8 sps:$4 sm:$0xff]  }
  0xdf   : > { %5961 = vmatpush1.bf16.msra.mxu0 %v7788_v46  ;;  %5470 = vmatprep.subr.bf16.mxu1 %v7793_v36  ;;  %v7880_v46 = vld [vmem:[%s8782_s30 + $0x1004] ss:$8 sps:$4 sm:$0xff]   ;;  %v1130_v36 = vcombine.high %v9114_v40, %v9114_v40 }
  0xe0   : > { %5962 = vmatprep.subr.bf16.mxu0 %v7796_v47  ;;  %v1277_v47 = vcombine.high %v9117_v41, %v9117_v41 }
  0xe2   : > { %5471 = vmatpush1.bf16.msra.mxu1 %v7791_v16  ;;  %v7875_v16 = vld [vmem:[%s8782_s30 + $0x400] ss:$8 sps:$4 sm:$0xff]  }
  0xe3   : > { %5963 = vmatpush1.bf16.msra.mxu0 %v7794_v48  ;;  %5472 = vmatprep.subr.bf16.mxu1 %v7799_v50  ;;  %v7878_v48 = vld [vmem:[%s8782_s30 + $0x1000] ss:$8 sps:$4 sm:$0xff]   ;;  %v1112_v50 = vcombine.high %v9043_v38, %v9043_v38  ;;  %v7881_v38 = vld [vmem:[%s8782_s30 + $0x410] ss:$8 sps:$4 sm:$0xff]  }
  0xe4   : > { %5964 = vmatprep.subr.bf16.mxu0 %v7802_v51  ;;  %v1259_v51 = vcombine.high %v9047_v39, %v9047_v39  ;;  %v7884_v39 = vld [vmem:[%s8782_s30 + $0x1010] ss:$8 sps:$4 sm:$0xff]  }
  0xe6   : > { %5473 = vmatpush1.bf16.msra.mxu1 %v7797_v53  ;;  %v7883_v53 = vld [vmem:[%s8782_s30 + $0x414] ss:$8 sps:$4 sm:$0xff]  }
  0xe7   : > { %5965 = vmatpush1.bf16.msra.mxu0 %v7800_v54  ;;  %5474 = vmatprep.subr.bf16.mxu1 %v7805_v55  ;;  %v7886_v54 = vld [vmem:[%s8782_s30 + $0x1014] ss:$8 sps:$4 sm:$0xff]   ;;  %v9138_v55 = vrot.slane %v1130_v36, %v8843_v49  ;;  %v7961_v36 = vld [vmem:[%s8782_s30 + $0x4e4] ss:$8 sps:$4 sm:$0xff]  }
  0xe8   : > { %5966 = vmatprep.subr.bf16.mxu0 %v7808_v57  ;;  %v9141_v57 = vrot.slane %v1277_v47, %v8843_v49  ;;  %v7964_v47 = vld [vmem:[%s8782_s30 + $0x10e4] ss:$8 sps:$4 sm:$0xff]  }
  0xea   : > { %5475 = vmatpush1.bf16.msra.mxu1 %v7803_v58  ;;  %v7889_v58 = vld [vmem:[%s8782_s30 + $0x424] ss:$8 sps:$4 sm:$0xff]  }
  0xeb   : > { %5967 = vmatpush1.bf16.msra.mxu0 %v7806_v59  ;;  %5476 = vmatprep.subr.bf16.mxu1 %v7811_v60  ;;  %v7892_v59 = vld [vmem:[%s8782_s30 + $0x1024] ss:$8 sps:$4 sm:$0xff]   ;;  %v7887_v60 = vld [vmem:[%s8782_s30 + $0x420] ss:$8 sps:$4 sm:$0xff]  }
  0xec   : > { %5968 = vmatprep.subr.bf16.mxu0 %v7814_v61  ;;  %v7890_v61 = vld [vmem:[%s8782_s30 + $0x1020] ss:$8 sps:$4 sm:$0xff]  }
  0xee   : > { %5477 = vmatpush1.bf16.msra.mxu1 %v7809_v62  ;;  %v7895_v62 = vld [vmem:[%s8782_s30 + $0x434] ss:$8 sps:$4 sm:$0xff]  }
  0xef   : > { %5969 = vmatpush1.bf16.msra.mxu0 %v7812_v63  ;;  %5478 = vmatprep.subr.bf16.mxu1 %v7817_v0  ;;  %v7898_v63 = vld [vmem:[%s8782_s30 + $0x1034] ss:$8 sps:$4 sm:$0xff]   ;;  %v7893_v0 = vld [vmem:[%s8782_s30 + $0x430] ss:$8 sps:$4 sm:$0xff]  }
  0xf0   : > { %5970 = vmatprep.subr.bf16.mxu0 %v7820_v1  ;;  %v7896_v1 = vld [vmem:[%s8782_s30 + $0x1030] ss:$8 sps:$4 sm:$0xff]  }
  0xf2   : > { %5479 = vmatpush1.bf16.msra.mxu1 %v7815_v2  ;;  %v7901_v2 = vld [vmem:[%s8782_s30 + $0x444] ss:$8 sps:$4 sm:$0xff]  }
  0xf3   : > { %5971 = vmatpush1.bf16.msra.mxu0 %v7818_v3  ;;  %5480 = vmatprep.subr.bf16.mxu1 %v7823_v4  ;;  %v7904_v3 = vld [vmem:[%s8782_s30 + $0x1044] ss:$8 sps:$4 sm:$0xff]   ;;  %v7899_v4 = vld [vmem:[%s8782_s30 + $0x440] ss:$8 sps:$4 sm:$0xff]  }
  0xf4   : > { %5972 = vmatprep.subr.bf16.mxu0 %v7826_v5  ;;  %v7902_v5 = vld [vmem:[%s8782_s30 + $0x1040] ss:$8 sps:$4 sm:$0xff]  }
  0xf6   : > { %5481 = vmatpush1.bf16.msra.mxu1 %v7821_v6  ;;  %v7907_v6 = vld [vmem:[%s8782_s30 + $0x454] ss:$8 sps:$4 sm:$0xff]  }
  0xf7   : > { %5973 = vmatpush1.bf16.msra.mxu0 %v7824_v7  ;;  %5482 = vmatprep.subr.bf16.mxu1 %v7829_v8  ;;  %v7910_v7 = vld [vmem:[%s8782_s30 + $0x1054] ss:$8 sps:$4 sm:$0xff]   ;;  %v7905_v8 = vld [vmem:[%s8782_s30 + $0x450] ss:$8 sps:$4 sm:$0xff]  }
  0xf8   : > { %5974 = vmatprep.subr.bf16.mxu0 %v7832_v9  ;;  %v7908_v9 = vld [vmem:[%s8782_s30 + $0x1050] ss:$8 sps:$4 sm:$0xff]  }
  0xfa   : > { %5483 = vmatpush1.bf16.msra.mxu1 %v7827_v10  ;;  %v7913_v10 = vld [vmem:[%s8782_s30 + $0x464] ss:$8 sps:$4 sm:$0xff]  }
  0xfb   : > { %5975 = vmatpush1.bf16.msra.mxu0 %v7830_v11  ;;  %5484 = vmatprep.subr.bf16.mxu1 %v7835_v12  ;;  %v7916_v11 = vld [vmem:[%s8782_s30 + $0x1064] ss:$8 sps:$4 sm:$0xff]   ;;  %v7911_v12 = vld [vmem:[%s8782_s30 + $0x460] ss:$8 sps:$4 sm:$0xff]  }
  0xfc   : > { %5976 = vmatprep.subr.bf16.mxu0 %v7838_v13  ;;  %v7914_v13 = vld [vmem:[%s8782_s30 + $0x1060] ss:$8 sps:$4 sm:$0xff]  }
  0xfe   : > { %5485 = vmatpush1.bf16.msra.mxu1 %v7833_v14  ;;  %v7919_v14 = vld [vmem:[%s8782_s30 + $0x474] ss:$8 sps:$4 sm:$0xff]  }
  0xff   : > { %5977 = vmatpush1.bf16.msra.mxu0 %v7836_v15  ;;  %5486 = vmatprep.subr.bf16.mxu1 %v7841_v18  ;;  %v7922_v15 = vld [vmem:[%s8782_s30 + $0x1074] ss:$8 sps:$4 sm:$0xff]   ;;  %v7917_v18 = vld [vmem:[%s8782_s30 + $0x470] ss:$8 sps:$4 sm:$0xff]  }
 0x100   : > { %5978 = vmatprep.subr.bf16.mxu0 %v7844_v19  ;;  %v7920_v19 = vld [vmem:[%s8782_s30 + $0x1070] ss:$8 sps:$4 sm:$0xff]  }
 0x102   : > { %5487 = vmatpush1.bf16.msra.mxu1 %v7839_v20  ;;  %v7925_v20 = vld [vmem:[%s8782_s30 + $0x484] ss:$8 sps:$4 sm:$0xff]  }
 0x103   : > { %5979 = vmatpush1.bf16.msra.mxu0 %v7842_v21  ;;  %5488 = vmatprep.subr.bf16.mxu1 %v7847_v22  ;;  %v7928_v21 = vld [vmem:[%s8782_s30 + $0x1084] ss:$8 sps:$4 sm:$0xff]   ;;  %v7923_v22 = vld [vmem:[%s8782_s30 + $0x480] ss:$8 sps:$4 sm:$0xff]  }
 0x104   : > { %5980 = vmatprep.subr.bf16.mxu0 %v7850_v23  ;;  %v7926_v23 = vld [vmem:[%s8782_s30 + $0x1080] ss:$8 sps:$4 sm:$0xff]  }
 0x106   : > { %5489 = vmatpush1.bf16.msra.mxu1 %v7845_v52  ;;  %v7931_v52 = vld [vmem:[%s8782_s30 + $0x494] ss:$8 sps:$4 sm:$0xff]  }
 0x107   : > { %5981 = vmatpush1.bf16.msra.mxu0 %v7848_v56  ;;  %5490 = vmatprep.subr.bf16.mxu1 %v7853_v26  ;;  %v7934_v56 = vld [vmem:[%s8782_s30 + $0x1094] ss:$8 sps:$4 sm:$0xff]   ;;  %v7929_v26 = vld [vmem:[%s8782_s30 + $0x490] ss:$8 sps:$4 sm:$0xff]  }
 0x108   : > { %5982 = vmatprep.subr.bf16.mxu0 %v7856_v27  ;;  %v7932_v27 = vld [vmem:[%s8782_s30 + $0x1090] ss:$8 sps:$4 sm:$0xff]  }
 0x10a   : > { %5491 = vmatpush1.bf16.msra.mxu1 %v7851_v28  ;;  %v7937_v28 = vld [vmem:[%s8782_s30 + $0x4a4] ss:$8 sps:$4 sm:$0xff]  }
 0x10b   : > { %5983 = vmatpush1.bf16.msra.mxu0 %v7854_v29  ;;  %5492 = vmatprep.subr.bf16.mxu1 %v7859_v30  ;;  %v7940_v29 = vld [vmem:[%s8782_s30 + $0x10a4] ss:$8 sps:$4 sm:$0xff]   ;;  %v7935_v30 = vld [vmem:[%s8782_s30 + $0x4a0] ss:$8 sps:$4 sm:$0xff]  }
 0x10c   : > { %5984 = vmatprep.subr.bf16.mxu0 %v7862_v31  ;;  %v7938_v31 = vld [vmem:[%s8782_s30 + $0x10a0] ss:$8 sps:$4 sm:$0xff]  }
 0x10e   : > { %5493 = vmatpush1.bf16.msra.mxu1 %v7857_v32  ;;  %v7943_v32 = vld [vmem:[%s8782_s30 + $0x4b4] ss:$8 sps:$4 sm:$0xff]  }
 0x10f   : > { %5985 = vmatpush1.bf16.msra.mxu0 %v7860_v33  ;;  %5494 = vmatprep.subr.bf16.mxu1 %v7865_v34  ;;  %v7946_v33 = vld [vmem:[%s8782_s30 + $0x10b4] ss:$8 sps:$4 sm:$0xff]   ;;  %v7941_v34 = vld [vmem:[%s8782_s30 + $0x4b0] ss:$8 sps:$4 sm:$0xff]  }
 0x110   : > { %5986 = vmatprep.subr.bf16.mxu0 %v7868_v35  ;;  %v7944_v35 = vld [vmem:[%s8782_s30 + $0x10b0] ss:$8 sps:$4 sm:$0xff]  }
 0x112   : > { %5495 = vmatpush1.bf16.msra.mxu1 %v7863_v17  ;;  %v7949_v17 = vld [vmem:[%s8782_s30 + $0x4c4] ss:$8 sps:$4 sm:$0xff]  }
 0x113   : > { %5987 = vmatpush1.bf16.msra.mxu0 %v7866_v37  ;;  %5496 = vmatprep.subr.bf16.mxu1 %v7871_v42  ;;  %v7952_v37 = vld [vmem:[%s8782_s30 + $0x10c4] ss:$8 sps:$4 sm:$0xff]   ;;  %v7947_v42 = vld [vmem:[%s8782_s30 + $0x4c0] ss:$8 sps:$4 sm:$0xff]  }
 0x114   : > { %5988 = vmatprep.subr.bf16.mxu0 %v7874_v44  ;;  %v7950_v44 = vld [vmem:[%s8782_s30 + $0x10c0] ss:$8 sps:$4 sm:$0xff]  }
 0x116   : > { %5497 = vmatpush1.bf16.msra.mxu1 %v7869_v24  ;;  %v7955_v24 = vld [vmem:[%s8782_s30 + $0x4d4] ss:$8 sps:$4 sm:$0xff]  }
 0x117   : > { %5989 = vmatpush1.bf16.msra.mxu0 %v7872_v45  ;;  %5507 = vmatprep.subr.bf16.mxu1 %v7877_v25  ;;  %v7958_v45 = vld [vmem:[%s8782_s30 + $0x10d4] ss:$8 sps:$4 sm:$0xff]   ;;  %v7953_v25 = vld [vmem:[%s8782_s30 + $0x4d0] ss:$8 sps:$4 sm:$0xff]  }
 0x118   : > { %5999 = vmatprep.subr.bf16.mxu0 %v7880_v46  ;;  %v7956_v46 = vld [vmem:[%s8782_s30 + $0x10d0] ss:$8 sps:$4 sm:$0xff]  }
 0x119   : > { %5499 = vmatmul.mubr.bf16.vlgmr.msra.gmra.mrb[0].mxu1 %v1112_v50  ;;  %v7967_v50 = vld [vmem:[%s8782_s30 + $0x4f4] ss:$8 sps:$4 sm:$0xff]  }
 0x11a   : > { %5991 = vmatmul.mubr.bf16.vlgmr.msra.gmra.mrb[0].mxu0 %v1259_v51  ;;  %5508 = vmatpush1.bf16.msra.mxu1 %v7875_v16  ;;  %v7959_v16 = vld [vmem:[%s8782_s30 + $0x4e0] ss:$8 sps:$4 sm:$0xff]   ;;  %v7970_v51 = vld [vmem:[%s8782_s30 + $0x10f4] ss:$8 sps:$4 sm:$0xff]  }
 0x11b   : > { %6000 = vmatpush1.bf16.msra.mxu0 %v7878_v48  ;;  %5509 = vmatprep.subr.bf16.mxu1 %v7883_v53  ;;  %v7962_v48 = vld [vmem:[%s8782_s30 + $0x10e0] ss:$8 sps:$4 sm:$0xff]   ;;  %v7965_v53 = vld [vmem:[%s8782_s30 + $0x4f0] ss:$8 sps:$4 sm:$0xff]  }
 0x11c   : > { %6001 = vmatprep.subr.bf16.mxu0 %v7886_v54  ;;  %5539 = vmatprep.mubr.bf16.mxu1 %v9138_v55  ;;  %v7968_v54 = vld [vmem:[%s8782_s30 + $0x10f0] ss:$8 sps:$4 sm:$0xff]  }
 0x11d   : > { %6031 = vmatprep.mubr.bf16.mxu0 %v9141_v57 }
 0x11e   : > { %5510 = vmatpush1.bf16.msra.mxu1 %v7881_v38  ;;  %v7973_v38 = vld [vmem:[%s8782_s30 + $0x504] ss:$8 sps:$4 sm:$0xff]  }
 0x11f   : > { %6002 = vmatpush1.bf16.msra.mxu0 %v7884_v39  ;;  %5511 = vmatprep.subr.bf16.mxu1 %v7889_v58  ;;  %v7976_v39 = vld [vmem:[%s8782_s30 + $0x1104] ss:$8 sps:$4 sm:$0xff]   ;;  %v9207_v58 = vrot.slane %v9114_v40, %v8843_v49  ;;  %v1162_v40 = vcombine.high %v9138_v55, %v9138_v55 }
 0x120   : > { %6003 = vmatprep.subr.bf16.mxu0 %v7892_v59  ;;  %v9211_v59 = vrot.slane %v9117_v41, %v8843_v49  ;;  %v7977_v41 = vld [vmem:[%s8782_s30 + $0x510] ss:$8 sps:$4 sm:$0xff]   ;;  %v7985_v55 = vld [vmem:[%s8782_s30 + $0x524] ss:$8 sps:$4 sm:$0xff]  }
 0x122   : > { %5512 = vmatpush1.bf16.msra.mxu1 %v7887_v60  ;;  %v7971_v60 = vld [vmem:[%s8782_s30 + $0x500] ss:$8 sps:$4 sm:$0xff]  }
 0x123   : > { %6004 = vmatpush1.bf16.msra.mxu0 %v7890_v61  ;;  %5513 = vmatprep.subr.bf16.mxu1 %v7895_v62  ;;  %v7974_v61 = vld [vmem:[%s8782_s30 + $0x1100] ss:$8 sps:$4 sm:$0xff]   ;;  %v7979_v62 = vld [vmem:[%s8782_s30 + $0x514] ss:$8 sps:$4 sm:$0xff]  }
 0x124   : > { %6005 = vmatprep.subr.bf16.mxu0 %v7898_v63  ;;  %v7982_v63 = vld [vmem:[%s8782_s30 + $0x1114] ss:$8 sps:$4 sm:$0xff]  }
 0x126   : > { %5514 = vmatpush1.bf16.msra.mxu1 %v7893_v0  ;;  %v1309_v0 = vcombine.high %v9141_v57, %v9141_v57  ;;  %v7983_v57 = vld [vmem:[%s8782_s30 + $0x520] ss:$8 sps:$4 sm:$0xff]  }
 0x127   : > { %6006 = vmatpush1.bf16.msra.mxu0 %v7896_v1  ;;  %5515 = vmatprep.subr.bf16.mxu1 %v7901_v2  ;;  %v7980_v1 = vld [vmem:[%s8782_s30 + $0x1110] ss:$8 sps:$4 sm:$0xff]   ;;  %v7988_v2 = vld [vmem:[%s8782_s30 + $0x1124] ss:$8 sps:$4 sm:$0xff]  }
 0x128   : > { %6007 = vmatprep.subr.bf16.mxu0 %v7904_v3  ;;  %v7986_v3 = vld [vmem:[%s8782_s30 + $0x1120] ss:$8 sps:$4 sm:$0xff]  }
 0x12a   : > { %5516 = vmatpush1.bf16.msra.mxu1 %v7899_v4  ;;  %v7991_v4 = vld [vmem:[%s8782_s30 + $0x534] ss:$8 sps:$4 sm:$0xff]  }
 0x12b   : > { %6008 = vmatpush1.bf16.msra.mxu0 %v7902_v5  ;;  %5517 = vmatprep.subr.bf16.mxu1 %v7907_v6  ;;  %v7994_v5 = vld [vmem:[%s8782_s30 + $0x1134] ss:$8 sps:$4 sm:$0xff]   ;;  %v7989_v6 = vld [vmem:[%s8782_s30 + $0x530] ss:$8 sps:$4 sm:$0xff]  }
 0x12c   : > { %6009 = vmatprep.subr.bf16.mxu0 %v7910_v7  ;;  %v7992_v7 = vld [vmem:[%s8782_s30 + $0x1130] ss:$8 sps:$4 sm:$0xff]  }
 0x12e   : > { %5518 = vmatpush1.bf16.msra.mxu1 %v7905_v8  ;;  %v7997_v8 = vld [vmem:[%s8782_s30 + $0x544] ss:$8 sps:$4 sm:$0xff]  }
 0x12f   : > { %6010 = vmatpush1.bf16.msra.mxu0 %v7908_v9  ;;  %5519 = vmatprep.subr.bf16.mxu1 %v7913_v10  ;;  %v8000_v9 = vld [vmem:[%s8782_s30 + $0x1144] ss:$8 sps:$4 sm:$0xff]   ;;  %v7995_v10 = vld [vmem:[%s8782_s30 + $0x540] ss:$8 sps:$4 sm:$0xff]  }
 0x130   : > { %6011 = vmatprep.subr.bf16.mxu0 %v7916_v11  ;;  %v7998_v11 = vld [vmem:[%s8782_s30 + $0x1140] ss:$8 sps:$4 sm:$0xff]  }
 0x132   : > { %5520 = vmatpush1.bf16.msra.mxu1 %v7911_v12  ;;  %v8003_v12 = vld [vmem:[%s8782_s30 + $0x554] ss:$8 sps:$4 sm:$0xff]  }
 0x133   : > { %6012 = vmatpush1.bf16.msra.mxu0 %v7914_v13  ;;  %5521 = vmatprep.subr.bf16.mxu1 %v7919_v14  ;;  %v8006_v13 = vld [vmem:[%s8782_s30 + $0x1154] ss:$8 sps:$4 sm:$0xff]   ;;  %v8001_v14 = vld [vmem:[%s8782_s30 + $0x550] ss:$8 sps:$4 sm:$0xff]  }
 0x134   : > { %6013 = vmatprep.subr.bf16.mxu0 %v7922_v15  ;;  %v8004_v15 = vld [vmem:[%s8782_s30 + $0x1150] ss:$8 sps:$4 sm:$0xff]  }
 0x136   : > { %5522 = vmatpush1.bf16.msra.mxu1 %v7917_v18  ;;  %v8009_v18 = vld [vmem:[%s8782_s30 + $0x564] ss:$8 sps:$4 sm:$0xff]  }
 0x137   : > { %6014 = vmatpush1.bf16.msra.mxu0 %v7920_v19  ;;  %5523 = vmatprep.subr.bf16.mxu1 %v7925_v20  ;;  %v8012_v19 = vld [vmem:[%s8782_s30 + $0x1164] ss:$8 sps:$4 sm:$0xff]   ;;  %v8007_v20 = vld [vmem:[%s8782_s30 + $0x560] ss:$8 sps:$4 sm:$0xff]  }
 0x138   : > { %6015 = vmatprep.subr.bf16.mxu0 %v7928_v21  ;;  %v8010_v21 = vld [vmem:[%s8782_s30 + $0x1160] ss:$8 sps:$4 sm:$0xff]  }
 0x13a   : > { %5524 = vmatpush1.bf16.msra.mxu1 %v7923_v22  ;;  %v8015_v22 = vld [vmem:[%s8782_s30 + $0x574] ss:$8 sps:$4 sm:$0xff]  }
 0x13b   : > { %6016 = vmatpush1.bf16.msra.mxu0 %v7926_v23  ;;  %5525 = vmatprep.subr.bf16.mxu1 %v7931_v52  ;;  %v8018_v23 = vld [vmem:[%s8782_s30 + $0x1174] ss:$8 sps:$4 sm:$0xff]   ;;  %v8013_v52 = vld [vmem:[%s8782_s30 + $0x570] ss:$8 sps:$4 sm:$0xff]  }
 0x13c   : > { %6017 = vmatprep.subr.bf16.mxu0 %v7934_v56  ;;  %v8016_v56 = vld [vmem:[%s8782_s30 + $0x1170] ss:$8 sps:$4 sm:$0xff]  }
 0x13e   : > { %5526 = vmatpush1.bf16.msra.mxu1 %v7929_v26  ;;  %v8021_v26 = vld [vmem:[%s8782_s30 + $0x584] ss:$8 sps:$4 sm:$0xff]  }
 0x13f   : > { %6018 = vmatpush1.bf16.msra.mxu0 %v7932_v27  ;;  %5527 = vmatprep.subr.bf16.mxu1 %v7937_v28  ;;  %v8024_v27 = vld [vmem:[%s8782_s30 + $0x1184] ss:$8 sps:$4 sm:$0xff]   ;;  %v8019_v28 = vld [vmem:[%s8782_s30 + $0x580] ss:$8 sps:$4 sm:$0xff]  }
 0x140   : > { %6019 = vmatprep.subr.bf16.mxu0 %v7940_v29  ;;  %v8022_v29 = vld [vmem:[%s8782_s30 + $0x1180] ss:$8 sps:$4 sm:$0xff]  }
 0x142   : > { %5528 = vmatpush1.bf16.msra.mxu1 %v7935_v30  ;;  %v8027_v30 = vld [vmem:[%s8782_s30 + $0x594] ss:$8 sps:$4 sm:$0xff]  }
 0x143   : > { %6020 = vmatpush1.bf16.msra.mxu0 %v7938_v31  ;;  %5529 = vmatprep.subr.bf16.mxu1 %v7943_v32  ;;  %v8030_v31 = vld [vmem:[%s8782_s30 + $0x1194] ss:$8 sps:$4 sm:$0xff]   ;;  %v8025_v32 = vld [vmem:[%s8782_s30 + $0x590] ss:$8 sps:$4 sm:$0xff]  }
 0x144   : > { %6021 = vmatprep.subr.bf16.mxu0 %v7946_v33  ;;  %v8028_v33 = vld [vmem:[%s8782_s30 + $0x1190] ss:$8 sps:$4 sm:$0xff]  }
 0x146   : > { %5530 = vmatpush1.bf16.msra.mxu1 %v7941_v34  ;;  %v8033_v34 = vld [vmem:[%s8782_s30 + $0x5a4] ss:$8 sps:$4 sm:$0xff]  }
 0x147   : > { %6022 = vmatpush1.bf16.msra.mxu0 %v7944_v35  ;;  %5531 = vmatprep.subr.bf16.mxu1 %v7949_v17  ;;  %v8036_v35 = vld [vmem:[%s8782_s30 + $0x11a4] ss:$8 sps:$4 sm:$0xff]   ;;  %v8031_v17 = vld [vmem:[%s8782_s30 + $0x5a0] ss:$8 sps:$4 sm:$0xff]  }
 0x148   : > { %6023 = vmatprep.subr.bf16.mxu0 %v7952_v37  ;;  %v8034_v37 = vld [vmem:[%s8782_s30 + $0x11a0] ss:$8 sps:$4 sm:$0xff]  }
 0x14a   : > { %5532 = vmatpush1.bf16.msra.mxu1 %v7947_v42  ;;  %v8039_v42 = vld [vmem:[%s8782_s30 + $0x5b4] ss:$8 sps:$4 sm:$0xff]  }
 0x14b   : > { %6024 = vmatpush1.bf16.msra.mxu0 %v7950_v44  ;;  %5533 = vmatprep.subr.bf16.mxu1 %v7955_v24  ;;  %v8042_v44 = vld [vmem:[%s8782_s30 + $0x11b4] ss:$8 sps:$4 sm:$0xff]   ;;  %v8037_v24 = vld [vmem:[%s8782_s30 + $0x5b0] ss:$8 sps:$4 sm:$0xff]  }
 0x14c   : > { %6025 = vmatprep.subr.bf16.mxu0 %v7958_v45  ;;  %v8040_v45 = vld [vmem:[%s8782_s30 + $0x11b0] ss:$8 sps:$4 sm:$0xff]  }
 0x14e   : > { %5534 = vmatpush1.bf16.msra.mxu1 %v7953_v25  ;;  %v8045_v25 = vld [vmem:[%s8782_s30 + $0x5c4] ss:$8 sps:$4 sm:$0xff]  }
 0x14f   : > { %6026 = vmatpush1.bf16.msra.mxu0 %v7956_v46  ;;  %5535 = vmatprep.subr.bf16.mxu1 %v7961_v36  ;;  %v8048_v46 = vld [vmem:[%s8782_s30 + $0x11c4] ss:$8 sps:$4 sm:$0xff]   ;;  %v8043_v36 = vld [vmem:[%s8782_s30 + $0x5c0] ss:$8 sps:$4 sm:$0xff]  }
 0x150   : > { %6027 = vmatprep.subr.bf16.mxu0 %v7964_v47  ;;  %v8046_v47 = vld [vmem:[%s8782_s30 + $0x11c0] ss:$8 sps:$4 sm:$0xff]  }
 0x152   : > { %5536 = vmatpush1.bf16.msra.mxu1 %v7959_v16  ;;  %v8051_v16 = vld [vmem:[%s8782_s30 + $0x5d4] ss:$8 sps:$4 sm:$0xff]  }
 0x153   : > { %6028 = vmatpush1.bf16.msra.mxu0 %v7962_v48  ;;  %5537 = vmatprep.subr.bf16.mxu1 %v7967_v50  ;;  %v8054_v48 = vld [vmem:[%s8782_s30 + $0x11d4] ss:$8 sps:$4 sm:$0xff]   ;;  %v8049_v50 = vld [vmem:[%s8782_s30 + $0x5d0] ss:$8 sps:$4 sm:$0xff]  }
 0x154   : > { %6029 = vmatprep.subr.bf16.mxu0 %v7970_v51  ;;  %v8052_v51 = vld [vmem:[%s8782_s30 + $0x11d0] ss:$8 sps:$4 sm:$0xff]  }
 0x156   : > { %5538 = vmatpush1.bf16.msra.mxu1 %v7965_v53  ;;  %v8057_v53 = vld [vmem:[%s8782_s30 + $0x5e4] ss:$8 sps:$4 sm:$0xff]  }
 0x157   : > { %6030 = vmatpush1.bf16.msra.mxu0 %v7968_v54  ;;  %5548 = vmatprep.subr.bf16.mxu1 %v7973_v38  ;;  %v8060_v54 = vld [vmem:[%s8782_s30 + $0x11e4] ss:$8 sps:$4 sm:$0xff]  }
 0x158   : > { %6040 = vmatprep.subr.bf16.mxu0 %v7976_v39  ;;  %v8671_v38 = vld [vmem:[%s8840_s11 + $0x8] sm:$0xff] }
 0x159   : > { %5540 = vmatmul.mubr.bf16.vlgmr.msra.gmra.mrb[0].mxu1 %v9207_v58  ;;  %v1115_v39 = vcombine.high %v8671_v38, %v8671_v38  ;;  %v8135_v38 = vld [vmem:[%s8782_s30 + $0x6b4] ss:$8 sps:$4 sm:$0xff]  }
 0x15a   : > { %6032 = vmatmul.mubr.bf16.vlgmr.msra.gmra.mrb[0].mxu0 %v9211_v59  ;;  %5549 = vmatpush1.bf16.msra.mxu1 %v7971_v60  ;;  %v8672_v60 = vld [vmem:[%s8840_s11 + $0x20] sm:$0xff] }
 0x15b   : > { %6041 = vmatpush1.bf16.msra.mxu0 %v7974_v61  ;;  %5550 = vmatprep.subr.bf16.mxu1 %v7979_v62  ;;  %v1262_v61 = vcombine.high %v8672_v60, %v8672_v60  ;;  %v8055_v62 = vld [vmem:[%s8782_s30 + $0x5e0] ss:$8 sps:$4 sm:$0xff]   ;;  %v8133_v60 = vld [vmem:[%s8782_s30 + $0x6b0] ss:$8 sps:$4 sm:$0xff]  }
 0x15c   : > { %6042 = vmatprep.subr.bf16.mxu0 %v7982_v63  ;;  %5580 = vmatprep.mubr.bf16.mxu1 %v1162_v40  ;;  %v8058_v63 = vld [vmem:[%s8782_s30 + $0x11e0] ss:$8 sps:$4 sm:$0xff]   ;;  %v8063_v40 = vld [vmem:[%s8782_s30 + $0x5f4] ss:$8 sps:$4 sm:$0xff]  }
 0x15d   : > { %6072 = vmatprep.mubr.bf16.mxu0 %v1309_v0  ;;  %v8066_v0 = vld [vmem:[%s8782_s30 + $0x11f4] ss:$8 sps:$4 sm:$0xff]  }
 0x15e   : > { %5551 = vmatpush1.bf16.msra.mxu1 %v7977_v41  ;;  %v9282_v41 = vrot.slane %v1115_v39, %v8843_v49  ;;  %v8138_v39 = vld [vmem:[%s8782_s30 + $0x12b4] ss:$8 sps:$4 sm:$0xff]  }
 0x15f   : > { %6043 = vmatpush1.bf16.msra.mxu0 %v7980_v1  ;;  %5552 = vmatprep.subr.bf16.mxu1 %v7985_v55  ;;  %v9285_v1 = vrot.slane %v1262_v61, %v8843_v49  ;;  %v8061_v55 = vld [vmem:[%s8782_s30 + $0x5f0] ss:$8 sps:$4 sm:$0xff]  }
 0x160   : > { %6044 = vmatprep.subr.bf16.mxu0 %v7988_v2  ;;  %v8064_v2 = vld [vmem:[%s8782_s30 + $0x11f0] ss:$8 sps:$4 sm:$0xff]  }
 0x161   : > { %v8136_v61 = vld [vmem:[%s8782_s30 + $0x12b0] ss:$8 sps:$4 sm:$0xff]  }
 0x162   : > { %5553 = vmatpush1.bf16.msra.mxu1 %v7983_v57  ;;  %v8069_v57 = vld [vmem:[%s8782_s30 + $0x604] ss:$8 sps:$4 sm:$0xff]  }
 0x163   : > { %6045 = vmatpush1.bf16.msra.mxu0 %v7986_v3  ;;  %5554 = vmatprep.subr.bf16.mxu1 %v7991_v4  ;;  %v8072_v3 = vld [vmem:[%s8782_s30 + $0x1204] ss:$8 sps:$4 sm:$0xff]   ;;  %v1131_v4 = vcombine.high %v9282_v41, %v9282_v41 }
 0x164   : > { %6046 = vmatprep.subr.bf16.mxu0 %v7994_v5  ;;  %v1278_v5 = vcombine.high %v9285_v1, %v9285_v1 }
 0x166   : > { %5555 = vmatpush1.bf16.msra.mxu1 %v7989_v6  ;;  %v1160_v6 = vcombine.high %v9207_v58, %v9207_v58  ;;  %v9307_v58 = vrot.slane %v1278_v5, %v8843_v49  ;;  %v8156_v5 = vld [vmem:[%s8782_s30 + $0x12e4] ss:$8 sps:$4 sm:$0xff]  }
 0x167   : > { %6047 = vmatpush1.bf16.msra.mxu0 %v7992_v7  ;;  %5556 = vmatprep.subr.bf16.mxu1 %v7997_v8  ;;  %v1307_v7 = vcombine.high %v9211_v59, %v9211_v59  ;;  %v8067_v8 = vld [vmem:[%s8782_s30 + $0x600] ss:$8 sps:$4 sm:$0xff]   ;;  %v8073_v59 = vld [vmem:[%s8782_s30 + $0x610] ss:$8 sps:$4 sm:$0xff]  }
 0x168   : > { %6048 = vmatprep.subr.bf16.mxu0 %v8000_v9  ;;  %v8070_v9 = vld [vmem:[%s8782_s30 + $0x1200] ss:$8 sps:$4 sm:$0xff]  }
 0x16a   : > { %5557 = vmatpush1.bf16.msra.mxu1 %v7995_v10  ;;  %v8075_v10 = vld [vmem:[%s8782_s30 + $0x614] ss:$8 sps:$4 sm:$0xff]  }
 0x16b   : > { %6049 = vmatpush1.bf16.msra.mxu0 %v7998_v11  ;;  %5558 = vmatprep.subr.bf16.mxu1 %v8003_v12  ;;  %v8078_v11 = vld [vmem:[%s8782_s30 + $0x1214] ss:$8 sps:$4 sm:$0xff]   ;;  %v9304_v12 = vrot.slane %v1131_v4, %v8843_v49  ;;  %v8153_v4 = vld [vmem:[%s8782_s30 + $0x6e4] ss:$8 sps:$4 sm:$0xff]  }
 0x16c   : > { %6050 = vmatprep.subr.bf16.mxu0 %v8006_v13  ;;  %v8076_v13 = vld [vmem:[%s8782_s30 + $0x1210] ss:$8 sps:$4 sm:$0xff]  }
 0x16e   : > { %5559 = vmatpush1.bf16.msra.mxu1 %v8001_v14  ;;  %v8081_v14 = vld [vmem:[%s8782_s30 + $0x624] ss:$8 sps:$4 sm:$0xff]  }
 0x16f   : > { %6051 = vmatpush1.bf16.msra.mxu0 %v8004_v15  ;;  %5560 = vmatprep.subr.bf16.mxu1 %v8009_v18  ;;  %v8084_v15 = vld [vmem:[%s8782_s30 + $0x1224] ss:$8 sps:$4 sm:$0xff]   ;;  %v8079_v18 = vld [vmem:[%s8782_s30 + $0x620] ss:$8 sps:$4 sm:$0xff]  }
 0x170   : > { %6052 = vmatprep.subr.bf16.mxu0 %v8012_v19  ;;  %v8082_v19 = vld [vmem:[%s8782_s30 + $0x1220] ss:$8 sps:$4 sm:$0xff]  }
 0x172   : > { %5561 = vmatpush1.bf16.msra.mxu1 %v8007_v20  ;;  %v8087_v20 = vld [vmem:[%s8782_s30 + $0x634] ss:$8 sps:$4 sm:$0xff]  }
 0x173   : > { %6053 = vmatpush1.bf16.msra.mxu0 %v8010_v21  ;;  %5562 = vmatprep.subr.bf16.mxu1 %v8015_v22  ;;  %v8090_v21 = vld [vmem:[%s8782_s30 + $0x1234] ss:$8 sps:$4 sm:$0xff]   ;;  %v8085_v22 = vld [vmem:[%s8782_s30 + $0x630] ss:$8 sps:$4 sm:$0xff]  }
 0x174   : > { %6054 = vmatprep.subr.bf16.mxu0 %v8018_v23  ;;  %v8088_v23 = vld [vmem:[%s8782_s30 + $0x1230] ss:$8 sps:$4 sm:$0xff]  }
 0x176   : > { %5563 = vmatpush1.bf16.msra.mxu1 %v8013_v52  ;;  %v8093_v52 = vld [vmem:[%s8782_s30 + $0x644] ss:$8 sps:$4 sm:$0xff]  }
 0x177   : > { %6055 = vmatpush1.bf16.msra.mxu0 %v8016_v56  ;;  %5564 = vmatprep.subr.bf16.mxu1 %v8021_v26  ;;  %v8096_v56 = vld [vmem:[%s8782_s30 + $0x1244] ss:$8 sps:$4 sm:$0xff]   ;;  %v8091_v26 = vld [vmem:[%s8782_s30 + $0x640] ss:$8 sps:$4 sm:$0xff]  }
 0x178   : > { %6056 = vmatprep.subr.bf16.mxu0 %v8024_v27  ;;  %v8094_v27 = vld [vmem:[%s8782_s30 + $0x1240] ss:$8 sps:$4 sm:$0xff]  }
 0x17a   : > { %5565 = vmatpush1.bf16.msra.mxu1 %v8019_v28  ;;  %v8099_v28 = vld [vmem:[%s8782_s30 + $0x654] ss:$8 sps:$4 sm:$0xff]  }
 0x17b   : > { %6057 = vmatpush1.bf16.msra.mxu0 %v8022_v29  ;;  %5566 = vmatprep.subr.bf16.mxu1 %v8027_v30  ;;  %v8102_v29 = vld [vmem:[%s8782_s30 + $0x1254] ss:$8 sps:$4 sm:$0xff]   ;;  %v8097_v30 = vld [vmem:[%s8782_s30 + $0x650] ss:$8 sps:$4 sm:$0xff]  }
 0x17c   : > { %6058 = vmatprep.subr.bf16.mxu0 %v8030_v31  ;;  %v8100_v31 = vld [vmem:[%s8782_s30 + $0x1250] ss:$8 sps:$4 sm:$0xff]  }
 0x17e   : > { %5567 = vmatpush1.bf16.msra.mxu1 %v8025_v32  ;;  %v8105_v32 = vld [vmem:[%s8782_s30 + $0x664] ss:$8 sps:$4 sm:$0xff]  }
 0x17f   : > { %6059 = vmatpush1.bf16.msra.mxu0 %v8028_v33  ;;  %5568 = vmatprep.subr.bf16.mxu1 %v8033_v34  ;;  %v8108_v33 = vld [vmem:[%s8782_s30 + $0x1264] ss:$8 sps:$4 sm:$0xff]   ;;  %v8103_v34 = vld [vmem:[%s8782_s30 + $0x660] ss:$8 sps:$4 sm:$0xff]  }
 0x180   : > { %6060 = vmatprep.subr.bf16.mxu0 %v8036_v35  ;;  %v8106_v35 = vld [vmem:[%s8782_s30 + $0x1260] ss:$8 sps:$4 sm:$0xff]  }
 0x182   : > { %5569 = vmatpush1.bf16.msra.mxu1 %v8031_v17  ;;  %v8111_v17 = vld [vmem:[%s8782_s30 + $0x674] ss:$8 sps:$4 sm:$0xff]  }
 0x183   : > { %6061 = vmatpush1.bf16.msra.mxu0 %v8034_v37  ;;  %5570 = vmatprep.subr.bf16.mxu1 %v8039_v42  ;;  %v8114_v37 = vld [vmem:[%s8782_s30 + $0x1274] ss:$8 sps:$4 sm:$0xff]   ;;  %v8109_v42 = vld [vmem:[%s8782_s30 + $0x670] ss:$8 sps:$4 sm:$0xff]  }
 0x184   : > { %6062 = vmatprep.subr.bf16.mxu0 %v8042_v44  ;;  %v8112_v44 = vld [vmem:[%s8782_s30 + $0x1270] ss:$8 sps:$4 sm:$0xff]  }
 0x186   : > { %5571 = vmatpush1.bf16.msra.mxu1 %v8037_v24  ;;  %v8117_v24 = vld [vmem:[%s8782_s30 + $0x684] ss:$8 sps:$4 sm:$0xff]  }
 0x187   : > { %6063 = vmatpush1.bf16.msra.mxu0 %v8040_v45  ;;  %5572 = vmatprep.subr.bf16.mxu1 %v8045_v25  ;;  %v8120_v45 = vld [vmem:[%s8782_s30 + $0x1284] ss:$8 sps:$4 sm:$0xff]   ;;  %v8115_v25 = vld [vmem:[%s8782_s30 + $0x680] ss:$8 sps:$4 sm:$0xff]  }
 0x188   : > { %6064 = vmatprep.subr.bf16.mxu0 %v8048_v46  ;;  %v8118_v46 = vld [vmem:[%s8782_s30 + $0x1280] ss:$8 sps:$4 sm:$0xff]  }
 0x18a   : > { %5573 = vmatpush1.bf16.msra.mxu1 %v8043_v36  ;;  %v8123_v36 = vld [vmem:[%s8782_s30 + $0x694] ss:$8 sps:$4 sm:$0xff]  }
 0x18b   : > { %6065 = vmatpush1.bf16.msra.mxu0 %v8046_v47  ;;  %5574 = vmatprep.subr.bf16.mxu1 %v8051_v16  ;;  %v8126_v47 = vld [vmem:[%s8782_s30 + $0x1294] ss:$8 sps:$4 sm:$0xff]   ;;  %v8121_v16 = vld [vmem:[%s8782_s30 + $0x690] ss:$8 sps:$4 sm:$0xff]  }
 0x18c   : > { %6066 = vmatprep.subr.bf16.mxu0 %v8054_v48  ;;  %v8124_v48 = vld [vmem:[%s8782_s30 + $0x1290] ss:$8 sps:$4 sm:$0xff]  }
 0x18e   : > { %5575 = vmatpush1.bf16.msra.mxu1 %v8049_v50  ;;  %v8129_v50 = vld [vmem:[%s8782_s30 + $0x6a4] ss:$8 sps:$4 sm:$0xff]  }
 0x18f   : > { %6067 = vmatpush1.bf16.msra.mxu0 %v8052_v51  ;;  %5576 = vmatprep.subr.bf16.mxu1 %v8057_v53  ;;  %v8132_v51 = vld [vmem:[%s8782_s30 + $0x12a4] ss:$8 sps:$4 sm:$0xff]   ;;  %v8127_v53 = vld [vmem:[%s8782_s30 + $0x6a0] ss:$8 sps:$4 sm:$0xff]  }
 0x190   : > { %6068 = vmatprep.subr.bf16.mxu0 %v8060_v54  ;;  %v8130_v54 = vld [vmem:[%s8782_s30 + $0x12a0] ss:$8 sps:$4 sm:$0xff]  }
 0x192   : > { %5577 = vmatpush1.bf16.msra.mxu1 %v8055_v62  ;;  %v8141_v62 = vld [vmem:[%s8782_s30 + $0x6c4] ss:$8 sps:$4 sm:$0xff]  }
 0x193   : > { %6069 = vmatpush1.bf16.msra.mxu0 %v8058_v63  ;;  %5578 = vmatprep.subr.bf16.mxu1 %v8063_v40  ;;  %v8144_v63 = vld [vmem:[%s8782_s30 + $0x12c4] ss:$8 sps:$4 sm:$0xff]   ;;  %v8139_v40 = vld [vmem:[%s8782_s30 + $0x6c0] ss:$8 sps:$4 sm:$0xff]  }
 0x194   : > { %6070 = vmatprep.subr.bf16.mxu0 %v8066_v0  ;;  %v8142_v0 = vld [vmem:[%s8782_s30 + $0x12c0] ss:$8 sps:$4 sm:$0xff]  }
 0x196   : > { %5579 = vmatpush1.bf16.msra.mxu1 %v8061_v55  ;;  %v8147_v55 = vld [vmem:[%s8782_s30 + $0x6d4] ss:$8 sps:$4 sm:$0xff]  }
 0x197   : > { %6071 = vmatpush1.bf16.msra.mxu0 %v8064_v2  ;;  %5589 = vmatprep.subr.bf16.mxu1 %v8069_v57  ;;  %v8150_v2 = vld [vmem:[%s8782_s30 + $0x12d4] ss:$8 sps:$4 sm:$0xff]   ;;  %v8145_v57 = vld [vmem:[%s8782_s30 + $0x6d0] ss:$8 sps:$4 sm:$0xff]  }
 0x198   : > { %6081 = vmatprep.subr.bf16.mxu0 %v8072_v3  ;;  %v8148_v3 = vld [vmem:[%s8782_s30 + $0x12d0] ss:$8 sps:$4 sm:$0xff]  }
 0x199   : > { %5581 = vmatmul.mubr.bf16.vlgmr.msra.gmra.mrb[0].mxu1 %v1160_v6  ;;  %v8151_v6 = vld [vmem:[%s8782_s30 + $0x6e0] ss:$8 sps:$4 sm:$0xff]  }
 0x19a   : > { %6073 = vmatmul.mubr.bf16.vlgmr.msra.gmra.mrb[0].mxu0 %v1307_v7  ;;  %5590 = vmatpush1.bf16.msra.mxu1 %v8067_v8  ;;  %v8154_v7 = vld [vmem:[%s8782_s30 + $0x12e0] ss:$8 sps:$4 sm:$0xff]   ;;  %v8159_v8 = vld [vmem:[%s8782_s30 + $0x6f4] ss:$8 sps:$4 sm:$0xff]  }
 0x19b   : > { %6082 = vmatpush1.bf16.msra.mxu0 %v8070_v9  ;;  %5591 = vmatprep.subr.bf16.mxu1 %v8075_v10  ;;  %v8162_v9 = vld [vmem:[%s8782_s30 + $0x12f4] ss:$8 sps:$4 sm:$0xff]   ;;  %v8157_v10 = vld [vmem:[%s8782_s30 + $0x6f0] ss:$8 sps:$4 sm:$0xff]  }
 0x19c   : > { %6083 = vmatprep.subr.bf16.mxu0 %v8078_v11  ;;  %5621 = vmatprep.mubr.bf16.mxu1 %v9304_v12  ;;  %v8160_v11 = vld [vmem:[%s8782_s30 + $0x12f0] ss:$8 sps:$4 sm:$0xff]  }
 0x19d   : > { %6113 = vmatprep.mubr.bf16.mxu0 %v9307_v58 }
 0x19e   : > { %5592 = vmatpush1.bf16.msra.mxu1 %v8073_v59  ;;  %v8166_v59 = vld [vmem:[%s8782_s30 + $0x704] ss:$8 sps:$4 sm:$0xff]  }
 0x19f   : > { %6084 = vmatpush1.bf16.msra.mxu0 %v8076_v13  ;;  %5593 = vmatprep.subr.bf16.mxu1 %v8081_v14  ;;  %v8170_v13 = vld [vmem:[%s8782_s30 + $0x1304] ss:$8 sps:$4 sm:$0xff]   ;;  %v9373_v14 = vrot.slane %v9282_v41, %v8843_v49  ;;  %v1163_v41 = vcombine.high %v9304_v12, %v9304_v12 }
 0x1a0   : > { %6085 = vmatprep.subr.bf16.mxu0 %v8084_v15  ;;  %v9377_v15 = vrot.slane %v9285_v1, %v8843_v49  ;;  %v8171_v1 = vld [vmem:[%s8782_s30 + $0x710] ss:$8 sps:$4 sm:$0xff]   ;;  %v8179_v12 = vld [vmem:[%s8782_s30 + $0x724] ss:$8 sps:$4 sm:$0xff]  }
 0x1a2   : > { %5594 = vmatpush1.bf16.msra.mxu1 %v8079_v18  ;;  %v8164_v18 = vld [vmem:[%s8782_s30 + $0x700] ss:$8 sps:$4 sm:$0xff]  }
 0x1a3   : > { %6086 = vmatpush1.bf16.msra.mxu0 %v8082_v19  ;;  %5595 = vmatprep.subr.bf16.mxu1 %v8087_v20  ;;  %v8168_v19 = vld [vmem:[%s8782_s30 + $0x1300] ss:$8 sps:$4 sm:$0xff]   ;;  %v8173_v20 = vld [vmem:[%s8782_s30 + $0x714] ss:$8 sps:$4 sm:$0xff]  }
 0x1a4   : > { %6087 = vmatprep.subr.bf16.mxu0 %v8090_v21  ;;  %v8176_v21 = vld [vmem:[%s8782_s30 + $0x1314] ss:$8 sps:$4 sm:$0xff]  }
 0x1a6   : > { %5596 = vmatpush1.bf16.msra.mxu1 %v8085_v22  ;;  %v1310_v22 = vcombine.high %v9307_v58, %v9307_v58  ;;  %v8177_v58 = vld [vmem:[%s8782_s30 + $0x720] ss:$8 sps:$4 sm:$0xff]  }
 0x1a7   : > { %6088 = vmatpush1.bf16.msra.mxu0 %v8088_v23  ;;  %5597 = vmatprep.subr.bf16.mxu1 %v8093_v52  ;;  %v8174_v23 = vld [vmem:[%s8782_s30 + $0x1310] ss:$8 sps:$4 sm:$0xff]   ;;  %v8182_v52 = vld [vmem:[%s8782_s30 + $0x1324] ss:$8 sps:$4 sm:$0xff]  }
 0x1a8   : > { %6089 = vmatprep.subr.bf16.mxu0 %v8096_v56  ;;  %v8180_v56 = vld [vmem:[%s8782_s30 + $0x1320] ss:$8 sps:$4 sm:$0xff]  }
 0x1aa   : > { %5598 = vmatpush1.bf16.msra.mxu1 %v8091_v26  ;;  %v8185_v26 = vld [vmem:[%s8782_s30 + $0x734] ss:$8 sps:$4 sm:$0xff]  }
 0x1ab   : > { %6090 = vmatpush1.bf16.msra.mxu0 %v8094_v27  ;;  %5599 = vmatprep.subr.bf16.mxu1 %v8099_v28  ;;  %v8188_v27 = vld [vmem:[%s8782_s30 + $0x1334] ss:$8 sps:$4 sm:$0xff]   ;;  %v8183_v28 = vld [vmem:[%s8782_s30 + $0x730] ss:$8 sps:$4 sm:$0xff]  }
 0x1ac   : > { %6091 = vmatprep.subr.bf16.mxu0 %v8102_v29  ;;  %v8186_v29 = vld [vmem:[%s8782_s30 + $0x1330] ss:$8 sps:$4 sm:$0xff]  }
 0x1ae   : > { %5600 = vmatpush1.bf16.msra.mxu1 %v8097_v30  ;;  %v8191_v30 = vld [vmem:[%s8782_s30 + $0x744] ss:$8 sps:$4 sm:$0xff]  }
 0x1af   : > { %6092 = vmatpush1.bf16.msra.mxu0 %v8100_v31  ;;  %5601 = vmatprep.subr.bf16.mxu1 %v8105_v32  ;;  %v8194_v31 = vld [vmem:[%s8782_s30 + $0x1344] ss:$8 sps:$4 sm:$0xff]   ;;  %v8189_v32 = vld [vmem:[%s8782_s30 + $0x740] ss:$8 sps:$4 sm:$0xff]  }
 0x1b0   : > { %6093 = vmatprep.subr.bf16.mxu0 %v8108_v33  ;;  %v8192_v33 = vld [vmem:[%s8782_s30 + $0x1340] ss:$8 sps:$4 sm:$0xff]  }
 0x1b2   : > { %5602 = vmatpush1.bf16.msra.mxu1 %v8103_v34  ;;  %v8197_v34 = vld [vmem:[%s8782_s30 + $0x754] ss:$8 sps:$4 sm:$0xff]  }
 0x1b3   : > { %6094 = vmatpush1.bf16.msra.mxu0 %v8106_v35  ;;  %5603 = vmatprep.subr.bf16.mxu1 %v8111_v17  ;;  %v8200_v35 = vld [vmem:[%s8782_s30 + $0x1354] ss:$8 sps:$4 sm:$0xff]   ;;  %v8195_v17 = vld [vmem:[%s8782_s30 + $0x750] ss:$8 sps:$4 sm:$0xff]  }
 0x1b4   : > { %6095 = vmatprep.subr.bf16.mxu0 %v8114_v37  ;;  %v8198_v37 = vld [vmem:[%s8782_s30 + $0x1350] ss:$8 sps:$4 sm:$0xff]  }
 0x1b6   : > { %5604 = vmatpush1.bf16.msra.mxu1 %v8109_v42  ;;  %v8203_v42 = vld [vmem:[%s8782_s30 + $0x764] ss:$8 sps:$4 sm:$0xff]  }
 0x1b7   : > { %6096 = vmatpush1.bf16.msra.mxu0 %v8112_v44  ;;  %5605 = vmatprep.subr.bf16.mxu1 %v8117_v24  ;;  %v8206_v44 = vld [vmem:[%s8782_s30 + $0x1364] ss:$8 sps:$4 sm:$0xff]   ;;  %v8201_v24 = vld [vmem:[%s8782_s30 + $0x760] ss:$8 sps:$4 sm:$0xff]  }
 0x1b8   : > { %6097 = vmatprep.subr.bf16.mxu0 %v8120_v45  ;;  %v8204_v45 = vld [vmem:[%s8782_s30 + $0x1360] ss:$8 sps:$4 sm:$0xff]  }
 0x1ba   : > { %5606 = vmatpush1.bf16.msra.mxu1 %v8115_v25  ;;  %v8209_v25 = vld [vmem:[%s8782_s30 + $0x774] ss:$8 sps:$4 sm:$0xff]  }
 0x1bb   : > { %6098 = vmatpush1.bf16.msra.mxu0 %v8118_v46  ;;  %5607 = vmatprep.subr.bf16.mxu1 %v8123_v36  ;;  %v8212_v46 = vld [vmem:[%s8782_s30 + $0x1374] ss:$8 sps:$4 sm:$0xff]   ;;  %v8207_v36 = vld [vmem:[%s8782_s30 + $0x770] ss:$8 sps:$4 sm:$0xff]  }
 0x1bc   : > { %6099 = vmatprep.subr.bf16.mxu0 %v8126_v47  ;;  %v8210_v47 = vld [vmem:[%s8782_s30 + $0x1370] ss:$8 sps:$4 sm:$0xff]  }
 0x1be   : > { %5608 = vmatpush1.bf16.msra.mxu1 %v8121_v16  ;;  %v8215_v16 = vld [vmem:[%s8782_s30 + $0x784] ss:$8 sps:$4 sm:$0xff]  }
 0x1bf   : > { %6100 = vmatpush1.bf16.msra.mxu0 %v8124_v48  ;;  %5609 = vmatprep.subr.bf16.mxu1 %v8129_v50  ;;  %v8218_v48 = vld [vmem:[%s8782_s30 + $0x1384] ss:$8 sps:$4 sm:$0xff]   ;;  %v8213_v50 = vld [vmem:[%s8782_s30 + $0x780] ss:$8 sps:$4 sm:$0xff]  }
 0x1c0   : > { %6101 = vmatprep.subr.bf16.mxu0 %v8132_v51  ;;  %v8216_v51 = vld [vmem:[%s8782_s30 + $0x1380] ss:$8 sps:$4 sm:$0xff]  }
 0x1c2   : > { %5610 = vmatpush1.bf16.msra.mxu1 %v8127_v53  ;;  %v8221_v53 = vld [vmem:[%s8782_s30 + $0x794] ss:$8 sps:$4 sm:$0xff]  }
 0x1c3   : > { %6102 = vmatpush1.bf16.msra.mxu0 %v8130_v54  ;;  %5611 = vmatprep.subr.bf16.mxu1 %v8135_v38  ;;  %v8224_v54 = vld [vmem:[%s8782_s30 + $0x1394] ss:$8 sps:$4 sm:$0xff]   ;;  %v8219_v38 = vld [vmem:[%s8782_s30 + $0x790] ss:$8 sps:$4 sm:$0xff]  }
 0x1c4   : > { %6103 = vmatprep.subr.bf16.mxu0 %v8138_v39  ;;  %v8222_v39 = vld [vmem:[%s8782_s30 + $0x1390] ss:$8 sps:$4 sm:$0xff]  }
 0x1c6   : > { %5612 = vmatpush1.bf16.msra.mxu1 %v8133_v60  ;;  %v8227_v60 = vld [vmem:[%s8782_s30 + $0x7a4] ss:$8 sps:$4 sm:$0xff]  }
 0x1c7   : > { %6104 = vmatpush1.bf16.msra.mxu0 %v8136_v61  ;;  %5613 = vmatprep.subr.bf16.mxu1 %v8141_v62  ;;  %v8230_v61 = vld [vmem:[%s8782_s30 + $0x13a4] ss:$8 sps:$4 sm:$0xff]   ;;  %v8225_v62 = vld [vmem:[%s8782_s30 + $0x7a0] ss:$8 sps:$4 sm:$0xff]  }
 0x1c8   : > { %6105 = vmatprep.subr.bf16.mxu0 %v8144_v63  ;;  %v8228_v63 = vld [vmem:[%s8782_s30 + $0x13a0] ss:$8 sps:$4 sm:$0xff]  }
 0x1ca   : > { %5614 = vmatpush1.bf16.msra.mxu1 %v8139_v40  ;;  %v8233_v40 = vld [vmem:[%s8782_s30 + $0x7b4] ss:$8 sps:$4 sm:$0xff]  }
 0x1cb   : > { %6106 = vmatpush1.bf16.msra.mxu0 %v8142_v0  ;;  %5615 = vmatprep.subr.bf16.mxu1 %v8147_v55  ;;  %v8236_v0 = vld [vmem:[%s8782_s30 + $0x13b4] ss:$8 sps:$4 sm:$0xff]   ;;  %v8231_v55 = vld [vmem:[%s8782_s30 + $0x7b0] ss:$8 sps:$4 sm:$0xff]  }
 0x1cc   : > { %6107 = vmatprep.subr.bf16.mxu0 %v8150_v2  ;;  %v8234_v2 = vld [vmem:[%s8782_s30 + $0x13b0] ss:$8 sps:$4 sm:$0xff]  }
 0x1ce   : > { %5616 = vmatpush1.bf16.msra.mxu1 %v8145_v57  ;;  %v8239_v57 = vld [vmem:[%s8782_s30 + $0x7c4] ss:$8 sps:$4 sm:$0xff]  }
 0x1cf   : > { %6108 = vmatpush1.bf16.msra.mxu0 %v8148_v3  ;;  %5617 = vmatprep.subr.bf16.mxu1 %v8153_v4  ;;  %v8242_v3 = vld [vmem:[%s8782_s30 + $0x13c4] ss:$8 sps:$4 sm:$0xff]   ;;  %v8237_v4 = vld [vmem:[%s8782_s30 + $0x7c0] ss:$8 sps:$4 sm:$0xff]  }
 0x1d0   : > { %6109 = vmatprep.subr.bf16.mxu0 %v8156_v5  ;;  %v8240_v5 = vld [vmem:[%s8782_s30 + $0x13c0] ss:$8 sps:$4 sm:$0xff]  }
 0x1d2   : > { %5618 = vmatpush1.bf16.msra.mxu1 %v8151_v6  ;;  %v8245_v6 = vld [vmem:[%s8782_s30 + $0x7d4] ss:$8 sps:$4 sm:$0xff]  }
 0x1d3   : > { %6110 = vmatpush1.bf16.msra.mxu0 %v8154_v7  ;;  %5619 = vmatprep.subr.bf16.mxu1 %v8159_v8  ;;  %v8248_v7 = vld [vmem:[%s8782_s30 + $0x13d4] ss:$8 sps:$4 sm:$0xff]   ;;  %v8243_v8 = vld [vmem:[%s8782_s30 + $0x7d0] ss:$8 sps:$4 sm:$0xff]  }
 0x1d4   : > { %6111 = vmatprep.subr.bf16.mxu0 %v8162_v9  ;;  %v8246_v9 = vld [vmem:[%s8782_s30 + $0x13d0] ss:$8 sps:$4 sm:$0xff]  }
 0x1d6   : > { %5620 = vmatpush1.bf16.msra.mxu1 %v8157_v10  ;;  %v8251_v10 = vld [vmem:[%s8782_s30 + $0x7e4] ss:$8 sps:$4 sm:$0xff]  }
 0x1d7   : > { %6112 = vmatpush1.bf16.msra.mxu0 %v8160_v11  ;;  %5630 = vmatprep.subr.bf16.mxu1 %v8166_v59  ;;  %v8254_v11 = vld [vmem:[%s8782_s30 + $0x13e4] ss:$8 sps:$4 sm:$0xff]   ;;  %v9442_v59 = vld [vmem:[%s8840_s11 + $0x10] sm:$0xff] }
 0x1d8   : > { %6122 = vmatprep.subr.bf16.mxu0 %v8170_v13  ;;  %v9445_v13 = vld [vmem:[%s8840_s11 + $0x28] sm:$0xff] }
 0x1d9   : > { %5622 = vmatmul.mubr.bf16.vlgmr.msra.gmra.mrb[0].mxu1 %v9373_v14 }
 0x1da   : > { %6114 = vmatmul.mubr.bf16.vlgmr.msra.gmra.mrb[0].mxu0 %v9377_v15  ;;  %5631 = vmatpush1.bf16.msra.mxu1 %v8164_v18  ;;  %v8249_v18 = vld [vmem:[%s8782_s30 + $0x7e0] ss:$8 sps:$4 sm:$0xff]  }
 0x1db   : > { %6123 = vmatpush1.bf16.msra.mxu0 %v8168_v19  ;;  %5632 = vmatprep.subr.bf16.mxu1 %v8173_v20  ;;  %v8252_v19 = vld [vmem:[%s8782_s30 + $0x13e0] ss:$8 sps:$4 sm:$0xff]   ;;  %v8257_v20 = vld [vmem:[%s8782_s30 + $0x7f4] ss:$8 sps:$4 sm:$0xff]  }
 0x1dc   : > { %6124 = vmatprep.subr.bf16.mxu0 %v8176_v21  ;;  %5662 = vmatprep.mubr.bf16.mxu1 %v1163_v41  ;;  %v8260_v21 = vld [vmem:[%s8782_s30 + $0x13f4] ss:$8 sps:$4 sm:$0xff]   ;;  %v9453_v41 = vrot.slane %v9442_v59, %v8843_v49 }
 0x1dd   : > { %6154 = vmatprep.mubr.bf16.mxu0 %v1310_v22  ;;  %v9457_v22 = vrot.slane %v9445_v13, %v8843_v49 }
 0x1de   : > { %5633 = vmatpush1.bf16.msra.mxu1 %v8171_v1  ;;  %v8255_v1 = vld [vmem:[%s8782_s30 + $0x7f0] ss:$8 sps:$4 sm:$0xff]  }
 0x1df   : > { %6125 = vmatpush1.bf16.msra.mxu0 %v8174_v23  ;;  %5634 = vmatprep.subr.bf16.mxu1 %v8179_v12  ;;  %v8258_v23 = vld [vmem:[%s8782_s30 + $0x13f0] ss:$8 sps:$4 sm:$0xff]   ;;  %v8263_v12 = vld [vmem:[%s8782_s30 + $0x804] ss:$8 sps:$4 sm:$0xff]  }
 0x1e0   : > { %6126 = vmatprep.subr.bf16.mxu0 %v8182_v52  ;;  %v8266_v52 = vld [vmem:[%s8782_s30 + $0x1404] ss:$8 sps:$4 sm:$0xff]  }
 0x1e2   : > { %5635 = vmatpush1.bf16.msra.mxu1 %v8177_v58  ;;  %v1179_v58 = vcombine.high %v9453_v41, %v9453_v41 }
 0x1e3   : > { %6127 = vmatpush1.bf16.msra.mxu0 %v8180_v56  ;;  %5636 = vmatprep.subr.bf16.mxu1 %v8185_v26  ;;  %v1326_v56 = vcombine.high %v9457_v22, %v9457_v22  ;;  %v1161_v26 = vcombine.high %v9373_v14, %v9373_v14 }
 0x1e4   : > { %6128 = vmatprep.subr.bf16.mxu0 %v8188_v27  ;;  %v1308_v27 = vcombine.high %v9377_v15, %v9377_v15  ;;  %v8267_v15 = vld [vmem:[%s8782_s30 + $0x810] ss:$8 sps:$4 sm:$0xff]  }
 0x1e5   : > { %v9479_v14 = vrot.slane %v1326_v56, %v8843_v49  ;;  %v8342_v56 = vld [vmem:[%s8782_s30 + $0x14d0] ss:$8 sps:$4 sm:$0xff]  }
 0x1e6   : > { %5637 = vmatpush1.bf16.msra.mxu1 %v8183_v28  ;;  %v8261_v28 = vld [vmem:[%s8782_s30 + $0x800] ss:$8 sps:$4 sm:$0xff]  }
 0x1e7   : > { %6129 = vmatpush1.bf16.msra.mxu0 %v8186_v29  ;;  %5638 = vmatprep.subr.bf16.mxu1 %v8191_v30  ;;  %v8264_v29 = vld [vmem:[%s8782_s30 + $0x1400] ss:$8 sps:$4 sm:$0xff]   ;;  %v8269_v30 = vld [vmem:[%s8782_s30 + $0x814] ss:$8 sps:$4 sm:$0xff]  }
 0x1e8   : > { %6130 = vmatprep.subr.bf16.mxu0 %v8194_v31  ;;  %v8272_v31 = vld [vmem:[%s8782_s30 + $0x1414] ss:$8 sps:$4 sm:$0xff]  }
 0x1ea   : > { %5639 = vmatpush1.bf16.msra.mxu1 %v8189_v32  ;;  %v9476_v32 = vrot.slane %v1179_v58, %v8843_v49  ;;  %v8339_v58 = vld [vmem:[%s8782_s30 + $0x8d0] ss:$8 sps:$4 sm:$0xff]  }
 0x1eb   : > { %6131 = vmatpush1.bf16.msra.mxu0 %v8192_v33  ;;  %5640 = vmatprep.subr.bf16.mxu1 %v8197_v34  ;;  %v8270_v33 = vld [vmem:[%s8782_s30 + $0x1410] ss:$8 sps:$4 sm:$0xff]   ;;  %v8275_v34 = vld [vmem:[%s8782_s30 + $0x824] ss:$8 sps:$4 sm:$0xff]  }
 0x1ec   : > { %6132 = vmatprep.subr.bf16.mxu0 %v8200_v35  ;;  %v8278_v35 = vld [vmem:[%s8782_s30 + $0x1424] ss:$8 sps:$4 sm:$0xff]  }
 0x1ee   : > { %5641 = vmatpush1.bf16.msra.mxu1 %v8195_v17  ;;  %v8273_v17 = vld [vmem:[%s8782_s30 + $0x820] ss:$8 sps:$4 sm:$0xff]  }
 0x1ef   : > { %6133 = vmatpush1.bf16.msra.mxu0 %v8198_v37  ;;  %5642 = vmatprep.subr.bf16.mxu1 %v8203_v42  ;;  %v8276_v37 = vld [vmem:[%s8782_s30 + $0x1420] ss:$8 sps:$4 sm:$0xff]   ;;  %v8281_v42 = vld [vmem:[%s8782_s30 + $0x834] ss:$8 sps:$4 sm:$0xff]  }
 0x1f0   : > { %6134 = vmatprep.subr.bf16.mxu0 %v8206_v44  ;;  %v8284_v44 = vld [vmem:[%s8782_s30 + $0x1434] ss:$8 sps:$4 sm:$0xff]  }
 0x1f2   : > { %5643 = vmatpush1.bf16.msra.mxu1 %v8201_v24  ;;  %v8279_v24 = vld [vmem:[%s8782_s30 + $0x830] ss:$8 sps:$4 sm:$0xff]  }
 0x1f3   : > { %6135 = vmatpush1.bf16.msra.mxu0 %v8204_v45  ;;  %5644 = vmatprep.subr.bf16.mxu1 %v8209_v25  ;;  %v8282_v45 = vld [vmem:[%s8782_s30 + $0x1430] ss:$8 sps:$4 sm:$0xff]   ;;  %v8287_v25 = vld [vmem:[%s8782_s30 + $0x844] ss:$8 sps:$4 sm:$0xff]  }
 0x1f4   : > { %6136 = vmatprep.subr.bf16.mxu0 %v8212_v46  ;;  %v8290_v46 = vld [vmem:[%s8782_s30 + $0x1444] ss:$8 sps:$4 sm:$0xff]  }
 0x1f6   : > { %5645 = vmatpush1.bf16.msra.mxu1 %v8207_v36  ;;  %v8285_v36 = vld [vmem:[%s8782_s30 + $0x840] ss:$8 sps:$4 sm:$0xff]  }
 0x1f7   : > { %6137 = vmatpush1.bf16.msra.mxu0 %v8210_v47  ;;  %5646 = vmatprep.subr.bf16.mxu1 %v8215_v16  ;;  %v8288_v47 = vld [vmem:[%s8782_s30 + $0x1440] ss:$8 sps:$4 sm:$0xff]   ;;  %v8293_v16 = vld [vmem:[%s8782_s30 + $0x854] ss:$8 sps:$4 sm:$0xff]  }
 0x1f8   : > { %6138 = vmatprep.subr.bf16.mxu0 %v8218_v48  ;;  %v8296_v48 = vld [vmem:[%s8782_s30 + $0x1454] ss:$8 sps:$4 sm:$0xff]  }
 0x1fa   : > { %5647 = vmatpush1.bf16.msra.mxu1 %v8213_v50  ;;  %v8291_v50 = vld [vmem:[%s8782_s30 + $0x850] ss:$8 sps:$4 sm:$0xff]  }
 0x1fb   : > { %6139 = vmatpush1.bf16.msra.mxu0 %v8216_v51  ;;  %5648 = vmatprep.subr.bf16.mxu1 %v8221_v53  ;;  %v8294_v51 = vld [vmem:[%s8782_s30 + $0x1450] ss:$8 sps:$4 sm:$0xff]   ;;  %v8299_v53 = vld [vmem:[%s8782_s30 + $0x864] ss:$8 sps:$4 sm:$0xff]  }
 0x1fc   : > { %6140 = vmatprep.subr.bf16.mxu0 %v8224_v54  ;;  %v8302_v54 = vld [vmem:[%s8782_s30 + $0x1464] ss:$8 sps:$4 sm:$0xff]  }
 0x1fe   : > { %5649 = vmatpush1.bf16.msra.mxu1 %v8219_v38  ;;  %v8297_v38 = vld [vmem:[%s8782_s30 + $0x860] ss:$8 sps:$4 sm:$0xff]  }
 0x1ff   : > { %6141 = vmatpush1.bf16.msra.mxu0 %v8222_v39  ;;  %5650 = vmatprep.subr.bf16.mxu1 %v8227_v60  ;;  %v8300_v39 = vld [vmem:[%s8782_s30 + $0x1460] ss:$8 sps:$4 sm:$0xff]   ;;  %v8305_v60 = vld [vmem:[%s8782_s30 + $0x874] ss:$8 sps:$4 sm:$0xff]  }
 0x200   : > { %6142 = vmatprep.subr.bf16.mxu0 %v8230_v61  ;;  %v8308_v61 = vld [vmem:[%s8782_s30 + $0x1474] ss:$8 sps:$4 sm:$0xff]  }
 0x202   : > { %5651 = vmatpush1.bf16.msra.mxu1 %v8225_v62  ;;  %v8303_v62 = vld [vmem:[%s8782_s30 + $0x870] ss:$8 sps:$4 sm:$0xff]  }
 0x203   : > { %6143 = vmatpush1.bf16.msra.mxu0 %v8228_v63  ;;  %5652 = vmatprep.subr.bf16.mxu1 %v8233_v40  ;;  %v8306_v63 = vld [vmem:[%s8782_s30 + $0x1470] ss:$8 sps:$4 sm:$0xff]   ;;  %v8311_v40 = vld [vmem:[%s8782_s30 + $0x884] ss:$8 sps:$4 sm:$0xff]  }
 0x204   : > { %6144 = vmatprep.subr.bf16.mxu0 %v8236_v0  ;;  %v8314_v0 = vld [vmem:[%s8782_s30 + $0x1484] ss:$8 sps:$4 sm:$0xff]  }
 0x206   : > { %5653 = vmatpush1.bf16.msra.mxu1 %v8231_v55  ;;  %v8309_v55 = vld [vmem:[%s8782_s30 + $0x880] ss:$8 sps:$4 sm:$0xff]  }
 0x207   : > { %6145 = vmatpush1.bf16.msra.mxu0 %v8234_v2  ;;  %5654 = vmatprep.subr.bf16.mxu1 %v8239_v57  ;;  %v8312_v2 = vld [vmem:[%s8782_s30 + $0x1480] ss:$8 sps:$4 sm:$0xff]   ;;  %v8317_v57 = vld [vmem:[%s8782_s30 + $0x894] ss:$8 sps:$4 sm:$0xff]  }
 0x208   : > { %6146 = vmatprep.subr.bf16.mxu0 %v8242_v3  ;;  %v8320_v3 = vld [vmem:[%s8782_s30 + $0x1494] ss:$8 sps:$4 sm:$0xff]  }
 0x20a   : > { %5655 = vmatpush1.bf16.msra.mxu1 %v8237_v4  ;;  %v8315_v4 = vld [vmem:[%s8782_s30 + $0x890] ss:$8 sps:$4 sm:$0xff]  }
 0x20b   : > { %6147 = vmatpush1.bf16.msra.mxu0 %v8240_v5  ;;  %5656 = vmatprep.subr.bf16.mxu1 %v8245_v6  ;;  %v8318_v5 = vld [vmem:[%s8782_s30 + $0x1490] ss:$8 sps:$4 sm:$0xff]   ;;  %v8323_v6 = vld [vmem:[%s8782_s30 + $0x8a4] ss:$8 sps:$4 sm:$0xff]  }
 0x20c   : > { %6148 = vmatprep.subr.bf16.mxu0 %v8248_v7  ;;  %v8326_v7 = vld [vmem:[%s8782_s30 + $0x14a4] ss:$8 sps:$4 sm:$0xff]  }
 0x20e   : > { %5657 = vmatpush1.bf16.msra.mxu1 %v8243_v8  ;;  %v8321_v8 = vld [vmem:[%s8782_s30 + $0x8a0] ss:$8 sps:$4 sm:$0xff]  }
 0x20f   : > { %6149 = vmatpush1.bf16.msra.mxu0 %v8246_v9  ;;  %5658 = vmatprep.subr.bf16.mxu1 %v8251_v10  ;;  %v8324_v9 = vld [vmem:[%s8782_s30 + $0x14a0] ss:$8 sps:$4 sm:$0xff]   ;;  %v8329_v10 = vld [vmem:[%s8782_s30 + $0x8b4] ss:$8 sps:$4 sm:$0xff]  }
 0x210   : > { %6150 = vmatprep.subr.bf16.mxu0 %v8254_v11  ;;  %v8332_v11 = vld [vmem:[%s8782_s30 + $0x14b4] ss:$8 sps:$4 sm:$0xff]  }
 0x212   : > { %5659 = vmatpush1.bf16.msra.mxu1 %v8249_v18  ;;  %v8327_v18 = vld [vmem:[%s8782_s30 + $0x8b0] ss:$8 sps:$4 sm:$0xff]  }
 0x213   : > { %6151 = vmatpush1.bf16.msra.mxu0 %v8252_v19  ;;  %5660 = vmatprep.subr.bf16.mxu1 %v8257_v20  ;;  %v8330_v19 = vld [vmem:[%s8782_s30 + $0x14b0] ss:$8 sps:$4 sm:$0xff]   ;;  %v8335_v20 = vld [vmem:[%s8782_s30 + $0x8c4] ss:$8 sps:$4 sm:$0xff]  }
 0x214   : > { %6152 = vmatprep.subr.bf16.mxu0 %v8260_v21  ;;  %v8338_v21 = vld [vmem:[%s8782_s30 + $0x14c4] ss:$8 sps:$4 sm:$0xff]  }
 0x216   : > { %5661 = vmatpush1.bf16.msra.mxu1 %v8255_v1  ;;  %v8333_v1 = vld [vmem:[%s8782_s30 + $0x8c0] ss:$8 sps:$4 sm:$0xff]  }
 0x217   : > { %6153 = vmatpush1.bf16.msra.mxu0 %v8258_v23  ;;  %5671 = vmatprep.subr.bf16.mxu1 %v8263_v12  ;;  %v8336_v23 = vld [vmem:[%s8782_s30 + $0x14c0] ss:$8 sps:$4 sm:$0xff]   ;;  %v8341_v12 = vld [vmem:[%s8782_s30 + $0x8d4] ss:$8 sps:$4 sm:$0xff]  }
 0x218   : > { %6163 = vmatprep.subr.bf16.mxu0 %v8266_v52  ;;  %v8344_v52 = vld [vmem:[%s8782_s30 + $0x14d4] ss:$8 sps:$4 sm:$0xff]  }
 0x219   : > { %5663 = vmatmul.mubr.bf16.vlgmr.msra.gmra.mrb[0].mxu1 %v1161_v26  ;;  %v8347_v26 = vld [vmem:[%s8782_s30 + $0x8e4] ss:$8 sps:$4 sm:$0xff]  }
 0x21a   : > { %6155 = vmatmul.mubr.bf16.vlgmr.msra.gmra.mrb[0].mxu0 %v1308_v27  ;;  %5672 = vmatpush1.bf16.msra.mxu1 %v8261_v28  ;;  %v8350_v27 = vld [vmem:[%s8782_s30 + $0x14e4] ss:$8 sps:$4 sm:$0xff]   ;;  %v8345_v28 = vld [vmem:[%s8782_s30 + $0x8e0] ss:$8 sps:$4 sm:$0xff]  }
 0x21b   : > { %6164 = vmatpush1.bf16.msra.mxu0 %v8264_v29  ;;  %5673 = vmatprep.subr.bf16.mxu1 %v8269_v30  ;;  %v8348_v29 = vld [vmem:[%s8782_s30 + $0x14e0] ss:$8 sps:$4 sm:$0xff]   ;;  %v8353_v30 = vld [vmem:[%s8782_s30 + $0x8f4] ss:$8 sps:$4 sm:$0xff]  }
 0x21c   : > { %6165 = vmatprep.subr.bf16.mxu0 %v8272_v31  ;;  %5703 = vmatprep.mubr.bf16.mxu1 %v9476_v32  ;;  %v8356_v31 = vld [vmem:[%s8782_s30 + $0x14f4] ss:$8 sps:$4 sm:$0xff]  }
 0x21d   : > { %6195 = vmatprep.mubr.bf16.mxu0 %v9479_v14 }
 0x21e   : > { %5674 = vmatpush1.bf16.msra.mxu1 %v8267_v15  ;;  %v8351_v15 = vld [vmem:[%s8782_s30 + $0x8f0] ss:$8 sps:$4 sm:$0xff]  }
 0x21f   : > { %6166 = vmatpush1.bf16.msra.mxu0 %v8270_v33  ;;  %5675 = vmatprep.subr.bf16.mxu1 %v8275_v34  ;;  %v8354_v33 = vld [vmem:[%s8782_s30 + $0x14f0] ss:$8 sps:$4 sm:$0xff]   ;;  %v8359_v34 = vld [vmem:[%s8782_s30 + $0x904] ss:$8 sps:$4 sm:$0xff]  }
 0x220   : > { %6167 = vmatprep.subr.bf16.mxu0 %v8278_v35  ;;  %v8362_v35 = vld [vmem:[%s8782_s30 + $0x1504] ss:$8 sps:$4 sm:$0xff]  }
 0x222   : > { %5676 = vmatpush1.bf16.msra.mxu1 %v8273_v17  ;;  %v9545_v17 = vrot.slane %v9453_v41, %v8843_v49  ;;  %v1211_v41 = vcombine.high %v9476_v32, %v9476_v32  ;;  %v8371_v32 = vld [vmem:[%s8782_s30 + $0x924] ss:$8 sps:$4 sm:$0xff]  }
 0x223   : > { %6168 = vmatpush1.bf16.msra.mxu0 %v8276_v37  ;;  %5677 = vmatprep.subr.bf16.mxu1 %v8281_v42  ;;  %v9549_v37 = vrot.slane %v9457_v22, %v8843_v49  ;;  %v8357_v42 = vld [vmem:[%s8782_s30 + $0x900] ss:$8 sps:$4 sm:$0xff]   ;;  %v8363_v22 = vld [vmem:[%s8782_s30 + $0x910] ss:$8 sps:$4 sm:$0xff]  }
 0x224   : > { %6169 = vmatprep.subr.bf16.mxu0 %v8284_v44  ;;  %v8360_v44 = vld [vmem:[%s8782_s30 + $0x1500] ss:$8 sps:$4 sm:$0xff]  }
 0x226   : > { %5678 = vmatpush1.bf16.msra.mxu1 %v8279_v24  ;;  %v8365_v24 = vld [vmem:[%s8782_s30 + $0x914] ss:$8 sps:$4 sm:$0xff]  }
 0x227   : > { %6170 = vmatpush1.bf16.msra.mxu0 %v8282_v45  ;;  %5679 = vmatprep.subr.bf16.mxu1 %v8287_v25  ;;  %v8368_v45 = vld [vmem:[%s8782_s30 + $0x1514] ss:$8 sps:$4 sm:$0xff]   ;;  %v1358_v25 = vcombine.high %v9479_v14, %v9479_v14  ;;  %v8369_v14 = vld [vmem:[%s8782_s30 + $0x920] ss:$8 sps:$4 sm:$0xff]  }
 0x228   : > { %6171 = vmatprep.subr.bf16.mxu0 %v8290_v46  ;;  %v8366_v46 = vld [vmem:[%s8782_s30 + $0x1510] ss:$8 sps:$4 sm:$0xff]  }
 0x22a   : > { %5680 = vmatpush1.bf16.msra.mxu1 %v8285_v36  ;;  %v8374_v36 = vld [vmem:[%s8782_s30 + $0x1524] ss:$8 sps:$4 sm:$0xff]  }
 0x22b   : > { %6172 = vmatpush1.bf16.msra.mxu0 %v8288_v47  ;;  %5681 = vmatprep.subr.bf16.mxu1 %v8293_v16  ;;  %v8372_v47 = vld [vmem:[%s8782_s30 + $0x1520] ss:$8 sps:$4 sm:$0xff]   ;;  %v8377_v16 = vld [vmem:[%s8782_s30 + $0x934] ss:$8 sps:$4 sm:$0xff]  }
 0x22c   : > { %6173 = vmatprep.subr.bf16.mxu0 %v8296_v48  ;;  %v8380_v48 = vld [vmem:[%s8782_s30 + $0x1534] ss:$8 sps:$4 sm:$0xff]  }
 0x22e   : > { %5682 = vmatpush1.bf16.msra.mxu1 %v8291_v50  ;;  %v8375_v50 = vld [vmem:[%s8782_s30 + $0x930] ss:$8 sps:$4 sm:$0xff]  }
 0x22f   : > { %6174 = vmatpush1.bf16.msra.mxu0 %v8294_v51  ;;  %5683 = vmatprep.subr.bf16.mxu1 %v8299_v53  ;;  %v8378_v51 = vld [vmem:[%s8782_s30 + $0x1530] ss:$8 sps:$4 sm:$0xff]   ;;  %v8383_v53 = vld [vmem:[%s8782_s30 + $0x944] ss:$8 sps:$4 sm:$0xff]  }
 0x230   : > { %6175 = vmatprep.subr.bf16.mxu0 %v8302_v54  ;;  %v8386_v54 = vld [vmem:[%s8782_s30 + $0x1544] ss:$8 sps:$4 sm:$0xff]  }
 0x232   : > { %5684 = vmatpush1.bf16.msra.mxu1 %v8297_v38  ;;  %v8381_v38 = vld [vmem:[%s8782_s30 + $0x940] ss:$8 sps:$4 sm:$0xff]  }
 0x233   : > { %6176 = vmatpush1.bf16.msra.mxu0 %v8300_v39  ;;  %5685 = vmatprep.subr.bf16.mxu1 %v8305_v60  ;;  %v8384_v39 = vld [vmem:[%s8782_s30 + $0x1540] ss:$8 sps:$4 sm:$0xff]   ;;  %v8389_v60 = vld [vmem:[%s8782_s30 + $0x954] ss:$8 sps:$4 sm:$0xff]  }
 0x234   : > { %6177 = vmatprep.subr.bf16.mxu0 %v8308_v61  ;;  %v8392_v61 = vld [vmem:[%s8782_s30 + $0x1554] ss:$8 sps:$4 sm:$0xff]  }
 0x236   : > { %5686 = vmatpush1.bf16.msra.mxu1 %v8303_v62  ;;  %v8387_v62 = vld [vmem:[%s8782_s30 + $0x950] ss:$8 sps:$4 sm:$0xff]  }
 0x237   : > { %6178 = vmatpush1.bf16.msra.mxu0 %v8306_v63  ;;  %5687 = vmatprep.subr.bf16.mxu1 %v8311_v40  ;;  %v8390_v63 = vld [vmem:[%s8782_s30 + $0x1550] ss:$8 sps:$4 sm:$0xff]   ;;  %v8395_v40 = vld [vmem:[%s8782_s30 + $0x964] ss:$8 sps:$4 sm:$0xff]  }
 0x238   : > { %6179 = vmatprep.subr.bf16.mxu0 %v8314_v0  ;;  %v8398_v0 = vld [vmem:[%s8782_s30 + $0x1564] ss:$8 sps:$4 sm:$0xff]  }
 0x23a   : > { %5688 = vmatpush1.bf16.msra.mxu1 %v8309_v55  ;;  %v8393_v55 = vld [vmem:[%s8782_s30 + $0x960] ss:$8 sps:$4 sm:$0xff]  }
 0x23b   : > { %6180 = vmatpush1.bf16.msra.mxu0 %v8312_v2  ;;  %5689 = vmatprep.subr.bf16.mxu1 %v8317_v57  ;;  %v8396_v2 = vld [vmem:[%s8782_s30 + $0x1560] ss:$8 sps:$4 sm:$0xff]   ;;  %v8401_v57 = vld [vmem:[%s8782_s30 + $0x974] ss:$8 sps:$4 sm:$0xff]  }
 0x23c   : > { %6181 = vmatprep.subr.bf16.mxu0 %v8320_v3  ;;  %v8404_v3 = vld [vmem:[%s8782_s30 + $0x1574] ss:$8 sps:$4 sm:$0xff]  }
 0x23e   : > { %5690 = vmatpush1.bf16.msra.mxu1 %v8315_v4  ;;  %v8399_v4 = vld [vmem:[%s8782_s30 + $0x970] ss:$8 sps:$4 sm:$0xff]  }
 0x23f   : > { %6182 = vmatpush1.bf16.msra.mxu0 %v8318_v5  ;;  %5691 = vmatprep.subr.bf16.mxu1 %v8323_v6  ;;  %v8402_v5 = vld [vmem:[%s8782_s30 + $0x1570] ss:$8 sps:$4 sm:$0xff]   ;;  %v8407_v6 = vld [vmem:[%s8782_s30 + $0x984] ss:$8 sps:$4 sm:$0xff]  }
 0x240   : > { %6183 = vmatprep.subr.bf16.mxu0 %v8326_v7  ;;  %v8410_v7 = vld [vmem:[%s8782_s30 + $0x1584] ss:$8 sps:$4 sm:$0xff]  }
 0x242   : > { %5692 = vmatpush1.bf16.msra.mxu1 %v8321_v8  ;;  %v8405_v8 = vld [vmem:[%s8782_s30 + $0x980] ss:$8 sps:$4 sm:$0xff]  }
 0x243   : > { %6184 = vmatpush1.bf16.msra.mxu0 %v8324_v9  ;;  %5693 = vmatprep.subr.bf16.mxu1 %v8329_v10  ;;  %v8408_v9 = vld [vmem:[%s8782_s30 + $0x1580] ss:$8 sps:$4 sm:$0xff]   ;;  %v8413_v10 = vld [vmem:[%s8782_s30 + $0x994] ss:$8 sps:$4 sm:$0xff]  }
 0x244   : > { %6185 = vmatprep.subr.bf16.mxu0 %v8332_v11  ;;  %v8416_v11 = vld [vmem:[%s8782_s30 + $0x1594] ss:$8 sps:$4 sm:$0xff]  }
 0x246   : > { %5694 = vmatpush1.bf16.msra.mxu1 %v8327_v18  ;;  %v8411_v18 = vld [vmem:[%s8782_s30 + $0x990] ss:$8 sps:$4 sm:$0xff]  }
 0x247   : > { %6186 = vmatpush1.bf16.msra.mxu0 %v8330_v19  ;;  %5695 = vmatprep.subr.bf16.mxu1 %v8335_v20  ;;  %v8414_v19 = vld [vmem:[%s8782_s30 + $0x1590] ss:$8 sps:$4 sm:$0xff]   ;;  %v8419_v20 = vld [vmem:[%s8782_s30 + $0x9a4] ss:$8 sps:$4 sm:$0xff]  }
 0x248   : > { %6187 = vmatprep.subr.bf16.mxu0 %v8338_v21  ;;  %v8422_v21 = vld [vmem:[%s8782_s30 + $0x15a4] ss:$8 sps:$4 sm:$0xff]  }
 0x24a   : > { %5696 = vmatpush1.bf16.msra.mxu1 %v8333_v1  ;;  %v8417_v1 = vld [vmem:[%s8782_s30 + $0x9a0] ss:$8 sps:$4 sm:$0xff]  }
 0x24b   : > { %6188 = vmatpush1.bf16.msra.mxu0 %v8336_v23  ;;  %5697 = vmatprep.subr.bf16.mxu1 %v8341_v12  ;;  %v8420_v23 = vld [vmem:[%s8782_s30 + $0x15a0] ss:$8 sps:$4 sm:$0xff]   ;;  %v8425_v12 = vld [vmem:[%s8782_s30 + $0x9b4] ss:$8 sps:$4 sm:$0xff]  }
 0x24c   : > { %6189 = vmatprep.subr.bf16.mxu0 %v8344_v52  ;;  %v8428_v52 = vld [vmem:[%s8782_s30 + $0x15b4] ss:$8 sps:$4 sm:$0xff]  }
 0x24e   : > { %5698 = vmatpush1.bf16.msra.mxu1 %v8339_v58  ;;  %v8423_v58 = vld [vmem:[%s8782_s30 + $0x9b0] ss:$8 sps:$4 sm:$0xff]  }
 0x24f   : > { %6190 = vmatpush1.bf16.msra.mxu0 %v8342_v56  ;;  %5699 = vmatprep.subr.bf16.mxu1 %v8347_v26  ;;  %v8426_v56 = vld [vmem:[%s8782_s30 + $0x15b0] ss:$8 sps:$4 sm:$0xff]   ;;  %v8431_v26 = vld [vmem:[%s8782_s30 + $0x9c4] ss:$8 sps:$4 sm:$0xff]  }
 0x250   : > { %6191 = vmatprep.subr.bf16.mxu0 %v8350_v27  ;;  %v8434_v27 = vld [vmem:[%s8782_s30 + $0x15c4] ss:$8 sps:$4 sm:$0xff]  }
 0x252   : > { %5700 = vmatpush1.bf16.msra.mxu1 %v8345_v28  ;;  %v8429_v28 = vld [vmem:[%s8782_s30 + $0x9c0] ss:$8 sps:$4 sm:$0xff]  }
 0x253   : > { %6192 = vmatpush1.bf16.msra.mxu0 %v8348_v29  ;;  %5701 = vmatprep.subr.bf16.mxu1 %v8353_v30  ;;  %v8432_v29 = vld [vmem:[%s8782_s30 + $0x15c0] ss:$8 sps:$4 sm:$0xff]   ;;  %v8437_v30 = vld [vmem:[%s8782_s30 + $0x9d4] ss:$8 sps:$4 sm:$0xff]  }
 0x254   : > { %6193 = vmatprep.subr.bf16.mxu0 %v8356_v31  ;;  %v8440_v31 = vld [vmem:[%s8782_s30 + $0x15d4] ss:$8 sps:$4 sm:$0xff]  }
 0x256   : > { %5702 = vmatpush1.bf16.msra.mxu1 %v8351_v15  ;;  %v8435_v15 = vld [vmem:[%s8782_s30 + $0x9d0] ss:$8 sps:$4 sm:$0xff]  }
 0x257   : > { %6194 = vmatpush1.bf16.msra.mxu0 %v8354_v33  ;;  %5712 = vmatprep.subr.bf16.mxu1 %v8359_v34  ;;  %v8438_v33 = vld [vmem:[%s8782_s30 + $0x15d0] ss:$8 sps:$4 sm:$0xff]   ;;  %v8443_v34 = vld [vmem:[%s8782_s30 + $0x9e4] ss:$8 sps:$4 sm:$0xff]  }
 0x258   : > { %6204 = vmatprep.subr.bf16.mxu0 %v8362_v35  ;;  %v8446_v35 = vld [vmem:[%s8782_s30 + $0x15e4] ss:$8 sps:$4 sm:$0xff]  }
 0x259   : > { %5704 = vmatmul.mubr.bf16.vlgmr.msra.gmra.mrb[0].mxu1 %v9545_v17 }
 0x25a   : > { %6196 = vmatmul.mubr.bf16.vlgmr.msra.gmra.mrb[0].mxu0 %v9549_v37  ;;  %5713 = vmatpush1.bf16.msra.mxu1 %v8357_v42  ;;  %v1164_v42 = vcombine.high %v9442_v59, %v9442_v59  ;;  %v8447_v59 = vld [vmem:[%s8782_s30 + $0x9f0] ss:$8 sps:$4 sm:$0xff]  }
 0x25b   : > { %6205 = vmatpush1.bf16.msra.mxu0 %v8360_v44  ;;  %5714 = vmatprep.subr.bf16.mxu1 %v8365_v24  ;;  %v1311_v44 = vcombine.high %v9445_v13, %v9445_v13  ;;  %v8441_v24 = vld [vmem:[%s8782_s30 + $0x9e0] ss:$8 sps:$4 sm:$0xff]   ;;  %v8450_v13 = vld [vmem:[%s8782_s30 + $0x15f0] ss:$8 sps:$4 sm:$0xff]  }
 0x25c   : > { %6206 = vmatprep.subr.bf16.mxu0 %v8368_v45  ;;  %5744 = vmatprep.mubr.bf16.mxu1 %v1211_v41  ;;  %v8444_v45 = vld [vmem:[%s8782_s30 + $0x15e0] ss:$8 sps:$4 sm:$0xff]   ;;  %v8449_v41 = vld [vmem:[%s8782_s30 + $0x9f4] ss:$8 sps:$4 sm:$0xff]  }
 0x25d   : > { %6236 = vmatprep.mubr.bf16.mxu0 %v1358_v25  ;;  %v8452_v25 = vld [vmem:[%s8782_s30 + $0x15f4] ss:$8 sps:$4 sm:$0xff]  }
 0x25e   : > { %5715 = vmatpush1.bf16.msra.mxu1 %v8363_v22  ;;  %v9622_v22 = vrot.slane %v1164_v42, %v8843_v49  ;;  %v8519_v42 = vld [vmem:[%s8782_s30 + $0xab0] ss:$8 sps:$4 sm:$0xff]  }
 0x25f   : > { %6207 = vmatpush1.bf16.msra.mxu0 %v8366_v46  ;;  %5716 = vmatprep.subr.bf16.mxu1 %v8371_v32  ;;  %v9625_v46 = vrot.slane %v1311_v44, %v8843_v49  ;;  %v8455_v32 = vld [vmem:[%s8782_s30 + $0xa04] ss:$8 sps:$4 sm:$0xff]   ;;  %v8522_v44 = vld [vmem:[%s8782_s30 + $0x16b0] ss:$8 sps:$4 sm:$0xff]  }
 0x260   : > { %6208 = vmatprep.subr.bf16.mxu0 %v8374_v36  ;;  %v8458_v36 = vld [vmem:[%s8782_s30 + $0x1604] ss:$8 sps:$4 sm:$0xff]  }
 0x262   : > { %5717 = vmatpush1.bf16.msra.mxu1 %v8369_v14  ;;  %v1180_v14 = vcombine.high %v9622_v22, %v9622_v22 }
 0x263   : > { %6209 = vmatpush1.bf16.msra.mxu0 %v8372_v47  ;;  %5718 = vmatprep.subr.bf16.mxu1 %v8377_v16  ;;  %v1327_v47 = vcombine.high %v9625_v46, %v9625_v46  ;;  %v1209_v16 = vcombine.high %v9545_v17, %v9545_v17 }
 0x264   : > { %6210 = vmatprep.subr.bf16.mxu0 %v8380_v48  ;;  %v1356_v48 = vcombine.high %v9549_v37, %v9549_v37  ;;  %v8459_v37 = vld [vmem:[%s8782_s30 + $0xa10] ss:$8 sps:$4 sm:$0xff]  }
 0x265   : > { %v9647_v17 = vrot.slane %v1327_v47, %v8843_v49  ;;  %v8542_v47 = vld [vmem:[%s8782_s30 + $0x16e4] ss:$8 sps:$4 sm:$0xff]  }
 0x266   : > { %5719 = vmatpush1.bf16.msra.mxu1 %v8375_v50  ;;  %v8453_v50 = vld [vmem:[%s8782_s30 + $0xa00] ss:$8 sps:$4 sm:$0xff]  }
 0x267   : > { %6211 = vmatpush1.bf16.msra.mxu0 %v8378_v51  ;;  %5720 = vmatprep.subr.bf16.mxu1 %v8383_v53  ;;  %v8456_v51 = vld [vmem:[%s8782_s30 + $0x1600] ss:$8 sps:$4 sm:$0xff]   ;;  %v8461_v53 = vld [vmem:[%s8782_s30 + $0xa14] ss:$8 sps:$4 sm:$0xff]  }
 0x268   : > { %6212 = vmatprep.subr.bf16.mxu0 %v8386_v54  ;;  %v8464_v54 = vld [vmem:[%s8782_s30 + $0x1614] ss:$8 sps:$4 sm:$0xff]  }
 0x26a   : > { %5721 = vmatpush1.bf16.msra.mxu1 %v8381_v38  ;;  %v9644_v38 = vrot.slane %v1180_v14, %v8843_v49  ;;  %v8539_v14 = vld [vmem:[%s8782_s30 + $0xae4] ss:$8 sps:$4 sm:$0xff]  }
 0x26b   : > { %6213 = vmatpush1.bf16.msra.mxu0 %v8384_v39  ;;  %5722 = vmatprep.subr.bf16.mxu1 %v8389_v60  ;;  %v8462_v39 = vld [vmem:[%s8782_s30 + $0x1610] ss:$8 sps:$4 sm:$0xff]   ;;  %v8467_v60 = vld [vmem:[%s8782_s30 + $0xa24] ss:$8 sps:$4 sm:$0xff]  }
 0x26c   : > { %6214 = vmatprep.subr.bf16.mxu0 %v8392_v61  ;;  %v8470_v61 = vld [vmem:[%s8782_s30 + $0x1624] ss:$8 sps:$4 sm:$0xff]  }
 0x26e   : > { %5723 = vmatpush1.bf16.msra.mxu1 %v8387_v62  ;;  %v8465_v62 = vld [vmem:[%s8782_s30 + $0xa20] ss:$8 sps:$4 sm:$0xff]  }
 0x26f   : > { %6215 = vmatpush1.bf16.msra.mxu0 %v8390_v63  ;;  %5724 = vmatprep.subr.bf16.mxu1 %v8395_v40  ;;  %v8468_v63 = vld [vmem:[%s8782_s30 + $0x1620] ss:$8 sps:$4 sm:$0xff]   ;;  %v8473_v40 = vld [vmem:[%s8782_s30 + $0xa34] ss:$8 sps:$4 sm:$0xff]  }
 0x270   : > { %6216 = vmatprep.subr.bf16.mxu0 %v8398_v0  ;;  %v8476_v0 = vld [vmem:[%s8782_s30 + $0x1634] ss:$8 sps:$4 sm:$0xff]  }
 0x272   : > { %5725 = vmatpush1.bf16.msra.mxu1 %v8393_v55  ;;  %v8471_v55 = vld [vmem:[%s8782_s30 + $0xa30] ss:$8 sps:$4 sm:$0xff]  }
 0x273   : > { %6217 = vmatpush1.bf16.msra.mxu0 %v8396_v2  ;;  %5726 = vmatprep.subr.bf16.mxu1 %v8401_v57  ;;  %v8474_v2 = vld [vmem:[%s8782_s30 + $0x1630] ss:$8 sps:$4 sm:$0xff]   ;;  %v8479_v57 = vld [vmem:[%s8782_s30 + $0xa44] ss:$8 sps:$4 sm:$0xff]  }
 0x274   : > { %6218 = vmatprep.subr.bf16.mxu0 %v8404_v3  ;;  %v8482_v3 = vld [vmem:[%s8782_s30 + $0x1644] ss:$8 sps:$4 sm:$0xff]  }
 0x276   : > { %5727 = vmatpush1.bf16.msra.mxu1 %v8399_v4  ;;  %v8477_v4 = vld [vmem:[%s8782_s30 + $0xa40] ss:$8 sps:$4 sm:$0xff]  }
 0x277   : > { %6219 = vmatpush1.bf16.msra.mxu0 %v8402_v5  ;;  %5728 = vmatprep.subr.bf16.mxu1 %v8407_v6  ;;  %v8480_v5 = vld [vmem:[%s8782_s30 + $0x1640] ss:$8 sps:$4 sm:$0xff]   ;;  %v8485_v6 = vld [vmem:[%s8782_s30 + $0xa54] ss:$8 sps:$4 sm:$0xff]  }
 0x278   : > { %6220 = vmatprep.subr.bf16.mxu0 %v8410_v7  ;;  %v8488_v7 = vld [vmem:[%s8782_s30 + $0x1654] ss:$8 sps:$4 sm:$0xff]  }
 0x27a   : > { %5729 = vmatpush1.bf16.msra.mxu1 %v8405_v8  ;;  %v8483_v8 = vld [vmem:[%s8782_s30 + $0xa50] ss:$8 sps:$4 sm:$0xff]  }
 0x27b   : > { %6221 = vmatpush1.bf16.msra.mxu0 %v8408_v9  ;;  %5730 = vmatprep.subr.bf16.mxu1 %v8413_v10  ;;  %v8486_v9 = vld [vmem:[%s8782_s30 + $0x1650] ss:$8 sps:$4 sm:$0xff]   ;;  %v8491_v10 = vld [vmem:[%s8782_s30 + $0xa64] ss:$8 sps:$4 sm:$0xff]  }
 0x27c   : > { %6222 = vmatprep.subr.bf16.mxu0 %v8416_v11  ;;  %v8494_v11 = vld [vmem:[%s8782_s30 + $0x1664] ss:$8 sps:$4 sm:$0xff]  }
 0x27e   : > { %5731 = vmatpush1.bf16.msra.mxu1 %v8411_v18  ;;  %v8489_v18 = vld [vmem:[%s8782_s30 + $0xa60] ss:$8 sps:$4 sm:$0xff]  }
 0x27f   : > { %6223 = vmatpush1.bf16.msra.mxu0 %v8414_v19  ;;  %5732 = vmatprep.subr.bf16.mxu1 %v8419_v20  ;;  %v8492_v19 = vld [vmem:[%s8782_s30 + $0x1660] ss:$8 sps:$4 sm:$0xff]   ;;  %v8497_v20 = vld [vmem:[%s8782_s30 + $0xa74] ss:$8 sps:$4 sm:$0xff]  }
 0x280   : > { %6224 = vmatprep.subr.bf16.mxu0 %v8422_v21  ;;  %v8500_v21 = vld [vmem:[%s8782_s30 + $0x1674] ss:$8 sps:$4 sm:$0xff]  }
 0x282   : > { %5733 = vmatpush1.bf16.msra.mxu1 %v8417_v1  ;;  %v8495_v1 = vld [vmem:[%s8782_s30 + $0xa70] ss:$8 sps:$4 sm:$0xff]  }
 0x283   : > { %6225 = vmatpush1.bf16.msra.mxu0 %v8420_v23  ;;  %5734 = vmatprep.subr.bf16.mxu1 %v8425_v12  ;;  %v8498_v23 = vld [vmem:[%s8782_s30 + $0x1670] ss:$8 sps:$4 sm:$0xff]   ;;  %v8503_v12 = vld [vmem:[%s8782_s30 + $0xa84] ss:$8 sps:$4 sm:$0xff]  }
 0x284   : > { %6226 = vmatprep.subr.bf16.mxu0 %v8428_v52  ;;  %v8506_v52 = vld [vmem:[%s8782_s30 + $0x1684] ss:$8 sps:$4 sm:$0xff]  }
 0x286   : > { %5735 = vmatpush1.bf16.msra.mxu1 %v8423_v58  ;;  %v8501_v58 = vld [vmem:[%s8782_s30 + $0xa80] ss:$8 sps:$4 sm:$0xff]  }
 0x287   : > { %6227 = vmatpush1.bf16.msra.mxu0 %v8426_v56  ;;  %5736 = vmatprep.subr.bf16.mxu1 %v8431_v26  ;;  %v8504_v56 = vld [vmem:[%s8782_s30 + $0x1680] ss:$8 sps:$4 sm:$0xff]   ;;  %v8509_v26 = vld [vmem:[%s8782_s30 + $0xa94] ss:$8 sps:$4 sm:$0xff]  }
 0x288   : > { %6228 = vmatprep.subr.bf16.mxu0 %v8434_v27  ;;  %v8512_v27 = vld [vmem:[%s8782_s30 + $0x1694] ss:$8 sps:$4 sm:$0xff]  }
 0x28a   : > { %5737 = vmatpush1.bf16.msra.mxu1 %v8429_v28  ;;  %v8507_v28 = vld [vmem:[%s8782_s30 + $0xa90] ss:$8 sps:$4 sm:$0xff]  }
 0x28b   : > { %6229 = vmatpush1.bf16.msra.mxu0 %v8432_v29  ;;  %5738 = vmatprep.subr.bf16.mxu1 %v8437_v30  ;;  %v8510_v29 = vld [vmem:[%s8782_s30 + $0x1690] ss:$8 sps:$4 sm:$0xff]   ;;  %v8515_v30 = vld [vmem:[%s8782_s30 + $0xaa4] ss:$8 sps:$4 sm:$0xff]  }
 0x28c   : > { %6230 = vmatprep.subr.bf16.mxu0 %v8440_v31  ;;  %v8518_v31 = vld [vmem:[%s8782_s30 + $0x16a4] ss:$8 sps:$4 sm:$0xff]  }
 0x28e   : > { %5739 = vmatpush1.bf16.msra.mxu1 %v8435_v15  ;;  %v8513_v15 = vld [vmem:[%s8782_s30 + $0xaa0] ss:$8 sps:$4 sm:$0xff]  }
 0x28f   : > { %6231 = vmatpush1.bf16.msra.mxu0 %v8438_v33  ;;  %5740 = vmatprep.subr.bf16.mxu1 %v8443_v34  ;;  %v8516_v33 = vld [vmem:[%s8782_s30 + $0x16a0] ss:$8 sps:$4 sm:$0xff]   ;;  %v8521_v34 = vld [vmem:[%s8782_s30 + $0xab4] ss:$8 sps:$4 sm:$0xff]  }
 0x290   : > { %6232 = vmatprep.subr.bf16.mxu0 %v8446_v35  ;;  %v8524_v35 = vld [vmem:[%s8782_s30 + $0x16b4] ss:$8 sps:$4 sm:$0xff]  }
 0x292   : > { %5741 = vmatpush1.bf16.msra.mxu1 %v8441_v24  ;;  %v8527_v24 = vld [vmem:[%s8782_s30 + $0xac4] ss:$8 sps:$4 sm:$0xff]  }
 0x293   : > { %6233 = vmatpush1.bf16.msra.mxu0 %v8444_v45  ;;  %5742 = vmatprep.subr.bf16.mxu1 %v8449_v41  ;;  %v8530_v45 = vld [vmem:[%s8782_s30 + $0x16c4] ss:$8 sps:$4 sm:$0xff]   ;;  %v8525_v41 = vld [vmem:[%s8782_s30 + $0xac0] ss:$8 sps:$4 sm:$0xff]  }
 0x294   : > { %6234 = vmatprep.subr.bf16.mxu0 %v8452_v25  ;;  %v8528_v25 = vld [vmem:[%s8782_s30 + $0x16c0] ss:$8 sps:$4 sm:$0xff]  }
 0x296   : > { %5743 = vmatpush1.bf16.msra.mxu1 %v8447_v59  ;;  %v8533_v59 = vld [vmem:[%s8782_s30 + $0xad4] ss:$8 sps:$4 sm:$0xff]  }
 0x297   : > { %6235 = vmatpush1.bf16.msra.mxu0 %v8450_v13  ;;  %5753 = vmatprep.subr.bf16.mxu1 %v8455_v32  ;;  %v8536_v13 = vld [vmem:[%s8782_s30 + $0x16d4] ss:$8 sps:$4 sm:$0xff]   ;;  %v8531_v32 = vld [vmem:[%s8782_s30 + $0xad0] ss:$8 sps:$4 sm:$0xff]  }
 0x298   : > { %6245 = vmatprep.subr.bf16.mxu0 %v8458_v36  ;;  %v8534_v36 = vld [vmem:[%s8782_s30 + $0x16d0] ss:$8 sps:$4 sm:$0xff]  }
 0x299   : > { %5745 = vmatmul.mubr.bf16.vlgmr.msra.gmra.mrb[0].mxu1 %v1209_v16  ;;  %v8537_v16 = vld [vmem:[%s8782_s30 + $0xae0] ss:$8 sps:$4 sm:$0xff]  }
 0x29a   : > { %6237 = vmatmul.mubr.bf16.vlgmr.msra.gmra.mrb[0].mxu0 %v1356_v48  ;;  %5754 = vmatpush1.bf16.msra.mxu1 %v8453_v50  ;;  %v8540_v48 = vld [vmem:[%s8782_s30 + $0x16e0] ss:$8 sps:$4 sm:$0xff]   ;;  %v8545_v50 = vld [vmem:[%s8782_s30 + $0xaf4] ss:$8 sps:$4 sm:$0xff]  }
 0x29b   : > { %6246 = vmatpush1.bf16.msra.mxu0 %v8456_v51  ;;  %5755 = vmatprep.subr.bf16.mxu1 %v8461_v53  ;;  %v8548_v51 = vld [vmem:[%s8782_s30 + $0x16f4] ss:$8 sps:$4 sm:$0xff]   ;;  %v8543_v53 = vld [vmem:[%s8782_s30 + $0xaf0] ss:$8 sps:$4 sm:$0xff]  }
 0x29c   : > { %6247 = vmatprep.subr.bf16.mxu0 %v8464_v54  ;;  %5785 = vmatprep.mubr.bf16.mxu1 %v9644_v38  ;;  %v8546_v54 = vld [vmem:[%s8782_s30 + $0x16f0] ss:$8 sps:$4 sm:$0xff]  }
 0x29d   : > { %6277 = vmatprep.mubr.bf16.mxu0 %v9647_v17 }
 0x29e   : > { %5756 = vmatpush1.bf16.msra.mxu1 %v8459_v37  ;;  %v8552_v37 = vld [vmem:[%s8782_s30 + $0xb04] ss:$8 sps:$4 sm:$0xff]  }
 0x29f   : > { %6248 = vmatpush1.bf16.msra.mxu0 %v8462_v39  ;;  %5757 = vmatprep.subr.bf16.mxu1 %v8467_v60  ;;  %v8556_v39 = vld [vmem:[%s8782_s30 + $0x1704] ss:$8 sps:$4 sm:$0xff]   ;;  %v9713_v60 = vrot.slane %v9622_v22, %v8843_v49  ;;  %v1212_v22 = vcombine.high %v9644_v38, %v9644_v38 }
 0x2a0   : > { %6249 = vmatprep.subr.bf16.mxu0 %v8470_v61  ;;  %v9717_v61 = vrot.slane %v9625_v46, %v8843_v49  ;;  %v8557_v46 = vld [vmem:[%s8782_s30 + $0xb10] ss:$8 sps:$4 sm:$0xff]   ;;  %v8565_v38 = vld [vmem:[%s8782_s30 + $0xb24] ss:$8 sps:$4 sm:$0xff]  }
 0x2a2   : > { %5758 = vmatpush1.bf16.msra.mxu1 %v8465_v62  ;;  %v8550_v62 = vld [vmem:[%s8782_s30 + $0xb00] ss:$8 sps:$4 sm:$0xff]  }
 0x2a3   : > { %6250 = vmatpush1.bf16.msra.mxu0 %v8468_v63  ;;  %5759 = vmatprep.subr.bf16.mxu1 %v8473_v40  ;;  %v8554_v63 = vld [vmem:[%s8782_s30 + $0x1700] ss:$8 sps:$4 sm:$0xff]   ;;  %v8559_v40 = vld [vmem:[%s8782_s30 + $0xb14] ss:$8 sps:$4 sm:$0xff]  }
 0x2a4   : > { %6251 = vmatprep.subr.bf16.mxu0 %v8476_v0  ;;  %v8562_v0 = vld [vmem:[%s8782_s30 + $0x1714] ss:$8 sps:$4 sm:$0xff]  }
 0x2a6   : > { %5760 = vmatpush1.bf16.msra.mxu1 %v8471_v55  ;;  %v1359_v55 = vcombine.high %v9647_v17, %v9647_v17  ;;  %v8563_v17 = vld [vmem:[%s8782_s30 + $0xb20] ss:$8 sps:$4 sm:$0xff]  }
 0x2a7   : > { %6252 = vmatpush1.bf16.msra.mxu0 %v8474_v2  ;;  %5761 = vmatprep.subr.bf16.mxu1 %v8479_v57  ;;  %v8560_v2 = vld [vmem:[%s8782_s30 + $0x1710] ss:$8 sps:$4 sm:$0xff]   ;;  %v8568_v57 = vld [vmem:[%s8782_s30 + $0x1724] ss:$8 sps:$4 sm:$0xff]  }
 0x2a8   : > { %6253 = vmatprep.subr.bf16.mxu0 %v8482_v3  ;;  %v8566_v3 = vld [vmem:[%s8782_s30 + $0x1720] ss:$8 sps:$4 sm:$0xff]  }
 0x2aa   : > { %5762 = vmatpush1.bf16.msra.mxu1 %v8477_v4  ;;  %v8571_v4 = vld [vmem:[%s8782_s30 + $0xb34] ss:$8 sps:$4 sm:$0xff]  }
 0x2ab   : > { %6254 = vmatpush1.bf16.msra.mxu0 %v8480_v5  ;;  %5763 = vmatprep.subr.bf16.mxu1 %v8485_v6  ;;  %v8574_v5 = vld [vmem:[%s8782_s30 + $0x1734] ss:$8 sps:$4 sm:$0xff]   ;;  %v8569_v6 = vld [vmem:[%s8782_s30 + $0xb30] ss:$8 sps:$4 sm:$0xff]  }
 0x2ac   : > { %6255 = vmatprep.subr.bf16.mxu0 %v8488_v7  ;;  %v8572_v7 = vld [vmem:[%s8782_s30 + $0x1730] ss:$8 sps:$4 sm:$0xff]  }
 0x2ae   : > { %5764 = vmatpush1.bf16.msra.mxu1 %v8483_v8  ;;  %v8577_v8 = vld [vmem:[%s8782_s30 + $0xb44] ss:$8 sps:$4 sm:$0xff]  }
 0x2af   : > { %6256 = vmatpush1.bf16.msra.mxu0 %v8486_v9  ;;  %5765 = vmatprep.subr.bf16.mxu1 %v8491_v10  ;;  %v8580_v9 = vld [vmem:[%s8782_s30 + $0x1744] ss:$8 sps:$4 sm:$0xff]   ;;  %v8575_v10 = vld [vmem:[%s8782_s30 + $0xb40] ss:$8 sps:$4 sm:$0xff]  }
 0x2b0   : > { %6257 = vmatprep.subr.bf16.mxu0 %v8494_v11  ;;  %v8578_v11 = vld [vmem:[%s8782_s30 + $0x1740] ss:$8 sps:$4 sm:$0xff]  }
 0x2b2   : > { %5766 = vmatpush1.bf16.msra.mxu1 %v8489_v18  ;;  %v8583_v18 = vld [vmem:[%s8782_s30 + $0xb54] ss:$8 sps:$4 sm:$0xff]  }
 0x2b3   : > { %6258 = vmatpush1.bf16.msra.mxu0 %v8492_v19  ;;  %5767 = vmatprep.subr.bf16.mxu1 %v8497_v20  ;;  %v8586_v19 = vld [vmem:[%s8782_s30 + $0x1754] ss:$8 sps:$4 sm:$0xff]   ;;  %v8581_v20 = vld [vmem:[%s8782_s30 + $0xb50] ss:$8 sps:$4 sm:$0xff]  }
 0x2b4   : > { %6259 = vmatprep.subr.bf16.mxu0 %v8500_v21  ;;  %v8584_v21 = vld [vmem:[%s8782_s30 + $0x1750] ss:$8 sps:$4 sm:$0xff]  }
 0x2b6   : > { %5768 = vmatpush1.bf16.msra.mxu1 %v8495_v1  ;;  %v8589_v1 = vld [vmem:[%s8782_s30 + $0xb64] ss:$8 sps:$4 sm:$0xff]  }
 0x2b7   : > { %6260 = vmatpush1.bf16.msra.mxu0 %v8498_v23  ;;  %5769 = vmatprep.subr.bf16.mxu1 %v8503_v12  ;;  %v8592_v23 = vld [vmem:[%s8782_s30 + $0x1764] ss:$8 sps:$4 sm:$0xff]   ;;  %v8587_v12 = vld [vmem:[%s8782_s30 + $0xb60] ss:$8 sps:$4 sm:$0xff]  }
 0x2b8   : > { %6261 = vmatprep.subr.bf16.mxu0 %v8506_v52  ;;  %v8590_v52 = vld [vmem:[%s8782_s30 + $0x1760] ss:$8 sps:$4 sm:$0xff]  }
 0x2ba   : > { %5770 = vmatpush1.bf16.msra.mxu1 %v8501_v58  ;;  %v8595_v58 = vld [vmem:[%s8782_s30 + $0xb74] ss:$8 sps:$4 sm:$0xff]  }
 0x2bb   : > { %6262 = vmatpush1.bf16.msra.mxu0 %v8504_v56  ;;  %5771 = vmatprep.subr.bf16.mxu1 %v8509_v26  ;;  %v8598_v56 = vld [vmem:[%s8782_s30 + $0x1774] ss:$8 sps:$4 sm:$0xff]   ;;  %v8593_v26 = vld [vmem:[%s8782_s30 + $0xb70] ss:$8 sps:$4 sm:$0xff]  }
 0x2bc   : > { %6263 = vmatprep.subr.bf16.mxu0 %v8512_v27  ;;  %v8596_v27 = vld [vmem:[%s8782_s30 + $0x1770] ss:$8 sps:$4 sm:$0xff]  }
 0x2be   : > { %5772 = vmatpush1.bf16.msra.mxu1 %v8507_v28  ;;  %v8601_v28 = vld [vmem:[%s8782_s30 + $0xb84] ss:$8 sps:$4 sm:$0xff]  }
 0x2bf   : > { %6264 = vmatpush1.bf16.msra.mxu0 %v8510_v29  ;;  %5773 = vmatprep.subr.bf16.mxu1 %v8515_v30  ;;  %v8604_v29 = vld [vmem:[%s8782_s30 + $0x1784] ss:$8 sps:$4 sm:$0xff]   ;;  %v8599_v30 = vld [vmem:[%s8782_s30 + $0xb80] ss:$8 sps:$4 sm:$0xff]  }
 0x2c0   : > { %6265 = vmatprep.subr.bf16.mxu0 %v8518_v31  ;;  %v8602_v31 = vld [vmem:[%s8782_s30 + $0x1780] ss:$8 sps:$4 sm:$0xff]  }
 0x2c2   : > { %5774 = vmatpush1.bf16.msra.mxu1 %v8513_v15  ;;  %v8607_v15 = vld [vmem:[%s8782_s30 + $0xb94] ss:$8 sps:$4 sm:$0xff]  }
 0x2c3   : > { %6266 = vmatpush1.bf16.msra.mxu0 %v8516_v33  ;;  %5775 = vmatprep.subr.bf16.mxu1 %v8521_v34  ;;  %v8610_v33 = vld [vmem:[%s8782_s30 + $0x1794] ss:$8 sps:$4 sm:$0xff]   ;;  %v8605_v34 = vld [vmem:[%s8782_s30 + $0xb90] ss:$8 sps:$4 sm:$0xff]  }
 0x2c4   : > { %6267 = vmatprep.subr.bf16.mxu0 %v8524_v35  ;;  %v8608_v35 = vld [vmem:[%s8782_s30 + $0x1790] ss:$8 sps:$4 sm:$0xff]  }
 0x2c6   : > { %5776 = vmatpush1.bf16.msra.mxu1 %v8519_v42  ;;  %v8613_v42 = vld [vmem:[%s8782_s30 + $0xba4] ss:$8 sps:$4 sm:$0xff]  }
 0x2c7   : > { %6268 = vmatpush1.bf16.msra.mxu0 %v8522_v44  ;;  %5777 = vmatprep.subr.bf16.mxu1 %v8527_v24  ;;  %v8616_v44 = vld [vmem:[%s8782_s30 + $0x17a4] ss:$8 sps:$4 sm:$0xff]   ;;  %v8611_v24 = vld [vmem:[%s8782_s30 + $0xba0] ss:$8 sps:$4 sm:$0xff]  }
 0x2c8   : > { %6269 = vmatprep.subr.bf16.mxu0 %v8530_v45  ;;  %v8614_v45 = vld [vmem:[%s8782_s30 + $0x17a0] ss:$8 sps:$4 sm:$0xff]  }
 0x2ca   : > { %5778 = vmatpush1.bf16.msra.mxu1 %v8525_v41  ;;  %v8619_v41 = vld [vmem:[%s8782_s30 + $0xbb4] ss:$8 sps:$4 sm:$0xff]  }
 0x2cb   : > { %6270 = vmatpush1.bf16.msra.mxu0 %v8528_v25  ;;  %5779 = vmatprep.subr.bf16.mxu1 %v8533_v59  ;;  %v8622_v25 = vld [vmem:[%s8782_s30 + $0x17b4] ss:$8 sps:$4 sm:$0xff]   ;;  %v8617_v59 = vld [vmem:[%s8782_s30 + $0xbb0] ss:$8 sps:$4 sm:$0xff]  }
 0x2cc   : > { %6271 = vmatprep.subr.bf16.mxu0 %v8536_v13  ;;  %v8620_v13 = vld [vmem:[%s8782_s30 + $0x17b0] ss:$8 sps:$4 sm:$0xff]  }
 0x2ce   : > { %5780 = vmatpush1.bf16.msra.mxu1 %v8531_v32  ;;  %v8625_v32 = vld [vmem:[%s8782_s30 + $0xbc4] ss:$8 sps:$4 sm:$0xff]  }
 0x2cf   : > { %6272 = vmatpush1.bf16.msra.mxu0 %v8534_v36  ;;  %5781 = vmatprep.subr.bf16.mxu1 %v8539_v14  ;;  %v8628_v36 = vld [vmem:[%s8782_s30 + $0x17c4] ss:$8 sps:$4 sm:$0xff]   ;;  %v8623_v14 = vld [vmem:[%s8782_s30 + $0xbc0] ss:$8 sps:$4 sm:$0xff]  }
 0x2d0   : > { %6273 = vmatprep.subr.bf16.mxu0 %v8542_v47  ;;  %v8626_v47 = vld [vmem:[%s8782_s30 + $0x17c0] ss:$8 sps:$4 sm:$0xff]  }
 0x2d2   : > { %5782 = vmatpush1.bf16.msra.mxu1 %v8537_v16  ;;  %v8631_v16 = vld [vmem:[%s8782_s30 + $0xbd4] ss:$8 sps:$4 sm:$0xff]  }
 0x2d3   : > { %6274 = vmatpush1.bf16.msra.mxu0 %v8540_v48  ;;  %5783 = vmatprep.subr.bf16.mxu1 %v8545_v50  ;;  %v8634_v48 = vld [vmem:[%s8782_s30 + $0x17d4] ss:$8 sps:$4 sm:$0xff]   ;;  %v8629_v50 = vld [vmem:[%s8782_s30 + $0xbd0] ss:$8 sps:$4 sm:$0xff]  }
 0x2d4   : > { %6275 = vmatprep.subr.bf16.mxu0 %v8548_v51  ;;  %v8632_v51 = vld [vmem:[%s8782_s30 + $0x17d0] ss:$8 sps:$4 sm:$0xff]  }
 0x2d6   : > { %5784 = vmatpush1.bf16.msra.mxu1 %v8543_v53  ;;  %v8637_v53 = vld [vmem:[%s8782_s30 + $0xbe4] ss:$8 sps:$4 sm:$0xff]  }
 0x2d7   : > { %6276 = vmatpush1.bf16.msra.mxu0 %v8546_v54  ;;  %5794 = vmatprep.subr.bf16.mxu1 %v8552_v37  ;;  %v8640_v54 = vld [vmem:[%s8782_s30 + $0x17e4] ss:$8 sps:$4 sm:$0xff]   ;;  %v8635_v37 = vld [vmem:[%s8782_s30 + $0xbe0] ss:$8 sps:$4 sm:$0xff]  }
 0x2d8   : > { %6286 = vmatprep.subr.bf16.mxu0 %v8556_v39  ;;  %v8638_v39 = vld [vmem:[%s8782_s30 + $0x17e0] ss:$8 sps:$4 sm:$0xff]  }
 0x2d9   : > { %5786 = vmatmul.mubr.bf16.vlgmr.msra.gmra.mrb[0].mxu1 %v9713_v60 }
 0x2da   : > { %6278 = vmatmul.mubr.bf16.vlgmr.msra.gmra.mrb[0].mxu0 %v9717_v61  ;;  %5795 = vmatpush1.bf16.msra.mxu1 %v8550_v62  ;;  %v8643_v62 = vld [vmem:[%s8782_s30 + $0xbf4] ss:$8 sps:$4 sm:$0xff]  }
 0x2db   : > { %6287 = vmatpush1.bf16.msra.mxu0 %v8554_v63  ;;  %5796 = vmatprep.subr.bf16.mxu1 %v8559_v40  ;;  %v8646_v63 = vld [vmem:[%s8782_s30 + $0x17f4] ss:$8 sps:$4 sm:$0xff]   ;;  %v8641_v40 = vld [vmem:[%s8782_s30 + $0xbf0] ss:$8 sps:$4 sm:$0xff]  }
 0x2dc   : > { %6288 = vmatprep.subr.bf16.mxu0 %v8562_v0  ;;  %5826 = vmatprep.mubr.bf16.mxu1 %v1212_v22  ;;  %v8644_v0 = vld [vmem:[%s8782_s30 + $0x17f0] ss:$8 sps:$4 sm:$0xff]   ;;  %v8649_v22 = vld [vmem:[%s8782_s30 + $0x1804] ss:$8 sps:$4 sm:$0xff]  }
 0x2dd   : > { %6318 = vmatprep.mubr.bf16.mxu0 %v1359_v55  ;;  %v1210_v55 = vcombine.high %v9713_v60, %v9713_v60  ;;  %v8655_v60 = vld [vmem:[%s8782_s30 + $0x1824] ss:$8 sps:$4 sm:$0xff]  }
 0x2de   : > { %5797 = vmatpush1.bf16.msra.mxu1 %v8557_v46  ;;  %v1357_v46 = vcombine.high %v9717_v61, %v9717_v61  ;;  %v8653_v61 = vld [vmem:[%s8782_s30 + $0x1820] ss:$8 sps:$4 sm:$0xff]  }
 0x2df   : > { %6289 = vmatpush1.bf16.msra.mxu0 %v8560_v2  ;;  %5798 = vmatprep.subr.bf16.mxu1 %v8565_v38  ;;  %v8647_v2 = vld [vmem:[%s8782_s30 + $0x1800] ss:$8 sps:$4 sm:$0xff]   ;;  %v8652_v38 = vld [vmem:[%s8782_s30 + $0x1814] ss:$8 sps:$4 sm:$0xff]  }
 0x2e0   : > { %6290 = vmatprep.subr.bf16.mxu0 %v8568_v57  ;;  %v8650_v57 = vld [vmem:[%s8782_s30 + $0x1810] ss:$8 sps:$4 sm:$0xff]  }
 0x2e2   : > { %5799 = vmatpush1.bf16.msra.mxu1 %v8563_v17  ;;  %v8716_v17 = vmov 0  }
 0x2e3   : > { %6291 = vmatpush1.bf16.msra.mxu0 %v8566_v3  ;;  %5800 = vmatprep.subr.bf16.mxu1 %v8571_v4  ;;  %v8658_v3 = vld [vmem:[%s8782_s30 + $0x1834] ss:$8 sps:$4 sm:$0xff]   ;;  %v8656_v4 = vld [vmem:[%s8782_s30 + $0x1830] ss:$8 sps:$4 sm:$0xff]  }
 0x2e4   : > { %6292 = vmatprep.subr.bf16.mxu0 %v8574_v5  ;;  %v8661_v5 = vld [vmem:[%s8782_s30 + $0x1844] ss:$8 sps:$4 sm:$0xff]  }
 0x2e6   : > { %5801 = vmatpush1.bf16.msra.mxu1 %v8569_v6  ;;  %v8659_v6 = vld [vmem:[%s8782_s30 + $0x1840] ss:$8 sps:$4 sm:$0xff]  }
 0x2e7   : > { %6293 = vmatpush1.bf16.msra.mxu0 %v8572_v7  ;;  %5802 = vmatprep.subr.bf16.mxu1 %v8577_v8  ;;  %v8664_v7 = vld [vmem:[%s8782_s30 + $0x1854] ss:$8 sps:$4 sm:$0xff]   ;;  %v8662_v8 = vld [vmem:[%s8782_s30 + $0x1850] ss:$8 sps:$4 sm:$0xff]  }
 0x2e8   : > { %6294 = vmatprep.subr.bf16.mxu0 %v8580_v9  ;;  %v8667_v9 = vld [vmem:[%s8782_s30 + $0x1864] ss:$8 sps:$4 sm:$0xff]  }
 0x2ea   : > { %5803 = vmatpush1.bf16.msra.mxu1 %v8575_v10  ;;  %v8665_v10 = vld [vmem:[%s8782_s30 + $0x1860] ss:$8 sps:$4 sm:$0xff]  }
 0x2eb   : > { %6295 = vmatpush1.bf16.msra.mxu0 %v8578_v11  ;;  %5804 = vmatprep.subr.bf16.mxu1 %v8583_v18  ;;  %v8670_v11 = vld [vmem:[%s8782_s30 + $0x1874] ss:$8 sps:$4 sm:$0xff]   ;;  %v8668_v18 = vld [vmem:[%s8782_s30 + $0x1870] ss:$8 sps:$4 sm:$0xff]  }
 0x2ec   : > { %6296 = vmatprep.subr.bf16.mxu0 %v8586_v19  ;;  %v6558_v19 = vld.sshfl [vmem:[%s8840_s11 + $0x30] sm:$0x1 pattern:$0x75316420] }
 0x2ee   : > { %5805 = vmatpush1.bf16.msra.mxu1 %v8581_v20  ;;  %v1373_v20 = vrot.slane %v6558_v19, %v8843_v49 }
 0x2ef   : > { %6297 = vmatpush1.bf16.msra.mxu0 %v8584_v21  ;;  %5806 = vmatprep.subr.bf16.mxu1 %v8589_v1 }
 0x2f0   : > { %6298 = vmatprep.subr.bf16.mxu0 %v8592_v23 }
 0x2f2   : > { %5807 = vmatpush1.bf16.msra.mxu1 %v8587_v12 }
 0x2f3   : > { %6299 = vmatpush1.bf16.msra.mxu0 %v8590_v52  ;;  %5808 = vmatprep.subr.bf16.mxu1 %v8595_v58 }
 0x2f4   : > { %6300 = vmatprep.subr.bf16.mxu0 %v8598_v56 }
 0x2f6   : > { %5809 = vmatpush1.bf16.msra.mxu1 %v8593_v26 }
 0x2f7   : > { %6301 = vmatpush1.bf16.msra.mxu0 %v8596_v27  ;;  %5810 = vmatprep.subr.bf16.mxu1 %v8601_v28 }
 0x2f8   : > { %6302 = vmatprep.subr.bf16.mxu0 %v8604_v29 }
 0x2fa   : > { %5811 = vmatpush1.bf16.msra.mxu1 %v8599_v30 }
 0x2fb   : > { %6303 = vmatpush1.bf16.msra.mxu0 %v8602_v31  ;;  %5812 = vmatprep.subr.bf16.mxu1 %v8607_v15 }
 0x2fc   : > { %6304 = vmatprep.subr.bf16.mxu0 %v8610_v33 }
 0x2fe   : > { %5813 = vmatpush1.bf16.msra.mxu1 %v8605_v34 }
 0x2ff   : > { %6305 = vmatpush1.bf16.msra.mxu0 %v8608_v35  ;;  %5814 = vmatprep.subr.bf16.mxu1 %v8613_v42 }
 0x300   : > { %6306 = vmatprep.subr.bf16.mxu0 %v8616_v44 }
 0x302   : > { %5815 = vmatpush1.bf16.msra.mxu1 %v8611_v24 }
 0x303   : > { %6307 = vmatpush1.bf16.msra.mxu0 %v8614_v45  ;;  %5816 = vmatprep.subr.bf16.mxu1 %v8619_v41 }
 0x304   : > { %6308 = vmatprep.subr.bf16.mxu0 %v8622_v25 }
 0x306   : > { %5817 = vmatpush1.bf16.msra.mxu1 %v8617_v59 }
 0x307   : > { %6309 = vmatpush1.bf16.msra.mxu0 %v8620_v13  ;;  %5818 = vmatprep.subr.bf16.mxu1 %v8625_v32 }
 0x308   : > { %6310 = vmatprep.subr.bf16.mxu0 %v8628_v36 }
 0x30a   : > { %5819 = vmatpush1.bf16.msra.mxu1 %v8623_v14 }
 0x30b   : > { %6311 = vmatpush1.bf16.msra.mxu0 %v8626_v47  ;;  %5820 = vmatprep.subr.bf16.mxu1 %v8631_v16 }
 0x30c   : > { %6312 = vmatprep.subr.bf16.mxu0 %v8634_v48 }
 0x30e   : > { %5821 = vmatpush1.bf16.msra.mxu1 %v8629_v50 }
 0x30f   : > { %6313 = vmatpush1.bf16.msra.mxu0 %v8632_v51  ;;  %5822 = vmatprep.subr.bf16.mxu1 %v8637_v53 }
 0x310   : > { %6314 = vmatprep.subr.bf16.mxu0 %v8640_v54 }
 0x312   : > { %5823 = vmatpush1.bf16.msra.mxu1 %v8635_v37 }
 0x313   : > { %6315 = vmatpush1.bf16.msra.mxu0 %v8638_v39  ;;  %5824 = vmatprep.subr.bf16.mxu1 %v8643_v62 }
 0x314   : > { %6316 = vmatprep.subr.bf16.mxu0 %v8646_v63 }
 0x316   : > { %5825 = vmatpush1.bf16.msra.mxu1 %v8641_v40 }
 0x317   : > { %6317 = vmatpush1.bf16.msra.mxu0 %v8644_v0 }
 0x318   : > { %6327 = vmatprep.subr.bf16.mxu0 %v8649_v22 }
 0x319   : > { %5827 = vmatmul.mubr.bf16.vlgmr.msra.gmra.mrb[0].mxu1 %v1210_v55 }
 0x31a   : > { %6319 = vmatmul.mubr.bf16.vlgmr.msra.gmra.mrb[0].mxu0 %v1357_v46 }
 0x31b   : > { %6328 = vmatpush1.bf16.msra.mxu0 %v8647_v2  ;;  %6359 = vmatprep.mubr.bf16.mxu0 %v8716_v17 }
 0x31c   : > { %6329 = vmatprep.subr.bf16.mxu0 %v8652_v38 }
 0x31f   : > { %6330 = vmatpush1.bf16.msra.mxu0 %v8650_v57 }
 0x320   : > { %6331 = vmatprep.subr.bf16.mxu0 %v8655_v60 }
 0x323   : > { %6332 = vmatpush1.bf16.msra.mxu0 %v8653_v61 }
 0x324   : > { %6333 = vmatprep.subr.bf16.mxu0 %v8658_v3 }
 0x327   : > { %6334 = vmatpush1.bf16.msra.mxu0 %v8656_v4 }
 0x328   : > { %6335 = vmatprep.subr.bf16.mxu0 %v8661_v5 }
 0x32b   : > { %6336 = vmatpush1.bf16.msra.mxu0 %v8659_v6 }
 0x32c   : > { %6337 = vmatprep.subr.bf16.mxu0 %v8664_v7 }
 0x32f   : > { %6338 = vmatpush1.bf16.msra.mxu0 %v8662_v8 }
 0x330   : > { %6339 = vmatprep.subr.bf16.mxu0 %v8667_v9 }
 0x333   : > { %6340 = vmatpush1.bf16.msra.mxu0 %v8665_v10 }
 0x334   : > { %6341 = vmatprep.subr.bf16.mxu0 %v8670_v11 }
 0x337   : > { %6342 = vmatpush1.bf16.msra.mxu0 %v8668_v18 }
 0x33a   : > { %6360 = vmatmul.mubr.bf16.vlgmr.msra.gmra.mrb[0].mxu0 %v1373_v20 }
 0x3ec   : > { %v5828_v21 = vpop.f32.mrb[0].mxu1 }
 0x3ed   : > { %v5830_v1 = vpop.f32.mrb[1].mxu1 }
 0x3ee   : > { %v5832_v23 = vpop.f32.mrb[2].mxu1 }
 0x3ef   : > { %v5833_v12 = vpop.f32.mrb[3].mxu1 }
 0x40a   : > { %6371 = sbr.rel (%p7343_p9) target bundleno = 1044 (0x414), region = 36 }
 0x40d   : > { %v6361_v52 = vpop.f32.mrb[0].mxu0 }
 0x40e   : > { %v7349_v58 = vadd.f32 %v6361_v52, %v5828_v21  ;;  %v6363_v56 = vpop.f32.mrb[1].mxu0 }
 0x40f   : > { %v7350_v26 = vadd.f32 %v6363_v56, %v5830_v1  ;;  %v6365_v27 = vpop.f32.mrb[2].mxu0 }
 0x410   : > { %v6366_v28 = vpop.f32.mrb[3].mxu0 }
 0x411   : > { %v6374_v29 = vcombine.low %v7349_v58, %v7350_v26 }
 0x413   : > { %7344 = vst.sshfl [vmem:[%s8788_s7] sm:$0x33 pattern:$0x76325410] %v6374_v29 }
 0x414 PF: > { %p7345_p10 = scmp.le.s32.totalorder %s8697_s12, 0 }
 0x415   : > { %v8717_v49 = vmov (!%p7345_p10), 1983009808   ;;  %v6391_v31 = vcombine.low (!%p7345_p10), %v7349_v58, %v7350_v26 }
 0x416   : > { %6387 = sbr.rel (%p7345_p10) target bundleno = 1057 (0x421), region = 40  ;;  %v6393_v30 = vunpack.c.l.s4 (!%p7345_p10), %v8717_v49 }
 0x418   : > { %v6394_v15 = vunpack.c.0.s8 (!%p7345_p10), %v6393_v30 }
 0x41a   : > { %v6397_v33 = vsub.s32 (!%p7345_p10), %v6394_v15, %v8830_v43  ;;  %v6388_v34 = vld [vmem:[%s8788_s7] sm:$0xf] (!%p7345_p10) }
 0x41c   : > { %v6398_v35 = vrot.slane (!%p7345_p10), %v6391_v31, %v6397_v33 }
 0x41e   : > { %v6400_v42 = vadd.f32 %v6398_v35, %v6388_v34 }
 0x420   : > { %6401 = vst [vmem:[%s8788_s7] sm:$0xf] %v6400_v42 }
 0x421 PF: > { %p7346_p11 = scmp.ne.s32.totalorder %s8697_s12, 3 }
 0x422   : > { %v6407_v44 = vld [vmem:[%s255_s27] sm:$0x3] (!%p7346_p11)  ;;  %v6411_v24 = vsub.s32 (!%p7346_p11), 0, %v8830_v43  ;;  %v6415_v45 = vsub.s32 (!%p7346_p11), 1, %v8830_v43  ;;  %v8718_v59 = vmov (!%p7346_p11), 1983009808  }
 0x423   : > { %6405 = sbr.rel (%p7346_p11) target bundleno = 1072 (0x430), region = 44  ;;  %v6419_v13 = vunpack.c.l.s4 (!%p7346_p11), %v8718_v59 }
 0x424   : > { %v6412_v41 = vrot.slane (!%p7346_p11), %v6407_v44, %v6411_v24  ;;  %v6416_v25 = vrot.slane (!%p7346_p11), %v6407_v44, %v6415_v45 }
 0x425   : > { %v6420_v36 = vunpack.c.0.s8 (!%p7346_p11), %v6419_v13 }
 0x426   : > { %v6417_v32 = vcombine.low (!%p7346_p11), %v6412_v41, %v6416_v25 }
 0x427   : > { %v6423_v14 = vsub.s32 (!%p7346_p11), %v6420_v36, %v8830_v43  ;;  %v6406_v47 = vld [vmem:[%s8788_s7] sm:$0xf] (!%p7346_p11) }
 0x429   : > { %v6424_v16 = vrot.slane (!%p7346_p11), %v6417_v32, %v6423_v14 }
 0x42b   : > { %v6426_v48 = vadd.f32 %v6424_v16, %v6406_v47 }
 0x42d   : > { %v6427_v50 = vmax.f32 %v6426_v48, 0.0 }
 0x42f   : > { %6428 = vst [vmem:[%s8788_s7] sm:$0xf] %v6427_v50 }
 0x430 PF: > { %s13_s16 = sadd.s32 1, %s8713_s16   ;;  %s9845_s12 = smov %s8705_s14 }
 0x431   : > { %p10_p12 = scmp.ge.s32.totalorder %s13_s16, 10   ;;  %s9846_s13 = smov %s8709_s15 }
 0x432   : > { %s9847_s14 = smov %s9850_s17  ;;  %s9848_s15 = smov %s9854_s18 }
 0x433   :  { %12 = sbr.rel (!%p10_p12) target bundleno = 3 (0x3), region = 80 }

</bundles_post_ra>
